<compile_context>
chip_gen: v7x
topology: tpu7x:2x2x1
jax: 0.10.0
libtpu: 0.0.40
codegen_flags: <defaults>
</compile_context>

<pallas_src>
import functools

import jax
import jax.numpy as jnp
from jax.experimental import pallas as pl
from jax.experimental.pallas import tpu as pltpu


_VGG_MEAN = (0.485, 0.456, 0.406)
_VGG_STD = (0.229, 0.224, 0.225)

_VGG_CFG = [(3, 64), (64, 64), (64, 128), (128, 128), (128, 256), (256, 256)]
_RELU = [True, True, True, True, True, False]   # features[:13] ends before the ReLU
_POOL = [False, True, False, True, False, False]

_TILE_H_MAX = 32                       # target row tile (multiple of 8)
_TILE_VMEM_BUDGET = 24 * 1024 * 1024   # cap for the tile-size-scaling VMEM users


def _round_up(x, m):
    return ((x + m - 1) // m) * m


@functools.lru_cache(maxsize=None)
def _vmem_limit_bytes():
    """~3/4 of physical per-core VMEM (v7x only has 64 MiB); 48 MiB fallback."""
    try:
        cap = pltpu.get_tpu_info().vmem_capacity_bytes
        return int(min(100 * 1024 * 1024, cap * 3 // 4))
    except Exception:
        return 48 * 1024 * 1024


# ----------------------------------------------------------------------------
# Probe: does this Mosaic version lower a lane-dim concat with 64-lane offsets?
# (Used to decide whether the Cin=64 layers may merge their kw taps to K=192.)
# ----------------------------------------------------------------------------
def _concat_probe_kernel(x_ref, o_ref):
    a = x_ref[...]
    o_ref[...] = jnp.concatenate([a, a, a], axis=-1)


@functools.lru_cache(maxsize=None)
def _unaligned_lane_concat_ok():
    try:
        x = jnp.zeros((8, 8, 64), jnp.bfloat16)
        y = pl.pallas_call(
            _concat_probe_kernel,
            out_shape=jax.ShapeDtypeStruct((8, 8, 192), jnp.bfloat16),
        )(x)
        jax.block_until_ready(y)
        return True
    except Exception:
        return False


# ----------------------------------------------------------------------------
# 3x3 "same" conv (+ optional ReLU), bf16 MXU matmuls with f32 accumulation.
# ----------------------------------------------------------------------------
def _conv3x3_kernel(x_ref, h_ref, w_ref, b_ref, o_ref, win_ref, *,
                    tH, Wc, relu, merge_kw):
    # x_ref:   (1, tH, Wc+2, Cin)   main rows of the zero-padded input (bf16)
    # h_ref:   (1, 2,  Wc+2, Cin)   the 2 halo rows directly below the tile (bf16)
    # w_ref:   (3, 3*Cin, Cout) if merge_kw else (3, 3, Cin, Cout)   (bf16)
    # b_ref:   (1, Cout)            f32 bias
    # o_ref:   (1, tH, Wc, Cout)    bf16 output tile
    # win_ref: (tH+2, Wc+2, Cin)    VMEM scratch: contiguous halo'd row window
    cin = x_ref.shape[-1]
    cout = o_ref.shape[-1]

    # Assemble the (tH + 2)-row window (outer-dim stores only).
    win_ref[0:tH] = x_ref[0]
    win_ref[tH:tH + 2] = h_ref[0]

    acc = jnp.zeros((tH * Wc, cout), jnp.float32)
    if merge_kw:
        # kw-direction im2col: K = 3*Cin, one MXU matmul per kh (3 total).
        for kh in range(3):
            patch = jnp.concatenate(
                [win_ref[kh:kh + tH, 0:Wc, :],
                 win_ref[kh:kh + tH, 1:Wc + 1, :],
                 win_ref[kh:kh + tH, 2:Wc + 2, :]],
                axis=-1).reshape(tH * Wc, 3 * cin)
            acc = acc + jnp.dot(patch, w_ref[kh],
                                preferred_element_type=jnp.float32)
    else:
        for kh in range(3):
            for kw in range(3):
                patch = win_ref[kh:kh + tH, kw:kw + Wc, :].reshape(tH * Wc, cin)
                acc = acc + jnp.dot(patch, w_ref[kh, kw],
                                    preferred_element_type=jnp.float32)

    out = acc + b_ref[...]
    if relu:
        out = jnp.maximum(out, 0.0)
    o_ref[...] = out.reshape(1, tH, Wc, cout).astype(o_ref.dtype)


def _pick_tile_h(H, Wc, cin, cout):
    """Largest row tile (multiple of 8, <= _TILE_H_MAX) whose per-step VMEM fits."""
    tH = min(_TILE_H_MAX, _round_up(max(H, 1), 8))
    # per-tile-row bytes: 2x main-in + win + im2col patch (bf16) + 2x out (bf16) + f32 acc
    per_row = Wc * ((2 * 2 + 2 + 2 * 3) * cin + (2 * 2 + 4) * cout)
    while tH > 8 and tH * per_row > _TILE_VMEM_BUDGET:
        tH -= 8
    return tH


def conv3x3(x, w, b, *, relu):
    """3x3 "same" convolution (+ optional ReLU) on NHWC input; returns bf16 NHWC."""
    N, H, W, Cin = x.shape
    Cout = w.shape[-1]
    Wc = _round_up(W, 8)                    # padded compute width (x8 => clean reshapes)
    tH = _pick_tile_h(H, Wc, Cin, Cout)
    assert tH % 8 == 0
    Ht = _round_up(H, tH)                   # padded output height (multiple of tH)
    nj = Ht // tH
    hb2 = tH // 2                           # halo view uses 2-row blocks

    # Zero padding: rows [1, H+1) / cols [1, W+1) hold the real image; the bottom pad
    # makes the total row count a multiple of tH while covering the last tile's 2 halo
    # rows ([Ht, Ht+2) <= Ht+tH).
    xp = jnp.pad(x.astype(jnp.bfloat16),
                 ((0, 0), (1, Ht - H + tH - 1), (1, Wc - W + 1), (0, 0)))
    b2 = b.reshape(1, Cout).astype(jnp.float32)

    merge_kw = (Cin % 128 == 0) or (Cin % 64 == 0 and _unaligned_lane_concat_ok())
    if merge_kw:
        wk = w.reshape(3, 3 * Cin, Cout).astype(jnp.bfloat16)
        w_spec = pl.BlockSpec((3, 3 * Cin, Cout), lambda n, j: (0, 0, 0))
    else:
        wk = w.astype(jnp.bfloat16)
        w_spec = pl.BlockSpec((3, 3, Cin, Cout), lambda n, j: (0, 0, 0, 0))

    kernel = functools.partial(_conv3x3_kernel, tH=tH, Wc=Wc, relu=relu,
                               merge_kw=merge_kw)
    y = pl.pallas_call(
        kernel,
        out_shape=jax.ShapeDtypeStruct((N, Ht, Wc, Cout), jnp.bfloat16),
        grid_spec=pltpu.PrefetchScalarGridSpec(
            num_scalar_prefetch=0,
            grid=(N, nj),
            in_specs=[
                # main tH rows of the padded image
                pl.BlockSpec((1, tH, Wc + 2, Cin), lambda n, j: (n, j, 0, 0)),
                # the 2 rows directly below the tile (halo), as 2-row blocks
                pl.BlockSpec((1, 2, Wc + 2, Cin),
                             lambda n, j, hb2=hb2: (n, (j + 1) * hb2, 0, 0)),
                w_spec,
                pl.BlockSpec((1, Cout), lambda n, j: (0, 0)),
            ],
            out_specs=pl.BlockSpec((1, tH, Wc, Cout), lambda n, j: (n, j, 0, 0)),
            scratch_shapes=[pltpu.VMEM((tH + 2, Wc + 2, Cin), jnp.bfloat16)],
        ),
        compiler_params=pltpu.CompilerParams(
            dimension_semantics=("parallel", "parallel"),
            vmem_limit_bytes=_vmem_limit_bytes()),
    )(xp, xp, wk, b2)
    return y[:, :H, :W]                     # drop row/col padding


# ----------------------------------------------------------------------------
# Layer 0 (Cin=3): wrapper-side 3x3 im2col (27 channels) + one MXU matmul / tile.
# ----------------------------------------------------------------------------
def _pointwise_conv_kernel(x_ref, w_ref, b_ref, o_ref, *, relu):
    # x_ref: (1, tH, Wc, K) bf16 im2col rows; w_ref: (K, Cout) bf16; b_ref: (1, Cout) f32
    tH, Wc, K = x_ref.shape[1], x_ref.shape[2], x_ref.shape[3]
    cout = o_ref.shape[-1]
    patch = x_ref[0].reshape(tH * Wc, K)
    out = jnp.dot(patch, w_ref[...], preferred_element_type=jnp.float32) + b_ref[...]
    if relu:
        out = jnp.maximum(out, 0.0)
    o_ref[...] = out.reshape(1, tH, Wc, cout).astype(o_ref.dtype)


def conv3x3_im2col(x, w, b, *, relu):
    """First conv: 3x3 'same' conv via wrapper im2col (K = 27) — 1 MXU pass per tile."""
    N, H, W, Cin = x.shape
    KH, KW, Cout = w.shape[0], w.shape[1], w.shape[-1]
    K = KH * KW * Cin
    Wc = _round_up(W, 8)
    tH = _pick_tile_h(H, Wc, K, Cout)
    Ht = _round_up(H, tH)

    xp = jnp.pad(x.astype(jnp.bfloat16), ((0, 0), (1, 1), (1, 1), (0, 0)))
    cols = [xp[:, kh:kh + H, kw:kw + W, :] for kh in range(KH) for kw in range(KW)]
    xi = jnp.concatenate(cols, axis=-1)                       # (N, H, W, 27)
    xi = jnp.pad(xi, ((0, 0), (0, Ht - H), (0, Wc - W), (0, 0)))
    wk = w.reshape(K, Cout).astype(jnp.bfloat16)              # matches cols ordering
    b2 = b.reshape(1, Cout).astype(jnp.float32)

    kernel = functools.partial(_pointwise_conv_kernel, relu=relu)
    y = pl.pallas_call(
        kernel,
        out_shape=jax.ShapeDtypeStruct((N, Ht, Wc, Cout), jnp.bfloat16),
        grid_spec=pltpu.PrefetchScalarGridSpec(
            num_scalar_prefetch=0,
            grid=(N, Ht // tH),
            in_specs=[
                pl.BlockSpec((1, tH, Wc, K), lambda n, j: (n, j, 0, 0)),
                pl.BlockSpec((K, Cout), lambda n, j: (0, 0)),
                pl.BlockSpec((1, Cout), lambda n, j: (0, 0)),
            ],
            out_specs=pl.BlockSpec((1, tH, Wc, Cout), lambda n, j: (n, j, 0, 0)),
        ),
        compiler_params=pltpu.CompilerParams(
            dimension_semantics=("parallel", "parallel"),
            vmem_limit_bytes=_vmem_limit_bytes()),
    )(xi, wk, b2)
    return y[:, :H, :W]


# ----------------------------------------------------------------------------
# 2x2 max-pool (stride 2) — wrapper-level reshape+max (see TODO above).
# ----------------------------------------------------------------------------
def maxpool2x2(x):
    N, H, W, C = x.shape
    assert H % 2 == 0 and W % 2 == 0
    return jnp.max(x.reshape(N, H // 2, 2, W // 2, 2, C), axis=(2, 4))


# ----------------------------------------------------------------------------
# Tiled L1 reduction: streams row-chunks, accumulates per-lane sums in the output
# block (resident across the grid), final 256-wide reduce in the wrapper.
# ----------------------------------------------------------------------------
def _l1_partial_kernel(a_ref, b_ref, o_ref):
    @pl.when(pl.program_id(0) == 0)
    def _():
        o_ref[...] = jnp.zeros_like(o_ref)

    d = jnp.abs(a_ref[...].astype(jnp.float32) - b_ref[...].astype(jnp.float32))
    o_ref[...] += jnp.sum(d, axis=0, keepdims=True)


def l1_loss(a, b):
    assert a.shape == b.shape
    C = a.shape[-1]
    af = a.reshape(-1, C)
    bf = b.reshape(-1, C)
    R = af.shape[0]
    chunk = min(1024, _round_up(R, 8))
    Rp = _round_up(R, chunk)
    if Rp != R:                              # zero-pad (|0-0| contributes nothing)
        af = jnp.pad(af, ((0, Rp - R), (0, 0)))
        bf = jnp.pad(bf, ((0, Rp - R), (0, 0)))
    partial = pl.pallas_call(
        _l1_partial_kernel,
        out_shape=jax.ShapeDtypeStruct((1, C), jnp.float32),
        grid_spec=pltpu.PrefetchScalarGridSpec(
            num_scalar_prefetch=0,
            grid=(Rp // chunk,),
            in_specs=[pl.BlockSpec((chunk, C), lambda i: (i, 0)),
                      pl.BlockSpec((chunk, C), lambda i: (i, 0))],
            out_specs=pl.BlockSpec((1, C), lambda i: (0, 0)),
        ),
        compiler_params=pltpu.CompilerParams(
            dimension_semantics=("arbitrary",),
            vmem_limit_bytes=_vmem_limit_bytes()),
    )(af, bf)
    return jnp.sum(partial) / a.size


# ----------------------------------------------------------------------------
# VGG forward (features[:13]) and the loss.
# ----------------------------------------------------------------------------
def init_params(key):
    """Deterministic synthetic weights (the real module loads pretrained VGG19)."""
    params = []
    for cin, cout in _VGG_CFG:
        key, wk, bk = jax.random.split(key, 3)
        w = jax.random.normal(wk, (3, 3, cin, cout), jnp.float32) * jnp.sqrt(
            2.0 / (9.0 * cin))
        b = jax.random.normal(bk, (cout,), jnp.float32) * 0.01
        params.append((w, b))
    return params


def vgg_features(x_nchw, params, rgb_range=1.0):
    mean = jnp.asarray(_VGG_MEAN, jnp.float32) * rgb_range
    inv_std = 1.0 / (jnp.asarray(_VGG_STD, jnp.float32) * rgb_range)
    # MeanShift fused into conv1_1: subtract the mean here (exact w.r.t. the conv's
    # zero padding) and fold the 1/std scale into conv1_1's input channels.
    x = jnp.transpose(x_nchw, (0, 2, 3, 1)).astype(jnp.float32) - mean   # NCHW -> NHWC
    for i, (w, b) in enumerate(params):
        if i == 0:
            w0 = w * inv_std[None, None, :, None]
            x = conv3x3_im2col(x, w0, b, relu=_RELU[i])
        else:
            x = conv3x3(x, w, b, relu=_RELU[i])
        if _POOL[i]:
            x = maxpool2x2(x)
    return x                                  # (N, H/4, W/4, 256) bf16


def vgg_l1_loss(sr, hr, params):
    feat_sr = vgg_features(sr, params)
    feat_hr = vgg_features(hr, params)        # hr.detach(): no-op here (no grads)
    return l1_loss(feat_sr, feat_hr)


# ----------------------------------------------------------------------------
# Pure-JAX f32 reference (for a loose numerical cross-check in __main__).
# ----------------------------------------------------------------------------
def _vgg_features_ref(x_nchw, params, rgb_range=1.0):
    mean = jnp.asarray(_VGG_MEAN, jnp.float32) * rgb_range
    std = jnp.asarray(_VGG_STD, jnp.float32) * rgb_range
    x = (jnp.transpose(x_nchw, (0, 2, 3, 1)).astype(jnp.float32) - mean) / std
    for i, (w, b) in enumerate(params):
        N, H, W, Cin = x.shape
        Cout = w.shape[-1]
        xp = jnp.pad(x, ((0, 0), (1, 1), (1, 1), (0, 0)))
        acc = jnp.zeros((N, H, W, Cout), jnp.float32) + b
        for kh in range(3):
            for kw in range(3):
                acc = acc + jnp.einsum('nhwc,cd->nhwd',
                                       xp[:, kh:kh + H, kw:kw + W, :], w[kh, kw])
        if _RELU[i]:
            acc = jnp.maximum(acc, 0.0)
        if _POOL[i]:
            acc = jnp.max(acc.reshape(N, H // 2, 2, W // 2, 2, Cout), axis=(2, 4))
        x = acc
    return x


def _vgg_l1_loss_ref(sr, hr, params):
    fa = _vgg_features_ref(sr, params)
    fb = _vgg_features_ref(hr, params)
    return jnp.mean(jnp.abs(fa - fb))


if __name__ == "__main__":
    key = jax.random.PRNGKey(0)
    pkey, k_sr, k_hr = jax.random.split(key, 3)
    params = init_params(pkey)

    # Small shapes consistent with the module: NCHW RGB images.
    sr = jax.random.uniform(k_sr, (2, 3, 16, 16), jnp.float32)
    hr = jax.random.uniform(k_hr, (2, 3, 16, 16), jnp.float32)

    loss = jax.jit(vgg_l1_loss)(sr, hr, params)
    jax.block_until_ready(loss)
    assert bool(jnp.isfinite(loss)), "loss is not finite"

    # Cross-check vs. a pure-JAX f32 reference (bf16 MXU inputs -> loose tolerance).
    loss_ref = jax.jit(_vgg_l1_loss_ref)(sr, hr, params)
    jax.block_until_ready(loss_ref)
    assert bool(jnp.allclose(loss, loss_ref, rtol=0.1, atol=1e-3)), (
        float(loss), float(loss_ref))

    print("KERNEL_OK")
</pallas_src>

<mosaic_0001>
module attributes {stable_mosaic.version = 11 : i64} {
  func.func @_pointwise_conv_kernel(%arg0: i32, %arg1: i32, %arg2: memref<1x16x16x27xbf16, #tpu.memory_space<vmem>>, %arg3: memref<27x64xbf16, #tpu.memory_space<vmem>>, %arg4: memref<1x64xf32, #tpu.memory_space<vmem>>, %arg5: memref<1x16x16x64xbf16, #tpu.memory_space<vmem>>) attributes {dimension_semantics = [#tpu.dimension_semantics<parallel>, #tpu.dimension_semantics<parallel>], iteration_bounds = array<i64: 2, 1>, scalar_prefetch = 0 : i64, scratch_operands = 0 : i64, tpu.core_type = #tpu.core_type<tc>, window_params = [{transform_indices = @transform_0, window_bounds = array<i64: 1, 16, 16, 27>}, {pipeline_mode = #tpu.pipeline_mode<synchronous>, transform_indices = @transform_1, window_bounds = array<i64: 27, 64>}, {pipeline_mode = #tpu.pipeline_mode<synchronous>, transform_indices = @transform_2, window_bounds = array<i64: 1, 64>}, {transform_indices = @transform_3, window_bounds = array<i64: 1, 16, 16, 64>}]} {
    %c0 = arith.constant 0 : index
    %c0_0 = arith.constant 0 : index
    %c0_1 = arith.constant 0 : index
    %c0_2 = arith.constant 0 : index
    %0 = vector.load %arg2[%c0, %c0_0, %c0_1, %c0_2] : memref<1x16x16x27xbf16, #tpu.memory_space<vmem>>, vector<1x16x16x27xbf16>
    %1 = vector.shape_cast %0 : vector<1x16x16x27xbf16> to vector<16x16x27xbf16>
    %2 = vector.shape_cast %1 : vector<16x16x27xbf16> to vector<256x27xbf16>
    %c0_3 = arith.constant 0 : index
    %c0_4 = arith.constant 0 : index
    %3 = vector.load %arg3[%c0_3, %c0_4] : memref<27x64xbf16, #tpu.memory_space<vmem>>, vector<27x64xbf16>
    %cst = arith.constant dense<0.000000e+00> : vector<256x64xf32>
    %4 = tpu.matmul %2, %3, %cst {dimension_numbers = #tpu.dot_dimension_numbers<[1], [0], [0], [1], [0, 0, 1, 1], [], []>} : vector<256x27xbf16>, vector<27x64xbf16>, vector<256x64xf32> -> vector<256x64xf32>
    %c0_5 = arith.constant 0 : index
    %c0_6 = arith.constant 0 : index
    %5 = vector.load %arg4[%c0_5, %c0_6] : memref<1x64xf32, #tpu.memory_space<vmem>>, vector<1x64xf32>
    %6 = vector.broadcast %5 : vector<1x64xf32> to vector<256x64xf32>
    %7 = arith.addf %4, %6 : vector<256x64xf32>
    %cst_7 = arith.constant 0.000000e+00 : f32
    %8 = vector.broadcast %cst_7 : f32 to vector<256x64xf32>
    %9 = arith.maximumf %7, %8 : vector<256x64xf32>
    %10 = vector.shape_cast %9 : vector<256x64xf32> to vector<1x16x16x64xf32>
    %11 = arith.truncf %10 : vector<1x16x16x64xf32> to vector<1x16x16x64xbf16>
    %c0_8 = arith.constant 0 : index
    %c0_9 = arith.constant 0 : index
    %c0_10 = arith.constant 0 : index
    %c0_11 = arith.constant 0 : index
    %12 = vector.load %arg5[%c0_8, %c0_9, %c0_10, %c0_11] : memref<1x16x16x64xbf16, #tpu.memory_space<vmem>>, vector<1x16x16x64xbf16>
    tpu.vector_store %arg5[%c0_8, %c0_9, %c0_10, %c0_11], %11 {strides = array<i32>} : memref<1x16x16x64xbf16, #tpu.memory_space<vmem>>, vector<1x16x16x64xbf16>,
    return
  }
  func.func @transform_0(%arg0: i32, %arg1: i32) -> (i32, i32, i32, i32) {
    %c0_i32 = arith.constant 0 : i32
    %c0_i32_0 = arith.constant 0 : i32
    %c0_i32_1 = arith.constant 0 : i32
    return %arg0, %arg1, %c0_i32, %c0_i32_0 : i32, i32, i32, i32
  }
  func.func @transform_1(%arg0: i32, %arg1: i32) -> (i32, i32) {
    %c0_i32 = arith.constant 0 : i32
    %c0_i32_0 = arith.constant 0 : i32
    %c0_i32_1 = arith.constant 0 : i32
    return %c0_i32, %c0_i32_0 : i32, i32
  }
  func.func @transform_2(%arg0: i32, %arg1: i32) -> (i32, i32) {
    %c0_i32 = arith.constant 0 : i32
    %c0_i32_0 = arith.constant 0 : i32
    %c0_i32_1 = arith.constant 0 : i32
    return %c0_i32, %c0_i32_0 : i32, i32
  }
  func.func @transform_3(%arg0: i32, %arg1: i32) -> (i32, i32, i32, i32) {
    %c0_i32 = arith.constant 0 : i32
    %c0_i32_0 = arith.constant 0 : i32
    %c0_i32_1 = arith.constant 0 : i32
    return %arg0, %arg1, %c0_i32, %c0_i32_0 : i32, i32, i32, i32
  }
}

module attributes {stable_mosaic.version = 11 : i64} {
  func.func @_conv3x3_kernel(%arg0: i32, %arg1: i32, %arg2: memref<1x16x18x64xbf16, #tpu.memory_space<vmem>>, %arg3: memref<1x2x18x64xbf16, #tpu.memory_space<vmem>>, %arg4: memref<3x192x64xbf16, #tpu.memory_space<vmem>>, %arg5: memref<1x64xf32, #tpu.memory_space<vmem>>, %arg6: memref<1x16x16x64xbf16, #tpu.memory_space<vmem>>, %arg7: memref<18x18x64xbf16, #tpu.memory_space<vmem>>) attributes {dimension_semantics = [#tpu.dimension_semantics<parallel>, #tpu.dimension_semantics<parallel>], iteration_bounds = array<i64: 2, 1>, scalar_prefetch = 0 : i64, scratch_operands = 1 : i64, tpu.core_type = #tpu.core_type<tc>, window_params = [{transform_indices = @transform_0, window_bounds = array<i64: 1, 16, 18, 64>}, {transform_indices = @transform_1, window_bounds = array<i64: 1, 2, 18, 64>}, {pipeline_mode = #tpu.pipeline_mode<synchronous>, transform_indices = @transform_2, window_bounds = array<i64: 3, 192, 64>}, {pipeline_mode = #tpu.pipeline_mode<synchronous>, transform_indices = @transform_3, window_bounds = array<i64: 1, 64>}, {transform_indices = @transform_4, window_bounds = array<i64: 1, 16, 16, 64>}]} {
    %c0 = arith.constant 0 : index
    %c0_0 = arith.constant 0 : index
    %c0_1 = arith.constant 0 : index
    %c0_2 = arith.constant 0 : index
    %0 = vector.load %arg2[%c0, %c0_0, %c0_1, %c0_2] : memref<1x16x18x64xbf16, #tpu.memory_space<vmem>>, vector<1x16x18x64xbf16>
    %1 = vector.shape_cast %0 : vector<1x16x18x64xbf16> to vector<16x18x64xbf16>
    %c0_3 = arith.constant 0 : index
    %c0_4 = arith.constant 0 : index
    %c0_5 = arith.constant 0 : index
    %2 = vector.load %arg7[%c0_3, %c0_4, %c0_5] : memref<18x18x64xbf16, #tpu.memory_space<vmem>>, vector<16x18x64xbf16>
    tpu.vector_store %arg7[%c0_3, %c0_4, %c0_5], %1 {strides = array<i32>} : memref<18x18x64xbf16, #tpu.memory_space<vmem>>, vector<16x18x64xbf16>,
    %c0_6 = arith.constant 0 : index
    %c0_7 = arith.constant 0 : index
    %c0_8 = arith.constant 0 : index
    %c0_9 = arith.constant 0 : index
    %3 = vector.load %arg3[%c0_6, %c0_7, %c0_8, %c0_9] : memref<1x2x18x64xbf16, #tpu.memory_space<vmem>>, vector<1x2x18x64xbf16>
    %4 = vector.shape_cast %3 : vector<1x2x18x64xbf16> to vector<2x18x64xbf16>
    %c16 = arith.constant 16 : index
    %c0_10 = arith.constant 0 : index
    %c0_11 = arith.constant 0 : index
    %5 = vector.load %arg7[%c16, %c0_10, %c0_11] : memref<18x18x64xbf16, #tpu.memory_space<vmem>>, vector<2x18x64xbf16>
    tpu.vector_store %arg7[%c16, %c0_10, %c0_11], %4 {strides = array<i32>} : memref<18x18x64xbf16, #tpu.memory_space<vmem>>, vector<2x18x64xbf16>,
    %cst = arith.constant 0.000000e+00 : f32
    %6 = vector.broadcast %cst : f32 to vector<256x64xf32>
    %c0_12 = arith.constant 0 : index
    %c0_13 = arith.constant 0 : index
    %c0_14 = arith.constant 0 : index
    %7 = vector.load %arg7[%c0_12, %c0_13, %c0_14] : memref<18x18x64xbf16, #tpu.memory_space<vmem>>, vector<16x16x64xbf16>
    %c0_15 = arith.constant 0 : index
    %c1 = arith.constant 1 : index
    %c0_16 = arith.constant 0 : index
    %8 = vector.load %arg7[%c0_15, %c1, %c0_16] : memref<18x18x64xbf16, #tpu.memory_space<vmem>>, vector<16x16x64xbf16>
    %c0_17 = arith.constant 0 : index
    %c2 = arith.constant 2 : index
    %c0_18 = arith.constant 0 : index
    %9 = vector.load %arg7[%c0_17, %c2, %c0_18] : memref<18x18x64xbf16, #tpu.memory_space<vmem>>, vector<16x16x64xbf16>
    %10 = tpu.concatenate %7, %8, %9 in 2 : vector<16x16x64xbf16>, vector<16x16x64xbf16>, vector<16x16x64xbf16> -> vector<16x16x192xbf16>
    %11 = vector.shape_cast %10 : vector<16x16x192xbf16> to vector<256x192xbf16>
    %c0_19 = arith.constant 0 : index
    %c0_20 = arith.constant 0 : index
    %c0_21 = arith.constant 0 : index
    %12 = vector.load %arg4[%c0_19, %c0_20, %c0_21] : memref<3x192x64xbf16, #tpu.memory_space<vmem>>, vector<1x192x64xbf16>
    %13 = vector.shape_cast %12 : vector<1x192x64xbf16> to vector<192x64xbf16>
    %cst_22 = arith.constant dense<0.000000e+00> : vector<256x64xf32>
    %14 = tpu.matmul %11, %13, %cst_22 {dimension_numbers = #tpu.dot_dimension_numbers<[1], [0], [0], [1], [0, 0, 1, 1], [], []>} : vector<256x192xbf16>, vector<192x64xbf16>, vector<256x64xf32> -> vector<256x64xf32>
    %15 = arith.addf %6, %14 : vector<256x64xf32>
    %c1_23 = arith.constant 1 : index
    %c0_24 = arith.constant 0 : index
    %c0_25 = arith.constant 0 : index
    %16 = vector.load %arg7[%c1_23, %c0_24, %c0_25] : memref<18x18x64xbf16, #tpu.memory_space<vmem>>, vector<16x16x64xbf16>
    %c1_26 = arith.constant 1 : index
    %c1_27 = arith.constant 1 : index
    %c0_28 = arith.constant 0 : index
    %17 = vector.load %arg7[%c1_26, %c1_27, %c0_28] : memref<18x18x64xbf16, #tpu.memory_space<vmem>>, vector<16x16x64xbf16>
    %c1_29 = arith.constant 1 : index
    %c2_30 = arith.constant 2 : index
    %c0_31 = arith.constant 0 : index
    %18 = vector.load %arg7[%c1_29, %c2_30, %c0_31] : memref<18x18x64xbf16, #tpu.memory_space<vmem>>, vector<16x16x64xbf16>
    %19 = tpu.concatenate %16, %17, %18 in 2 : vector<16x16x64xbf16>, vector<16x16x64xbf16>, vector<16x16x64xbf16> -> vector<16x16x192xbf16>
    %20 = vector.shape_cast %19 : vector<16x16x192xbf16> to vector<256x192xbf16>
    %c1_32 = arith.constant 1 : index
    %c0_33 = arith.constant 0 : index
    %c0_34 = arith.constant 0 : index
    %21 = vector.load %arg4[%c1_32, %c0_33, %c0_34] : memref<3x192x64xbf16, #tpu.memory_space<vmem>>, vector<1x192x64xbf16>
    %22 = vector.shape_cast %21 : vector<1x192x64xbf16> to vector<192x64xbf16>
    %cst_35 = arith.constant dense<0.000000e+00> : vector<256x64xf32>
    %23 = tpu.matmul %20, %22, %cst_35 {dimension_numbers = #tpu.dot_dimension_numbers<[1], [0], [0], [1], [0, 0, 1, 1], [], []>} : vector<256x192xbf16>, vector<192x64xbf16>, vector<256x64xf32> -> vector<256x64xf32>
    %24 = arith.addf %15, %23 : vector<256x64xf32>
    %c2_36 = arith.constant 2 : index
    %c0_37 = arith.constant 0 : index
    %c0_38 = arith.constant 0 : index
    %25 = vector.load %arg7[%c2_36, %c0_37, %c0_38] : memref<18x18x64xbf16, #tpu.memory_space<vmem>>, vector<16x16x64xbf16>
    %c2_39 = arith.constant 2 : index
    %c1_40 = arith.constant 1 : index
    %c0_41 = arith.constant 0 : index
    %26 = vector.load %arg7[%c2_39, %c1_40, %c0_41] : memref<18x18x64xbf16, #tpu.memory_space<vmem>>, vector<16x16x64xbf16>
    %c2_42 = arith.constant 2 : index
    %c2_43 = arith.constant 2 : index
    %c0_44 = arith.constant 0 : index
    %27 = vector.load %arg7[%c2_42, %c2_43, %c0_44] : memref<18x18x64xbf16, #tpu.memory_space<vmem>>, vector<16x16x64xbf16>
    %28 = tpu.concatenate %25, %26, %27 in 2 : vector<16x16x64xbf16>, vector<16x16x64xbf16>, vector<16x16x64xbf16> -> vector<16x16x192xbf16>
    %29 = vector.shape_cast %28 : vector<16x16x192xbf16> to vector<256x192xbf16>
    %c2_45 = arith.constant 2 : index
    %c0_46 = arith.constant 0 : index
    %c0_47 = arith.constant 0 : index
    %30 = vector.load %arg4[%c2_45, %c0_46, %c0_47] : memref<3x192x64xbf16, #tpu.memory_space<vmem>>, vector<1x192x64xbf16>
    %31 = vector.shape_cast %30 : vector<1x192x64xbf16> to vector<192x64xbf16>
    %cst_48 = arith.constant dense<0.000000e+00> : vector<256x64xf32>
    %32 = tpu.matmul %29, %31, %cst_48 {dimension_numbers = #tpu.dot_dimension_numbers<[1], [0], [0], [1], [0, 0, 1, 1], [], []>} : vector<256x192xbf16>, vector<192x64xbf16>, vector<256x64xf32> -> vector<256x64xf32>
    %33 = arith.addf %24, %32 : vector<256x64xf32>
    %c0_49 = arith.constant 0 : index
    %c0_50 = arith.constant 0 : index
    %34 = vector.load %arg5[%c0_49, %c0_50] : memref<1x64xf32, #tpu.memory_space<vmem>>, vector<1x64xf32>
    %35 = vector.broadcast %34 : vector<1x64xf32> to vector<256x64xf32>
    %36 = arith.addf %33, %35 : vector<256x64xf32>
    %cst_51 = arith.constant 0.000000e+00 : f32
    %37 = vector.broadcast %cst_51 : f32 to vector<256x64xf32>
    %38 = arith.maximumf %36, %37 : vector<256x64xf32>
    %39 = vector.shape_cast %38 : vector<256x64xf32> to vector<1x16x16x64xf32>
    %40 = arith.truncf %39 : vector<1x16x16x64xf32> to vector<1x16x16x64xbf16>
    %c0_52 = arith.constant 0 : index
    %c0_53 = arith.constant 0 : index
    %c0_54 = arith.constant 0 : index
    %c0_55 = arith.constant 0 : index
    %41 = vector.load %arg6[%c0_52, %c0_53, %c0_54, %c0_55] : memref<1x16x16x64xbf16, #tpu.memory_space<vmem>>, vector<1x16x16x64xbf16>
    tpu.vector_store %arg6[%c0_52, %c0_53, %c0_54, %c0_55], %40 {strides = array<i32>} : memref<1x16x16x64xbf16, #tpu.memory_space<vmem>>, vector<1x16x16x64xbf16>,
    return
  }
  func.func @transform_0(%arg0: i32, %arg1: i32) -> (i32, i32, i32, i32) {
    %c0_i32 = arith.constant 0 : i32
    %c0_i32_0 = arith.constant 0 : i32
    %c0_i32_1 = arith.constant 0 : i32
    return %arg0, %arg1, %c0_i32, %c0_i32_0 : i32, i32, i32, i32
  }
  func.func @transform_1(%arg0: i32, %arg1: i32) -> (i32, i32, i32, i32) {
    %c1_i32 = arith.constant 1 : i32
    %0 = arith.addi %arg1, %c1_i32 : i32
    %c8_i32 = arith.constant 8 : i32
    %1 = arith.muli %0, %c8_i32 : i32
    %c0_i32 = arith.constant 0 : i32
    %c0_i32_0 = arith.constant 0 : i32
    %c0_i32_1 = arith.constant 0 : i32
    return %arg0, %1, %c0_i32, %c0_i32_0 : i32, i32, i32, i32
  }
  func.func @transform_2(%arg0: i32, %arg1: i32) -> (i32, i32, i32) {
    %c0_i32 = arith.constant 0 : i32
    %c0_i32_0 = arith.constant 0 : i32
    %c0_i32_1 = arith.constant 0 : i32
    %c0_i32_2 = arith.constant 0 : i32
    return %c0_i32, %c0_i32_0, %c0_i32_1 : i32, i32, i32
  }
  func.func @transform_3(%arg0: i32, %arg1: i32) -> (i32, i32) {
    %c0_i32 = arith.constant 0 : i32
    %c0_i32_0 = arith.constant 0 : i32
    %c0_i32_1 = arith.constant 0 : i32
    return %c0_i32, %c0_i32_0 : i32, i32
  }
  func.func @transform_4(%arg0: i32, %arg1: i32) -> (i32, i32, i32, i32) {
    %c0_i32 = arith.constant 0 : i32
    %c0_i32_0 = arith.constant 0 : i32
    %c0_i32_1 = arith.constant 0 : i32
    return %arg0, %arg1, %c0_i32, %c0_i32_0 : i32, i32, i32, i32
  }
}

module attributes {stable_mosaic.version = 11 : i64} {
  func.func @_conv3x3_kernel(%arg0: i32, %arg1: i32, %arg2: memref<1x8x10x64xbf16, #tpu.memory_space<vmem>>, %arg3: memref<1x2x10x64xbf16, #tpu.memory_space<vmem>>, %arg4: memref<3x192x128xbf16, #tpu.memory_space<vmem>>, %arg5: memref<1x128xf32, #tpu.memory_space<vmem>>, %arg6: memref<1x8x8x128xbf16, #tpu.memory_space<vmem>>, %arg7: memref<10x10x64xbf16, #tpu.memory_space<vmem>>) attributes {dimension_semantics = [#tpu.dimension_semantics<parallel>, #tpu.dimension_semantics<parallel>], iteration_bounds = array<i64: 2, 1>, scalar_prefetch = 0 : i64, scratch_operands = 1 : i64, tpu.core_type = #tpu.core_type<tc>, window_params = [{transform_indices = @transform_0, window_bounds = array<i64: 1, 8, 10, 64>}, {transform_indices = @transform_1, window_bounds = array<i64: 1, 2, 10, 64>}, {pipeline_mode = #tpu.pipeline_mode<synchronous>, transform_indices = @transform_2, window_bounds = array<i64: 3, 192, 128>}, {pipeline_mode = #tpu.pipeline_mode<synchronous>, transform_indices = @transform_3, window_bounds = array<i64: 1, 128>}, {transform_indices = @transform_4, window_bounds = array<i64: 1, 8, 8, 128>}]} {
    %c0 = arith.constant 0 : index
    %c0_0 = arith.constant 0 : index
    %c0_1 = arith.constant 0 : index
    %c0_2 = arith.constant 0 : index
    %0 = vector.load %arg2[%c0, %c0_0, %c0_1, %c0_2] : memref<1x8x10x64xbf16, #tpu.memory_space<vmem>>, vector<1x8x10x64xbf16>
    %1 = vector.shape_cast %0 : vector<1x8x10x64xbf16> to vector<8x10x64xbf16>
    %c0_3 = arith.constant 0 : index
    %c0_4 = arith.constant 0 : index
    %c0_5 = arith.constant 0 : index
    %2 = vector.load %arg7[%c0_3, %c0_4, %c0_5] : memref<10x10x64xbf16, #tpu.memory_space<vmem>>, vector<8x10x64xbf16>
    tpu.vector_store %arg7[%c0_3, %c0_4, %c0_5], %1 {strides = array<i32>} : memref<10x10x64xbf16, #tpu.memory_space<vmem>>, vector<8x10x64xbf16>,
    %c0_6 = arith.constant 0 : index
    %c0_7 = arith.constant 0 : index
    %c0_8 = arith.constant 0 : index
    %c0_9 = arith.constant 0 : index
    %3 = vector.load %arg3[%c0_6, %c0_7, %c0_8, %c0_9] : memref<1x2x10x64xbf16, #tpu.memory_space<vmem>>, vector<1x2x10x64xbf16>
    %4 = vector.shape_cast %3 : vector<1x2x10x64xbf16> to vector<2x10x64xbf16>
    %c8 = arith.constant 8 : index
    %c0_10 = arith.constant 0 : index
    %c0_11 = arith.constant 0 : index
    %5 = vector.load %arg7[%c8, %c0_10, %c0_11] : memref<10x10x64xbf16, #tpu.memory_space<vmem>>, vector<2x10x64xbf16>
    tpu.vector_store %arg7[%c8, %c0_10, %c0_11], %4 {strides = array<i32>} : memref<10x10x64xbf16, #tpu.memory_space<vmem>>, vector<2x10x64xbf16>,
    %cst = arith.constant 0.000000e+00 : f32
    %6 = vector.broadcast %cst : f32 to vector<64x128xf32>
    %c0_12 = arith.constant 0 : index
    %c0_13 = arith.constant 0 : index
    %c0_14 = arith.constant 0 : index
    %7 = vector.load %arg7[%c0_12, %c0_13, %c0_14] : memref<10x10x64xbf16, #tpu.memory_space<vmem>>, vector<8x8x64xbf16>
    %c0_15 = arith.constant 0 : index
    %c1 = arith.constant 1 : index
    %c0_16 = arith.constant 0 : index
    %8 = vector.load %arg7[%c0_15, %c1, %c0_16] : memref<10x10x64xbf16, #tpu.memory_space<vmem>>, vector<8x8x64xbf16>
    %c0_17 = arith.constant 0 : index
    %c2 = arith.constant 2 : index
    %c0_18 = arith.constant 0 : index
    %9 = vector.load %arg7[%c0_17, %c2, %c0_18] : memref<10x10x64xbf16, #tpu.memory_space<vmem>>, vector<8x8x64xbf16>
    %10 = tpu.concatenate %7, %8, %9 in 2 : vector<8x8x64xbf16>, vector<8x8x64xbf16>, vector<8x8x64xbf16> -> vector<8x8x192xbf16>
    %11 = vector.shape_cast %10 : vector<8x8x192xbf16> to vector<64x192xbf16>
    %c0_19 = arith.constant 0 : index
    %c0_20 = arith.constant 0 : index
    %c0_21 = arith.constant 0 : index
    %12 = vector.load %arg4[%c0_19, %c0_20, %c0_21] : memref<3x192x128xbf16, #tpu.memory_space<vmem>>, vector<1x192x128xbf16>
    %13 = vector.shape_cast %12 : vector<1x192x128xbf16> to vector<192x128xbf16>
    %cst_22 = arith.constant dense<0.000000e+00> : vector<64x128xf32>
    %14 = tpu.matmul %11, %13, %cst_22 {dimension_numbers = #tpu.dot_dimension_numbers<[1], [0], [0], [1], [0, 0, 1, 1], [], []>} : vector<64x192xbf16>, vector<192x128xbf16>, vector<64x128xf32> -> vector<64x128xf32>
    %15 = arith.addf %6, %14 : vector<64x128xf32>
    %c1_23 = arith.constant 1 : index
    %c0_24 = arith.constant 0 : index
    %c0_25 = arith.constant 0 : index
    %16 = vector.load %arg7[%c1_23, %c0_24, %c0_25] : memref<10x10x64xbf16, #tpu.memory_space<vmem>>, vector<8x8x64xbf16>
    %c1_26 = arith.constant 1 : index
    %c1_27 = arith.constant 1 : index
    %c0_28 = arith.constant 0 : index
    %17 = vector.load %arg7[%c1_26, %c1_27, %c0_28] : memref<10x10x64xbf16, #tpu.memory_space<vmem>>, vector<8x8x64xbf16>
    %c1_29 = arith.constant 1 : index
    %c2_30 = arith.constant 2 : index
    %c0_31 = arith.constant 0 : index
    %18 = vector.load %arg7[%c1_29, %c2_30, %c0_31] : memref<10x10x64xbf16, #tpu.memory_space<vmem>>, vector<8x8x64xbf16>
    %19 = tpu.concatenate %16, %17, %18 in 2 : vector<8x8x64xbf16>, vector<8x8x64xbf16>, vector<8x8x64xbf16> -> vector<8x8x192xbf16>
    %20 = vector.shape_cast %19 : vector<8x8x192xbf16> to vector<64x192xbf16>
    %c1_32 = arith.constant 1 : index
    %c0_33 = arith.constant 0 : index
    %c0_34 = arith.constant 0 : index
    %21 = vector.load %arg4[%c1_32, %c0_33, %c0_34] : memref<3x192x128xbf16, #tpu.memory_space<vmem>>, vector<1x192x128xbf16>
    %22 = vector.shape_cast %21 : vector<1x192x128xbf16> to vector<192x128xbf16>
    %cst_35 = arith.constant dense<0.000000e+00> : vector<64x128xf32>
    %23 = tpu.matmul %20, %22, %cst_35 {dimension_numbers = #tpu.dot_dimension_numbers<[1], [0], [0], [1], [0, 0, 1, 1], [], []>} : vector<64x192xbf16>, vector<192x128xbf16>, vector<64x128xf32> -> vector<64x128xf32>
    %24 = arith.addf %15, %23 : vector<64x128xf32>
    %c2_36 = arith.constant 2 : index
    %c0_37 = arith.constant 0 : index
    %c0_38 = arith.constant 0 : index
    %25 = vector.load %arg7[%c2_36, %c0_37, %c0_38] : memref<10x10x64xbf16, #tpu.memory_space<vmem>>, vector<8x8x64xbf16>
    %c2_39 = arith.constant 2 : index
    %c1_40 = arith.constant 1 : index
    %c0_41 = arith.constant 0 : index
    %26 = vector.load %arg7[%c2_39, %c1_40, %c0_41] : memref<10x10x64xbf16, #tpu.memory_space<vmem>>, vector<8x8x64xbf16>
    %c2_42 = arith.constant 2 : index
    %c2_43 = arith.constant 2 : index
    %c0_44 = arith.constant 0 : index
    %27 = vector.load %arg7[%c2_42, %c2_43, %c0_44] : memref<10x10x64xbf16, #tpu.memory_space<vmem>>, vector<8x8x64xbf16>
    %28 = tpu.concatenate %25, %26, %27 in 2 : vector<8x8x64xbf16>, vector<8x8x64xbf16>, vector<8x8x64xbf16> -> vector<8x8x192xbf16>
    %29 = vector.shape_cast %28 : vector<8x8x192xbf16> to vector<64x192xbf16>
    %c2_45 = arith.constant 2 : index
    %c0_46 = arith.constant 0 : index
    %c0_47 = arith.constant 0 : index
    %30 = vector.load %arg4[%c2_45, %c0_46, %c0_47] : memref<3x192x128xbf16, #tpu.memory_space<vmem>>, vector<1x192x128xbf16>
    %31 = vector.shape_cast %30 : vector<1x192x128xbf16> to vector<192x128xbf16>
    %cst_48 = arith.constant dense<0.000000e+00> : vector<64x128xf32>
    %32 = tpu.matmul %29, %31, %cst_48 {dimension_numbers = #tpu.dot_dimension_numbers<[1], [0], [0], [1], [0, 0, 1, 1], [], []>} : vector<64x192xbf16>, vector<192x128xbf16>, vector<64x128xf32> -> vector<64x128xf32>
    %33 = arith.addf %24, %32 : vector<64x128xf32>
    %c0_49 = arith.constant 0 : index
    %c0_50 = arith.constant 0 : index
    %34 = vector.load %arg5[%c0_49, %c0_50] : memref<1x128xf32, #tpu.memory_space<vmem>>, vector<1x128xf32>
    %35 = vector.broadcast %34 : vector<1x128xf32> to vector<64x128xf32>
    %36 = arith.addf %33, %35 : vector<64x128xf32>
    %cst_51 = arith.constant 0.000000e+00 : f32
    %37 = vector.broadcast %cst_51 : f32 to vector<64x128xf32>
    %38 = arith.maximumf %36, %37 : vector<64x128xf32>
    %39 = vector.shape_cast %38 : vector<64x128xf32> to vector<1x8x8x128xf32>
    %40 = arith.truncf %39 : vector<1x8x8x128xf32> to vector<1x8x8x128xbf16>
    %c0_52 = arith.constant 0 : index
    %c0_53 = arith.constant 0 : index
    %c0_54 = arith.constant 0 : index
    %c0_55 = arith.constant 0 : index
    %41 = vector.load %arg6[%c0_52, %c0_53, %c0_54, %c0_55] : memref<1x8x8x128xbf16, #tpu.memory_space<vmem>>, vector<1x8x8x128xbf16>
    tpu.vector_store %arg6[%c0_52, %c0_53, %c0_54, %c0_55], %40 {strides = array<i32>} : memref<1x8x8x128xbf16, #tpu.memory_space<vmem>>, vector<1x8x8x128xbf16>,
    return
  }
  func.func @transform_0(%arg0: i32, %arg1: i32) -> (i32, i32, i32, i32) {
    %c0_i32 = arith.constant 0 : i32
    %c0_i32_0 = arith.constant 0 : i32
    %c0_i32_1 = arith.constant 0 : i32
    return %arg0, %arg1, %c0_i32, %c0_i32_0 : i32, i32, i32, i32
  }
  func.func @transform_1(%arg0: i32, %arg1: i32) -> (i32, i32, i32, i32) {
    %c1_i32 = arith.constant 1 : i32
    %0 = arith.addi %arg1, %c1_i32 : i32
    %c4_i32 = arith.constant 4 : i32
    %1 = arith.muli %0, %c4_i32 : i32
    %c0_i32 = arith.constant 0 : i32
    %c0_i32_0 = arith.constant 0 : i32
    %c0_i32_1 = arith.constant 0 : i32
    return %arg0, %1, %c0_i32, %c0_i32_0 : i32, i32, i32, i32
  }
  func.func @transform_2(%arg0: i32, %arg1: i32) -> (i32, i32, i32) {
    %c0_i32 = arith.constant 0 : i32
    %c0_i32_0 = arith.constant 0 : i32
    %c0_i32_1 = arith.constant 0 : i32
    %c0_i32_2 = arith.constant 0 : i32
    return %c0_i32, %c0_i32_0, %c0_i32_1 : i32, i32, i32
  }
  func.func @transform_3(%arg0: i32, %arg1: i32) -> (i32, i32) {
    %c0_i32 = arith.constant 0 : i32
    %c0_i32_0 = arith.constant 0 : i32
    %c0_i32_1 = arith.constant 0 : i32
    return %c0_i32, %c0_i32_0 : i32, i32
  }
  func.func @transform_4(%arg0: i32, %arg1: i32) -> (i32, i32, i32, i32) {
    %c0_i32 = arith.constant 0 : i32
    %c0_i32_0 = arith.constant 0 : i32
    %c0_i32_1 = arith.constant 0 : i32
    return %arg0, %arg1, %c0_i32, %c0_i32_0 : i32, i32, i32, i32
  }
}

module attributes {stable_mosaic.version = 11 : i64} {
  func.func @_conv3x3_kernel(%arg0: i32, %arg1: i32, %arg2: memref<1x8x10x128xbf16, #tpu.memory_space<vmem>>, %arg3: memref<1x2x10x128xbf16, #tpu.memory_space<vmem>>, %arg4: memref<3x384x128xbf16, #tpu.memory_space<vmem>>, %arg5: memref<1x128xf32, #tpu.memory_space<vmem>>, %arg6: memref<1x8x8x128xbf16, #tpu.memory_space<vmem>>, %arg7: memref<10x10x128xbf16, #tpu.memory_space<vmem>>) attributes {dimension_semantics = [#tpu.dimension_semantics<parallel>, #tpu.dimension_semantics<parallel>], iteration_bounds = array<i64: 2, 1>, scalar_prefetch = 0 : i64, scratch_operands = 1 : i64, tpu.core_type = #tpu.core_type<tc>, window_params = [{transform_indices = @transform_0, window_bounds = array<i64: 1, 8, 10, 128>}, {transform_indices = @transform_1, window_bounds = array<i64: 1, 2, 10, 128>}, {pipeline_mode = #tpu.pipeline_mode<synchronous>, transform_indices = @transform_2, window_bounds = array<i64: 3, 384, 128>}, {pipeline_mode = #tpu.pipeline_mode<synchronous>, transform_indices = @transform_3, window_bounds = array<i64: 1, 128>}, {transform_indices = @transform_4, window_bounds = array<i64: 1, 8, 8, 128>}]} {
    %c0 = arith.constant 0 : index
    %c0_0 = arith.constant 0 : index
    %c0_1 = arith.constant 0 : index
    %c0_2 = arith.constant 0 : index
    %0 = vector.load %arg2[%c0, %c0_0, %c0_1, %c0_2] : memref<1x8x10x128xbf16, #tpu.memory_space<vmem>>, vector<1x8x10x128xbf16>
    %1 = vector.shape_cast %0 : vector<1x8x10x128xbf16> to vector<8x10x128xbf16>
    %c0_3 = arith.constant 0 : index
    %c0_4 = arith.constant 0 : index
    %c0_5 = arith.constant 0 : index
    %2 = vector.load %arg7[%c0_3, %c0_4, %c0_5] : memref<10x10x128xbf16, #tpu.memory_space<vmem>>, vector<8x10x128xbf16>
    tpu.vector_store %arg7[%c0_3, %c0_4, %c0_5], %1 {strides = array<i32>} : memref<10x10x128xbf16, #tpu.memory_space<vmem>>, vector<8x10x128xbf16>,
    %c0_6 = arith.constant 0 : index
    %c0_7 = arith.constant 0 : index
    %c0_8 = arith.constant 0 : index
    %c0_9 = arith.constant 0 : index
    %3 = vector.load %arg3[%c0_6, %c0_7, %c0_8, %c0_9] : memref<1x2x10x128xbf16, #tpu.memory_space<vmem>>, vector<1x2x10x128xbf16>
    %4 = vector.shape_cast %3 : vector<1x2x10x128xbf16> to vector<2x10x128xbf16>
    %c8 = arith.constant 8 : index
    %c0_10 = arith.constant 0 : index
    %c0_11 = arith.constant 0 : index
    %5 = vector.load %arg7[%c8, %c0_10, %c0_11] : memref<10x10x128xbf16, #tpu.memory_space<vmem>>, vector<2x10x128xbf16>
    tpu.vector_store %arg7[%c8, %c0_10, %c0_11], %4 {strides = array<i32>} : memref<10x10x128xbf16, #tpu.memory_space<vmem>>, vector<2x10x128xbf16>,
    %cst = arith.constant 0.000000e+00 : f32
    %6 = vector.broadcast %cst : f32 to vector<64x128xf32>
    %c0_12 = arith.constant 0 : index
    %c0_13 = arith.constant 0 : index
    %c0_14 = arith.constant 0 : index
    %7 = vector.load %arg7[%c0_12, %c0_13, %c0_14] : memref<10x10x128xbf16, #tpu.memory_space<vmem>>, vector<8x8x128xbf16>
    %c0_15 = arith.constant 0 : index
    %c1 = arith.constant 1 : index
    %c0_16 = arith.constant 0 : index
    %8 = vector.load %arg7[%c0_15, %c1, %c0_16] : memref<10x10x128xbf16, #tpu.memory_space<vmem>>, vector<8x8x128xbf16>
    %c0_17 = arith.constant 0 : index
    %c2 = arith.constant 2 : index
    %c0_18 = arith.constant 0 : index
    %9 = vector.load %arg7[%c0_17, %c2, %c0_18] : memref<10x10x128xbf16, #tpu.memory_space<vmem>>, vector<8x8x128xbf16>
    %10 = tpu.concatenate %7, %8, %9 in 2 : vector<8x8x128xbf16>, vector<8x8x128xbf16>, vector<8x8x128xbf16> -> vector<8x8x384xbf16>
    %11 = vector.shape_cast %10 : vector<8x8x384xbf16> to vector<64x384xbf16>
    %c0_19 = arith.constant 0 : index
    %c0_20 = arith.constant 0 : index
    %c0_21 = arith.constant 0 : index
    %12 = vector.load %arg4[%c0_19, %c0_20, %c0_21] : memref<3x384x128xbf16, #tpu.memory_space<vmem>>, vector<1x384x128xbf16>
    %13 = vector.shape_cast %12 : vector<1x384x128xbf16> to vector<384x128xbf16>
    %cst_22 = arith.constant dense<0.000000e+00> : vector<64x128xf32>
    %14 = tpu.matmul %11, %13, %cst_22 {dimension_numbers = #tpu.dot_dimension_numbers<[1], [0], [0], [1], [0, 0, 1, 1], [], []>} : vector<64x384xbf16>, vector<384x128xbf16>, vector<64x128xf32> -> vector<64x128xf32>
    %15 = arith.addf %6, %14 : vector<64x128xf32>
    %c1_23 = arith.constant 1 : index
    %c0_24 = arith.constant 0 : index
    %c0_25 = arith.constant 0 : index
    %16 = vector.load %arg7[%c1_23, %c0_24, %c0_25] : memref<10x10x128xbf16, #tpu.memory_space<vmem>>, vector<8x8x128xbf16>
    %c1_26 = arith.constant 1 : index
    %c1_27 = arith.constant 1 : index
    %c0_28 = arith.constant 0 : index
    %17 = vector.load %arg7[%c1_26, %c1_27, %c0_28] : memref<10x10x128xbf16, #tpu.memory_space<vmem>>, vector<8x8x128xbf16>
    %c1_29 = arith.constant 1 : index
    %c2_30 = arith.constant 2 : index
    %c0_31 = arith.constant 0 : index
    %18 = vector.load %arg7[%c1_29, %c2_30, %c0_31] : memref<10x10x128xbf16, #tpu.memory_space<vmem>>, vector<8x8x128xbf16>
    %19 = tpu.concatenate %16, %17, %18 in 2 : vector<8x8x128xbf16>, vector<8x8x128xbf16>, vector<8x8x128xbf16> -> vector<8x8x384xbf16>
    %20 = vector.shape_cast %19 : vector<8x8x384xbf16> to vector<64x384xbf16>
    %c1_32 = arith.constant 1 : index
    %c0_33 = arith.constant 0 : index
    %c0_34 = arith.constant 0 : index
    %21 = vector.load %arg4[%c1_32, %c0_33, %c0_34] : memref<3x384x128xbf16, #tpu.memory_space<vmem>>, vector<1x384x128xbf16>
    %22 = vector.shape_cast %21 : vector<1x384x128xbf16> to vector<384x128xbf16>
    %cst_35 = arith.constant dense<0.000000e+00> : vector<64x128xf32>
    %23 = tpu.matmul %20, %22, %cst_35 {dimension_numbers = #tpu.dot_dimension_numbers<[1], [0], [0], [1], [0, 0, 1, 1], [], []>} : vector<64x384xbf16>, vector<384x128xbf16>, vector<64x128xf32> -> vector<64x128xf32>
    %24 = arith.addf %15, %23 : vector<64x128xf32>
    %c2_36 = arith.constant 2 : index
    %c0_37 = arith.constant 0 : index
    %c0_38 = arith.constant 0 : index
    %25 = vector.load %arg7[%c2_36, %c0_37, %c0_38] : memref<10x10x128xbf16, #tpu.memory_space<vmem>>, vector<8x8x128xbf16>
    %c2_39 = arith.constant 2 : index
    %c1_40 = arith.constant 1 : index
    %c0_41 = arith.constant 0 : index
    %26 = vector.load %arg7[%c2_39, %c1_40, %c0_41] : memref<10x10x128xbf16, #tpu.memory_space<vmem>>, vector<8x8x128xbf16>
    %c2_42 = arith.constant 2 : index
    %c2_43 = arith.constant 2 : index
    %c0_44 = arith.constant 0 : index
    %27 = vector.load %arg7[%c2_42, %c2_43, %c0_44] : memref<10x10x128xbf16, #tpu.memory_space<vmem>>, vector<8x8x128xbf16>
    %28 = tpu.concatenate %25, %26, %27 in 2 : vector<8x8x128xbf16>, vector<8x8x128xbf16>, vector<8x8x128xbf16> -> vector<8x8x384xbf16>
    %29 = vector.shape_cast %28 : vector<8x8x384xbf16> to vector<64x384xbf16>
    %c2_45 = arith.constant 2 : index
    %c0_46 = arith.constant 0 : index
    %c0_47 = arith.constant 0 : index
    %30 = vector.load %arg4[%c2_45, %c0_46, %c0_47] : memref<3x384x128xbf16, #tpu.memory_space<vmem>>, vector<1x384x128xbf16>
    %31 = vector.shape_cast %30 : vector<1x384x128xbf16> to vector<384x128xbf16>
    %cst_48 = arith.constant dense<0.000000e+00> : vector<64x128xf32>
    %32 = tpu.matmul %29, %31, %cst_48 {dimension_numbers = #tpu.dot_dimension_numbers<[1], [0], [0], [1], [0, 0, 1, 1], [], []>} : vector<64x384xbf16>, vector<384x128xbf16>, vector<64x128xf32> -> vector<64x128xf32>
    %33 = arith.addf %24, %32 : vector<64x128xf32>
    %c0_49 = arith.constant 0 : index
    %c0_50 = arith.constant 0 : index
    %34 = vector.load %arg5[%c0_49, %c0_50] : memref<1x128xf32, #tpu.memory_space<vmem>>, vector<1x128xf32>
    %35 = vector.broadcast %34 : vector<1x128xf32> to vector<64x128xf32>
    %36 = arith.addf %33, %35 : vector<64x128xf32>
    %cst_51 = arith.constant 0.000000e+00 : f32
    %37 = vector.broadcast %cst_51 : f32 to vector<64x128xf32>
    %38 = arith.maximumf %36, %37 : vector<64x128xf32>
    %39 = vector.shape_cast %38 : vector<64x128xf32> to vector<1x8x8x128xf32>
    %40 = arith.truncf %39 : vector<1x8x8x128xf32> to vector<1x8x8x128xbf16>
    %c0_52 = arith.constant 0 : index
    %c0_53 = arith.constant 0 : index
    %c0_54 = arith.constant 0 : index
    %c0_55 = arith.constant 0 : index
    %41 = vector.load %arg6[%c0_52, %c0_53, %c0_54, %c0_55] : memref<1x8x8x128xbf16, #tpu.memory_space<vmem>>, vector<1x8x8x128xbf16>
    tpu.vector_store %arg6[%c0_52, %c0_53, %c0_54, %c0_55], %40 {strides = array<i32>} : memref<1x8x8x128xbf16, #tpu.memory_space<vmem>>, vector<1x8x8x128xbf16>,
    return
  }
  func.func @transform_0(%arg0: i32, %arg1: i32) -> (i32, i32, i32, i32) {
    %c0_i32 = arith.constant 0 : i32
    %c0_i32_0 = arith.constant 0 : i32
    %c0_i32_1 = arith.constant 0 : i32
    return %arg0, %arg1, %c0_i32, %c0_i32_0 : i32, i32, i32, i32
  }
  func.func @transform_1(%arg0: i32, %arg1: i32) -> (i32, i32, i32, i32) {
    %c1_i32 = arith.constant 1 : i32
    %0 = arith.addi %arg1, %c1_i32 : i32
    %c4_i32 = arith.constant 4 : i32
    %1 = arith.muli %0, %c4_i32 : i32
    %c0_i32 = arith.constant 0 : i32
    %c0_i32_0 = arith.constant 0 : i32
    %c0_i32_1 = arith.constant 0 : i32
    return %arg0, %1, %c0_i32, %c0_i32_0 : i32, i32, i32, i32
  }
  func.func @transform_2(%arg0: i32, %arg1: i32) -> (i32, i32, i32) {
    %c0_i32 = arith.constant 0 : i32
    %c0_i32_0 = arith.constant 0 : i32
    %c0_i32_1 = arith.constant 0 : i32
    %c0_i32_2 = arith.constant 0 : i32
    return %c0_i32, %c0_i32_0, %c0_i32_1 : i32, i32, i32
  }
  func.func @transform_3(%arg0: i32, %arg1: i32) -> (i32, i32) {
    %c0_i32 = arith.constant 0 : i32
    %c0_i32_0 = arith.constant 0 : i32
    %c0_i32_1 = arith.constant 0 : i32
    return %c0_i32, %c0_i32_0 : i32, i32
  }
  func.func @transform_4(%arg0: i32, %arg1: i32) -> (i32, i32, i32, i32) {
    %c0_i32 = arith.constant 0 : i32
    %c0_i32_0 = arith.constant 0 : i32
    %c0_i32_1 = arith.constant 0 : i32
    return %arg0, %arg1, %c0_i32, %c0_i32_0 : i32, i32, i32, i32
  }
}

module attributes {stable_mosaic.version = 11 : i64} {
  func.func @_conv3x3_kernel(%arg0: i32, %arg1: i32, %arg2: memref<1x8x10x128xbf16, #tpu.memory_space<vmem>>, %arg3: memref<1x2x10x128xbf16, #tpu.memory_space<vmem>>, %arg4: memref<3x384x256xbf16, #tpu.memory_space<vmem>>, %arg5: memref<1x256xf32, #tpu.memory_space<vmem>>, %arg6: memref<1x8x8x256xbf16, #tpu.memory_space<vmem>>, %arg7: memref<10x10x128xbf16, #tpu.memory_space<vmem>>) attributes {dimension_semantics = [#tpu.dimension_semantics<parallel>, #tpu.dimension_semantics<parallel>], iteration_bounds = array<i64: 2, 1>, scalar_prefetch = 0 : i64, scratch_operands = 1 : i64, tpu.core_type = #tpu.core_type<tc>, window_params = [{transform_indices = @transform_0, window_bounds = array<i64: 1, 8, 10, 128>}, {transform_indices = @transform_1, window_bounds = array<i64: 1, 2, 10, 128>}, {pipeline_mode = #tpu.pipeline_mode<synchronous>, transform_indices = @transform_2, window_bounds = array<i64: 3, 384, 256>}, {pipeline_mode = #tpu.pipeline_mode<synchronous>, transform_indices = @transform_3, window_bounds = array<i64: 1, 256>}, {transform_indices = @transform_4, window_bounds = array<i64: 1, 8, 8, 256>}]} {
    %c0 = arith.constant 0 : index
    %c0_0 = arith.constant 0 : index
    %c0_1 = arith.constant 0 : index
    %c0_2 = arith.constant 0 : index
    %0 = vector.load %arg2[%c0, %c0_0, %c0_1, %c0_2] : memref<1x8x10x128xbf16, #tpu.memory_space<vmem>>, vector<1x8x10x128xbf16>
    %1 = vector.shape_cast %0 : vector<1x8x10x128xbf16> to vector<8x10x128xbf16>
    %c0_3 = arith.constant 0 : index
    %c0_4 = arith.constant 0 : index
    %c0_5 = arith.constant 0 : index
    %2 = vector.load %arg7[%c0_3, %c0_4, %c0_5] : memref<10x10x128xbf16, #tpu.memory_space<vmem>>, vector<8x10x128xbf16>
    tpu.vector_store %arg7[%c0_3, %c0_4, %c0_5], %1 {strides = array<i32>} : memref<10x10x128xbf16, #tpu.memory_space<vmem>>, vector<8x10x128xbf16>,
    %c0_6 = arith.constant 0 : index
    %c0_7 = arith.constant 0 : index
    %c0_8 = arith.constant 0 : index
    %c0_9 = arith.constant 0 : index
    %3 = vector.load %arg3[%c0_6, %c0_7, %c0_8, %c0_9] : memref<1x2x10x128xbf16, #tpu.memory_space<vmem>>, vector<1x2x10x128xbf16>
    %4 = vector.shape_cast %3 : vector<1x2x10x128xbf16> to vector<2x10x128xbf16>
    %c8 = arith.constant 8 : index
    %c0_10 = arith.constant 0 : index
    %c0_11 = arith.constant 0 : index
    %5 = vector.load %arg7[%c8, %c0_10, %c0_11] : memref<10x10x128xbf16, #tpu.memory_space<vmem>>, vector<2x10x128xbf16>
    tpu.vector_store %arg7[%c8, %c0_10, %c0_11], %4 {strides = array<i32>} : memref<10x10x128xbf16, #tpu.memory_space<vmem>>, vector<2x10x128xbf16>,
    %cst = arith.constant 0.000000e+00 : f32
    %6 = vector.broadcast %cst : f32 to vector<64x256xf32>
    %c0_12 = arith.constant 0 : index
    %c0_13 = arith.constant 0 : index
    %c0_14 = arith.constant 0 : index
    %7 = vector.load %arg7[%c0_12, %c0_13, %c0_14] : memref<10x10x128xbf16, #tpu.memory_space<vmem>>, vector<8x8x128xbf16>
    %c0_15 = arith.constant 0 : index
    %c1 = arith.constant 1 : index
    %c0_16 = arith.constant 0 : index
    %8 = vector.load %arg7[%c0_15, %c1, %c0_16] : memref<10x10x128xbf16, #tpu.memory_space<vmem>>, vector<8x8x128xbf16>
    %c0_17 = arith.constant 0 : index
    %c2 = arith.constant 2 : index
    %c0_18 = arith.constant 0 : index
    %9 = vector.load %arg7[%c0_17, %c2, %c0_18] : memref<10x10x128xbf16, #tpu.memory_space<vmem>>, vector<8x8x128xbf16>
    %10 = tpu.concatenate %7, %8, %9 in 2 : vector<8x8x128xbf16>, vector<8x8x128xbf16>, vector<8x8x128xbf16> -> vector<8x8x384xbf16>
    %11 = vector.shape_cast %10 : vector<8x8x384xbf16> to vector<64x384xbf16>
    %c0_19 = arith.constant 0 : index
    %c0_20 = arith.constant 0 : index
    %c0_21 = arith.constant 0 : index
    %12 = vector.load %arg4[%c0_19, %c0_20, %c0_21] : memref<3x384x256xbf16, #tpu.memory_space<vmem>>, vector<1x384x256xbf16>
    %13 = vector.shape_cast %12 : vector<1x384x256xbf16> to vector<384x256xbf16>
    %cst_22 = arith.constant dense<0.000000e+00> : vector<64x256xf32>
    %14 = tpu.matmul %11, %13, %cst_22 {dimension_numbers = #tpu.dot_dimension_numbers<[1], [0], [0], [1], [0, 0, 1, 1], [], []>} : vector<64x384xbf16>, vector<384x256xbf16>, vector<64x256xf32> -> vector<64x256xf32>
    %15 = arith.addf %6, %14 : vector<64x256xf32>
    %c1_23 = arith.constant 1 : index
    %c0_24 = arith.constant 0 : index
    %c0_25 = arith.constant 0 : index
    %16 = vector.load %arg7[%c1_23, %c0_24, %c0_25] : memref<10x10x128xbf16, #tpu.memory_space<vmem>>, vector<8x8x128xbf16>
    %c1_26 = arith.constant 1 : index
    %c1_27 = arith.constant 1 : index
    %c0_28 = arith.constant 0 : index
    %17 = vector.load %arg7[%c1_26, %c1_27, %c0_28] : memref<10x10x128xbf16, #tpu.memory_space<vmem>>, vector<8x8x128xbf16>
    %c1_29 = arith.constant 1 : index
    %c2_30 = arith.constant 2 : index
    %c0_31 = arith.constant 0 : index
    %18 = vector.load %arg7[%c1_29, %c2_30, %c0_31] : memref<10x10x128xbf16, #tpu.memory_space<vmem>>, vector<8x8x128xbf16>
    %19 = tpu.concatenate %16, %17, %18 in 2 : vector<8x8x128xbf16>, vector<8x8x128xbf16>, vector<8x8x128xbf16> -> vector<8x8x384xbf16>
    %20 = vector.shape_cast %19 : vector<8x8x384xbf16> to vector<64x384xbf16>
    %c1_32 = arith.constant 1 : index
    %c0_33 = arith.constant 0 : index
    %c0_34 = arith.constant 0 : index
    %21 = vector.load %arg4[%c1_32, %c0_33, %c0_34] : memref<3x384x256xbf16, #tpu.memory_space<vmem>>, vector<1x384x256xbf16>
    %22 = vector.shape_cast %21 : vector<1x384x256xbf16> to vector<384x256xbf16>
    %cst_35 = arith.constant dense<0.000000e+00> : vector<64x256xf32>
    %23 = tpu.matmul %20, %22, %cst_35 {dimension_numbers = #tpu.dot_dimension_numbers<[1], [0], [0], [1], [0, 0, 1, 1], [], []>} : vector<64x384xbf16>, vector<384x256xbf16>, vector<64x256xf32> -> vector<64x256xf32>
    %24 = arith.addf %15, %23 : vector<64x256xf32>
    %c2_36 = arith.constant 2 : index
    %c0_37 = arith.constant 0 : index
    %c0_38 = arith.constant 0 : index
    %25 = vector.load %arg7[%c2_36, %c0_37, %c0_38] : memref<10x10x128xbf16, #tpu.memory_space<vmem>>, vector<8x8x128xbf16>
    %c2_39 = arith.constant 2 : index
    %c1_40 = arith.constant 1 : index
    %c0_41 = arith.constant 0 : index
    %26 = vector.load %arg7[%c2_39, %c1_40, %c0_41] : memref<10x10x128xbf16, #tpu.memory_space<vmem>>, vector<8x8x128xbf16>
    %c2_42 = arith.constant 2 : index
    %c2_43 = arith.constant 2 : index
    %c0_44 = arith.constant 0 : index
    %27 = vector.load %arg7[%c2_42, %c2_43, %c0_44] : memref<10x10x128xbf16, #tpu.memory_space<vmem>>, vector<8x8x128xbf16>
    %28 = tpu.concatenate %25, %26, %27 in 2 : vector<8x8x128xbf16>, vector<8x8x128xbf16>, vector<8x8x128xbf16> -> vector<8x8x384xbf16>
    %29 = vector.shape_cast %28 : vector<8x8x384xbf16> to vector<64x384xbf16>
    %c2_45 = arith.constant 2 : index
    %c0_46 = arith.constant 0 : index
    %c0_47 = arith.constant 0 : index
    %30 = vector.load %arg4[%c2_45, %c0_46, %c0_47] : memref<3x384x256xbf16, #tpu.memory_space<vmem>>, vector<1x384x256xbf16>
    %31 = vector.shape_cast %30 : vector<1x384x256xbf16> to vector<384x256xbf16>
    %cst_48 = arith.constant dense<0.000000e+00> : vector<64x256xf32>
    %32 = tpu.matmul %29, %31, %cst_48 {dimension_numbers = #tpu.dot_dimension_numbers<[1], [0], [0], [1], [0, 0, 1, 1], [], []>} : vector<64x384xbf16>, vector<384x256xbf16>, vector<64x256xf32> -> vector<64x256xf32>
    %33 = arith.addf %24, %32 : vector<64x256xf32>
    %c0_49 = arith.constant 0 : index
    %c0_50 = arith.constant 0 : index
    %34 = vector.load %arg5[%c0_49, %c0_50] : memref<1x256xf32, #tpu.memory_space<vmem>>, vector<1x256xf32>
    %35 = vector.broadcast %34 : vector<1x256xf32> to vector<64x256xf32>
    %36 = arith.addf %33, %35 : vector<64x256xf32>
    %cst_51 = arith.constant 0.000000e+00 : f32
    %37 = vector.broadcast %cst_51 : f32 to vector<64x256xf32>
    %38 = arith.maximumf %36, %37 : vector<64x256xf32>
    %39 = vector.shape_cast %38 : vector<64x256xf32> to vector<1x8x8x256xf32>
    %40 = arith.truncf %39 : vector<1x8x8x256xf32> to vector<1x8x8x256xbf16>
    %c0_52 = arith.constant 0 : index
    %c0_53 = arith.constant 0 : index
    %c0_54 = arith.constant 0 : index
    %c0_55 = arith.constant 0 : index
    %41 = vector.load %arg6[%c0_52, %c0_53, %c0_54, %c0_55] : memref<1x8x8x256xbf16, #tpu.memory_space<vmem>>, vector<1x8x8x256xbf16>
    tpu.vector_store %arg6[%c0_52, %c0_53, %c0_54, %c0_55], %40 {strides = array<i32>} : memref<1x8x8x256xbf16, #tpu.memory_space<vmem>>, vector<1x8x8x256xbf16>,
    return
  }
  func.func @transform_0(%arg0: i32, %arg1: i32) -> (i32, i32, i32, i32) {
    %c0_i32 = arith.constant 0 : i32
    %c0_i32_0 = arith.constant 0 : i32
    %c0_i32_1 = arith.constant 0 : i32
    return %arg0, %arg1, %c0_i32, %c0_i32_0 : i32, i32, i32, i32
  }
  func.func @transform_1(%arg0: i32, %arg1: i32) -> (i32, i32, i32, i32) {
    %c1_i32 = arith.constant 1 : i32
    %0 = arith.addi %arg1, %c1_i32 : i32
    %c4_i32 = arith.constant 4 : i32
    %1 = arith.muli %0, %c4_i32 : i32
    %c0_i32 = arith.constant 0 : i32
    %c0_i32_0 = arith.constant 0 : i32
    %c0_i32_1 = arith.constant 0 : i32
    return %arg0, %1, %c0_i32, %c0_i32_0 : i32, i32, i32, i32
  }
  func.func @transform_2(%arg0: i32, %arg1: i32) -> (i32, i32, i32) {
    %c0_i32 = arith.constant 0 : i32
    %c0_i32_0 = arith.constant 0 : i32
    %c0_i32_1 = arith.constant 0 : i32
    %c0_i32_2 = arith.constant 0 : i32
    return %c0_i32, %c0_i32_0, %c0_i32_1 : i32, i32, i32
  }
  func.func @transform_3(%arg0: i32, %arg1: i32) -> (i32, i32) {
    %c0_i32 = arith.constant 0 : i32
    %c0_i32_0 = arith.constant 0 : i32
    %c0_i32_1 = arith.constant 0 : i32
    return %c0_i32, %c0_i32_0 : i32, i32
  }
  func.func @transform_4(%arg0: i32, %arg1: i32) -> (i32, i32, i32, i32) {
    %c0_i32 = arith.constant 0 : i32
    %c0_i32_0 = arith.constant 0 : i32
    %c0_i32_1 = arith.constant 0 : i32
    return %arg0, %arg1, %c0_i32, %c0_i32_0 : i32, i32, i32, i32
  }
}

module attributes {stable_mosaic.version = 11 : i64} {
  func.func @_conv3x3_kernel(%arg0: i32, %arg1: i32, %arg2: memref<1x8x10x256xbf16, #tpu.memory_space<vmem>>, %arg3: memref<1x2x10x256xbf16, #tpu.memory_space<vmem>>, %arg4: memref<3x768x256xbf16, #tpu.memory_space<vmem>>, %arg5: memref<1x256xf32, #tpu.memory_space<vmem>>, %arg6: memref<1x8x8x256xbf16, #tpu.memory_space<vmem>>, %arg7: memref<10x10x256xbf16, #tpu.memory_space<vmem>>) attributes {dimension_semantics = [#tpu.dimension_semantics<parallel>, #tpu.dimension_semantics<parallel>], iteration_bounds = array<i64: 2, 1>, scalar_prefetch = 0 : i64, scratch_operands = 1 : i64, tpu.core_type = #tpu.core_type<tc>, window_params = [{transform_indices = @transform_0, window_bounds = array<i64: 1, 8, 10, 256>}, {transform_indices = @transform_1, window_bounds = array<i64: 1, 2, 10, 256>}, {pipeline_mode = #tpu.pipeline_mode<synchronous>, transform_indices = @transform_2, window_bounds = array<i64: 3, 768, 256>}, {pipeline_mode = #tpu.pipeline_mode<synchronous>, transform_indices = @transform_3, window_bounds = array<i64: 1, 256>}, {transform_indices = @transform_4, window_bounds = array<i64: 1, 8, 8, 256>}]} {
    %c0 = arith.constant 0 : index
    %c0_0 = arith.constant 0 : index
    %c0_1 = arith.constant 0 : index
    %c0_2 = arith.constant 0 : index
    %0 = vector.load %arg2[%c0, %c0_0, %c0_1, %c0_2] : memref<1x8x10x256xbf16, #tpu.memory_space<vmem>>, vector<1x8x10x256xbf16>
    %1 = vector.shape_cast %0 : vector<1x8x10x256xbf16> to vector<8x10x256xbf16>
    %c0_3 = arith.constant 0 : index
    %c0_4 = arith.constant 0 : index
    %c0_5 = arith.constant 0 : index
    %2 = vector.load %arg7[%c0_3, %c0_4, %c0_5] : memref<10x10x256xbf16, #tpu.memory_space<vmem>>, vector<8x10x256xbf16>
    tpu.vector_store %arg7[%c0_3, %c0_4, %c0_5], %1 {strides = array<i32>} : memref<10x10x256xbf16, #tpu.memory_space<vmem>>, vector<8x10x256xbf16>,
    %c0_6 = arith.constant 0 : index
    %c0_7 = arith.constant 0 : index
    %c0_8 = arith.constant 0 : index
    %c0_9 = arith.constant 0 : index
    %3 = vector.load %arg3[%c0_6, %c0_7, %c0_8, %c0_9] : memref<1x2x10x256xbf16, #tpu.memory_space<vmem>>, vector<1x2x10x256xbf16>
    %4 = vector.shape_cast %3 : vector<1x2x10x256xbf16> to vector<2x10x256xbf16>
    %c8 = arith.constant 8 : index
    %c0_10 = arith.constant 0 : index
    %c0_11 = arith.constant 0 : index
    %5 = vector.load %arg7[%c8, %c0_10, %c0_11] : memref<10x10x256xbf16, #tpu.memory_space<vmem>>, vector<2x10x256xbf16>
    tpu.vector_store %arg7[%c8, %c0_10, %c0_11], %4 {strides = array<i32>} : memref<10x10x256xbf16, #tpu.memory_space<vmem>>, vector<2x10x256xbf16>,
    %cst = arith.constant 0.000000e+00 : f32
    %6 = vector.broadcast %cst : f32 to vector<64x256xf32>
    %c0_12 = arith.constant 0 : index
    %c0_13 = arith.constant 0 : index
    %c0_14 = arith.constant 0 : index
    %7 = vector.load %arg7[%c0_12, %c0_13, %c0_14] : memref<10x10x256xbf16, #tpu.memory_space<vmem>>, vector<8x8x256xbf16>
    %c0_15 = arith.constant 0 : index
    %c1 = arith.constant 1 : index
    %c0_16 = arith.constant 0 : index
    %8 = vector.load %arg7[%c0_15, %c1, %c0_16] : memref<10x10x256xbf16, #tpu.memory_space<vmem>>, vector<8x8x256xbf16>
    %c0_17 = arith.constant 0 : index
    %c2 = arith.constant 2 : index
    %c0_18 = arith.constant 0 : index
    %9 = vector.load %arg7[%c0_17, %c2, %c0_18] : memref<10x10x256xbf16, #tpu.memory_space<vmem>>, vector<8x8x256xbf16>
    %10 = tpu.concatenate %7, %8, %9 in 2 : vector<8x8x256xbf16>, vector<8x8x256xbf16>, vector<8x8x256xbf16> -> vector<8x8x768xbf16>
    %11 = vector.shape_cast %10 : vector<8x8x768xbf16> to vector<64x768xbf16>
    %c0_19 = arith.constant 0 : index
    %c0_20 = arith.constant 0 : index
    %c0_21 = arith.constant 0 : index
    %12 = vector.load %arg4[%c0_19, %c0_20, %c0_21] : memref<3x768x256xbf16, #tpu.memory_space<vmem>>, vector<1x768x256xbf16>
    %13 = vector.shape_cast %12 : vector<1x768x256xbf16> to vector<768x256xbf16>
    %cst_22 = arith.constant dense<0.000000e+00> : vector<64x256xf32>
    %14 = tpu.matmul %11, %13, %cst_22 {dimension_numbers = #tpu.dot_dimension_numbers<[1], [0], [0], [1], [0, 0, 1, 1], [], []>} : vector<64x768xbf16>, vector<768x256xbf16>, vector<64x256xf32> -> vector<64x256xf32>
    %15 = arith.addf %6, %14 : vector<64x256xf32>
    %c1_23 = arith.constant 1 : index
    %c0_24 = arith.constant 0 : index
    %c0_25 = arith.constant 0 : index
    %16 = vector.load %arg7[%c1_23, %c0_24, %c0_25] : memref<10x10x256xbf16, #tpu.memory_space<vmem>>, vector<8x8x256xbf16>
    %c1_26 = arith.constant 1 : index
    %c1_27 = arith.constant 1 : index
    %c0_28 = arith.constant 0 : index
    %17 = vector.load %arg7[%c1_26, %c1_27, %c0_28] : memref<10x10x256xbf16, #tpu.memory_space<vmem>>, vector<8x8x256xbf16>
    %c1_29 = arith.constant 1 : index
    %c2_30 = arith.constant 2 : index
    %c0_31 = arith.constant 0 : index
    %18 = vector.load %arg7[%c1_29, %c2_30, %c0_31] : memref<10x10x256xbf16, #tpu.memory_space<vmem>>, vector<8x8x256xbf16>
    %19 = tpu.concatenate %16, %17, %18 in 2 : vector<8x8x256xbf16>, vector<8x8x256xbf16>, vector<8x8x256xbf16> -> vector<8x8x768xbf16>
    %20 = vector.shape_cast %19 : vector<8x8x768xbf16> to vector<64x768xbf16>
    %c1_32 = arith.constant 1 : index
    %c0_33 = arith.constant 0 : index
    %c0_34 = arith.constant 0 : index
    %21 = vector.load %arg4[%c1_32, %c0_33, %c0_34] : memref<3x768x256xbf16, #tpu.memory_space<vmem>>, vector<1x768x256xbf16>
    %22 = vector.shape_cast %21 : vector<1x768x256xbf16> to vector<768x256xbf16>
    %cst_35 = arith.constant dense<0.000000e+00> : vector<64x256xf32>
    %23 = tpu.matmul %20, %22, %cst_35 {dimension_numbers = #tpu.dot_dimension_numbers<[1], [0], [0], [1], [0, 0, 1, 1], [], []>} : vector<64x768xbf16>, vector<768x256xbf16>, vector<64x256xf32> -> vector<64x256xf32>
    %24 = arith.addf %15, %23 : vector<64x256xf32>
    %c2_36 = arith.constant 2 : index
    %c0_37 = arith.constant 0 : index
    %c0_38 = arith.constant 0 : index
    %25 = vector.load %arg7[%c2_36, %c0_37, %c0_38] : memref<10x10x256xbf16, #tpu.memory_space<vmem>>, vector<8x8x256xbf16>
    %c2_39 = arith.constant 2 : index
    %c1_40 = arith.constant 1 : index
    %c0_41 = arith.constant 0 : index
    %26 = vector.load %arg7[%c2_39, %c1_40, %c0_41] : memref<10x10x256xbf16, #tpu.memory_space<vmem>>, vector<8x8x256xbf16>
    %c2_42 = arith.constant 2 : index
    %c2_43 = arith.constant 2 : index
    %c0_44 = arith.constant 0 : index
    %27 = vector.load %arg7[%c2_42, %c2_43, %c0_44] : memref<10x10x256xbf16, #tpu.memory_space<vmem>>, vector<8x8x256xbf16>
    %28 = tpu.concatenate %25, %26, %27 in 2 : vector<8x8x256xbf16>, vector<8x8x256xbf16>, vector<8x8x256xbf16> -> vector<8x8x768xbf16>
    %29 = vector.shape_cast %28 : vector<8x8x768xbf16> to vector<64x768xbf16>
    %c2_45 = arith.constant 2 : index
    %c0_46 = arith.constant 0 : index
    %c0_47 = arith.constant 0 : index
    %30 = vector.load %arg4[%c2_45, %c0_46, %c0_47] : memref<3x768x256xbf16, #tpu.memory_space<vmem>>, vector<1x768x256xbf16>
    %31 = vector.shape_cast %30 : vector<1x768x256xbf16> to vector<768x256xbf16>
    %cst_48 = arith.constant dense<0.000000e+00> : vector<64x256xf32>
    %32 = tpu.matmul %29, %31, %cst_48 {dimension_numbers = #tpu.dot_dimension_numbers<[1], [0], [0], [1], [0, 0, 1, 1], [], []>} : vector<64x768xbf16>, vector<768x256xbf16>, vector<64x256xf32> -> vector<64x256xf32>
    %33 = arith.addf %24, %32 : vector<64x256xf32>
    %c0_49 = arith.constant 0 : index
    %c0_50 = arith.constant 0 : index
    %34 = vector.load %arg5[%c0_49, %c0_50] : memref<1x256xf32, #tpu.memory_space<vmem>>, vector<1x256xf32>
    %35 = vector.broadcast %34 : vector<1x256xf32> to vector<64x256xf32>
    %36 = arith.addf %33, %35 : vector<64x256xf32>
    %37 = vector.shape_cast %36 : vector<64x256xf32> to vector<1x8x8x256xf32>
    %38 = arith.truncf %37 : vector<1x8x8x256xf32> to vector<1x8x8x256xbf16>
    %c0_51 = arith.constant 0 : index
    %c0_52 = arith.constant 0 : index
    %c0_53 = arith.constant 0 : index
    %c0_54 = arith.constant 0 : index
    %39 = vector.load %arg6[%c0_51, %c0_52, %c0_53, %c0_54] : memref<1x8x8x256xbf16, #tpu.memory_space<vmem>>, vector<1x8x8x256xbf16>
    tpu.vector_store %arg6[%c0_51, %c0_52, %c0_53, %c0_54], %38 {strides = array<i32>} : memref<1x8x8x256xbf16, #tpu.memory_space<vmem>>, vector<1x8x8x256xbf16>,
    return
  }
  func.func @transform_0(%arg0: i32, %arg1: i32) -> (i32, i32, i32, i32) {
    %c0_i32 = arith.constant 0 : i32
    %c0_i32_0 = arith.constant 0 : i32
    %c0_i32_1 = arith.constant 0 : i32
    return %arg0, %arg1, %c0_i32, %c0_i32_0 : i32, i32, i32, i32
  }
  func.func @transform_1(%arg0: i32, %arg1: i32) -> (i32, i32, i32, i32) {
    %c1_i32 = arith.constant 1 : i32
    %0 = arith.addi %arg1, %c1_i32 : i32
    %c4_i32 = arith.constant 4 : i32
    %1 = arith.muli %0, %c4_i32 : i32
    %c0_i32 = arith.constant 0 : i32
    %c0_i32_0 = arith.constant 0 : i32
    %c0_i32_1 = arith.constant 0 : i32
    return %arg0, %1, %c0_i32, %c0_i32_0 : i32, i32, i32, i32
  }
  func.func @transform_2(%arg0: i32, %arg1: i32) -> (i32, i32, i32) {
    %c0_i32 = arith.constant 0 : i32
    %c0_i32_0 = arith.constant 0 : i32
    %c0_i32_1 = arith.constant 0 : i32
    %c0_i32_2 = arith.constant 0 : i32
    return %c0_i32, %c0_i32_0, %c0_i32_1 : i32, i32, i32
  }
  func.func @transform_3(%arg0: i32, %arg1: i32) -> (i32, i32) {
    %c0_i32 = arith.constant 0 : i32
    %c0_i32_0 = arith.constant 0 : i32
    %c0_i32_1 = arith.constant 0 : i32
    return %c0_i32, %c0_i32_0 : i32, i32
  }
  func.func @transform_4(%arg0: i32, %arg1: i32) -> (i32, i32, i32, i32) {
    %c0_i32 = arith.constant 0 : i32
    %c0_i32_0 = arith.constant 0 : i32
    %c0_i32_1 = arith.constant 0 : i32
    return %arg0, %arg1, %c0_i32, %c0_i32_0 : i32, i32, i32, i32
  }
}

module attributes {stable_mosaic.version = 11 : i64} {
  func.func @_l1_partial_kernel(%arg0: i32, %arg1: memref<32x256xbf16, #tpu.memory_space<vmem>>, %arg2: memref<32x256xbf16, #tpu.memory_space<vmem>>, %arg3: memref<1x256xf32, #tpu.memory_space<vmem>>) attributes {dimension_semantics = [#tpu.dimension_semantics<arbitrary>], iteration_bounds = array<i64: 1>, scalar_prefetch = 0 : i64, scratch_operands = 0 : i64, tpu.core_type = #tpu.core_type<tc>, window_params = [{transform_indices = @transform_0, window_bounds = array<i64: 32, 256>}, {transform_indices = @transform_1, window_bounds = array<i64: 32, 256>}, {pipeline_mode = #tpu.pipeline_mode<synchronous>, transform_indices = @transform_2, window_bounds = array<i64: 1, 256>}]} {
    %c0_i32 = arith.constant 0 : i32
    %0 = arith.cmpi eq, %arg0, %c0_i32 : i32
    %1 = arith.extui %0 : i1 to i32
    %c0_i32_0 = arith.constant 0 : i32
    %2 = arith.cmpi ne, %1, %c0_i32_0 : i32
    scf.if %2 {
      %cst_8 = arith.constant 0.000000e+00 : f32
      %14 = vector.broadcast %cst_8 : f32 to vector<1x256xf32>
      %c0_9 = arith.constant 0 : index
      %c0_10 = arith.constant 0 : index
      %15 = vector.load %arg3[%c0_9, %c0_10] : memref<1x256xf32, #tpu.memory_space<vmem>>, vector<1x256xf32>
      tpu.vector_store %arg3[%c0_9, %c0_10], %14 {strides = array<i32>} : memref<1x256xf32, #tpu.memory_space<vmem>>, vector<1x256xf32>,
    } else {
    }
    %c0 = arith.constant 0 : index
    %c0_1 = arith.constant 0 : index
    %3 = vector.load %arg1[%c0, %c0_1] : memref<32x256xbf16, #tpu.memory_space<vmem>>, vector<32x256xbf16>
    %4 = arith.extf %3 : vector<32x256xbf16> to vector<32x256xf32>
    %c0_2 = arith.constant 0 : index
    %c0_3 = arith.constant 0 : index
    %5 = vector.load %arg2[%c0_2, %c0_3] : memref<32x256xbf16, #tpu.memory_space<vmem>>, vector<32x256xbf16>
    %6 = arith.extf %5 : vector<32x256xbf16> to vector<32x256xf32>
    %7 = arith.subf %4, %6 : vector<32x256xf32>
    %8 = math.absf %7 : vector<32x256xf32>
    %c0_4 = arith.constant 0 : index
    %c0_5 = arith.constant 0 : index
    %9 = vector.load %arg3[%c0_4, %c0_5] : memref<1x256xf32, #tpu.memory_space<vmem>>, vector<1x256xf32>
    %cst = arith.constant dense<0.000000e+00> : vector<256xf32>
    %10 = vector.multi_reduction <add>, %8, %cst [0] : vector<32x256xf32> to vector<256xf32>
    %11 = vector.shape_cast %10 : vector<256xf32> to vector<1x256xf32>
    %12 = arith.addf %9, %11 : vector<1x256xf32>
    %c0_6 = arith.constant 0 : index
    %c0_7 = arith.constant 0 : index
    %13 = vector.load %arg3[%c0_6, %c0_7] : memref<1x256xf32, #tpu.memory_space<vmem>>, vector<1x256xf32>
    tpu.vector_store %arg3[%c0_6, %c0_7], %12 {strides = array<i32>} : memref<1x256xf32, #tpu.memory_space<vmem>>, vector<1x256xf32>,
    return
  }
  func.func @transform_0(%arg0: i32) -> (i32, i32) {
    %c0_i32 = arith.constant 0 : i32
    %c0_i32_0 = arith.constant 0 : i32
    return %arg0, %c0_i32 : i32, i32
  }
  func.func @transform_1(%arg0: i32) -> (i32, i32) {
    %c0_i32 = arith.constant 0 : i32
    %c0_i32_0 = arith.constant 0 : i32
    return %arg0, %c0_i32 : i32, i32
  }
  func.func @transform_2(%arg0: i32) -> (i32, i32) {
    %c0_i32 = arith.constant 0 : i32
    %c0_i32_0 = arith.constant 0 : i32
    %c0_i32_1 = arith.constant 0 : i32
    return %c0_i32, %c0_i32_0 : i32, i32
  }
}

</mosaic_0001>

<bundles_post_ra>
// kernel: vgg_l1_loss.19
= control target key start
LH: loop header
LB: loop body
LE: loop exit
PB: predicated region body
PF: predicated region fallthrough
CT: control target
= control target key end

     0   :  { %s1114_s12 = smov 0   ;;  %s1116_s13 = smov 0   ;;  %s1297_s0 = inlined_call_operand.vmem [shape: bf16[2,16,16,27], index: 0, kind: input, shape index: {}]   ;;  %s1298_s1 = inlined_call_operand.vmem [shape: bf16[27,64], index: 1, kind: input, shape index: {}]   ;;  %s1299_s2 = inlined_call_operand.vmem [shape: f32[1,64], index: 2, kind: input, shape index: {}]   ;;  %s1300_s3 = inlined_call_operand.vmem [shape: bf16[2,16,16,64], index: 3, kind: output, shape index: {}]  }
   0x1   :  { %s1118_s14 = smov 0  }
   0x2 LB: > { %s25_s15 = sadd.s32 1, %s1087_s13  ;;  %p860_p0 = scmp.ge.s32.totalorder %s1091_s14, 1  ;;  %s1091_s14 = sphi %s1118_s14, %s13_s14   ;;  %s1087_s13 = sphi %s1116_s13, %s1302_s13   ;;  %s1083_s12 = sphi %s1114_s12, %s1301_s12  }
   0x3   : > { %p27_p1 = scmp.ge.s32.totalorder %s25_s15, 2  ;;  %p159_p2 = scmp.lt.s32.totalorder %s1091_s14, 3 }
   0x5   : > { %s1304_s15 = smov (%p27_p1, %s25_s15), 0  ;;  %p160_p3 = pnand %p860_p0, %p159_p2 }
   0x6   : > { %v1051_v0 = vld [vmem:[%s1298_s1] sm:$0xff] (!%p160_p3)   ;;  %vm399_vm0 = vcmask (!%p160_p3), 1044480   ;;  %v1052_v1 = vld [vmem:[%s1298_s1 + $0x8] sm:$0x3f] (!%p160_p3)   ;;  %vm400_vm1 = vcmask (!%p160_p3), 1045504   ;;  %p194_p4 = scmp.lt.s32.totalorder (!%p160_p3), %s1083_s12, 1 }
   0x7   : > { %163 = sbr.rel (%p160_p3) target bundleno = 266 (0x10a), region = 32  ;;  %986 = vmatprep.subr.bf16.mxu0 (!%p160_p3), %v1051_v0  ;;  %1022 = vmatprep.subr.bf16.mxu1 (!%p160_p3), %v1051_v0  ;;  %v1093_v2 = vmov (!%p160_p3), 65535   ;;  %vm350_vm2 = vcmask (!%p160_p3), 220160   ;;  %v1183_v22 = vld [vmem:[%s1299_s2] ss:$0 sm:$0xff] (!%p160_p3)  ;;  %vm727_vm3 = vcmask (!%p160_p3), 519168  }
   0x8   : > { %987 = vmatpush3.bf16.msra.mxu0 (!%p160_p3), %v1051_v0  ;;  %1024 = vmatpush3.bf16.msra.mxu1 (!%p160_p3), %v1051_v0  ;;  %v401_v3 = vsel (!%p160_p3), %vm399_vm0, 4294967295, %v1093_v2 }
   0x9   : > { %v402_v4 = vsel (!%p160_p3), %vm400_vm1, %v401_v3, 0 }
   0xa   : > { %v404_v5 = vand.u32 (!%p160_p3), %v1052_v1, %v402_v4 }
   0xc   : > { %988 = vmatprep.subr.bf16.mxu0 (!%p160_p3), %v404_v5  ;;  %1023 = vmatprep.subr.bf16.mxu1 (!%p160_p3), %v404_v5 }
   0xd   : > { %989 = vmatpush3.bf16.msra.mxu0 (!%p160_p3), %v404_v5  ;;  %1025 = vmatpush3.bf16.msra.mxu1 (!%p160_p3), %v404_v5 }
   0xe   : > { %s1306_s12 = smov (!%p194_p4, %s1083_s12), 1 }
   0xf   : > { %s934_s20 = sshll.u32 %s1306_s12, 7 }
  0x10   : > { %s1146_s23 = scalar_lea.vmem %s1297_s0, %s934_s20  ;;  %s1195_s28 = scalar_lea.vmem %s1300_s3, %s934_s20 }
  0x11   : > { %v1053_v6 = vld [vmem:[%s1146_s23] sm:$0xff]   ;;  %v1055_v8 = vld [vmem:[%s1146_s23 + $0x8] sm:$0xff]   ;;  %v1057_v10 = vld [vmem:[%s1146_s23 + $0x10] sm:$0xff]  }
  0x12   : > { %v1054_v7 = vld [vmem:[%s1146_s23 + $0x40] sm:$0xff]   ;;  %990 = vmatprep.mubr.msk.bf16.mxu0 %vm350_vm2, %v1053_v6  ;;  %v1056_v9 = vld [vmem:[%s1146_s23 + $0x48] sm:$0xff]   ;;  %v1058_v11 = vld [vmem:[%s1146_s23 + $0x50] sm:$0xff]  }
  0x13   : > { %1006 = vmatprep.mubr.msk.bf16.mxu1 %vm350_vm2, %v1054_v7  ;;  %991 = vmatmul.mubr.msk.bf16.vlgmr.msra.gmra.mrb[0].mxu0 %vm350_vm2, %v1055_v8  ;;  %v1059_v12 = vld [vmem:[%s1146_s23 + $0x18] sm:$0xff]   ;;  %v1061_v14 = vld [vmem:[%s1146_s23 + $0x20] sm:$0xff]   ;;  %v1063_v16 = vld [vmem:[%s1146_s23 + $0x28] sm:$0xff]  }
  0x14   : > { %1007 = vmatmul.mubr.msk.bf16.vlgmr.msra.gmra.mrb[0].mxu1 %vm350_vm2, %v1056_v9  ;;  %994 = vmatprep.mubr.msk.bf16.mxu0 %vm350_vm2, %v1057_v10  ;;  %v1060_v13 = vld [vmem:[%s1146_s23 + $0x58] sm:$0xff]   ;;  %v1062_v15 = vld [vmem:[%s1146_s23 + $0x60] sm:$0xff]   ;;  %v1064_v17 = vld [vmem:[%s1146_s23 + $0x68] sm:$0xff]  }
  0x15   : > { %1010 = vmatprep.mubr.msk.bf16.mxu1 %vm350_vm2, %v1058_v11  ;;  %v1065_v18 = vld [vmem:[%s1146_s23 + $0x30] sm:$0xff]   ;;  %v1067_v20 = vld [vmem:[%s1146_s23 + $0x38] sm:$0xff]  }
  0x16   : > { %v1066_v19 = vld [vmem:[%s1146_s23 + $0x70] sm:$0xff]   ;;  %v1068_v21 = vld [vmem:[%s1146_s23 + $0x78] sm:$0xff]  }
  0x1b   : > { %995 = vmatmul.mubr.msk.bf16.gmra.mrb[4].mxu0 %vm350_vm2, %v1059_v12 }
  0x1c   : > { %1011 = vmatmul.mubr.msk.bf16.gmra.mrb[4].mxu1 %vm350_vm2, %v1060_v13  ;;  %998 = vmatprep.mubr.msk.bf16.mxu0 %vm350_vm2, %v1061_v14 }
  0x1d   : > { %1014 = vmatprep.mubr.msk.bf16.mxu1 %vm350_vm2, %v1062_v15 }
  0x23   : > { %999 = vmatmul.mubr.msk.bf16.gmra.mrb[8].mxu0 %vm350_vm2, %v1063_v16 }
  0x24   : > { %1015 = vmatmul.mubr.msk.bf16.gmra.mrb[8].mxu1 %vm350_vm2, %v1064_v17  ;;  %1002 = vmatprep.mubr.msk.bf16.mxu0 %vm350_vm2, %v1065_v18 }
  0x25   : > { %1018 = vmatprep.mubr.msk.bf16.mxu1 %vm350_vm2, %v1066_v19 }
  0x2b   : > { %1003 = vmatmul.mubr.msk.bf16.gmra.mrb[12].mxu0 %vm350_vm2, %v1067_v20 }
  0x2c   : > { %1019 = vmatmul.mubr.msk.bf16.gmra.mrb[12].mxu1 %vm350_vm2, %v1068_v21 }
  0xe6   : > { %v992_v23 = vpop.f32.mrb[0].mxu0 }
  0xe7   : > { %v449_v24 = vadd.f32 %v992_v23, %v1183_v22  ;;  %v1008_v25 = vpop.f32.mrb[0].mxu1  ;;  %v440_v26 = vpop.f32.mrb[1].mxu0 }
  0xe8   : > { %v513_v27 = vadd.f32 %v1008_v25, %v1183_v22  ;;  %v441_v28 = vadd.f32 %v1183_v22, %v440_v26  ;;  %v504_v29 = vpop.f32.mrb[1].mxu1  ;;  %v993_v30 = vpop.f32.mrb[2].mxu0 }
  0xe9   : > { %v569_v31 = vmax.f32 %v449_v24, 0.0  ;;  %v505_v32 = vadd.f32 %v1183_v22, %v504_v29  ;;  %v452_v33 = vadd.f32 %v993_v30, %v1183_v22  ;;  %v1009_v34 = vpop.f32.mrb[2].mxu1  ;;  %v443_v35 = vpop.f32.mrb[3].mxu0 }
  0xea   : > { %v585_v36 = vmax.f32 %v513_v27, 0.0  ;;  %v567_v37 = vmax.f32 %v441_v28, 0.0  ;;  %v516_v38 = vadd.f32 %v1009_v34, %v1183_v22  ;;  %v444_v39 = vadd.f32 %v1183_v22, %v443_v35  ;;  %v507_v40 = vpop.f32.mrb[3].mxu1 }
  0xeb   : > { %v938_v41 = vpack.c.bf16 %v569_v31, %v569_v31  ;;  %v583_v42 = vmax.f32 %v505_v32, 0.0  ;;  %v570_v43 = vmax.f32 %v452_v33, 0.0  ;;  %v508_v44 = vadd.f32 %v1183_v22, %v507_v40 }
  0xec   : > { %v954_v45 = vpack.c.bf16 %v585_v36, %v585_v36  ;;  %v936_v46 = vpack.c.bf16 %v567_v37, %v567_v37  ;;  %v586_v47 = vmax.f32 %v516_v38, 0.0  ;;  %v568_v48 = vmax.f32 %v444_v39, 0.0 }
  0xed   : > { %730 = vst.msk [vmem:[%s1195_s28 + $0x8] sm:$0xf] %vm727_vm3, %v938_v41  ;;  %v952_v49 = vpack.c.bf16 %v583_v42, %v583_v42  ;;  %v939_v50 = vpack.c.bf16 %v570_v43, %v570_v43  ;;  %v584_v51 = vmax.f32 %v508_v44, 0.0 }
  0xee   : > { %746 = vst.msk [vmem:[%s1195_s28 + $0x48] sm:$0xf] %vm727_vm3, %v954_v45  ;;  %728 = vst.msk [vmem:[%s1195_s28] sm:$0xf] %vm727_vm3, %v936_v46  ;;  %v955_v52 = vpack.c.bf16 %v586_v47, %v586_v47  ;;  %v937_v53 = vpack.c.bf16 %v568_v48, %v568_v48  ;;  %v996_v54 = vpop.f32.mrb[4].mxu0 }
  0xef   : > { %744 = vst.msk [vmem:[%s1195_s28 + $0x40] sm:$0xf] %vm727_vm3, %v952_v49  ;;  %731 = vst.msk [vmem:[%s1195_s28 + $0xc] sm:$0xf] %vm727_vm3, %v939_v50  ;;  %v953_v55 = vpack.c.bf16 %v584_v51, %v584_v51  ;;  %v465_v56 = vadd.f32 %v996_v54, %v1183_v22  ;;  %v1012_v57 = vpop.f32.mrb[4].mxu1  ;;  %v456_v58 = vpop.f32.mrb[5].mxu0 }
  0xf0   : > { %747 = vst.msk [vmem:[%s1195_s28 + $0x4c] sm:$0xf] %vm727_vm3, %v955_v52  ;;  %729 = vst.msk [vmem:[%s1195_s28 + $0x4] sm:$0xf] %vm727_vm3, %v937_v53  ;;  %v529_v59 = vadd.f32 %v1012_v57, %v1183_v22  ;;  %v457_v60 = vadd.f32 %v1183_v22, %v456_v58  ;;  %v520_v61 = vpop.f32.mrb[5].mxu1  ;;  %v997_v62 = vpop.f32.mrb[6].mxu0 }
  0xf1   : > { %745 = vst.msk [vmem:[%s1195_s28 + $0x44] sm:$0xf] %vm727_vm3, %v953_v55  ;;  %v573_v63 = vmax.f32 %v465_v56, 0.0  ;;  %v521_v0 = vadd.f32 %v1183_v22, %v520_v61  ;;  %v468_v1 = vadd.f32 %v997_v62, %v1183_v22  ;;  %v1013_v2 = vpop.f32.mrb[6].mxu1  ;;  %v459_v3 = vpop.f32.mrb[7].mxu0 }
  0xf2   : > { %v589_v4 = vmax.f32 %v529_v59, 0.0  ;;  %v571_v5 = vmax.f32 %v457_v60, 0.0  ;;  %v532_v6 = vadd.f32 %v1013_v2, %v1183_v22  ;;  %v460_v7 = vadd.f32 %v1183_v22, %v459_v3  ;;  %v523_v8 = vpop.f32.mrb[7].mxu1 }
  0xf3   : > { %v942_v9 = vpack.c.bf16 %v573_v63, %v573_v63  ;;  %v587_v10 = vmax.f32 %v521_v0, 0.0  ;;  %v574_v11 = vmax.f32 %v468_v1, 0.0  ;;  %v524_v12 = vadd.f32 %v1183_v22, %v523_v8 }
  0xf4   : > { %v958_v13 = vpack.c.bf16 %v589_v4, %v589_v4  ;;  %v940_v14 = vpack.c.bf16 %v571_v5, %v571_v5  ;;  %v590_v15 = vmax.f32 %v532_v6, 0.0  ;;  %v572_v16 = vmax.f32 %v460_v7, 0.0 }
  0xf5   : > { %734 = vst.msk [vmem:[%s1195_s28 + $0x18] sm:$0xf] %vm727_vm3, %v942_v9  ;;  %v956_v17 = vpack.c.bf16 %v587_v10, %v587_v10  ;;  %v943_v18 = vpack.c.bf16 %v574_v11, %v574_v11  ;;  %v588_v19 = vmax.f32 %v524_v12, 0.0 }
  0xf6   : > { %750 = vst.msk [vmem:[%s1195_s28 + $0x58] sm:$0xf] %vm727_vm3, %v958_v13  ;;  %732 = vst.msk [vmem:[%s1195_s28 + $0x10] sm:$0xf] %vm727_vm3, %v940_v14  ;;  %v959_v20 = vpack.c.bf16 %v590_v15, %v590_v15  ;;  %v941_v21 = vpack.c.bf16 %v572_v16, %v572_v16  ;;  %v1000_v23 = vpop.f32.mrb[8].mxu0 }
  0xf7   : > { %748 = vst.msk [vmem:[%s1195_s28 + $0x50] sm:$0xf] %vm727_vm3, %v956_v17  ;;  %735 = vst.msk [vmem:[%s1195_s28 + $0x1c] sm:$0xf] %vm727_vm3, %v943_v18  ;;  %v957_v24 = vpack.c.bf16 %v588_v19, %v588_v19  ;;  %v481_v25 = vadd.f32 %v1000_v23, %v1183_v22  ;;  %v1016_v26 = vpop.f32.mrb[8].mxu1  ;;  %v472_v27 = vpop.f32.mrb[9].mxu0 }
  0xf8   : > { %751 = vst.msk [vmem:[%s1195_s28 + $0x5c] sm:$0xf] %vm727_vm3, %v959_v20  ;;  %733 = vst.msk [vmem:[%s1195_s28 + $0x14] sm:$0xf] %vm727_vm3, %v941_v21  ;;  %v545_v28 = vadd.f32 %v1016_v26, %v1183_v22  ;;  %v473_v29 = vadd.f32 %v1183_v22, %v472_v27  ;;  %v536_v30 = vpop.f32.mrb[9].mxu1  ;;  %v1001_v31 = vpop.f32.mrb[10].mxu0 }
  0xf9   : > { %749 = vst.msk [vmem:[%s1195_s28 + $0x54] sm:$0xf] %vm727_vm3, %v957_v24  ;;  %v577_v32 = vmax.f32 %v481_v25, 0.0  ;;  %v537_v33 = vadd.f32 %v1183_v22, %v536_v30  ;;  %v484_v34 = vadd.f32 %v1001_v31, %v1183_v22  ;;  %v1017_v35 = vpop.f32.mrb[10].mxu1  ;;  %v475_v36 = vpop.f32.mrb[11].mxu0 }
  0xfa   : > { %v593_v37 = vmax.f32 %v545_v28, 0.0  ;;  %v575_v38 = vmax.f32 %v473_v29, 0.0  ;;  %v548_v39 = vadd.f32 %v1017_v35, %v1183_v22  ;;  %v476_v40 = vadd.f32 %v1183_v22, %v475_v36  ;;  %v539_v41 = vpop.f32.mrb[11].mxu1 }
  0xfb   : > { %v946_v42 = vpack.c.bf16 %v577_v32, %v577_v32  ;;  %v591_v43 = vmax.f32 %v537_v33, 0.0  ;;  %v578_v44 = vmax.f32 %v484_v34, 0.0  ;;  %v540_v45 = vadd.f32 %v1183_v22, %v539_v41 }
  0xfc   : > { %v962_v46 = vpack.c.bf16 %v593_v37, %v593_v37  ;;  %v944_v47 = vpack.c.bf16 %v575_v38, %v575_v38  ;;  %v594_v48 = vmax.f32 %v548_v39, 0.0  ;;  %v576_v49 = vmax.f32 %v476_v40, 0.0 }
  0xfd   : > { %738 = vst.msk [vmem:[%s1195_s28 + $0x28] sm:$0xf] %vm727_vm3, %v946_v42  ;;  %v960_v50 = vpack.c.bf16 %v591_v43, %v591_v43  ;;  %v947_v51 = vpack.c.bf16 %v578_v44, %v578_v44  ;;  %v592_v52 = vmax.f32 %v540_v45, 0.0 }
  0xfe   : > { %754 = vst.msk [vmem:[%s1195_s28 + $0x68] sm:$0xf] %vm727_vm3, %v962_v46  ;;  %736 = vst.msk [vmem:[%s1195_s28 + $0x20] sm:$0xf] %vm727_vm3, %v944_v47  ;;  %v963_v53 = vpack.c.bf16 %v594_v48, %v594_v48  ;;  %v945_v54 = vpack.c.bf16 %v576_v49, %v576_v49  ;;  %v1004_v55 = vpop.f32.mrb[12].mxu0 }
  0xff   : > { %752 = vst.msk [vmem:[%s1195_s28 + $0x60] sm:$0xf] %vm727_vm3, %v960_v50  ;;  %739 = vst.msk [vmem:[%s1195_s28 + $0x2c] sm:$0xf] %vm727_vm3, %v947_v51  ;;  %v961_v56 = vpack.c.bf16 %v592_v52, %v592_v52  ;;  %v497_v57 = vadd.f32 %v1004_v55, %v1183_v22  ;;  %v1020_v58 = vpop.f32.mrb[12].mxu1  ;;  %v488_v59 = vpop.f32.mrb[13].mxu0 }
 0x100   : > { %755 = vst.msk [vmem:[%s1195_s28 + $0x6c] sm:$0xf] %vm727_vm3, %v963_v53  ;;  %737 = vst.msk [vmem:[%s1195_s28 + $0x24] sm:$0xf] %vm727_vm3, %v945_v54  ;;  %v561_v60 = vadd.f32 %v1020_v58, %v1183_v22  ;;  %v489_v61 = vadd.f32 %v1183_v22, %v488_v59  ;;  %v552_v62 = vpop.f32.mrb[13].mxu1  ;;  %v1005_v63 = vpop.f32.mrb[14].mxu0 }
 0x101   : > { %753 = vst.msk [vmem:[%s1195_s28 + $0x64] sm:$0xf] %vm727_vm3, %v961_v56  ;;  %v581_v0 = vmax.f32 %v497_v57, 0.0  ;;  %v553_v1 = vadd.f32 %v1183_v22, %v552_v62  ;;  %v500_v2 = vadd.f32 %v1005_v63, %v1183_v22  ;;  %v1021_v3 = vpop.f32.mrb[14].mxu1  ;;  %v491_v4 = vpop.f32.mrb[15].mxu0 }
 0x102   : > { %v597_v5 = vmax.f32 %v561_v60, 0.0  ;;  %v579_v6 = vmax.f32 %v489_v61, 0.0  ;;  %v564_v7 = vadd.f32 %v1021_v3, %v1183_v22  ;;  %v492_v8 = vadd.f32 %v1183_v22, %v491_v4  ;;  %v555_v9 = vpop.f32.mrb[15].mxu1 }
 0x103   : > { %v950_v10 = vpack.c.bf16 %v581_v0, %v581_v0  ;;  %v595_v11 = vmax.f32 %v553_v1, 0.0  ;;  %v582_v12 = vmax.f32 %v500_v2, 0.0  ;;  %v556_v13 = vadd.f32 %v1183_v22, %v555_v9 }
 0x104   : > { %v966_v14 = vpack.c.bf16 %v597_v5, %v597_v5  ;;  %v948_v15 = vpack.c.bf16 %v579_v6, %v579_v6  ;;  %v598_v16 = vmax.f32 %v564_v7, 0.0  ;;  %v580_v17 = vmax.f32 %v492_v8, 0.0 }
 0x105   : > { %742 = vst.msk [vmem:[%s1195_s28 + $0x38] sm:$0xf] %vm727_vm3, %v950_v10  ;;  %v964_v18 = vpack.c.bf16 %v595_v11, %v595_v11  ;;  %v951_v19 = vpack.c.bf16 %v582_v12, %v582_v12  ;;  %v596_v20 = vmax.f32 %v556_v13, 0.0 }
 0x106   : > { %758 = vst.msk [vmem:[%s1195_s28 + $0x78] sm:$0xf] %vm727_vm3, %v966_v14  ;;  %740 = vst.msk [vmem:[%s1195_s28 + $0x30] sm:$0xf] %vm727_vm3, %v948_v15  ;;  %v967_v21 = vpack.c.bf16 %v598_v16, %v598_v16  ;;  %v949_v23 = vpack.c.bf16 %v580_v17, %v580_v17 }
 0x107   : > { %756 = vst.msk [vmem:[%s1195_s28 + $0x70] sm:$0xf] %vm727_vm3, %v964_v18  ;;  %743 = vst.msk [vmem:[%s1195_s28 + $0x3c] sm:$0xf] %vm727_vm3, %v951_v19  ;;  %v965_v22 = vpack.c.bf16 %v596_v20, %v596_v20 }
 0x108   : > { %759 = vst.msk [vmem:[%s1195_s28 + $0x7c] sm:$0xf] %vm727_vm3, %v967_v21  ;;  %741 = vst.msk [vmem:[%s1195_s28 + $0x34] sm:$0xf] %vm727_vm3, %v949_v23 }
 0x109   : > { %757 = vst.msk [vmem:[%s1195_s28 + $0x74] sm:$0xf] %vm727_vm3, %v965_v22 }
 0x10a PF: > { %s13_s14 = sadd.s32 1, %s1091_s14   ;;  %s1301_s12 = smov %s1087_s13 }
 0x10b   : > { %p10_p5 = scmp.ge.s32.totalorder %s13_s14, 4   ;;  %s1302_s13 = smov %s1304_s15 }
 0x10d   :  { %12 = sbr.rel (!%p10_p5) target bundleno = 2 (0x2), region = 62 }

// kernel: vgg_l1_loss.21
= control target key start
LH: loop header
LB: loop body
LE: loop exit
PB: predicated region body
PF: predicated region fallthrough
CT: control target
= control target key end

     0   :  { %s2076_s15 = smov 0   ;;  %s2078_s16 = smov 0   ;;  %s2721_s0 = inlined_call_operand.vmem [shape: bf16[2,16,10,64], index: 0, kind: input, shape index: {}, may-alias: {0,1}]   ;;  %s2722_s1 = inlined_call_operand.vmem [shape: bf16[2,16,10,64], index: 1, kind: input, shape index: {}, may-alias: {0,1}]   ;;  %s2723_s2 = inlined_call_operand.vmem [shape: bf16[3,192,128], index: 2, kind: input, shape index: {}]   ;;  %s2724_s3 = inlined_call_operand.vmem [shape: f32[1,128], index: 3, kind: input, shape index: {}]   ;;  %s2725_s4 = inlined_call_operand.vmem [shape: bf16[2,8,8,128], index: 4, kind: output, shape index: {}]  }
   0x1   :  { %s2080_s17 = smov 0  }
   0x2 LB: > { %s26_s18 = sadd.s32 1, %s2043_s16  ;;  %p1707_p0 = scmp.ge.s32.totalorder %s2047_s17, 1  ;;  %s2047_s17 = sphi %s2080_s17, %s14_s17   ;;  %s2043_s16 = sphi %s2078_s16, %s2787_s16   ;;  %s2039_s15 = sphi %s2076_s15, %s2786_s15  }
   0x3   : > { %p28_p1 = scmp.ge.s32.totalorder %s26_s18, 2  ;;  %p210_p2 = scmp.lt.s32.totalorder %s2047_s17, 3 }
   0x5   : > { %s2789_s18 = smov (%p28_p1, %s26_s18), 0  ;;  %p211_p3 = pnand %p1707_p0, %p210_p2 }
   0x7   : > { %214 = sbr.rel (%p211_p3) target bundleno = 443 (0x1bb), region = 36 }
   0xe   : > { %p258_p4 = scmp.lt.s32.totalorder %s2039_s15, 1  ;;  %vm310_vm0 = vcmask 519168   ;;  %v1987_v0 = vld [vmem:[%s2723_s2 + $0x60] sm:$0xff]   ;;  %v2729_v1 = vmov 0   ;;  %vm312_vm1 = vcmask 516096   ;;  %v1989_v3 = vld [vmem:[%s2723_s2 + $0x68] sm:$0xff]  }
   0xf   : > { %916 = vmatprep.subr.bf16.mxu0 %v2729_v1  ;;  %1077 = vmatprep.subr.bf16.mxu1 %v2729_v1  ;;  %v1988_v2 = vld [vmem:[%s2723_s2] sm:$0xff]   ;;  %v1990_v4 = vld [vmem:[%s2723_s2 + $0x8] sm:$0xff]   ;;  %v1991_v5 = vld [vmem:[%s2723_s2 + $0x70] sm:$0xff]   ;;  %s2050_s21 = smov 64   ;;  %vm505_vm2 = vcmask 523264  }
  0x10   : > { %s2791_s15 = smov (!%p258_p4, %s2039_s15), 1  ;;  %917 = vmatpush1.bf16.msra.mxu0 %v1987_v0  ;;  %1078 = vmatpush1.bf16.msra.mxu1 %v1988_v2  ;;  %v1992_v26 = vld [vmem:[%s2723_s2 + $0x10] sm:$0xff]   ;;  %v1993_v54 = vld [vmem:[%s2723_s2 + $0x78] sm:$0xff]  }
  0x11   : > { %918 = vmatprep.subr.bf16.mxu0 %v2729_v1  ;;  %s1885_s25 = sshll.u32 %s2791_s15, 7  ;;  %1079 = vmatprep.subr.bf16.mxu1 %v2729_v1  ;;  %v1994_v2 = vld [vmem:[%s2723_s2 + $0x18] sm:$0xff]  }
  0x12   : > { %s2115_s30 = scalar_lea.vmem %s2721_s0, %s1885_s25  ;;  %s1887_s5 = sadd.s32 64, %s1885_s25 }
  0x13   : > { %v296_v6 = vld [vmem:[%s2115_s30 + $0x8] sm:$0xf]  ;;  %v297_v7 = vld [vmem:[%s2115_s30 + $0xc] sm:$0x1]  ;;  %v294_v8 = vld [vmem:[%s2115_s30] sm:$0xf]  ;;  %s279_s10 = scalar_lea.vmem %s2722_s1, %s1887_s5 }
  0x14   : > { %919 = vmatpush1.bf16.msra.mxu0 %v1989_v3  ;;  %314 = vst.msk [vmem:[#allocation2 + $0x8] sm:$0xf] %vm310_vm0, %v296_v6  ;;  %v295_v9 = vld [vmem:[%s2115_s30 + $0x4] sm:$0x1]  ;;  %311 = vst.msk [vmem:[#allocation2] sm:$0xf] %vm310_vm0, %v294_v8  ;;  %1080 = vmatpush1.bf16.msra.mxu1 %v1990_v4 }
  0x15   : > { %315 = vst.msk [vmem:[#allocation2 + $0xc] sm:$0x1] %vm312_vm1, %v297_v7  ;;  %v298_v10 = vld [vmem:[%s2115_s30 + $0x10] sm:$0xf]  ;;  %v299_v11 = vld [vmem:[%s2115_s30 + $0x14] sm:$0x1]  ;;  %920 = vmatprep.subr.bf16.mxu0 %v2729_v1  ;;  %1081 = vmatprep.subr.bf16.mxu1 %v2729_v1 }
  0x16   : > { %313 = vst.msk [vmem:[#allocation2 + $0x4] sm:$0x1] %vm312_vm1, %v295_v9  ;;  %317 = vst.msk [vmem:[#allocation2 + $0x14] sm:$0x1] %vm312_vm1, %v299_v11  ;;  %v300_v12 = vld [vmem:[%s2115_s30 + $0x18] sm:$0xf] }
  0x17   : > { %316 = vst.msk [vmem:[#allocation2 + $0x10] sm:$0xf] %vm310_vm0, %v298_v10  ;;  %v301_v13 = vld [vmem:[%s2115_s30 + $0x1c] sm:$0x1]  ;;  %v302_v14 = vld [vmem:[%s2115_s30 + $0x20] sm:$0xf] }
  0x18   : > { %318 = vst.msk [vmem:[#allocation2 + $0x18] sm:$0xf] %vm310_vm0, %v300_v12  ;;  %v303_v15 = vld [vmem:[%s2115_s30 + $0x24] sm:$0x1]  ;;  %320 = vst.msk [vmem:[#allocation2 + $0x20] sm:$0xf] %vm310_vm0, %v302_v14  ;;  %921 = vmatpush1.bf16.msra.mxu0 %v1991_v5  ;;  %1082 = vmatpush1.bf16.msra.mxu1 %v1992_v26 }
  0x19   : > { %319 = vst.msk [vmem:[#allocation2 + $0x1c] sm:$0x1] %vm312_vm1, %v301_v13  ;;  %v304_v16 = vld [vmem:[%s2115_s30 + $0x28] sm:$0xf]  ;;  %v305_v17 = vld [vmem:[%s2115_s30 + $0x2c] sm:$0x1]  ;;  %922 = vmatprep.subr.bf16.mxu0 %v2729_v1  ;;  %1083 = vmatprep.subr.bf16.mxu1 %v2729_v1 }
  0x1a   : > { %321 = vst.msk [vmem:[#allocation2 + $0x24] sm:$0x1] %vm312_vm1, %v303_v15  ;;  %323 = vst.msk [vmem:[#allocation2 + $0x2c] sm:$0x1] %vm312_vm1, %v305_v17  ;;  %v306_v18 = vld [vmem:[%s2115_s30 + $0x30] sm:$0xf] }
  0x1b   : > { %322 = vst.msk [vmem:[#allocation2 + $0x28] sm:$0xf] %vm310_vm0, %v304_v16  ;;  %v307_v19 = vld [vmem:[%s2115_s30 + $0x34] sm:$0x1]  ;;  %v308_v20 = vld [vmem:[%s2115_s30 + $0x38] sm:$0xf] }
  0x1c   : > { %324 = vst.msk [vmem:[#allocation2 + $0x30] sm:$0xf] %vm310_vm0, %v306_v18  ;;  %v309_v21 = vld [vmem:[%s2115_s30 + $0x3c] sm:$0x1]  ;;  %326 = vst.msk [vmem:[#allocation2 + $0x38] sm:$0xf] %vm310_vm0, %v308_v20  ;;  %923 = vmatpush1.bf16.msra.mxu0 %v1993_v54  ;;  %1084 = vmatpush1.bf16.msra.mxu1 %v1994_v2 }
  0x1d   : > { %325 = vst.msk [vmem:[#allocation2 + $0x34] sm:$0x1] %vm312_vm1, %v307_v19  ;;  %v328_v22 = vld [vmem:[%s279_s10] sm:$0xf]  ;;  %v329_v23 = vld [vmem:[%s279_s10 + $0x4] sm:$0x1]  ;;  %924 = vmatprep.subr.bf16.mxu0 %v2729_v1  ;;  %1085 = vmatprep.subr.bf16.mxu1 %v2729_v1 }
  0x1e   : > { %327 = vst.msk [vmem:[#allocation2 + $0x3c] sm:$0x1] %vm312_vm1, %v309_v21  ;;  %334 = vst.msk [vmem:[#allocation2 + $0x44] sm:$0x1] %vm312_vm1, %v329_v23  ;;  %v330_v24 = vld [vmem:[%s279_s10 + $0x8] sm:$0xf] }
  0x1f   : > { %333 = vst.msk [vmem:[#allocation2 + $0x40] sm:$0xf] %vm310_vm0, %v328_v22  ;;  %v331_v25 = vld [vmem:[%s279_s10 + $0xc] sm:$0x1]  ;;  %335 = vst.msk [vmem:[#allocation2 + $0x48] sm:$0xf] %vm310_vm0, %v330_v24 }
  0x20   : > { %336 = vst.msk [vmem:[#allocation2 + $0x4c] sm:$0x1] %vm312_vm1, %v331_v25  ;;  %v2166_v27 = vld [vmem:[#allocation2 + $0x8] sm:$0xf]  ;;  %v2168_v28 = vld [vmem:[#allocation2 + $0xc] sm:$0x1] }
  0x21   : > { %v2170_v29 = vld [vmem:[#allocation2] sm:$0xf]  ;;  %v1730_v30 = vcombine.low %v2166_v27, %v2168_v28  ;;  %v2174_v31 = vld [vmem:[#allocation2 + $0x4] sm:$0x1]  ;;  %v2176_v32 = vld [vmem:[#allocation2 + $0x10] sm:$0xf] }
  0x22   : > { %v2178_v33 = vld [vmem:[#allocation2 + $0x14] sm:$0x1]  ;;  %v1714_v34 = vcombine.low %v2170_v29, %v2174_v31  ;;  %v2184_v36 = vld [vmem:[#allocation2 + $0x8] sm:$0xf]  ;;  %v2186_v37 = vld [vmem:[#allocation2 + $0xc] sm:$0x1] }
  0x23   : > { %v1731_v35 = vcombine.low %v2176_v32, %v2178_v33  ;;  %v2188_v38 = vld [vmem:[#allocation2 + $0x18] sm:$0xf]  ;;  %v644_v39 = vshrl.u32 %v1730_v30, 16  ;;  %v646_v40 = vshll.u32 %v1730_v30, 16  ;;  %v1715_v41 = vcombine.low %v2184_v36, %v2186_v37  ;;  %v2193_v42 = vld [vmem:[#allocation2 + $0x1c] sm:$0x1] }
  0x24   : > { %v2195_v43 = vld [vmem:[#allocation2 + $0x10] sm:$0xf]  ;;  %v402_v44 = vshrl.u32 %v1714_v34, 16  ;;  %v404_v45 = vshll.u32 %v1714_v34, 16  ;;  %v2197_v48 = vld [vmem:[#allocation2 + $0x14] sm:$0x1]  ;;  %v1717_v52 = vcombine.low %v2188_v38, %v2193_v42 }
  0x25   : > { %2746 = vst [vmem:[#allocation3_spill] sm:$0xff] %v2195_v43  ;;  %v651_v46 = vshrl.u32 %v1731_v35, 16  ;;  %v653_v47 = vshll.u32 %v1731_v35, 16  ;;  %v648_v49 = vrot.slane %v646_v40, 1  ;;  %v409_v50 = vshrl.u32 %v1715_v41, 16  ;;  %v1995_v14 = vld [vmem:[%s2723_s2 + $0x80] sm:$0xff]  }
  0x26   : > { %v411_v51 = vshll.u32 %v1715_v41, 16  ;;  %v2201_v53 = vld [vmem:[#allocation2 + $0x20] sm:$0xf]  ;;  %v406_v55 = vrot.slane %v404_v45, 1  ;;  %v1716_v57 = vcombine.low %v2195_v43, %v2197_v48  ;;  %v2208_v58 = vld [vmem:[#allocation2 + $0x24] sm:$0x1]  ;;  %925 = vmatpush1.bf16.msra.mxu0 %v1995_v14 }
  0x27   : > { %2747 = vst [vmem:[#allocation4_spill] sm:$0xff] %v2201_v53  ;;  %v655_v56 = vrot.slane %v653_v47, 1  ;;  %v2210_v59 = vld [vmem:[#allocation2 + $0x18] sm:$0xf]  ;;  %v649_v60 = vor.u32 %v648_v49, %v644_v39  ;;  %v423_v62 = vshrl.u32 %v1717_v52, 16  ;;  %v425_v63 = vshll.u32 %v1717_v52, 16  ;;  %926 = vmatprep.subr.bf16.mxu0 %v2729_v1 }
  0x28   : > { %2748 = vst [vmem:[#allocation5_spill] sm:$0xff] %v2210_v59  ;;  %v413_v61 = vrot.slane %v411_v51, 1  ;;  %v2212_v0 = vld [vmem:[#allocation2 + $0x1c] sm:$0x1]  ;;  %v407_v3 = vor.u32 %v406_v55, %v402_v44  ;;  %v416_v4 = vshrl.u32 %v1716_v57, 16  ;;  %v418_v5 = vshll.u32 %v1716_v57, 16 }
  0x29   : > { %v2217_v6 = vld [vmem:[#allocation2 + $0x28] sm:$0xf]  ;;  %v2219_v7 = vld [vmem:[#allocation2 + $0x2c] sm:$0x1]  ;;  %699 = vrot.lane.b32.xlu1 %v649_v60, %s2050_s21  ;;  %v656_v8 = vor.u32 %v655_v56, %v651_v46  ;;  %v427_v9 = vrot.slane %v425_v63, 1  ;;  %v1733_v10 = vcombine.low %v2201_v53, %v2208_v58  ;;  %v1732_v11 = vcombine.low %v2210_v59, %v2212_v0  ;;  %v1996_v21 = vld [vmem:[%s2723_s2 + $0x20] sm:$0xff]  }
  0x2a   : > { %2749 = vst [vmem:[#allocation6_spill] sm:$0xff] %v2217_v6  ;;  %v2227_v12 = vld [vmem:[#allocation2 + $0x20] sm:$0xf]  ;;  %v2229_v13 = vld [vmem:[#allocation2 + $0x24] sm:$0x1]  ;;  %457 = vrot.lane.b32.xlu0 %v407_v3, %s2050_s21  ;;  %v414_v15 = vor.u32 %v413_v61, %v409_v50  ;;  %v420_v16 = vrot.slane %v418_v5, 1  ;;  %v1719_v17 = vcombine.low %v2217_v6, %v2219_v7  ;;  %1086 = vmatpush1.bf16.msra.mxu1 %v1996_v21 }
  0x2b   : > { %2750 = vst [vmem:[#allocation7_spill] sm:$0xff] %v2227_v12  ;;  %v2239_v18 = vcombine.low %v2227_v12, %v2229_v13  ;;  %v2241_v19 = vld [vmem:[#allocation2 + $0x30] sm:$0xf]  ;;  %v2243_v20 = vld [vmem:[#allocation2 + $0x34] sm:$0x1]  ;;  %v667_v22 = vshll.u32 %v1733_v10, 16  ;;  %v428_v25 = vor.u32 %v427_v9, %v423_v62  ;;  %1087 = vmatprep.subr.bf16.mxu1 %v2729_v1 }
  0x2c   : > { %2751 = vst [vmem:[#allocation8_spill] sm:$0xff] %v2241_v19  ;;  %v2249_v23 = vld [vmem:[#allocation2 + $0x28] sm:$0xf]  ;;  %v660_v26 = vshll.u32 %v1732_v11, 16  ;;  %v439_v30 = vshll.u32 %v1719_v17, 16  ;;  %v665_v35 = vshrl.u32 %v1733_v10, 16  ;;  %v2260_v41 = vcombine.low %v2241_v19, %v2243_v20 }
  0x2d   : > { %2752 = vst [vmem:[#allocation9_spill] sm:$0xff] %v2249_v23  ;;  %v1997_v24 = vld [vmem:[%s2723_s2 + $0x88] sm:$0xff]   ;;  %701 = vrot.lane.b32.xlu1 %v656_v8, %s2050_s21  ;;  %v669_v39 = vrot.slane %v667_v22, 1  ;;  %v658_v40 = vshrl.u32 %v1732_v11, 16  ;;  %v2262_v44 = vld [vmem:[#allocation2 + $0x38] sm:$0xf]  ;;  %v421_v46 = vor.u32 %v420_v16, %v416_v4 }
  0x2e   : > { %v2254_v34 = vld [vmem:[#allocation2 + $0x2c] sm:$0x1]  ;;  %2753 = vst [vmem:[#allocation10_spill] sm:$0xff] %v2262_v44  ;;  %459 = vrot.lane.b32.xlu0 %v414_v15, %s2050_s21  ;;  %v662_v47 = vrot.slane %v660_v26, 1  ;;  %v432_v49 = vshll.u32 %v2239_v18, 16  ;;  %v437_v54 = vshrl.u32 %v1719_v17, 16  ;;  %927 = vmatpush1.bf16.msra.mxu0 %v1997_v24 }
  0x2f   : > { %v1998_v45 = vld [vmem:[%s2723_s2 + $0x28] sm:$0xff]   ;;  %v2271_v50 = vcombine.low %v2249_v23, %v2254_v34  ;;  %v2273_v51 = vld [vmem:[#allocation2 + $0x3c] sm:$0x1]  ;;  %v2275_v52 = vld [vmem:[#allocation2 + $0x30] sm:$0xf]  ;;  %v441_v55 = vrot.slane %v439_v30, 1  ;;  %928 = vmatprep.subr.bf16.mxu0 %v2729_v1  ;;  %v670_v2 = vor.u32 %v669_v39, %v665_v35 }
  0x30   : > { %2754 = vst [vmem:[#allocation11_spill] sm:$0xff] %v2275_v52  ;;  %v2278_v56 = vld [vmem:[#allocation2 + $0x34] sm:$0x1]  ;;  %v681_v60 = vshll.u32 %v2260_v41, 16  ;;  %v2285_v62 = vld [vmem:[#allocation2 + $0x40] sm:$0xf]  ;;  %v2293_v3 = vcombine.low %v2262_v44, %v2273_v51  ;;  %1088 = vmatpush1.bf16.msra.mxu1 %v1998_v45  ;;  %v663_v10 = vor.u32 %v662_v47, %v658_v40 }
  0x31   : > { %v1999_v57 = vld [vmem:[%s2723_s2 + $0x90] sm:$0xff]   ;;  %v674_v61 = vshll.u32 %v2271_v50, 16  ;;  %2755 = vst [vmem:[#allocation12_spill] sm:$0xff] %v2285_v62  ;;  %v2287_v63 = vld [vmem:[#allocation2 + $0x44] sm:$0x1]  ;;  %463 = vrot.lane.b32.xlu1 %v428_v25, %s2050_s21  ;;  %v2297_v4 = vcombine.low %v2275_v52, %v2278_v56  ;;  %v430_v11 = vshrl.u32 %v2239_v18, 16  ;;  %1089 = vmatprep.subr.bf16.mxu1 %v2729_v1  ;;  %v442_v21 = vor.u32 %v441_v55, %v437_v54 }
  0x32   : > { %v2299_v5 = vld [vmem:[#allocation2 + $0x38] sm:$0xf]  ;;  %v2301_v8 = vld [vmem:[#allocation2 + $0x3c] sm:$0x1]  ;;  %v2000_v9 = vld [vmem:[%s2723_s2 + $0x30] sm:$0xff]   ;;  %461 = vrot.lane.b32.xlu0 %v421_v46, %s2050_s21  ;;  %v434_v14 = vrot.slane %v432_v49, 1  ;;  %v2310_v15 = vcombine.low %v2285_v62, %v2287_v63  ;;  %929 = vmatpush1.bf16.msra.mxu0 %v1999_v57 }
  0x33   : > { %2756 = vst [vmem:[#allocation13_spill] sm:$0xff] %v2299_v5  ;;  %v2312_v16 = vld [vmem:[#allocation2 + $0x18] sm:$0xf]  ;;  %v2314_v17 = vld [vmem:[#allocation2 + $0x1c] sm:$0x1]  ;;  %v679_v22 = vshrl.u32 %v2260_v41, 16  ;;  %v2321_v25 = vcombine.low %v2299_v5, %v2301_v8  ;;  %930 = vmatprep.subr.bf16.mxu0 %v2729_v1 }
  0x34   : > { %2757 = vst [vmem:[#allocation14_spill] sm:$0xff] %v2312_v16  ;;  %v453_v24 = vshll.u32 %v2293_v3, 16  ;;  %v2323_v18 = vld [vmem:[#allocation2 + $0x10] sm:$0xf]  ;;  %v2001_v26 = vld [vmem:[%s2723_s2 + $0x98] sm:$0xff]   ;;  %v683_v30 = vrot.slane %v681_v60, 1  ;;  %v2339_v49 = vcombine.low %v2312_v16, %v2314_v17  ;;  %1090 = vmatpush1.bf16.msra.mxu1 %v2000_v9  ;;  %v435_v55 = vor.u32 %v434_v14, %v430_v11 }
  0x35   : > { %2758 = vst [vmem:[#allocation15_spill] sm:$0xff] %v2323_v18  ;;  %v672_v35 = vshrl.u32 %v2271_v50, 16  ;;  %v676_v39 = vrot.slane %v674_v61, 1  ;;  %v451_v40 = vshrl.u32 %v2293_v3, 16  ;;  %v2330_v41 = vld [vmem:[#allocation2 + $0x14] sm:$0x1]  ;;  %705 = vrot.lane.b32.xlu1 %v670_v2, %s2050_s21  ;;  %1091 = vmatprep.subr.bf16.mxu1 %v2729_v1 }
  0x36   : > { %v446_v46 = vshll.u32 %v2297_v4, 16  ;;  %v695_v47 = vshll.u32 %v2310_v15, 16  ;;  %v2002_v50 = vld [vmem:[%s2723_s2 + $0x38] sm:$0xff]   ;;  %v2003_v54 = vld [vmem:[%s2723_s2 + $0xa0] sm:$0xff]   ;;  %703 = vrot.lane.b32.xlu0 %v663_v10, %s2050_s21  ;;  %v2350_v57 = vcombine.low %v2323_v18, %v2330_v41  ;;  %v2356_v2 = vld [vmem:[#allocation2 + $0x30] sm:$0xf]  ;;  %931 = vmatpush1.bf16.msra.mxu0 %v2001_v26  ;;  %v684_v11 = vor.u32 %v683_v30, %v679_v22 }
  0x37   : > { %v2352_v60 = vld [vmem:[#allocation2 + $0x38] sm:$0xf]  ;;  %v2354_v61 = vld [vmem:[#allocation2 + $0x3c] sm:$0x1]  ;;  %2760 = vst [vmem:[#allocation17_spill] sm:$0xff] %v2356_v2  ;;  %v455_v3 = vrot.slane %v453_v24, 1  ;;  %v677_v9 = vor.u32 %v676_v39, %v672_v35 }
  0x38   : > { %2759 = vst [vmem:[#allocation16_spill] sm:$0xff] %v2352_v60  ;;  %v688_v45 = vshll.u32 %v2321_v25, 16  ;;  %v2361_v16 = vld [vmem:[#allocation2 + $0x34] sm:$0x1]  ;;  %v2004_v10 = vld [vmem:[%s2723_s2 + $0x40] sm:$0xff]   ;;  %v1217_v18 = vshll.u32 %v2339_v49, 16  ;;  %v2377_v62 = vcombine.low %v2352_v60, %v2354_v61  ;;  %1092 = vmatpush1.bf16.msra.mxu1 %v2002_v50 }
  0x39   : > { %v2368_v5 = vld [vmem:[#allocation2 + $0x28] sm:$0xf]  ;;  %v2370_v1 = vld [vmem:[#allocation2 + $0x2c] sm:$0x1]  ;;  %v2762_v24 = vmov 0   ;;  %467 = vrot.lane.b32.xlu1 %v442_v21, %s2050_s21  ;;  %v1210_v26 = vshll.u32 %v2350_v57, 16  ;;  %v2381_v22 = vcombine.low %v2356_v2, %v2361_v16  ;;  %v456_v50 = vor.u32 %v455_v3, %v451_v40 }
  0x3a   : > { %2761 = vst [vmem:[#allocation18_spill] sm:$0xff] %v2368_v5  ;;  %932 = vmatprep.subr.bf16.mxu0 %v2762_v24  ;;  %v2383_v30 = vld [vmem:[#allocation2 + $0x20] sm:$0xf]  ;;  %v2385_v14 = vld [vmem:[#allocation2 + $0x24] sm:$0x1]  ;;  %v2005_v21 = vld [vmem:[%s2723_s2 + $0xa8] sm:$0xff]   ;;  %465 = vrot.lane.b32.xlu0 %v435_v55, %s2050_s21  ;;  %v2393_v60 = vcombine.low %v2368_v5, %v2370_v1 }
  0x3b   : > { %2763 = vst [vmem:[#allocation19_spill] sm:$0xff] %v2383_v30  ;;  %v448_v35 = vrot.slane %v446_v46, 1  ;;  %v697_v39 = vrot.slane %v695_v47, 1  ;;  %v2397_v2 = vcombine.low %v2383_v30, %v2385_v14  ;;  %v2399_v52 = vld [vmem:[#allocation2 + $0x48] sm:$0xf]  ;;  %1093 = vmatprep.subr.bf16.mxu1 %v2762_v24  ;;  %v690_v23 = vrot.slane %v688_v45, 1  ;;  %933 = vmatpush1.bf16.msra.mxu0 %v2003_v54 }
  0x3c   : > { %2764 = vst [vmem:[#allocation20_spill] sm:$0xff] %v2399_v52  ;;  %v2401_v44 = vld [vmem:[#allocation2 + $0x4c] sm:$0x1]  ;;  %v1215_v55 = vshrl.u32 %v2339_v49, 16  ;;  %v1245_v46 = vshll.u32 %v2377_v62, 16  ;;  %v1219_v5 = vrot.slane %v1217_v18, 1  ;;  %934 = vmatprep.subr.bf16.mxu0 %v2762_v24  ;;  %1094 = vmatpush1.bf16.msra.mxu1 %v2004_v10 }
  0x3d   : > { %v2406_v47 = vld [vmem:[#allocation2 + $0x40] sm:$0xf]  ;;  %v2006_v30 = vld [vmem:[%s2723_s2 + $0x48] sm:$0xff]   ;;  %v1208_v19 = vshrl.u32 %v2350_v57, 16  ;;  %v1238_v12 = vshll.u32 %v2381_v22, 16  ;;  %v1231_v6 = vshll.u32 %v2393_v60, 16  ;;  %709 = vrot.lane.b32.xlu1 %v684_v11, %s2050_s21  ;;  %v2422_v18 = vcombine.low %v2399_v52, %v2401_v44  ;;  %1095 = vmatprep.subr.bf16.mxu1 %v2762_v24 }
  0x3e   : > { %v2414_v40 = vld [vmem:[#allocation2 + $0x44] sm:$0x1]  ;;  %v1212_v45 = vrot.slane %v1210_v26, 1  ;;  %v1243_v49 = vshrl.u32 %v2377_v62, 16  ;;  %v1224_v54 = vshll.u32 %v2397_v2, 16  ;;  %v2007_v57 = vld [vmem:[%s2723_s2 + $0xb0] sm:$0xff]   ;;  %707 = vrot.lane.b32.xlu0 %v677_v9, %s2050_s21 }
  0x3f   : > { %v2765_v3 = vshrl.u32 %v2297_v4, 16  ;;  %v1236_v11 = vshrl.u32 %v2381_v22, 16  ;;  %v1229_v62 = vshrl.u32 %v2393_v60, 16  ;;  %v2434_v26 = vcombine.low %v2406_v47, %v2414_v40  ;;  %935 = vmatpush1.bf16.msra.mxu0 %v2005_v21  ;;  %v2008_v4 = vld [vmem:[%s2723_s2 + $0x50] sm:$0xff]   ;;  %v2009_v21 = vld [vmem:[%s2723_s2 + $0xb8] sm:$0xff]   ;;  %s1888_s10 = sshll.u32 %s2791_s15, 5 }
  0x40   : > { %v1247_v10 = vrot.slane %v1245_v46, 1  ;;  %v1240_v52 = vrot.slane %v1238_v12, 1  ;;  %v1222_v53 = vshrl.u32 %v2397_v2, 16  ;;  %v1259_v43 = vshll.u32 %v2422_v18, 16  ;;  %936 = vmatprep.subr.bf16.mxu0 %v2762_v24  ;;  %1096 = vmatpush1.bf16.msra.mxu1 %v2006_v30  ;;  %s291_s13 = scalar_lea.vmem %s2725_s4, %s1888_s10 }
  0x41   : > { %v449_v59 = vor.u32 %v448_v35, %v2765_v3  ;;  %v1233_v9 = vrot.slane %v1231_v6, 1  ;;  %v1226_v22 = vrot.slane %v1224_v54, 1  ;;  %471 = vrot.lane.b32.xlu1 %v456_v50, %s2050_s21  ;;  %v2766_v60 = vshrl.u32 %v2310_v15, 16  ;;  %1097 = vmatprep.subr.bf16.mxu1 %v2762_v24  ;;  %v2010_v15 = vld [vmem:[%s2723_s2 + $0x58] sm:$0xff]  }
  0x42   : > { %v1257_v12 = vshrl.u32 %v2422_v18, 16  ;;  %v1250_v2 = vshrl.u32 %v2434_v26, 16  ;;  %v2767_v6 = vshrl.u32 %v2321_v25, 16  ;;  %v1261_v54 = vrot.slane %v1259_v43, 1  ;;  %v595_v25 = vld [vmem:[#allocation2 + $0x8] sm:$0xe] }
  0x43   : > { %v698_v35 = vor.u32 %v697_v39, %v2766_v60  ;;  %469 = vrot.lane.b32.xlu0 %v449_v59, %s2050_s21  ;;  %v1252_v50 = vshll.u32 %v2434_v26, 16  ;;  %937 = vmatpush1.bf16.msra.mxu0 %v2007_v57  ;;  %v1220_v30 = vor.u32 %v1219_v5, %v1215_v55  ;;  %v1213_v59 = vor.u32 %v1212_v45, %v1208_v19  ;;  %v596_v5 = vld [vmem:[#allocation2 + $0x10] sm:$0xe]  ;;  %v353_v39 = vld [vmem:[#allocation2] sm:$0xe] }
  0x44   : > { %v691_v46 = vor.u32 %v690_v23, %v2767_v6  ;;  %938 = vmatprep.subr.bf16.mxu0 %v2762_v24  ;;  %1098 = vmatpush1.bf16.msra.mxu1 %v2008_v4  ;;  %v1248_v43 = vor.u32 %v1247_v10, %v1243_v49  ;;  %v1241_v23 = vor.u32 %v1240_v52, %v1236_v11  ;;  %v354_v45 = vld [vmem:[#allocation2 + $0x8] sm:$0xe]  ;;  %v357_v6 = vld [vmem:[#allocation2 + $0x20] sm:$0xe] }
  0x45   : > { %713 = vrot.lane.b32.xlu1 %v698_v35, %s2050_s21  ;;  %1099 = vmatprep.subr.bf16.mxu1 %v2762_v24  ;;  %v1738_v55 = vcombine.low %v595_v25, %v2168_v28  ;;  %v1739_v19 = vcombine.low %v596_v5, %v2178_v33  ;;  %v1722_v18 = vcombine.low %v353_v39, %v2174_v31  ;;  %v1254_v52 = vrot.slane %v1252_v50, 1  ;;  %v355_v33 = vld [vmem:[#allocation2 + $0x10] sm:$0xe]  ;;  %v356_v35 = vld [vmem:[#allocation2 + $0x18] sm:$0xe] }
  0x46   : > { %v1234_v57 = vor.u32 %v1233_v9, %v1229_v62  ;;  %v1227_v49 = vor.u32 %v1226_v22, %v1222_v53  ;;  %v1723_v3 = vcombine.low %v354_v45, %v2186_v37  ;;  %v1262_v28 = vor.u32 %v1261_v54, %v1257_v12  ;;  %v598_v62 = vld [vmem:[#allocation2 + $0x20] sm:$0xe]  ;;  %v359_v39 = vld [vmem:[#allocation2 + $0x30] sm:$0xe]  ;;  %v601_v45 = vld [vmem:[#allocation2 + $0x38] sm:$0xe] }
  0x47   : > { %711 = vrot.lane.b32.xlu0 %v691_v46, %s2050_s21  ;;  %939 = vmatpush1.bf16.msra.mxu0 %v2009_v21  ;;  %v739_v11 = vrot.slane %v1738_v55, 1  ;;  %v740_v26 = vrot.slane %v1739_v19, 1  ;;  %v497_v10 = vrot.slane %v1722_v18, 1  ;;  %v597_v21 = vld [vmem:[#allocation2 + $0x18] sm:$0xe]  ;;  %v1724_v53 = vcombine.low %v355_v33, %v2197_v48 }
  0x48   : > { %1480 = vmatprep.subr.bf16.mxu0 %v2762_v24  ;;  %1100 = vmatpush1.bf16.msra.mxu1 %v2010_v15  ;;  %v498_v4 = vrot.slane %v1723_v3, 1  ;;  %v1725_v37 = vcombine.low %v356_v35, %v2193_v42  ;;  %v1740_v9 = vcombine.low %v597_v21, %v2212_v0  ;;  %v1255_v22 = vor.u32 %v1254_v52, %v1250_v2  ;;  %v358_v42 = vld [vmem:[#allocation2 + $0x28] sm:$0xe]  ;;  %v360_v55 = vld [vmem:[#allocation2 + $0x38] sm:$0xe] }
  0x49   : > { %1265 = vrot.lane.b32.xlu1 %v1220_v30, %s2050_s21  ;;  %1913 = vmatprep.subr.bf16.mxu1 %v2762_v24  ;;  %v1771_v60 = vcombine.low %v739_v11, %v740_v26  ;;  %v1741_v12 = vcombine.low %v598_v62, %v2208_v58  ;;  %v2481_v46 = vrot.slane %v1724_v53, 1  ;;  %v1726_v50 = vcombine.low %v357_v6, %v2229_v13  ;;  %v599_v15 = vld [vmem:[#allocation2 + $0x28] sm:$0xe]  ;;  %v600_v30 = vld [vmem:[#allocation2 + $0x30] sm:$0xe] }
  0x4a   : > { %v1795_v31 = vcombine.low %v497_v10, %v498_v4  ;;  %v2483_v54 = vrot.slane %v1725_v37, 1  ;;  %v2485_v48 = vrot.slane %v1740_v9, 1  ;;  %v1727_v2 = vcombine.low %v358_v42, %v2219_v7  ;;  %v602_v18 = vld [vmem:[#allocation2 + $0x40] sm:$0xe]  ;;  %v1160_v4 = vld [vmem:[#allocation2 + $0x18] sm:$0xe] }
  0x4b   : > { %1263 = vrot.lane.b32.xlu0 %v1213_v59, %s2050_s21  ;;  %1790 = vmatprep.mubr.msk.bf16.mxu0 %vm505_vm2, %v1771_v60  ;;  %v2488_v0 = vrot.slane %v1741_v12, 1  ;;  %v2494_v59 = vrot.slane %v1726_v50, 1  ;;  %v1745_v3 = vcombine.low %v602_v18, %v2287_v63  ;;  %v1827_v63 = vcombine.low %v1160_v4, %v2314_v17  ;;  %v1163_v60 = vld [vmem:[#allocation2 + $0x30] sm:$0xe]  ;;  %v1164_v33 = vld [vmem:[#allocation2 + $0x38] sm:$0xe] }
  0x4c   : > { %1814 = vmatprep.mubr.msk.bf16.mxu1 %vm505_vm2, %v1795_v31  ;;  %v1797_v58 = vcombine.low %v2481_v46, %v2483_v54  ;;  %v2501_v25 = vrot.slane %v1727_v2, 1  ;;  %v1161_v35 = vld [vmem:[#allocation2 + $0x20] sm:$0xe]  ;;  %v1830_v21 = vcombine.low %v1163_v60, %v2361_v16  ;;  %v1831_v31 = vcombine.low %v1164_v33, %v2354_v61  ;;  %v1162_v53 = vld [vmem:[#allocation2 + $0x28] sm:$0xe]  ;;  %v2768_v4 = vld [vmem:[#allocation3_spill] sm:$0xff] }
  0x4d   : > { %1273 = vrot.lane.b32.xlu1 %v1248_v43, %s2050_s21  ;;  %v1742_v43 = vcombine.low %v599_v15, %v2254_v34  ;;  %v1773_v13 = vcombine.low %v2485_v48, %v2488_v0  ;;  %v1728_v34 = vcombine.low %v359_v39, %v2278_v56  ;;  %v2521_v10 = vrot.slane %v1745_v3, 1  ;;  %v1159_v56 = vld [vmem:[#allocation2 + $0x10] sm:$0xe]  ;;  %v1165_v62 = vld [vmem:[#allocation2 + $0x40] sm:$0xe]  ;;  %v2769_v60 = vld [vmem:[#allocation4_spill] sm:$0xff] }
  0x4e   : > { %v1799_v19 = vcombine.low %v2494_v59, %v2501_v25  ;;  %v1828_v37 = vcombine.low %v1161_v35, %v2385_v14  ;;  %v1166_v9 = vld [vmem:[#allocation2 + $0x48] sm:$0xe]  ;;  %v2534_v12 = vrot.slane %v1827_v63, 1  ;;  %v1832_v17 = vcombine.low %v1165_v62, %v2414_v40  ;;  %v2770_v46 = vld [vmem:[#allocation5_spill] sm:$0xff] }
  0x4f   : > { %1271 = vrot.lane.b32.xlu0 %v1241_v23, %s2050_s21  ;;  %v1743_v23 = vcombine.low %v600_v30, %v2243_v20  ;;  %v2503_v7 = vrot.slane %v1742_v43, 1  ;;  %v1729_v20 = vcombine.low %v360_v55, %v2273_v51  ;;  %v2515_v52 = vrot.slane %v1728_v34, 1  ;;  %v2774_v59 = vld [vmem:[#allocation9_spill] sm:$0xff] }
  0x50   : > { %v2538_v6 = vrot.slane %v1830_v21, 1  ;;  %v2540_v42 = vrot.slane %v1831_v31, 1  ;;  %v2542_v16 = vrot.slane %v1828_v37, 1  ;;  %v1833_v61 = vcombine.low %v1166_v9, %v2401_v44  ;;  %v2771_v21 = vld [vmem:[#allocation6_spill] sm:$0xff]  ;;  %v2015_v9 = vld [vmem:[%s2723_s2 + $0xe0] sm:$0xff]  }
  0x51   : > { %1269 = vrot.lane.b32.xlu1 %v1234_v57, %s2050_s21  ;;  %v2505_v5 = vrot.slane %v1743_v23, 1  ;;  %v2517_v11 = vrot.slane %v1729_v20, 1  ;;  %v2549_v2 = vrot.slane %v1832_v17, 1  ;;  %v2011_v20 = vld [vmem:[%s2723_s2 + $0xc0] sm:$0xff]   ;;  %v2773_v17 = vld [vmem:[#allocation8_spill] sm:$0xff] }
  0x52   : > { %v2553_v15 = vrot.slane %v1833_v61, 1 }
  0x53   : > { %1267 = vrot.lane.b32.xlu0 %v1227_v49, %s2050_s21  ;;  %v1775_v57 = vcombine.low %v2503_v7, %v2505_v5  ;;  %v1744_v49 = vcombine.low %v601_v45, %v2301_v8  ;;  %v1801_v51 = vcombine.low %v2515_v52, %v2517_v11  ;;  %v1826_v8 = vcombine.low %v1159_v56, %v2330_v41  ;;  %v2778_v52 = vld [vmem:[#allocation13_spill] sm:$0xff] }
  0x54   : > { %v1829_v41 = vcombine.low %v1162_v53, %v2370_v1  ;;  %v1863_v1 = vcombine.low %v2538_v6, %v2540_v42  ;;  %v1865_v30 = vcombine.low %v2549_v2, %v2553_v15  ;;  %v2772_v53 = vld [vmem:[#allocation7_spill] sm:$0xff] }
  0x55   : > { %1277 = vrot.lane.b32.xlu1 %v1262_v28, %s2050_s21  ;;  %v2519_v26 = vrot.slane %v1744_v49, 1  ;;  %v2021_v42 = vld [vmem:[%s2723_s2 + $0x110] sm:$0xff]  }
  0x56   : > { %v2547_v50 = vrot.slane %v1829_v41, 1 }
  0x57   : > { %1275 = vrot.lane.b32.xlu0 %v1255_v22, %s2050_s21  ;;  %v1777_v28 = vcombine.low %v2519_v26, %v2521_v10  ;;  %v2532_v22 = vrot.slane %v1826_v8, 1  ;;  %v2018_v10 = vld [vmem:[%s2723_s2 + $0xf8] sm:$0xff]  }
  0x58   : > { %v1861_v40 = vcombine.low %v2542_v16, %v2547_v50 }
  0x59   : > { %v1859_v14 = vcombine.low %v2532_v22, %v2534_v12  ;;  %v2020_v22 = vld [vmem:[%s2723_s2 + $0x108] sm:$0xff]  }
  0x9b   : > { %v700_v43 = vpop.permute.xlu1 %699 }
  0x9c   : > { %v458_v44 = vpop.permute.xlu0 %457  ;;  %v749_v39 = vsel %vm505_vm2, %v2166_v27, %v700_v43  ;;  %v2012_v27 = vld [vmem:[%s2723_s2 + $0xc8] sm:$0xff]  }
  0x9d   : > { %v508_v45 = vsel %vm505_vm2, %v2170_v29, %v458_v44  ;;  %v2775_v44 = vld [vmem:[#allocation10_spill] sm:$0xff] }
  0x9f   : > { %v702_v23 = vpop.permute.xlu1 %701 }
  0xa0   : > { %v752_v55 = vsel %vm505_vm2, %v2176_v32, %v702_v23  ;;  %v460_v34 = vpop.permute.xlu0 %459 }
  0xa1   : > { %v1770_v18 = vcombine.low %v749_v39, %v752_v55  ;;  %v511_v49 = vsel %vm505_vm2, %v2184_v36, %v460_v34  ;;  %v2776_v39 = vld [vmem:[#allocation11_spill] sm:$0xff] }
  0xa2   : > { %v1794_v3 = vcombine.low %v508_v45, %v511_v49 }
  0xa3   : > { %949 = vmatmul.mubr.bf16.vlgmr.msra.gmra.mrb[0].mxu0 %v1770_v18  ;;  %v464_v56 = vpop.permute.xlu1 %463  ;;  %v2777_v18 = vld [vmem:[#allocation12_spill] sm:$0xff] }
  0xa4   : > { %1110 = vmatmul.mubr.bf16.vlgmr.msra.gmra.mrb[0].mxu1 %v1794_v3  ;;  %1481 = vmatpush1.bf16.msra.mxu0 %v2011_v20  ;;  %v462_v32 = vpop.permute.xlu0 %461  ;;  %v517_v29 = vsel %vm505_vm2, %v2188_v38, %v464_v56  ;;  %v2013_v38 = vld [vmem:[%s2723_s2 + $0xd0] sm:$0xff]  }
  0xa5   : > { %1925 = vmatpush1.bf16.msra.mxu1 %v2011_v20  ;;  %1482 = vmatprep.subr.bf16.mxu0 %v2762_v24  ;;  %v514_v8 = vsel %vm505_vm2, %v2768_v4, %v462_v32  ;;  %v2017_v20 = vld [vmem:[%s2723_s2 + $0xf0] sm:$0xff]   ;;  %v2779_v32 = vld [vmem:[#allocation16_spill] sm:$0xff]  ;;  %v2780_v4 = vld [vmem:[#allocation17_spill] sm:$0xff] }
  0xa6   : > { %1914 = vmatprep.subr.bf16.mxu1 %v2762_v24  ;;  %1815 = vmatprep.mubr.msk.bf16.mxu1 %vm505_vm2, %v1797_v58  ;;  %v1796_v63 = vcombine.low %v514_v8, %v517_v29  ;;  %v2014_v58 = vld [vmem:[%s2723_s2 + $0xd8] sm:$0xff]  }
  0xa7   : > { %v706_v36 = vpop.permute.xlu1 %705  ;;  %1791 = vmatprep.mubr.msk.bf16.mxu0 %vm505_vm2, %v1773_v13 }
  0xa8   : > { %1483 = vmatpush1.bf16.msra.mxu0 %v2012_v27  ;;  %v758_v33 = vsel %vm505_vm2, %v2769_v60, %v706_v36  ;;  %v704_v35 = vpop.permute.xlu0 %703  ;;  %v2781_v36 = vld [vmem:[#allocation14_spill] sm:$0xff] }
  0xa9   : > { %1926 = vmatpush1.bf16.msra.mxu1 %v2012_v27  ;;  %1484 = vmatprep.subr.bf16.mxu0 %v2762_v24  ;;  %v755_v54 = vsel %vm505_vm2, %v2770_v46, %v704_v35 }
  0xaa   : > { %1915 = vmatprep.subr.bf16.mxu1 %v2762_v24  ;;  %v1772_v48 = vcombine.low %v755_v54, %v758_v33 }
  0xab   : > { %v468_v0 = vpop.permute.xlu1 %467 }
  0xac   : > { %1485 = vmatpush1.bf16.msra.mxu0 %v2013_v38  ;;  %1118 = vmatmul.mubr.bf16.gmra.mrb[4].mxu1 %v1796_v63  ;;  %v466_v13 = vpop.permute.xlu0 %465  ;;  %v523_v31 = vsel %vm505_vm2, %v2771_v21, %v468_v0  ;;  %v2782_v63 = vld [vmem:[#allocation15_spill] sm:$0xff] }
  0xad   : > { %1927 = vmatpush1.bf16.msra.mxu1 %v2013_v38  ;;  %1486 = vmatprep.subr.bf16.mxu0 %v2762_v24  ;;  %v520_v37 = vsel %vm505_vm2, %v2772_v53, %v466_v13  ;;  %v2785_v21 = vld [vmem:[#allocation19_spill] sm:$0xff] }
  0xae   : > { %1916 = vmatprep.subr.bf16.mxu1 %v2762_v24  ;;  %957 = vmatmul.mubr.bf16.gmra.mrb[4].mxu0 %v1772_v48  ;;  %v1798_v41 = vcombine.low %v520_v37, %v523_v31  ;;  %v2783_v48 = vld [vmem:[#allocation20_spill] sm:$0xff] }
  0xaf   : > { %v710_v62 = vpop.permute.xlu1 %709  ;;  %1816 = vmatprep.mubr.msk.bf16.mxu1 %vm505_vm2, %v1799_v19  ;;  %1792 = vmatprep.mubr.msk.bf16.mxu0 %vm505_vm2, %v1775_v57  ;;  %v2016_v19 = vld [vmem:[%s2723_s2 + $0xe8] sm:$0xff]  }
  0xb0   : > { %1487 = vmatpush1.bf16.msra.mxu0 %v2014_v58  ;;  %v764_v61 = vsel %vm505_vm2, %v2773_v17, %v710_v62  ;;  %v708_v43 = vpop.permute.xlu0 %707 }
  0xb1   : > { %1928 = vmatpush1.bf16.msra.mxu1 %v2014_v58  ;;  %1488 = vmatprep.subr.bf16.mxu0 %v2762_v24  ;;  %v761_v25 = vsel %vm505_vm2, %v2774_v59, %v708_v43 }
  0xb2   : > { %1917 = vmatprep.subr.bf16.mxu1 %v2762_v24  ;;  %v1774_v7 = vcombine.low %v761_v25, %v764_v61 }
  0xb3   : > { %v472_v5 = vpop.permute.xlu1 %471 }
  0xb4   : > { %1489 = vmatpush1.bf16.msra.mxu0 %v2015_v9  ;;  %1126 = vmatmul.mubr.bf16.gmra.mrb[8].mxu1 %v1798_v41  ;;  %v529_v23 = vsel %vm505_vm2, %v2775_v44, %v472_v5 }
  0xb5   : > { %v470_v57 = vpop.permute.xlu0 %469  ;;  %1929 = vmatpush1.bf16.msra.mxu1 %v2015_v9  ;;  %1490 = vmatprep.subr.bf16.mxu0 %v2762_v24 }
  0xb6   : > { %v526_v55 = vsel %vm505_vm2, %v2776_v39, %v470_v57  ;;  %1918 = vmatprep.subr.bf16.mxu1 %v2762_v24  ;;  %965 = vmatmul.mubr.bf16.gmra.mrb[8].mxu0 %v1774_v7 }
  0xb7   : > { %v714_v34 = vpop.permute.xlu1 %713  ;;  %1817 = vmatprep.mubr.msk.bf16.mxu1 %vm505_vm2, %v1801_v51  ;;  %1793 = vmatprep.mubr.msk.bf16.mxu0 %vm505_vm2, %v1777_v28  ;;  %v1800_v45 = vcombine.low %v526_v55, %v529_v23  ;;  %v2019_v51 = vld [vmem:[%s2723_s2 + $0x100] sm:$0xff]  }
  0xb8   : > { %1491 = vmatpush1.bf16.msra.mxu0 %v2016_v19  ;;  %v770_v49 = vsel %vm505_vm2, %v2777_v18, %v714_v34 }
  0xb9   : > { %v712_v3 = vpop.permute.xlu0 %711  ;;  %1930 = vmatpush1.bf16.msra.mxu1 %v2016_v19  ;;  %1492 = vmatprep.subr.bf16.mxu0 %v2762_v24 }
  0xba   : > { %v767_v11 = vsel %vm505_vm2, %v2778_v52, %v712_v3  ;;  %1919 = vmatprep.subr.bf16.mxu1 %v2762_v24 }
  0xbb   : > { %v1776_v26 = vcombine.low %v767_v11, %v770_v49  ;;  %v1266_v28 = vpop.permute.xlu1 %1265 }
  0xbc   : > { %1493 = vmatpush1.bf16.msra.mxu0 %v2017_v20  ;;  %1134 = vmatmul.mubr.bf16.gmra.mrb[12].mxu1 %v1800_v45  ;;  %v1316_v38 = vsel %vm505_vm2, %v2781_v36, %v1266_v28 }
  0xbd   : > { %1931 = vmatpush1.bf16.msra.mxu1 %v2017_v20  ;;  %1494 = vmatprep.subr.bf16.mxu0 %v2762_v24  ;;  %v1264_v56 = vpop.permute.xlu0 %1263 }
  0xbe   : > { %1920 = vmatprep.subr.bf16.mxu1 %v2762_v24  ;;  %973 = vmatmul.mubr.bf16.gmra.mrb[12].mxu0 %v1776_v26  ;;  %v1313_v60 = vsel %vm505_vm2, %v2782_v63, %v1264_v56 }
  0xbf   : > { %1878 = vmatprep.mubr.msk.bf16.mxu0 %vm505_vm2, %v1859_v14  ;;  %1880 = vmatprep.mubr.msk.bf16.mxu1 %vm505_vm2, %v1863_v1  ;;  %v1274_v12 = vpop.permute.xlu1 %1273  ;;  %v2022_v14 = vld [vmem:[%s2723_s2 + $0x118] sm:$0xff]   ;;  %v1858_v35 = vcombine.low %v1313_v60, %v1316_v38 }
  0xc0   : > { %1495 = vmatpush1.bf16.msra.mxu0 %v2018_v10  ;;  %v1328_v29 = vsel %vm505_vm2, %v2779_v32, %v1274_v12 }
  0xc1   : > { %1932 = vmatpush1.bf16.msra.mxu1 %v2018_v10  ;;  %1496 = vmatprep.subr.bf16.mxu0 %v2762_v24  ;;  %v1272_v6 = vpop.permute.xlu0 %1271 }
  0xc2   : > { %1921 = vmatprep.subr.bf16.mxu1 %v2762_v24  ;;  %v1325_v8 = vsel %vm505_vm2, %v2780_v4, %v1272_v6 }
  0xc3   : > { %v1270_v1 = vpop.permute.xlu1 %1269  ;;  %v1862_v33 = vcombine.low %v1325_v8, %v1328_v29 }
  0xc4   : > { %1497 = vmatpush1.bf16.msra.mxu0 %v2019_v51 }
  0xc5   : > { %1933 = vmatpush1.bf16.msra.mxu1 %v2019_v51  ;;  %1498 = vmatprep.subr.bf16.mxu0 %v2762_v24  ;;  %v1268_v27 = vpop.permute.xlu0 %1267 }
  0xc6   : > { %1922 = vmatprep.subr.bf16.mxu1 %v2762_v24  ;;  %v1319_v31 = vsel %vm505_vm2, %v2785_v21, %v1268_v27 }
  0xc7   : > { %v1278_v46 = vpop.permute.xlu1 %1277 }
  0xc8   : > { %1499 = vmatpush1.bf16.msra.mxu0 %v2020_v22  ;;  %v1334_v0 = vsel %vm505_vm2, %v2783_v48, %v1278_v46 }
  0xc9   : > { %1934 = vmatpush1.bf16.msra.mxu1 %v2020_v22  ;;  %1500 = vmatprep.subr.bf16.mxu0 %v2762_v24  ;;  %v1276_v54 = vpop.permute.xlu0 %1275 }
  0xca   : > { %1923 = vmatprep.subr.bf16.mxu1 %v2762_v24  ;;  %v1331_v58 = vsel %vm505_vm2, %v2406_v47, %v1276_v54 }
  0xcb   : > { %v1864_v16 = vcombine.low %v1331_v58, %v1334_v0 }
  0xcc   : > { %1501 = vmatpush1.bf16.msra.mxu0 %v2021_v42 }
  0xcd   : > { %1935 = vmatpush1.bf16.msra.mxu1 %v2021_v42  ;;  %1502 = vmatprep.subr.bf16.mxu0 %v2762_v24 }
  0xce   : > { %1924 = vmatprep.subr.bf16.mxu1 %v2762_v24  ;;  %v2784_v24 = vld [vmem:[#allocation18_spill] sm:$0xff] }
  0xcf   : > { %v1322_v13 = vsel %vm505_vm2, %v2784_v24, %v1270_v1  ;;  %v1882_v1 = vld [vmem:[%s2724_s3] ss:$0 sm:$0xff] }
  0xd0   : > { %1503 = vmatpush1.bf16.msra.mxu0 %v2022_v14  ;;  %v1860_v50 = vcombine.low %v1319_v31, %v1322_v13 }
  0xd1   : > { %1936 = vmatpush1.bf16.msra.mxu1 %v2022_v14 }
  0xd3   : > { %1513 = vmatmul.mubr.bf16.vlgmr.msra.gmra.mrb[16].mxu0 %v1858_v35 }
  0xd4   : > { %1529 = vmatmul.mubr.bf16.vlgmr.msra.gmra.mrb[16].mxu1 %v1862_v33  ;;  %1879 = vmatprep.mubr.msk.bf16.mxu0 %vm505_vm2, %v1861_v40 }
  0xd5   : > { %1881 = vmatprep.mubr.msk.bf16.mxu1 %vm505_vm2, %v1865_v30 }
  0xdb   : > { %1521 = vmatmul.mubr.bf16.gmra.mrb[20].mxu0 %v1860_v50 }
  0xdc   : > { %1537 = vmatmul.mubr.bf16.gmra.mrb[20].mxu1 %v1864_v16 }
 0x176   : > { %v950_v40 = vpop.f32.mrb[0].mxu0 }
 0x177   : > { %v1111_v53 = vpop.f32.mrb[0].mxu1  ;;  %v952_v37 = vpop.f32.mrb[1].mxu0 }
 0x178   : > { %v1112_v62 = vadd.f32 %v1111_v53, %v950_v40  ;;  %v1113_v47 = vpop.f32.mrb[1].mxu1  ;;  %v953_v9 = vpop.f32.mrb[2].mxu0 }
 0x179   : > { %v1114_v41 = vpop.f32.mrb[2].mxu1  ;;  %v955_v2 = vpop.f32.mrb[3].mxu0 }
 0x17a   : > { %v1115_v15 = vadd.f32 %v1114_v41, %v953_v9  ;;  %v1116_v30 = vpop.f32.mrb[3].mxu1 }
 0x17f   : > { %v1119_v17 = vpop.f32.mrb[4].mxu1 }
 0x180   : > { %v1121_v61 = vpop.f32.mrb[5].mxu1 }
 0x181   : > { %v958_v43 = vpop.f32.mrb[4].mxu0  ;;  %v1122_v59 = vpop.f32.mrb[6].mxu1 }
 0x182   : > { %v1120_v25 = vadd.f32 %v1119_v17, %v958_v43  ;;  %v960_v7 = vpop.f32.mrb[5].mxu0  ;;  %v1124_v5 = vpop.f32.mrb[7].mxu1 }
 0x183   : > { %v961_v19 = vpop.f32.mrb[6].mxu0 }
 0x184   : > { %v1123_v57 = vadd.f32 %v1122_v59, %v961_v19  ;;  %v963_v44 = vpop.f32.mrb[7].mxu0 }
 0x187   : > { %v1127_v23 = vpop.f32.mrb[8].mxu1 }
 0x188   : > { %v1129_v39 = vpop.f32.mrb[9].mxu1 }
 0x189   : > { %v966_v55 = vpop.f32.mrb[8].mxu0  ;;  %v1130_v34 = vpop.f32.mrb[10].mxu1 }
 0x18a   : > { %v1128_v20 = vadd.f32 %v1127_v23, %v966_v55  ;;  %v968_v45 = vpop.f32.mrb[9].mxu0  ;;  %v1132_v18 = vpop.f32.mrb[11].mxu1 }
 0x18b   : > { %v969_v49 = vpop.f32.mrb[10].mxu0 }
 0x18c   : > { %v1131_v3 = vadd.f32 %v1130_v34, %v969_v49  ;;  %v971_v52 = vpop.f32.mrb[11].mxu0 }
 0x18f   : > { %v1135_v11 = vpop.f32.mrb[12].mxu1 }
 0x190   : > { %v1137_v26 = vpop.f32.mrb[13].mxu1 }
 0x191   : > { %v974_v10 = vpop.f32.mrb[12].mxu0  ;;  %v1138_v51 = vpop.f32.mrb[14].mxu1 }
 0x192   : > { %v1136_v28 = vadd.f32 %v1135_v11, %v974_v10  ;;  %v976_v56 = vpop.f32.mrb[13].mxu0  ;;  %v1140_v22 = vpop.f32.mrb[15].mxu1 }
 0x193   : > { %v977_v12 = vpop.f32.mrb[14].mxu0 }
 0x194   : > { %v1139_v6 = vadd.f32 %v1138_v51, %v977_v12  ;;  %v979_v42 = vpop.f32.mrb[15].mxu0 }
 0x1a6   : > { %v1514_v14 = vpop.f32.mrb[16].mxu0 }
 0x1a7   : > { %v1545_v27 = vadd.f32 %v1514_v14, %v1112_v62  ;;  %v1530_v32 = vpop.f32.mrb[16].mxu1  ;;  %v1516_v29 = vpop.f32.mrb[17].mxu0 }
 0x1a8   : > { %v1549_v4 = vadd.f32 %v1530_v32, %v1128_v20  ;;  %v1532_v8 = vpop.f32.mrb[17].mxu1  ;;  %v1517_v36 = vpop.f32.mrb[18].mxu0 }
 0x1a9   : > { %v1560_v38 = vadd.f32 %v1882_v1, %v1545_v27  ;;  %v1546_v63 = vadd.f32 %v1517_v36, %v1115_v15  ;;  %v1533_v60 = vpop.f32.mrb[18].mxu1  ;;  %v1519_v33 = vpop.f32.mrb[19].mxu0 }
 0x1aa   : > { %v1564_v35 = vadd.f32 %v1882_v1, %v1549_v4  ;;  %v1550_v46 = vadd.f32 %v1533_v60, %v1131_v3  ;;  %v1535_v54 = vpop.f32.mrb[19].mxu1 }
 0x1ab   : > { %v1561_v48 = vadd.f32 %v1882_v1, %v1546_v63  ;;  %v1568_v58 = vmax.f32 %v1560_v38, 0.0 }
 0x1ac   : > { %v1565_v0 = vadd.f32 %v1882_v1, %v1550_v46  ;;  %v1572_v13 = vmax.f32 %v1564_v35, 0.0 }
 0x1ad   : > { %v1569_v24 = vmax.f32 %v1561_v48, 0.0 }
 0x1ae   : > { %v1573_v21 = vmax.f32 %v1565_v0, 0.0  ;;  %v1522_v31 = vpop.f32.mrb[20].mxu0 }
 0x1af   : > { %v1892_v16 = vpack.c.bf16 %v1569_v24, %v1568_v58  ;;  %v1547_v50 = vadd.f32 %v1522_v31, %v1120_v25  ;;  %v1538_v40 = vpop.f32.mrb[20].mxu1  ;;  %v1524_v53 = vpop.f32.mrb[21].mxu0 }
 0x1b0   : > { %v1902_v37 = vpack.c.bf16 %v1573_v21, %v1572_v13  ;;  %v1551_v62 = vadd.f32 %v1538_v40, %v1136_v28  ;;  %v1540_v47 = vpop.f32.mrb[21].mxu1  ;;  %v1525_v9 = vpop.f32.mrb[22].mxu0 }
 0x1b1   : > { %1893 = vst [vmem:[%s291_s13] sm:$0xff] %v1892_v16   ;;  %v1562_v41 = vadd.f32 %v1882_v1, %v1547_v50  ;;  %v1548_v2 = vadd.f32 %v1525_v9, %v1123_v57  ;;  %v1541_v15 = vpop.f32.mrb[22].mxu1  ;;  %v1527_v30 = vpop.f32.mrb[23].mxu0 }
 0x1b2   : > { %1911 = vst [vmem:[%s291_s13 + $0x10] sm:$0xff] %v1902_v37   ;;  %v1566_v17 = vadd.f32 %v1882_v1, %v1551_v62  ;;  %v1552_v61 = vadd.f32 %v1541_v15, %v1139_v6  ;;  %v1543_v43 = vpop.f32.mrb[23].mxu1 }
 0x1b3   : > { %v1563_v59 = vadd.f32 %v1882_v1, %v1548_v2  ;;  %v1570_v5 = vmax.f32 %v1562_v41, 0.0 }
 0x1b4   : > { %v1567_v7 = vadd.f32 %v1882_v1, %v1552_v61  ;;  %v1574_v25 = vmax.f32 %v1566_v17, 0.0 }
 0x1b5   : > { %v1571_v19 = vmax.f32 %v1563_v59, 0.0 }
 0x1b6   : > { %v1575_v44 = vmax.f32 %v1567_v7, 0.0 }
 0x1b7   : > { %v1897_v23 = vpack.c.bf16 %v1571_v19, %v1570_v5 }
 0x1b8   : > { %v1907_v39 = vpack.c.bf16 %v1575_v44, %v1574_v25 }
 0x1b9   : > { %1910 = vst [vmem:[%s291_s13 + $0x8] sm:$0xff] %v1897_v23  }
 0x1ba   : > { %1912 = vst [vmem:[%s291_s13 + $0x18] sm:$0xff] %v1907_v39  }
 0x1bb PF: > { %s14_s17 = sadd.s32 1, %s2047_s17   ;;  %s2786_s15 = smov %s2043_s16 }
 0x1bc   : > { %p11_p5 = scmp.ge.s32.totalorder %s14_s17, 4   ;;  %s2787_s16 = smov %s2789_s18 }
 0x1be   :  { %13 = sbr.rel (!%p11_p5) target bundleno = 2 (0x2), region = 74 }

// kernel: vgg_l1_loss.20
= control target key start
LH: loop header
LB: loop body
LE: loop exit
PB: predicated region body
PF: predicated region fallthrough
CT: control target
= control target key end

     0   :  { %s4052_s15 = smov 0   ;;  %s4054_s16 = smov 0   ;;  %s5231_s0 = inlined_call_operand.vmem [shape: bf16[2,32,18,64], index: 0, kind: input, shape index: {}, may-alias: {0,1}]   ;;  %s5232_s1 = inlined_call_operand.vmem [shape: bf16[2,32,18,64], index: 1, kind: input, shape index: {}, may-alias: {0,1}]   ;;  %s5233_s2 = inlined_call_operand.vmem [shape: bf16[3,192,64], index: 2, kind: input, shape index: {}]   ;;  %s5234_s3 = inlined_call_operand.vmem [shape: f32[1,64], index: 3, kind: input, shape index: {}]   ;;  %s5235_s4 = inlined_call_operand.vmem [shape: bf16[2,16,16,64], index: 4, kind: output, shape index: {}]  }
   0x1   :  { %s4056_s17 = smov 0  }
   0x2 LB: > { %s26_s18 = sadd.s32 1, %s4019_s16  ;;  %p3393_p0 = scmp.ge.s32.totalorder %s4023_s17, 1  ;;  %s4023_s17 = sphi %s4056_s17, %s14_s17   ;;  %s4019_s16 = sphi %s4054_s16, %s5307_s16   ;;  %s4015_s15 = sphi %s4052_s15, %s5306_s15  }
   0x3   : > { %p28_p1 = scmp.ge.s32.totalorder %s26_s18, 2  ;;  %p210_p2 = scmp.lt.s32.totalorder %s4023_s17, 3 }
   0x5   : > { %s5309_s18 = smov (%p28_p1, %s26_s18), 0  ;;  %p211_p3 = pnand %p3393_p0, %p210_p2 }
   0x7   : > { %214 = sbr.rel (%p211_p3) target bundleno = 572 (0x23c), region = 36 }
   0xe   : > { %p259_p4 = scmp.lt.s32.totalorder %s4015_s15, 1  ;;  %v3833_v0 = vld [vmem:[%s5233_s2 + $0x60] sm:$0xff]   ;;  %v5236_v1 = vmov 0   ;;  %v3836_v2 = vld [vmem:[%s5233_s2 + $0x68] sm:$0xff]   ;;  %vm344_vm0 = vcmask 519168   ;;  %vm347_vm1 = vcmask 516096  }
   0xf   : > { %3744 = vmatprep.subr.bf16.mxu1 %v5236_v1  ;;  %1700 = vmatprep.subr.bf16.mxu0 %v5236_v1  ;;  %v3839_v3 = vld [vmem:[%s5233_s2 + $0x70] sm:$0xff]   ;;  %v3842_v13 = vld [vmem:[%s5233_s2 + $0x78] sm:$0xff]   ;;  %vm599_vm2 = vsmask.f32 7424  ;;  %v3845_v26 = vld [vmem:[%s5233_s2 + $0x80] sm:$0xff]   ;;  %s4026_s11 = smov 64  }
  0x10   : > { %s5311_s15 = smov (!%p259_p4, %s4015_s15), 1  ;;  %3756 = vmatpush1.bf16.msra.mxu1 %v3833_v0  ;;  %1701 = vmatpush1.bf16.msra.mxu0 %v3833_v0  ;;  %v3848_v37 = vld [vmem:[%s5233_s2 + $0x88] sm:$0xff]   ;;  %v3851_v54 = vld [vmem:[%s5233_s2 + $0x90] sm:$0xff]   ;;  %vm872_vm3 = vcmask 1046528   ;;  %vm921_vm4 = vcmask 523264  }
  0x11   : > { %s3768_s23 = smul.u32 384, %s5311_s15  ;;  %3745 = vmatprep.subr.bf16.mxu1 %v5236_v1  ;;  %1702 = vmatprep.subr.bf16.mxu0 %v5236_v1  ;;  %s3711_s13 = sshll.u32 %s5311_s15, 7 }
  0x12   : > { %s5097_s20 = scalar_lea.vmem %s5235_s4, %s3711_s13 }
  0x13   : > { %s4088_s26 = scalar_lea.vmem %s5231_s0, %s3768_s23  ;;  %s4245_s22 = sadd.s32 192, %s3768_s23 }
  0x14   : > { %v323_v4 = vld [vmem:[%s4088_s26 + $0x6c] sm:$0xf]  ;;  %v324_v5 = vld [vmem:[%s4088_s26 + $0x70] sm:$0xf]  ;;  %v325_v6 = vld [vmem:[%s4088_s26 + $0x74] sm:$0x1]  ;;  %3757 = vmatpush1.bf16.msra.mxu1 %v3836_v2  ;;  %1703 = vmatpush1.bf16.msra.mxu0 %v3836_v2  ;;  %s4278_s28 = scalar_lea.vmem %s5232_s1, %s4245_s22 }
  0x15   : > { %373 = vst.msk [vmem:[#allocation2 + $0x6c] sm:$0xf] %vm344_vm0, %v323_v4  ;;  %374 = vst.msk [vmem:[#allocation2 + $0x70] sm:$0xf] %vm344_vm0, %v324_v5  ;;  %v299_v7 = vld [vmem:[%s4088_s26 + $0xc] sm:$0xf]  ;;  %3746 = vmatprep.subr.bf16.mxu1 %v5236_v1  ;;  %1704 = vmatprep.subr.bf16.mxu0 %v5236_v1 }
  0x16   : > { %375 = vst.msk [vmem:[#allocation2 + $0x74] sm:$0x1] %vm347_vm1, %v325_v6  ;;  %v300_v8 = vld [vmem:[%s4088_s26 + $0x10] sm:$0xf]  ;;  %v301_v9 = vld [vmem:[%s4088_s26 + $0x14] sm:$0x1] }
  0x17   : > { %349 = vst.msk [vmem:[#allocation2 + $0xc] sm:$0xf] %vm344_vm0, %v299_v7  ;;  %350 = vst.msk [vmem:[#allocation2 + $0x10] sm:$0xf] %vm344_vm0, %v300_v8  ;;  %v326_v10 = vld [vmem:[%s4088_s26 + $0x78] sm:$0xf] }
  0x18   : > { %351 = vst.msk [vmem:[#allocation2 + $0x14] sm:$0x1] %vm347_vm1, %v301_v9  ;;  %v327_v11 = vld [vmem:[%s4088_s26 + $0x7c] sm:$0xf]  ;;  %v328_v12 = vld [vmem:[%s4088_s26 + $0x80] sm:$0x1]  ;;  %3758 = vmatpush1.bf16.msra.mxu1 %v3839_v3  ;;  %1705 = vmatpush1.bf16.msra.mxu0 %v3839_v3 }
  0x19   : > { %376 = vst.msk [vmem:[#allocation2 + $0x78] sm:$0xf] %vm344_vm0, %v326_v10  ;;  %377 = vst.msk [vmem:[#allocation2 + $0x7c] sm:$0xf] %vm344_vm0, %v327_v11  ;;  %v302_v14 = vld [vmem:[%s4088_s26 + $0x18] sm:$0xf]  ;;  %3747 = vmatprep.subr.bf16.mxu1 %v5236_v1  ;;  %1706 = vmatprep.subr.bf16.mxu0 %v5236_v1 }
  0x1a   : > { %378 = vst.msk [vmem:[#allocation2 + $0x80] sm:$0x1] %vm347_vm1, %v328_v12  ;;  %v303_v15 = vld [vmem:[%s4088_s26 + $0x1c] sm:$0xf]  ;;  %v304_v16 = vld [vmem:[%s4088_s26 + $0x20] sm:$0x1] }
  0x1b   : > { %352 = vst.msk [vmem:[#allocation2 + $0x18] sm:$0xf] %vm344_vm0, %v302_v14  ;;  %353 = vst.msk [vmem:[#allocation2 + $0x1c] sm:$0xf] %vm344_vm0, %v303_v15  ;;  %v329_v17 = vld [vmem:[%s4088_s26 + $0x84] sm:$0xf] }
  0x1c   : > { %354 = vst.msk [vmem:[#allocation2 + $0x20] sm:$0x1] %vm347_vm1, %v304_v16  ;;  %v330_v18 = vld [vmem:[%s4088_s26 + $0x88] sm:$0xf]  ;;  %v331_v19 = vld [vmem:[%s4088_s26 + $0x8c] sm:$0x1]  ;;  %3759 = vmatpush1.bf16.msra.mxu1 %v3842_v13  ;;  %1707 = vmatpush1.bf16.msra.mxu0 %v3842_v13 }
  0x1d   : > { %379 = vst.msk [vmem:[#allocation2 + $0x84] sm:$0xf] %vm344_vm0, %v329_v17  ;;  %380 = vst.msk [vmem:[#allocation2 + $0x88] sm:$0xf] %vm344_vm0, %v330_v18  ;;  %v305_v20 = vld [vmem:[%s4088_s26 + $0x24] sm:$0xf]  ;;  %3748 = vmatprep.subr.bf16.mxu1 %v5236_v1  ;;  %1708 = vmatprep.subr.bf16.mxu0 %v5236_v1 }
  0x1e   : > { %381 = vst.msk [vmem:[#allocation2 + $0x8c] sm:$0x1] %vm347_vm1, %v331_v19  ;;  %v306_v21 = vld [vmem:[%s4088_s26 + $0x28] sm:$0xf]  ;;  %v307_v22 = vld [vmem:[%s4088_s26 + $0x2c] sm:$0x1] }
  0x1f   : > { %355 = vst.msk [vmem:[#allocation2 + $0x24] sm:$0xf] %vm344_vm0, %v305_v20  ;;  %356 = vst.msk [vmem:[#allocation2 + $0x28] sm:$0xf] %vm344_vm0, %v306_v21  ;;  %v332_v23 = vld [vmem:[%s4088_s26 + $0x90] sm:$0xf] }
  0x20   : > { %357 = vst.msk [vmem:[#allocation2 + $0x2c] sm:$0x1] %vm347_vm1, %v307_v22  ;;  %v333_v24 = vld [vmem:[%s4088_s26 + $0x94] sm:$0xf]  ;;  %v334_v25 = vld [vmem:[%s4088_s26 + $0x98] sm:$0x1]  ;;  %3760 = vmatpush1.bf16.msra.mxu1 %v3845_v26  ;;  %1709 = vmatpush1.bf16.msra.mxu0 %v3845_v26 }
  0x21   : > { %382 = vst.msk [vmem:[#allocation2 + $0x90] sm:$0xf] %vm344_vm0, %v332_v23  ;;  %383 = vst.msk [vmem:[#allocation2 + $0x94] sm:$0xf] %vm344_vm0, %v333_v24  ;;  %v308_v27 = vld [vmem:[%s4088_s26 + $0x30] sm:$0xf]  ;;  %3749 = vmatprep.subr.bf16.mxu1 %v5236_v1  ;;  %1710 = vmatprep.subr.bf16.mxu0 %v5236_v1 }
  0x22   : > { %384 = vst.msk [vmem:[#allocation2 + $0x98] sm:$0x1] %vm347_vm1, %v334_v25  ;;  %v309_v28 = vld [vmem:[%s4088_s26 + $0x34] sm:$0xf]  ;;  %v310_v29 = vld [vmem:[%s4088_s26 + $0x38] sm:$0x1] }
  0x23   : > { %v1011_v30 = vld [vmem:[#allocation2 + $0x6c] sm:$0xf]  ;;  %v4148_v31 = vld [vmem:[#allocation2 + $0x70] sm:$0xf]  ;;  %358 = vst.msk [vmem:[#allocation2 + $0x30] sm:$0xf] %vm344_vm0, %v308_v27 }
  0x24   : > { %359 = vst.msk [vmem:[#allocation2 + $0x34] sm:$0xf] %vm344_vm0, %v309_v28  ;;  %v4154_v32 = vcombine.low %v1011_v30, %v4148_v31  ;;  %v4156_v33 = vld [vmem:[#allocation2 + $0x74] ss:$0 sps:$4 sm:$0x11]   ;;  %3761 = vmatpush1.bf16.msra.mxu1 %v3848_v37  ;;  %1711 = vmatpush1.bf16.msra.mxu0 %v3848_v37  ;;  %v3854_v14 = vld [vmem:[%s5233_s2 + $0x98] sm:$0xff]  }
  0x25   : > { %360 = vst.msk [vmem:[#allocation2 + $0x38] sm:$0x1] %vm347_vm1, %v310_v29  ;;  %v995_v34 = vld [vmem:[#allocation2 + $0xc] sm:$0xf]  ;;  %v4160_v35 = vld [vmem:[#allocation2 + $0x10] sm:$0xf]  ;;  %3750 = vmatprep.subr.bf16.mxu1 %v5236_v1  ;;  %1712 = vmatprep.subr.bf16.mxu0 %v5236_v1 }
  0x26   : > { %v1013_v36 = vld [vmem:[#allocation2 + $0x78] sm:$0xf]  ;;  %v1284_v38 = vshrl.u32 %v4154_v32, 16  ;;  %v1286_v39 = vshll.u32 %v4154_v32, 16  ;;  %v1291_v40 = vshll.u32 %v4156_v33, 16  ;;  %v4169_v41 = vcombine.low %v995_v34, %v4160_v35 }
  0x27   : > { %v4171_v42 = vld [vmem:[#allocation2 + $0x14] ss:$0 sps:$4 sm:$0x11]   ;;  %v1014_v43 = vld [vmem:[#allocation2 + $0x7c] sm:$0xf] }
  0x28   : > { %v997_v44 = vld [vmem:[#allocation2 + $0x18] sm:$0xf]  ;;  %v1288_v45 = vrot.slane %v1286_v39, 1  ;;  %v1293_v46 = vrot.slane %v1291_v40, 1  ;;  %v1188_v47 = vshrl.u32 %v4169_v41, 16  ;;  %v1190_v48 = vshll.u32 %v4169_v41, 16  ;;  %3762 = vmatpush1.bf16.msra.mxu1 %v3851_v54  ;;  %1713 = vmatpush1.bf16.msra.mxu0 %v3851_v54 }
  0x29   : > { %v998_v49 = vld [vmem:[#allocation2 + $0x1c] sm:$0xf]  ;;  %v1195_v50 = vshll.u32 %v4171_v42, 16  ;;  %v4178_v51 = vcombine.low %v1013_v36, %v1014_v43  ;;  %v3802_v52 = vld [vmem:[#allocation2 + $0x80] ss:$0 sps:$4 sm:$0x11]   ;;  %3751 = vmatprep.subr.bf16.mxu1 %v5236_v1  ;;  %1714 = vmatprep.subr.bf16.mxu0 %v5236_v1 }
  0x2a   : > { %v4180_v53 = vcombine.low %v997_v44, %v998_v49  ;;  %v1289_v55 = vor.u32 %v1288_v45, %v1284_v38  ;;  %v1192_v56 = vrot.slane %v1190_v48, 1  ;;  %v3804_v57 = vld [vmem:[#allocation2 + $0x20] ss:$0 sps:$4 sm:$0x11]   ;;  %v1015_v58 = vld [vmem:[#allocation2 + $0x84] sm:$0xf] }
  0x2b   : > { %v1197_v59 = vrot.slane %v1195_v50, 1  ;;  %v1296_v60 = vshrl.u32 %v4178_v51, 16  ;;  %v1298_v61 = vshll.u32 %v4178_v51, 16  ;;  %v1303_v62 = vshll.u32 %v3802_v52, 16  ;;  %v1016_v63 = vld [vmem:[#allocation2 + $0x88] sm:$0xf] }
  0x2c   : > { %v1294_v0 = vsel %vm599_vm2, %v1289_v55, %v1293_v46  ;;  %v1193_v2 = vor.u32 %v1192_v56, %v1188_v47  ;;  %v1200_v3 = vshrl.u32 %v4180_v53, 16  ;;  %v1202_v4 = vshll.u32 %v4180_v53, 16  ;;  %v999_v5 = vld [vmem:[#allocation2 + $0x24] sm:$0xf]  ;;  %v1000_v13 = vld [vmem:[#allocation2 + $0x28] sm:$0xf]  ;;  %3763 = vmatpush1.bf16.msra.mxu1 %v3854_v14  ;;  %1715 = vmatpush1.bf16.msra.mxu0 %v3854_v14 }
  0x2d   : > { %1395 = vrot.lane.b32.xlu0 %v1294_v0, %s4026_s11  ;;  %v1300_v6 = vrot.slane %v1298_v61, 1  ;;  %v1305_v7 = vrot.slane %v1303_v62, 1  ;;  %v1207_v8 = vshll.u32 %v3804_v57, 16  ;;  %v4193_v9 = vcombine.low %v1015_v58, %v1016_v63  ;;  %v3806_v10 = vld [vmem:[#allocation2 + $0x8c] ss:$0 sps:$4 sm:$0x11]   ;;  %3752 = vmatprep.subr.bf16.mxu1 %v5236_v1 }
  0x2e   : > { %v1198_v11 = vsel %vm599_vm2, %v1193_v2, %v1197_v59  ;;  %v1204_v12 = vrot.slane %v1202_v4, 1  ;;  %v3808_v19 = vld [vmem:[#allocation2 + $0x2c] ss:$0 sps:$4 sm:$0x11]   ;;  %v1315_v21 = vshll.u32 %v3806_v10, 16  ;;  %v4201_v22 = vcombine.low %v999_v5, %v1000_v13  ;;  %v3857_v46 = vld [vmem:[%s5233_s2 + $0xa0] sm:$0xff]   ;;  %1716 = vmatprep.subr.bf16.mxu0 %v5236_v1 }
  0x2f   : > { %v1301_v15 = vor.u32 %v1300_v6, %v1296_v60  ;;  %v1209_v16 = vrot.slane %v1207_v8, 1  ;;  %v1308_v17 = vshrl.u32 %v4193_v9, 16  ;;  %v1310_v18 = vshll.u32 %v4193_v9, 16  ;;  %v1017_v23 = vld [vmem:[#allocation2 + $0x90] sm:$0xf] }
  0x30   : > { %v1205_v20 = vor.u32 %v1204_v12, %v1200_v3  ;;  %v1018_v24 = vld [vmem:[#allocation2 + $0x94] sm:$0xf]  ;;  %v1219_v27 = vshll.u32 %v3808_v19, 16  ;;  %v1001_v29 = vld [vmem:[#allocation2 + $0x30] sm:$0xf]  ;;  %v1317_v34 = vrot.slane %v1315_v21, 1  ;;  %3764 = vmatpush1.bf16.msra.mxu1 %v3857_v46  ;;  %1717 = vmatpush1.bf16.msra.mxu0 %v3857_v46 }
  0x31   : > { %1379 = vrot.lane.b32.xlu0 %v1198_v11, %s4026_s11  ;;  %v1306_v25 = vsel %vm599_vm2, %v1301_v15, %v1305_v7  ;;  %v1312_v26 = vrot.slane %v1310_v18, 1  ;;  %v4207_v28 = vcombine.low %v1017_v23, %v1018_v24  ;;  %v1212_v36 = vshrl.u32 %v4201_v22, 16  ;;  %v3810_v38 = vld [vmem:[#allocation2 + $0x98] ss:$0 sps:$4 sm:$0x11]   ;;  %v3860_v3 = vld [vmem:[%s5233_s2 + $0xa8] sm:$0xff]   ;;  %3753 = vmatprep.subr.bf16.mxu1 %v5236_v1 }
  0x32   : > { %1397 = vrot.lane.b32.xlu1 %v1306_v25, %s4026_s11  ;;  %v1210_v30 = vsel %vm599_vm2, %v1205_v20, %v1209_v16  ;;  %v1214_v37 = vshll.u32 %v4201_v22, 16  ;;  %v1221_v40 = vrot.slane %v1219_v27, 1  ;;  %v1002_v45 = vld [vmem:[#allocation2 + $0x34] sm:$0xf]  ;;  %v1327_v48 = vshll.u32 %v3810_v38, 16  ;;  %1718 = vmatprep.subr.bf16.mxu0 %v5236_v1 }
  0x33   : > { %v1313_v39 = vor.u32 %v1312_v26, %v1308_v17  ;;  %v1320_v43 = vshrl.u32 %v4207_v28, 16  ;;  %v1322_v44 = vshll.u32 %v4207_v28, 16  ;;  %v4218_v49 = vcombine.low %v1001_v29, %v1002_v45  ;;  %v335_v50 = vld [vmem:[%s4088_s26 + $0x9c] sm:$0xf]  ;;  %v336_v56 = vld [vmem:[%s4088_s26 + $0xa0] sm:$0xf] }
  0x34   : > { %v1216_v47 = vrot.slane %v1214_v37, 1  ;;  %v3812_v55 = vld [vmem:[#allocation2 + $0x38] ss:$0 sps:$4 sm:$0x11]   ;;  %385 = vst.msk [vmem:[#allocation2 + $0x9c] sm:$0xf] %vm344_vm0, %v335_v50  ;;  %3765 = vmatpush1.bf16.msra.mxu1 %v3860_v3  ;;  %1719 = vmatpush1.bf16.msra.mxu0 %v3860_v3 }
  0x35   : > { %v1318_v52 = vsel %vm599_vm2, %v1313_v39, %v1317_v34  ;;  %v1324_v54 = vrot.slane %v1322_v44, 1  ;;  %v1329_v58 = vrot.slane %v1327_v48, 1  ;;  %v1224_v59 = vshrl.u32 %v4218_v49, 16  ;;  %v337_v61 = vld [vmem:[%s4088_s26 + $0xa4] sm:$0x1]  ;;  %v3863_v13 = vld [vmem:[%s5233_s2 + $0xb0] sm:$0xff]   ;;  %3754 = vmatprep.subr.bf16.mxu1 %v5236_v1  ;;  %1720 = vmatprep.subr.bf16.mxu0 %v5236_v1 }
  0x36   : > { %1381 = vrot.lane.b32.xlu1 %v1210_v30, %s4026_s11  ;;  %1399 = vrot.lane.b32.xlu0 %v1318_v52, %s4026_s11  ;;  %v1217_v57 = vor.u32 %v1216_v47, %v1212_v36  ;;  %v1226_v60 = vshll.u32 %v4218_v49, 16  ;;  %386 = vst.msk [vmem:[#allocation2 + $0xa0] sm:$0xf] %vm344_vm0, %v336_v56  ;;  %v1231_v63 = vshll.u32 %v3812_v55, 16  ;;  %v311_v0 = vld [vmem:[%s4088_s26 + $0x3c] sm:$0xf] }
  0x37   : > { %v1325_v62 = vor.u32 %v1324_v54, %v1320_v43  ;;  %387 = vst.msk [vmem:[#allocation2 + $0xa4] sm:$0x1] %vm347_vm1, %v337_v61  ;;  %v312_v2 = vld [vmem:[%s4088_s26 + $0x40] sm:$0xf]  ;;  %v313_v6 = vld [vmem:[%s4088_s26 + $0x44] sm:$0x1] }
  0x38   : > { %v1222_v4 = vsel %vm599_vm2, %v1217_v57, %v1221_v40  ;;  %v1228_v5 = vrot.slane %v1226_v60, 1  ;;  %361 = vst.msk [vmem:[#allocation2 + $0x3c] sm:$0xf] %vm344_vm0, %v311_v0  ;;  %362 = vst.msk [vmem:[#allocation2 + $0x40] sm:$0xf] %vm344_vm0, %v312_v2  ;;  %v1233_v10 = vrot.slane %v1231_v63, 1  ;;  %3766 = vmatpush1.bf16.msra.mxu1 %v3863_v13  ;;  %1721 = vmatpush1.bf16.msra.mxu0 %v3863_v13 }
  0x39   : > { %v338_v7 = vld [vmem:[%s4088_s26 + $0xa8] sm:$0xf]  ;;  %v1330_v8 = vsel %vm599_vm2, %v1325_v62, %v1329_v58  ;;  %363 = vst.msk [vmem:[#allocation2 + $0x44] sm:$0x1] %vm347_vm1, %v313_v6  ;;  %v339_v11 = vld [vmem:[%s4088_s26 + $0xac] sm:$0xf]  ;;  %3755 = vmatprep.subr.bf16.mxu1 %v5236_v1  ;;  %1722 = vmatprep.subr.bf16.mxu0 %v5236_v1 }
  0x3a   : > { %v340_v12 = vld [vmem:[%s4088_s26 + $0xb0] sm:$0x1]  ;;  %388 = vst.msk [vmem:[#allocation2 + $0xa8] sm:$0xf] %vm344_vm0, %v338_v7  ;;  %1383 = vrot.lane.b32.xlu1 %v1222_v4, %s4026_s11  ;;  %1401 = vrot.lane.b32.xlu0 %v1330_v8, %s4026_s11  ;;  %v1229_v14 = vor.u32 %v1228_v5, %v1224_v59  ;;  %389 = vst.msk [vmem:[#allocation2 + $0xac] sm:$0xf] %vm344_vm0, %v339_v11 }
  0x3b   : > { %390 = vst.msk [vmem:[#allocation2 + $0xb0] sm:$0x1] %vm347_vm1, %v340_v12  ;;  %v314_v15 = vld [vmem:[%s4088_s26 + $0x48] sm:$0xf]  ;;  %v315_v16 = vld [vmem:[%s4088_s26 + $0x4c] sm:$0xf] }
  0x3c   : > { %v316_v17 = vld [vmem:[%s4088_s26 + $0x50] sm:$0x1]  ;;  %364 = vst.msk [vmem:[#allocation2 + $0x48] sm:$0xf] %vm344_vm0, %v314_v15  ;;  %365 = vst.msk [vmem:[#allocation2 + $0x4c] sm:$0xf] %vm344_vm0, %v315_v16  ;;  %v1234_v20 = vsel %vm599_vm2, %v1229_v14, %v1233_v10 }
  0x3d   : > { %v341_v18 = vld [vmem:[%s4088_s26 + $0xb4] sm:$0xf]  ;;  %v342_v19 = vld [vmem:[%s4088_s26 + $0xb8] sm:$0xf]  ;;  %v1019_v21 = vld [vmem:[#allocation2 + $0x9c] sm:$0xf] }
  0x3e   : > { %366 = vst.msk [vmem:[#allocation2 + $0x50] sm:$0x1] %vm347_vm1, %v316_v17  ;;  %v343_v23 = vld [vmem:[%s4088_s26 + $0xbc] sm:$0x1]  ;;  %v317_v24 = vld [vmem:[%s4088_s26 + $0x54] sm:$0xf]  ;;  %1385 = vrot.lane.b32.xlu1 %v1234_v20, %s4026_s11 }
  0x3f   : > { %391 = vst.msk [vmem:[#allocation2 + $0xb4] sm:$0xf] %vm344_vm0, %v341_v18  ;;  %392 = vst.msk [vmem:[#allocation2 + $0xb8] sm:$0xf] %vm344_vm0, %v342_v19  ;;  %v1020_v25 = vld [vmem:[#allocation2 + $0xa0] sm:$0xf] }
  0x40   : > { %393 = vst.msk [vmem:[#allocation2 + $0xbc] sm:$0x1] %vm347_vm1, %v343_v23  ;;  %v318_v26 = vld [vmem:[%s4088_s26 + $0x58] sm:$0xf]  ;;  %v319_v27 = vld [vmem:[%s4088_s26 + $0x5c] sm:$0x1]  ;;  %v4287_v29 = vcombine.low %v1019_v21, %v1020_v25 }
  0x41   : > { %367 = vst.msk [vmem:[#allocation2 + $0x54] sm:$0xf] %vm344_vm0, %v317_v24  ;;  %v3814_v30 = vld [vmem:[#allocation2 + $0xa4] ss:$0 sps:$4 sm:$0x11]   ;;  %v3866_v34 = vld [vmem:[%s5233_s2 + $0xb8] sm:$0xff]  }
  0x42   : > { %368 = vst.msk [vmem:[#allocation2 + $0x58] sm:$0xf] %vm344_vm0, %v318_v26  ;;  %v1003_v36 = vld [vmem:[#allocation2 + $0x3c] sm:$0xf]  ;;  %v1004_v37 = vld [vmem:[#allocation2 + $0x40] sm:$0xf]  ;;  %3767 = vmatpush1.bf16.msra.mxu1 %v3866_v34  ;;  %1723 = vmatpush1.bf16.msra.mxu0 %v3866_v34 }
  0x43   : > { %369 = vst.msk [vmem:[#allocation2 + $0x5c] sm:$0x1] %vm347_vm1, %v319_v27  ;;  %v394_v38 = vld [vmem:[%s4278_s28] sm:$0xf]  ;;  %v1332_v39 = vshrl.u32 %v4287_v29, 16  ;;  %v1334_v40 = vshll.u32 %v4287_v29, 16  ;;  %v4297_v44 = vcombine.low %v1003_v36, %v1004_v37  ;;  %1981 = vmatprep.subr.bf16.mxu1 %v5236_v1  ;;  %2848 = vmatprep.subr.bf16.mxu0 %v5236_v1 }
  0x44   : > { %v1339_v43 = vshll.u32 %v3814_v30, 16  ;;  %401 = vst.msk [vmem:[#allocation2 + $0xc0] sm:$0xf] %vm344_vm0, %v394_v38  ;;  %v3816_v45 = vld [vmem:[#allocation2 + $0x44] ss:$0 sps:$4 sm:$0x11]  }
  0x45   : > { %v1021_v46 = vld [vmem:[#allocation2 + $0xa8] sm:$0xf]  ;;  %v1336_v47 = vrot.slane %v1334_v40, 1  ;;  %v1236_v50 = vshrl.u32 %v4297_v44, 16  ;;  %v1238_v52 = vshll.u32 %v4297_v44, 16  ;;  %v1243_v55 = vshll.u32 %v3816_v45, 16 }
  0x46   : > { %v1341_v48 = vrot.slane %v1339_v43, 1  ;;  %v1022_v54 = vld [vmem:[#allocation2 + $0xac] sm:$0xf]  ;;  %v3818_v57 = vld [vmem:[#allocation2 + $0xb0] ss:$0 sps:$4 sm:$0x11]  }
  0x47   : > { %v4304_v56 = vcombine.low %v1021_v46, %v1022_v54  ;;  %v1337_v58 = vor.u32 %v1336_v47, %v1332_v39  ;;  %v1240_v59 = vrot.slane %v1238_v52, 1  ;;  %v1005_v60 = vld [vmem:[#allocation2 + $0x48] sm:$0xf]  ;;  %v1006_v61 = vld [vmem:[#allocation2 + $0x4c] sm:$0xf]  ;;  %v1245_v62 = vrot.slane %v1243_v55, 1 }
  0x48   : > { %v1351_v2 = vshll.u32 %v3818_v57, 16  ;;  %v4311_v5 = vcombine.low %v1005_v60, %v1006_v61  ;;  %v3820_v6 = vld [vmem:[#allocation2 + $0x50] ss:$0 sps:$4 sm:$0x11]   ;;  %v1023_v7 = vld [vmem:[#allocation2 + $0xb4] sm:$0xf] }
  0x49   : > { %v1344_v63 = vshrl.u32 %v4304_v56, 16  ;;  %v1346_v0 = vshll.u32 %v4304_v56, 16  ;;  %v1342_v3 = vsel %vm599_vm2, %v1337_v58, %v1341_v48  ;;  %v1241_v4 = vor.u32 %v1240_v59, %v1236_v50  ;;  %v1024_v11 = vld [vmem:[#allocation2 + $0xb8] sm:$0xf]  ;;  %v1007_v19 = vld [vmem:[#allocation2 + $0x54] sm:$0xf] }
  0x4a   : > { %1403 = vrot.lane.b32.xlu0 %v1342_v3, %s4026_s11  ;;  %v1353_v10 = vrot.slane %v1351_v2, 1  ;;  %v1248_v13 = vshrl.u32 %v4311_v5, 16  ;;  %v1250_v14 = vshll.u32 %v4311_v5, 16  ;;  %v1255_v15 = vshll.u32 %v3820_v6, 16  ;;  %v1008_v20 = vld [vmem:[#allocation2 + $0x58] sm:$0xf] }
  0x4b   : > { %v1348_v8 = vrot.slane %v1346_v0, 1  ;;  %v1246_v12 = vsel %vm599_vm2, %v1241_v4, %v1245_v62  ;;  %v3822_v16 = vld [vmem:[#allocation2 + $0xbc] ss:$0 sps:$4 sm:$0x11]   ;;  %v4318_v18 = vcombine.low %v1023_v7, %v1024_v11  ;;  %v4320_v25 = vcombine.low %v1007_v19, %v1008_v20  ;;  %v395_v36 = vld [vmem:[%s4278_s28 + $0x4] sm:$0xf] }
  0x4c   : > { %1387 = vrot.lane.b32.xlu1 %v1246_v12, %s4026_s11  ;;  %v1252_v21 = vrot.slane %v1250_v14, 1  ;;  %v1257_v23 = vrot.slane %v1255_v15, 1  ;;  %v1363_v24 = vshll.u32 %v3822_v16, 16  ;;  %v3824_v26 = vld [vmem:[#allocation2 + $0x5c] ss:$0 sps:$4 sm:$0x11]  }
  0x4d   : > { %v1349_v17 = vor.u32 %v1348_v8, %v1344_v63  ;;  %v1356_v30 = vshrl.u32 %v4318_v18, 16  ;;  %v1358_v34 = vshll.u32 %v4318_v18, 16  ;;  %v396_v37 = vld [vmem:[%s4278_s28 + $0x8] sm:$0x1]  ;;  %v1260_v40 = vshrl.u32 %v4320_v25, 16 }
  0x4e   : > { %v1253_v38 = vor.u32 %v1252_v21, %v1248_v13  ;;  %v1365_v39 = vrot.slane %v1363_v24, 1  ;;  %v1262_v43 = vshll.u32 %v4320_v25, 16  ;;  %402 = vst.msk [vmem:[#allocation2 + $0xc4] sm:$0xf] %vm344_vm0, %v395_v36  ;;  %v2143_v45 = vld [vmem:[#allocation2 + $0x18] sm:$0xf] }
  0x4f   : > { %v1354_v27 = vsel %vm599_vm2, %v1349_v17, %v1353_v10  ;;  %403 = vst.msk [vmem:[#allocation2 + $0xc8] sm:$0x1] %vm347_vm1, %v396_v37  ;;  %v1360_v46 = vrot.slane %v1358_v34, 1  ;;  %v1267_v47 = vshll.u32 %v3824_v26, 16  ;;  %v320_v48 = vld [vmem:[%s4088_s26 + $0x60] sm:$0xf] }
  0x50   : > { %1405 = vrot.lane.b32.xlu0 %v1354_v27, %s4026_s11  ;;  %v321_v50 = vld [vmem:[%s4088_s26 + $0x64] sm:$0xf]  ;;  %v1258_v52 = vsel %vm599_vm2, %v1253_v38, %v1257_v23  ;;  %v1264_v54 = vrot.slane %v1262_v43, 1  ;;  %v322_v55 = vld [vmem:[%s4088_s26 + $0x68] sm:$0x1] }
  0x51   : > { %370 = vst.msk [vmem:[#allocation2 + $0x60] sm:$0xf] %vm344_vm0, %v320_v48  ;;  %371 = vst.msk [vmem:[#allocation2 + $0x64] sm:$0xf] %vm344_vm0, %v321_v50  ;;  %v296_v57 = vld [vmem:[%s4088_s26] sm:$0xf]  ;;  %1389 = vrot.lane.b32.xlu1 %v1258_v52, %s4026_s11  ;;  %v1361_v58 = vor.u32 %v1360_v46, %v1356_v30 }
  0x52   : > { %v1269_v59 = vrot.slane %v1267_v47, 1  ;;  %v1025_v60 = vld [vmem:[#allocation2 + $0xc0] sm:$0xf]  ;;  %372 = vst.msk [vmem:[#allocation2 + $0x68] sm:$0x1] %vm347_vm1, %v322_v55  ;;  %v1265_v63 = vor.u32 %v1264_v54, %v1260_v40 }
  0x53   : > { %v297_v61 = vld [vmem:[%s4088_s26 + $0x4] sm:$0xf]  ;;  %v298_v62 = vld [vmem:[%s4088_s26 + $0x8] sm:$0x1]  ;;  %345 = vst.msk [vmem:[#allocation2] sm:$0xf] %vm344_vm0, %v296_v57  ;;  %v1366_v3 = vsel %vm599_vm2, %v1361_v58, %v1365_v39 }
  0x54   : > { %346 = vst.msk [vmem:[#allocation2 + $0x4] sm:$0xf] %vm344_vm0, %v297_v61  ;;  %v2144_v0 = vld [vmem:[#allocation2 + $0x1c] sm:$0xf]  ;;  %v409_v2 = vld [vmem:[#allocation2 + $0xc] sm:$0xf]  ;;  %1407 = vrot.lane.b32.xlu0 %v1366_v3, %s4026_s11  ;;  %v1270_v8 = vsel %vm599_vm2, %v1265_v63, %v1269_v59 }
  0x55   : > { %348 = vst.msk [vmem:[#allocation2 + $0x8] sm:$0x1] %vm347_vm1, %v298_v62  ;;  %v4347_v4 = vcombine.low %v2143_v45, %v2144_v0  ;;  %v3832_v6 = vld [vmem:[#allocation2 + $0x20] ss:$0 sps:$4 sm:$0x11]   ;;  %1391 = vrot.lane.b32.xlu1 %v1270_v8, %s4026_s11 }
  0x56   : > { %v410_v7 = vld [vmem:[#allocation2 + $0x10] sm:$0xf]  ;;  %v3835_v11 = vld [vmem:[#allocation2 + $0x14] ss:$0 sps:$4 sm:$0x11]   ;;  %v2343_v17 = vshll.u32 %v3832_v6, 16 }
  0x57   : > { %v4351_v10 = vcombine.low %v409_v2, %v410_v7  ;;  %v1026_v12 = vld [vmem:[#allocation2 + $0xc4] sm:$0xf]  ;;  %v2338_v13 = vshll.u32 %v4347_v4, 16  ;;  %v3826_v15 = vld [vmem:[#allocation2 + $0xc8] ss:$0 sps:$4 sm:$0x11]  }
  0x58   : > { %v4355_v14 = vcombine.low %v1025_v60, %v1026_v12  ;;  %v2336_v16 = vshrl.u32 %v4347_v4, 16  ;;  %v1009_v20 = vld [vmem:[#allocation2 + $0x60] sm:$0xf]  ;;  %v1010_v21 = vld [vmem:[#allocation2 + $0x64] sm:$0xf]  ;;  %v1375_v30 = vshll.u32 %v3826_v15, 16 }
  0x59   : > { %v613_v19 = vshrl.u32 %v4351_v10, 16  ;;  %v2340_v23 = vrot.slane %v2338_v13, 1  ;;  %v615_v24 = vshll.u32 %v4351_v10, 16  ;;  %v4362_v34 = vcombine.low %v1009_v20, %v1010_v21  ;;  %v3828_v36 = vld [vmem:[#allocation2 + $0x68] ss:$0 sps:$4 sm:$0x11]  }
  0x5a   : > { %v1368_v26 = vshrl.u32 %v4355_v14, 16  ;;  %v1370_v27 = vshll.u32 %v4355_v14, 16  ;;  %v407_v37 = vld [vmem:[#allocation2] sm:$0xf]  ;;  %v620_v38 = vshll.u32 %v3835_v11, 16  ;;  %v1377_v40 = vrot.slane %v1375_v30, 1 }
  0x5b   : > { %v1272_v43 = vshrl.u32 %v4362_v34, 16  ;;  %v1274_v45 = vshll.u32 %v4362_v34, 16  ;;  %v408_v46 = vld [vmem:[#allocation2 + $0x4] sm:$0xf]  ;;  %v1279_v47 = vshll.u32 %v3828_v36, 16  ;;  %v2341_v52 = vor.u32 %v2340_v23, %v2336_v16 }
  0x5c   : > { %v1372_v39 = vrot.slane %v1370_v27, 1  ;;  %v4366_v48 = vcombine.low %v407_v37, %v408_v46  ;;  %v3830_v50 = vld [vmem:[#allocation2 + $0x8] ss:$0 sps:$4 sm:$0x11]   ;;  %v2345_v57 = vrot.slane %v2343_v17, 1  ;;  %v617_v58 = vrot.slane %v615_v24, 1 }
  0x5d   : > { %v1276_v55 = vrot.slane %v1274_v45, 1  ;;  %v2145_v59 = vld [vmem:[#allocation2 + $0x24] sm:$0xf]  ;;  %v1281_v60 = vrot.slane %v1279_v47, 1  ;;  %v608_v63 = vshll.u32 %v3830_v50, 16  ;;  %v622_v6 = vrot.slane %v620_v38, 1 }
  0x5e   : > { %v1373_v54 = vor.u32 %v1372_v39, %v1368_v26  ;;  %v601_v61 = vshrl.u32 %v4366_v48, 16  ;;  %v603_v62 = vshll.u32 %v4366_v48, 16  ;;  %v2146_v0 = vld [vmem:[#allocation2 + $0x28] sm:$0xf]  ;;  %v411_v13 = vld [vmem:[#allocation2 + $0x18] sm:$0xf]  ;;  %v618_v24 = vor.u32 %v617_v58, %v613_v19 }
  0x5f   : > { %v1277_v3 = vor.u32 %v1276_v55, %v1272_v43  ;;  %v4371_v7 = vcombine.low %v2145_v59, %v2146_v0  ;;  %v3838_v8 = vld [vmem:[#allocation2 + $0x2c] ss:$0 sps:$4 sm:$0x11]   ;;  %v610_v12 = vrot.slane %v608_v63, 1  ;;  %v412_v15 = vld [vmem:[#allocation2 + $0x1c] sm:$0xf]  ;;  %v2346_v37 = vsel %vm599_vm2, %v2341_v52, %v2345_v57 }
  0x60   : > { %v1378_v2 = vsel %vm599_vm2, %v1373_v54, %v1377_v40  ;;  %v605_v11 = vrot.slane %v603_v62, 1  ;;  %v2147_v21 = vld [vmem:[#allocation2 + $0x30] sm:$0xf]  ;;  %v2355_v26 = vshll.u32 %v3838_v8, 16  ;;  %v4378_v27 = vcombine.low %v411_v13, %v412_v15  ;;  %v2148_v36 = vld [vmem:[#allocation2 + $0x34] sm:$0xf] }
  0x61   : > { %1409 = vrot.lane.b32.xlu0 %v1378_v2, %s4026_s11  ;;  %v1282_v16 = vsel %vm599_vm2, %v1277_v3, %v1281_v60  ;;  %v2348_v17 = vshrl.u32 %v4371_v7, 16  ;;  %v2350_v20 = vshll.u32 %v4371_v7, 16  ;;  %v3841_v30 = vld [vmem:[#allocation2 + $0x20] ss:$0 sps:$4 sm:$0x11]   ;;  %v4381_v39 = vcombine.low %v2147_v21, %v2148_v36 }
  0x62   : > { %1393 = vrot.lane.b32.xlu1 %v1282_v16, %s4026_s11  ;;  %v606_v23 = vor.u32 %v605_v11, %v601_v61  ;;  %v3844_v40 = vld [vmem:[#allocation2 + $0x38] ss:$0 sps:$4 sm:$0x11]   ;;  %v2357_v45 = vrot.slane %v2355_v26, 1  ;;  %v625_v46 = vshrl.u32 %v4378_v27, 16  ;;  %v627_v47 = vshll.u32 %v4378_v27, 16 }
  0x63   : > { %v2352_v38 = vrot.slane %v2350_v20, 1  ;;  %v413_v50 = vld [vmem:[#allocation2 + $0x24] sm:$0xf]  ;;  %v632_v54 = vshll.u32 %v3841_v30, 16  ;;  %v2360_v55 = vshrl.u32 %v4381_v39, 16  ;;  %v2362_v52 = vshll.u32 %v4381_v39, 16 }
  0x64   : > { %v611_v43 = vsel %vm599_vm2, %v606_v23, %v610_v12  ;;  %v414_v57 = vld [vmem:[#allocation2 + $0x28] sm:$0xf]  ;;  %v623_v58 = vsel %vm599_vm2, %v618_v24, %v622_v6  ;;  %v629_v59 = vrot.slane %v627_v47, 1  ;;  %v2367_v60 = vshll.u32 %v3844_v40, 16  ;;  %v2149_v62 = vld [vmem:[#allocation2 + $0x3c] sm:$0xf] }
  0x65   : > { %792 = vrot.lane.b32.xlu0 %v611_v43, %s4026_s11  ;;  %v2353_v19 = vor.u32 %v2352_v38, %v2348_v17  ;;  %v4391_v61 = vcombine.low %v413_v50, %v414_v57  ;;  %v634_v0 = vrot.slane %v632_v54, 1  ;;  %v2364_v2 = vrot.slane %v2362_v52, 1  ;;  %v3847_v3 = vld [vmem:[#allocation2 + $0x2c] ss:$0 sps:$4 sm:$0x11]  }
  0x66   : > { %2527 = vrot.lane.b32.xlu1 %v2346_v37, %s4026_s11  ;;  %v630_v8 = vor.u32 %v629_v59, %v625_v46  ;;  %v2369_v11 = vrot.slane %v2367_v60, 1  ;;  %v2150_v15 = vld [vmem:[#allocation2 + $0x40] sm:$0xf]  ;;  %v644_v16 = vshll.u32 %v3847_v3, 16  ;;  %v415_v37 = vld [vmem:[#allocation2 + $0x30] sm:$0xf] }
  0x67   : > { %v2358_v63 = vsel %vm599_vm2, %v2353_v19, %v2357_v45  ;;  %v637_v12 = vshrl.u32 %v4391_v61, 16  ;;  %v639_v13 = vshll.u32 %v4391_v61, 16  ;;  %v2365_v6 = vor.u32 %v2364_v2, %v2360_v55  ;;  %v3850_v20 = vld [vmem:[#allocation2 + $0x44] ss:$0 sps:$4 sm:$0x11]  }
  0x68   : > { %v4397_v17 = vcombine.low %v2149_v62, %v2150_v15  ;;  %v635_v21 = vsel %vm599_vm2, %v630_v8, %v634_v0  ;;  %v646_v26 = vrot.slane %v644_v16, 1  ;;  %v2379_v40 = vshll.u32 %v3850_v20, 16  ;;  %v416_v43 = vld [vmem:[#allocation2 + $0x34] sm:$0xf]  ;;  %v2151_v54 = vld [vmem:[#allocation2 + $0x48] sm:$0xf] }
  0x69   : > { %794 = vrot.lane.b32.xlu0 %v623_v58, %s4026_s11  ;;  %v641_v23 = vrot.slane %v639_v13, 1  ;;  %v2370_v24 = vsel %vm599_vm2, %v2365_v6, %v2369_v11  ;;  %v4405_v46 = vcombine.low %v415_v37, %v416_v43  ;;  %v3853_v47 = vld [vmem:[#allocation2 + $0x38] ss:$0 sps:$4 sm:$0x11]   ;;  %v2152_v59 = vld [vmem:[#allocation2 + $0x4c] sm:$0xf] }
  0x6a   : > { %2529 = vrot.lane.b32.xlu1 %v2358_v63, %s4026_s11  ;;  %v2372_v30 = vshrl.u32 %v4397_v17, 16  ;;  %v2374_v36 = vshll.u32 %v4397_v17, 16  ;;  %v2381_v19 = vrot.slane %v2379_v40, 1  ;;  %v656_v58 = vshll.u32 %v3853_v47, 16  ;;  %v418_v15 = vld [vmem:[#allocation2 + $0x40] sm:$0xf] }
  0x6b   : > { %v642_v38 = vor.u32 %v641_v23, %v637_v12  ;;  %v649_v52 = vshrl.u32 %v4405_v46, 16  ;;  %v651_v57 = vshll.u32 %v4405_v46, 16  ;;  %v4411_v60 = vcombine.low %v2151_v54, %v2152_v59  ;;  %v3856_v62 = vld [vmem:[#allocation2 + $0x50] ss:$0 sps:$4 sm:$0x11]  }
  0x6c   : > { %v2376_v45 = vrot.slane %v2374_v36, 1  ;;  %v658_v2 = vrot.slane %v656_v58, 1  ;;  %v2391_v11 = vshll.u32 %v3856_v62, 16  ;;  %v417_v12 = vld [vmem:[#allocation2 + $0x3c] sm:$0xf] }
  0x6d   : > { %796 = vrot.lane.b32.xlu0 %v635_v21, %s4026_s11  ;;  %v647_v50 = vsel %vm599_vm2, %v642_v38, %v646_v26  ;;  %5259 = vst [vmem:[#allocation3_spill] sm:$0xff] %v4411_v60  ;;  %v653_v0 = vrot.slane %v651_v57, 1  ;;  %v2384_v3 = vshrl.u32 %v4411_v60, 16  ;;  %v2386_v8 = vshll.u32 %v4411_v60, 16  ;;  %v2154_v26 = vld [vmem:[#allocation2 + $0x58] sm:$0xf] }
  0x6e   : > { %2531 = vrot.lane.b32.xlu1 %v2370_v24, %s4026_s11  ;;  %v2377_v55 = vor.u32 %v2376_v45, %v2372_v30  ;;  %v2393_v16 = vrot.slane %v2391_v11, 1  ;;  %v4418_v20 = vcombine.low %v417_v12, %v418_v15  ;;  %v3859_v21 = vld [vmem:[#allocation2 + $0x44] ss:$0 sps:$4 sm:$0x11]   ;;  %v2153_v24 = vld [vmem:[#allocation2 + $0x54] sm:$0xf] }
  0x6f   : > { %v654_v13 = vor.u32 %v653_v0, %v649_v52  ;;  %v2388_v6 = vrot.slane %v2386_v8, 1  ;;  %v668_v38 = vshll.u32 %v3859_v21, 16  ;;  %v4424_v40 = vcombine.low %v2153_v24, %v2154_v26  ;;  %v3862_v43 = vld [vmem:[#allocation2 + $0x5c] ss:$0 sps:$4 sm:$0x11]  }
  0x70   : > { %v2382_v63 = vsel %vm599_vm2, %v2377_v55, %v2381_v19  ;;  %5260 = vst [vmem:[#allocation4_spill] sm:$0xff] %v4418_v20  ;;  %v661_v36 = vshrl.u32 %v4418_v20, 16  ;;  %v663_v37 = vshll.u32 %v4418_v20, 16  ;;  %v419_v19 = vld [vmem:[#allocation2 + $0x48] sm:$0xf]  ;;  %v2403_v52 = vshll.u32 %v3862_v43, 16 }
  0x71   : > { %798 = vrot.lane.b32.xlu0 %v647_v50, %s4026_s11  ;;  %v659_v23 = vsel %vm599_vm2, %v654_v13, %v658_v2  ;;  %v2389_v30 = vor.u32 %v2388_v6, %v2384_v3  ;;  %5261 = vst [vmem:[#allocation5_spill] sm:$0xff] %v4424_v40  ;;  %v670_v50 = vrot.slane %v668_v38, 1  ;;  %v2396_v54 = vshrl.u32 %v4424_v40, 16  ;;  %v420_v57 = vld [vmem:[#allocation2 + $0x4c] sm:$0xf] }
  0x72   : > { %2533 = vrot.lane.b32.xlu1 %v2382_v63, %s4026_s11  ;;  %v665_v47 = vrot.slane %v663_v37, 1  ;;  %v2398_v55 = vshll.u32 %v4424_v40, 16  ;;  %v4430_v59 = vcombine.low %v419_v19, %v420_v57  ;;  %v3865_v62 = vld [vmem:[#allocation2 + $0x50] ss:$0 sps:$4 sm:$0x11]   ;;  %v1484_v63 = vrot.slane %v4156_v33, 1 }
  0x73   : > { %v2394_v45 = vsel %vm599_vm2, %v2389_v30, %v2393_v16  ;;  %v2405_v2 = vrot.slane %v2403_v52, 1  ;;  %v680_v12 = vshll.u32 %v3865_v62, 16  ;;  %v1051_v13 = vld [vmem:[#allocation2 + $0x6c] sm:$0xe]  ;;  %v2155_v16 = vld [vmem:[#allocation2 + $0x60] sm:$0xf] }
  0x74   : > { %v666_v58 = vor.u32 %v665_v47, %v661_v36  ;;  %5262 = vst [vmem:[#allocation6_spill] sm:$0xff] %v4430_v59  ;;  %v2400_v0 = vrot.slane %v2398_v55, 1  ;;  %v673_v8 = vshrl.u32 %v4430_v59, 16  ;;  %v675_v11 = vshll.u32 %v4430_v59, 16  ;;  %v2156_v21 = vld [vmem:[#allocation2 + $0x64] sm:$0xf] }
  0x75   : > { %800 = vrot.lane.b32.xlu0 %v659_v23, %s4026_s11  ;;  %v3486_v6 = vcombine.low %v1051_v13, %v4148_v31  ;;  %v682_v24 = vrot.slane %v680_v12, 1  ;;  %v4438_v33 = vcombine.low %v2155_v16, %v2156_v21  ;;  %v3868_v26 = vld [vmem:[#allocation2 + $0x68] ss:$0 sps:$4 sm:$0x11]   ;;  %v1460_v37 = vrot.slane %v4171_v42, 1 }
  0x76   : > { %2535 = vrot.lane.b32.xlu1 %v2394_v45, %s4026_s11  ;;  %v671_v3 = vsel %vm599_vm2, %v666_v58, %v670_v50  ;;  %v2401_v15 = vor.u32 %v2400_v0, %v2396_v54  ;;  %v677_v23 = vrot.slane %v675_v11, 1  ;;  %v2415_v45 = vshll.u32 %v3868_v26, 16  ;;  %v1043_v47 = vld [vmem:[#allocation2 + $0xc] sm:$0xe]  ;;  %v421_v54 = vld [vmem:[#allocation2 + $0x54] sm:$0xf] }
  0x77   : > { %5263 = vst [vmem:[#allocation7_spill] sm:$0xff] %v4438_v33  ;;  %v1483_v36 = vrot.slane %v3486_v6, 1  ;;  %v2408_v43 = vshrl.u32 %v4438_v33, 16  ;;  %v2410_v31 = vshll.u32 %v4438_v33, 16  ;;  %v3478_v19 = vcombine.low %v1043_v47, %v4160_v35  ;;  %v422_v57 = vld [vmem:[#allocation2 + $0x58] sm:$0xf] }
  0x78   : > { %v2406_v30 = vsel %vm599_vm2, %v2401_v15, %v2405_v2  ;;  %v678_v38 = vor.u32 %v677_v23, %v673_v8  ;;  %v2417_v42 = vrot.slane %v2415_v45, 1  ;;  %v4450_v62 = vcombine.low %v421_v54, %v422_v57  ;;  %v3872_v0 = vld [vmem:[#allocation2 + $0x5c] ss:$0 sps:$4 sm:$0x11]   ;;  %v2158_v12 = vld [vmem:[#allocation2 + $0x70] sm:$0xf] }
  0x79   : > { %802 = vrot.lane.b32.xlu0 %v671_v3, %s4026_s11  ;;  %v1485_v50 = vsel %vm872_vm3, %v1483_v36, %v1484_v63  ;;  %v2412_v52 = vrot.slane %v2410_v31, 1  ;;  %v1459_v58 = vrot.slane %v3478_v19, 1  ;;  %v2157_v3 = vld [vmem:[#allocation2 + $0x6c] sm:$0xf]  ;;  %v692_v11 = vshll.u32 %v3872_v0, 16 }
  0x7a   : > { %2537 = vrot.lane.b32.xlu1 %v2406_v30, %s4026_s11  ;;  %v683_v55 = vsel %vm599_vm2, %v678_v38, %v682_v24  ;;  %3538 = vmatprep.mubr.msk.bf16.mxu1 %vm921_vm4, %v1485_v50  ;;  %5264 = vst [vmem:[#allocation8_spill] sm:$0xff] %v4450_v62  ;;  %v685_v35 = vshrl.u32 %v4450_v62, 16  ;;  %v687_v8 = vshll.u32 %v4450_v62, 16  ;;  %v4457_v15 = vcombine.low %v2157_v3, %v2158_v12  ;;  %v3875_v6 = vld [vmem:[#allocation2 + $0x74] ss:$0 sps:$4 sm:$0x11]  }
  0x7b   : > { %v2413_v2 = vor.u32 %v2412_v52, %v2408_v43  ;;  %v1461_v63 = vsel %vm872_vm3, %v1459_v58, %v1460_v37  ;;  %v694_v21 = vrot.slane %v692_v11, 1  ;;  %v2427_v26 = vshll.u32 %v3875_v6, 16  ;;  %v423_v36 = vld [vmem:[#allocation2 + $0x60] sm:$0xf]  ;;  %v424_v37 = vld [vmem:[#allocation2 + $0x64] sm:$0xf] }
  0x7c   : > { %3530 = vmatprep.mubr.msk.bf16.mxu0 %vm921_vm4, %v1461_v63  ;;  %5265 = vst [vmem:[#allocation9_spill] sm:$0xff] %v4457_v15  ;;  %v689_v16 = vrot.slane %v687_v8, 1  ;;  %v2420_v23 = vshrl.u32 %v4457_v15, 16  ;;  %v2422_v24 = vshll.u32 %v4457_v15, 16  ;;  %v4462_v31 = vcombine.low %v423_v36, %v424_v37  ;;  %v2159_v52 = vld [vmem:[#allocation2 + $0x78] sm:$0xf] }
  0x7d   : > { %804 = vrot.lane.b32.xlu0 %v683_v55, %s4026_s11  ;;  %v2418_v13 = vsel %vm599_vm2, %v2413_v2, %v2417_v42  ;;  %v2429_v43 = vrot.slane %v2427_v26, 1  ;;  %v3878_v45 = vld [vmem:[#allocation2 + $0x68] ss:$0 sps:$4 sm:$0x11]   ;;  %v2160_v0 = vld [vmem:[#allocation2 + $0x7c] sm:$0xf] }
  0x7e   : > { %2539 = vrot.lane.b32.xlu1 %v2418_v13, %s4026_s11  ;;  %v690_v30 = vor.u32 %v689_v16, %v685_v35  ;;  %v2424_v38 = vrot.slane %v2422_v24, 1  ;;  %5266 = vst [vmem:[#allocation10_spill] sm:$0xff] %v4462_v31  ;;  %v697_v19 = vshrl.u32 %v4462_v31, 16  ;;  %v699_v54 = vshll.u32 %v4462_v31, 16  ;;  %v425_v13 = vld [vmem:[#allocation2 + $0x6c] sm:$0xf] }
  0x7f   : > { %v704_v55 = vshll.u32 %v3878_v45, 16  ;;  %v4470_v2 = vcombine.low %v2159_v52, %v2160_v0  ;;  %v3882_v3 = vld [vmem:[#allocation2 + $0x80] ss:$0 sps:$4 sm:$0x11]   ;;  %v426_v6 = vld [vmem:[#allocation2 + $0x70] sm:$0xf] }
  0x80   : > { %v695_v47 = vsel %vm599_vm2, %v690_v30, %v694_v21  ;;  %v2425_v50 = vor.u32 %v2424_v38, %v2420_v23  ;;  %v701_v57 = vrot.slane %v699_v54, 1  ;;  %v2439_v11 = vshll.u32 %v3882_v3, 16  ;;  %v3886_v24 = vld [vmem:[#allocation2 + $0x74] ss:$0 sps:$4 sm:$0x11]  }
  0x81   : > { %806 = vrot.lane.b32.xlu0 %v695_v47, %s4026_s11  ;;  %v706_v58 = vrot.slane %v704_v55, 1  ;;  %5267 = vst [vmem:[#allocation11_spill] sm:$0xff] %v4470_v2  ;;  %v2432_v35 = vshrl.u32 %v4470_v2, 16  ;;  %v2434_v8 = vshll.u32 %v4470_v2, 16  ;;  %v4476_v23 = vcombine.low %v425_v13, %v426_v6  ;;  %v1052_v26 = vld [vmem:[#allocation2 + $0x78] sm:$0xe] }
  0x82   : > { %v2430_v42 = vsel %vm599_vm2, %v2425_v50, %v2429_v43  ;;  %v702_v63 = vor.u32 %v701_v57, %v697_v19  ;;  %v2441_v21 = vrot.slane %v2439_v11, 1  ;;  %v716_v38 = vshll.u32 %v3886_v24, 16  ;;  %v2161_v43 = vld [vmem:[#allocation2 + $0x84] sm:$0xf]  ;;  %v2162_v45 = vld [vmem:[#allocation2 + $0x88] sm:$0xf] }
  0x83   : > { %2541 = vrot.lane.b32.xlu1 %v2430_v42, %s4026_s11  ;;  %v2436_v16 = vrot.slane %v2434_v8, 1  ;;  %5268 = vst [vmem:[#allocation12_spill] sm:$0xff] %v4476_v23  ;;  %v709_v36 = vshrl.u32 %v4476_v23, 16  ;;  %v711_v37 = vshll.u32 %v4476_v23, 16  ;;  %v4481_v54 = vcombine.low %v2161_v43, %v2162_v45  ;;  %v3933_v52 = vld [vmem:[#allocation2 + $0x7c] sm:$0xf] }
  0x84   : > { %v707_v12 = vsel %vm599_vm2, %v702_v63, %v706_v58  ;;  %v718_v19 = vrot.slane %v716_v38, 1  ;;  %v3889_v55 = vld [vmem:[#allocation2 + $0x8c] ss:$0 sps:$4 sm:$0x11]   ;;  %v3487_v42 = vcombine.low %v1052_v26, %v3933_v52  ;;  %v1044_v57 = vld [vmem:[#allocation2 + $0x18] sm:$0xe] }
  0x85   : > { %808 = vrot.lane.b32.xlu0 %v707_v12, %s4026_s11  ;;  %v2437_v30 = vor.u32 %v2436_v16, %v2432_v35  ;;  %v713_v50 = vrot.slane %v711_v37, 1  ;;  %5269 = vst [vmem:[#allocation13_spill] sm:$0xff] %v4481_v54  ;;  %v2444_v0 = vshrl.u32 %v4481_v54, 16  ;;  %v2446_v3 = vshll.u32 %v4481_v54, 16  ;;  %v427_v35 = vld [vmem:[#allocation2 + $0x78] sm:$0xf] }
  0x86   : > { %v2451_v63 = vshll.u32 %v3889_v55, 16  ;;  %v4486_v8 = vld [vmem:[#allocation2 + $0x7c] sm:$0xf]  ;;  %v4492_v16 = vld [vmem:[#allocation2 + $0x80] ss:$0 sps:$4 sm:$0x11]  }
  0x87   : > { %v2442_v47 = vsel %vm599_vm2, %v2437_v30, %v2441_v21  ;;  %v714_v58 = vor.u32 %v713_v50, %v709_v36  ;;  %v2448_v12 = vrot.slane %v2446_v3, 1  ;;  %v4490_v6 = vcombine.low %v427_v35, %v4486_v8  ;;  %v3934_v24 = vld [vmem:[#allocation2 + $0x80] ss:$0 sps:$4 sm:$0x11]   ;;  %v1053_v30 = vld [vmem:[#allocation2 + $0x84] sm:$0xe] }
  0x88   : > { %2543 = vrot.lane.b32.xlu1 %v2442_v47, %s4026_s11  ;;  %v2453_v13 = vrot.slane %v2451_v63, 1  ;;  %v1486_v21 = vrot.slane %v3487_v42, 1  ;;  %v1487_v26 = vrot.slane %v3934_v24, 1  ;;  %v728_v43 = vshll.u32 %v4492_v16, 16  ;;  %v3935_v45 = vld [vmem:[#allocation2 + $0x1c] sm:$0xf] }
  0x89   : > { %v719_v11 = vsel %vm599_vm2, %v714_v58, %v718_v19  ;;  %5270 = vst [vmem:[#allocation14_spill] sm:$0xff] %v4490_v6  ;;  %v2449_v36 = vor.u32 %v2448_v12, %v2444_v0  ;;  %v721_v37 = vshrl.u32 %v4490_v6, 16  ;;  %v723_v38 = vshll.u32 %v4490_v6, 16  ;;  %v2163_v50 = vld [vmem:[#allocation2 + $0x90] sm:$0xf]  ;;  %v3869_v19 = vld [vmem:[%s5233_s2] sm:$0xff]  }
  0x8a   : > { %810 = vrot.lane.b32.xlu0 %v719_v11, %s4026_s11  ;;  %v3479_v47 = vcombine.low %v1044_v57, %v3935_v45  ;;  %v730_v42 = vrot.slane %v728_v43, 1  ;;  %v4502_v58 = vld [vmem:[#allocation2 + $0x94] sm:$0xf]  ;;  %v3936_v0 = vld [vmem:[#allocation2 + $0x20] ss:$0 sps:$4 sm:$0x11]   ;;  %v1488_v57 = vsel %vm872_vm3, %v1486_v21, %v1487_v26 }
  0x8b   : > { %v2454_v55 = vsel %vm599_vm2, %v2449_v36, %v2453_v13  ;;  %v725_v52 = vrot.slane %v723_v38, 1  ;;  %v1463_v3 = vrot.slane %v3936_v0, 1  ;;  %v4506_v63 = vcombine.low %v2163_v50, %v4502_v58  ;;  %v4508_v35 = vld [vmem:[#allocation2 + $0x98] ss:$0 sps:$4 sm:$0x11]   ;;  %v3873_v21 = vld [vmem:[%s5233_s2 + $0x8] sm:$0xff]  }
  0x8c   : > { %2545 = vrot.lane.b32.xlu1 %v2454_v55, %s4026_s11  ;;  %v3937_v11 = vld [vmem:[#allocation2 + $0x88] sm:$0xf]  ;;  %v1045_v24 = vld [vmem:[#allocation2 + $0x24] sm:$0xe]  ;;  %v1462_v36 = vrot.slane %v3479_v47, 1  ;;  %v2463_v0 = vshll.u32 %v4508_v35, 16 }
  0x8d   : > { %5271 = vst [vmem:[#allocation15_spill] sm:$0xff] %v4506_v63  ;;  %v3488_v12 = vcombine.low %v1053_v30, %v3937_v11  ;;  %v726_v45 = vor.u32 %v725_v52, %v721_v37  ;;  %v2456_v38 = vshrl.u32 %v4506_v63, 16  ;;  %v2458_v43 = vshll.u32 %v4506_v63, 16  ;;  %v3870_v55 = vld [vmem:[%s5233_s2 + $0xc0] sm:$0xff]   ;;  %v4523_v37 = vld [vmem:[#allocation2 + $0x88] sm:$0xf] }
  0x8e   : > { %v429_v30 = vld [vmem:[#allocation2 + $0x84] sm:$0xf]  ;;  %v3938_v47 = vld [vmem:[#allocation2 + $0x8c] ss:$0 sps:$4 sm:$0x11]  }
  0x8f   : > { %v731_v26 = vsel %vm599_vm2, %v726_v45, %v730_v42  ;;  %v1490_v52 = vrot.slane %v3938_v47, 1  ;;  %v2460_v11 = vrot.slane %v2458_v43, 1  ;;  %v4529_v1 = vld [vmem:[#allocation2 + $0x8c] ss:$0 sps:$4 sm:$0x11]   ;;  %v1489_v63 = vrot.slane %v3488_v12, 1 }
  0x90   : > { %812 = vrot.lane.b32.xlu0 %v731_v26, %s4026_s11  ;;  %v3939_v42 = vld [vmem:[#allocation2 + $0x28] sm:$0xf]  ;;  %v4532_v6 = vld [vmem:[#allocation2 + $0x2c] ss:$0 sps:$4 sm:$0x11]   ;;  %v5273_v26 = vmov 0  }
  0x91   : > { %v3480_v45 = vcombine.low %v1045_v24, %v3939_v42  ;;  %v1054_v47 = vld [vmem:[#allocation2 + $0x90] sm:$0xe]  ;;  %v2461_v43 = vor.u32 %v2460_v11, %v2456_v38  ;;  %v3876_v24 = vld [vmem:[%s5233_s2 + $0xc8] sm:$0xff]   ;;  %v1464_v42 = vsel %vm872_vm3, %v1462_v36, %v1463_v3  ;;  %v2165_v11 = vld [vmem:[#allocation2 + $0x9c] sm:$0xf] }
  0x92   : > { %v3879_v38 = vld [vmem:[%s5233_s2 + $0x10] sm:$0xff]   ;;  %v4554_v31 = vld [vmem:[#allocation2 + $0xa4] ss:$0 sps:$4 sm:$0x11]   ;;  %v1055_v62 = vld [vmem:[#allocation2 + $0x9c] sm:$0xe] }
  0x93   : > { %v1046_v36 = vld [vmem:[#allocation2 + $0x30] sm:$0xe]  ;;  %v3942_v23 = vld [vmem:[#allocation2 + $0x94] sm:$0xf] }
  0x94   : > { %v4725_v40 = vld [vmem:[#allocation2 + $0xc8] ss:$0 sps:$4 sm:$0x11]   ;;  %v437_v20 = vld [vmem:[#allocation2 + $0xb4] sm:$0xf] }
  0x9f   : > { %v1396_v13 = vpop.permute.xlu0 %1395 }
  0xa0   : > { %v1532_v50 = vsel %vm921_vm4, %v4154_v32, %v1396_v13  ;;  %v2465_v32 = vrot.slane %v2463_v0, 1  ;;  %v4527_v13 = vcombine.low %v429_v30, %v4523_v37 }
  0xa1   : > { %1797 = vmatmul.mubr.bf16.vlgmr.msra.gmra.mrb[0].mxu1 %v1532_v50  ;;  %v4548_v50 = vld [vmem:[#allocation2 + $0xa0] sm:$0xf] }
  0xa2   : > { %5272 = vst [vmem:[#allocation16_spill] sm:$0xff] %v4527_v13  ;;  %1982 = vmatpush1.bf16.msra.mxu1 %v3869_v19  ;;  %3539 = vmatprep.mubr.msk.bf16.mxu1 %vm921_vm4, %v1488_v57  ;;  %v733_v0 = vshrl.u32 %v4527_v13, 16  ;;  %v735_v30 = vshll.u32 %v4527_v13, 16  ;;  %v740_v19 = vshll.u32 %v4529_v1, 16  ;;  %v4559_v15 = vcombine.low %v2165_v11, %v4548_v50 }
  0xa3   : > { %v1380_v54 = vpop.permute.xlu0 %1379  ;;  %1983 = vmatprep.subr.bf16.mxu1 %v5273_v26  ;;  %v4550_v13 = vld [vmem:[#allocation2 + $0x98] ss:$0 sps:$4 sm:$0x11]  }
  0xa4   : > { %v1508_v57 = vsel %vm921_vm4, %v4169_v41, %v1380_v54  ;;  %v1398_v12 = vpop.permute.xlu1 %1397  ;;  %v2466_v41 = vsel %vm599_vm2, %v2461_v43, %v2465_v32  ;;  %v737_v54 = vrot.slane %v735_v30, 1  ;;  %v742_v2 = vrot.slane %v740_v19, 1  ;;  %5274 = vst [vmem:[#allocation17_spill] sm:$0xff] %v4559_v15  ;;  %v431_v19 = vld [vmem:[#allocation2 + $0x90] sm:$0xf] }
  0xa5   : > { %1733 = vmatmul.mubr.bf16.vlgmr.msra.gmra.mrb[0].mxu0 %v1508_v57  ;;  %v1535_v3 = vsel %vm921_vm4, %v4178_v51, %v1398_v12  ;;  %v1465_v57 = vrot.slane %v3480_v45, 1  ;;  %v3489_v32 = vcombine.low %v1054_v47, %v3942_v23  ;;  %v2475_v30 = vshll.u32 %v4554_v31, 16  ;;  %v3883_v12 = vld [vmem:[%s5233_s2 + $0x18] sm:$0xff]   ;;  %2547 = vrot.lane.b32.xlu1 %v2466_v41, %s4026_s11  ;;  %v4575_v47 = vld [vmem:[#allocation2 + $0x94] sm:$0xf] }
  0xa6   : > { %2849 = vmatpush1.bf16.msra.mxu0 %v3870_v55  ;;  %1984 = vmatpush1.bf16.msra.mxu1 %v3873_v21  ;;  %v738_v43 = vor.u32 %v737_v54, %v733_v0  ;;  %v1491_v51 = vsel %vm872_vm3, %v1489_v63, %v1490_v52  ;;  %v3880_v21 = vld [vmem:[%s5233_s2 + $0xd0] sm:$0xff]   ;;  %v2468_v23 = vshrl.u32 %v4559_v15, 16  ;;  %v2470_v45 = vshll.u32 %v4559_v15, 16  ;;  %v4577_v63 = vld [vmem:[#allocation2 + $0x38] ss:$0 sps:$4 sm:$0x11]  }
  0xa7   : > { %2850 = vmatprep.subr.bf16.mxu0 %v5273_v26  ;;  %3531 = vmatprep.mubr.msk.bf16.mxu0 %vm921_vm4, %v1464_v42  ;;  %v3943_v0 = vld [vmem:[#allocation2 + $0x34] sm:$0xf]  ;;  %v4581_v54 = vld [vmem:[#allocation2 + $0x98] ss:$0 sps:$4 sm:$0x11]   ;;  %v2477_v33 = vrot.slane %v2475_v30, 1 }
  0xa8   : > { %v1382_v55 = vpop.permute.xlu1 %1381  ;;  %1985 = vmatprep.subr.bf16.mxu1 %v5273_v26  ;;  %v3481_v42 = vcombine.low %v1046_v36, %v3943_v0  ;;  %v743_v11 = vsel %vm599_vm2, %v738_v43, %v742_v2  ;;  %v2472_v15 = vrot.slane %v2470_v45, 1  ;;  %v1400_v36 = vpop.permute.xlu0 %1399  ;;  %v1492_v0 = vrot.slane %v3489_v32, 1  ;;  %v2167_v32 = vld [vmem:[#allocation2 + $0xa8] sm:$0xf] }
  0xa9   : > { %1805 = vmatmul.mubr.bf16.gmra.mrb[4].mxu1 %v1535_v3  ;;  %v1511_v41 = vsel %vm921_vm4, %v4180_v53, %v1382_v55  ;;  %v4586_v3 = vcombine.low %v431_v19, %v4575_v47  ;;  %v752_v2 = vshll.u32 %v4581_v54, 16  ;;  %814 = vrot.lane.b32.xlu0 %v743_v11, %s4026_s11  ;;  %v4601_v55 = vld [vmem:[#allocation2 + $0xac] sm:$0xf] }
  0xaa   : > { %2851 = vmatpush1.bf16.msra.mxu0 %v3876_v24  ;;  %1986 = vmatpush1.bf16.msra.mxu1 %v3879_v38  ;;  %v5276_v24 = vrot.slane %v4532_v6, 1  ;;  %v3884_v38 = vld [vmem:[%s5233_s2 + $0xd8] sm:$0xff]   ;;  %v2473_v43 = vor.u32 %v2472_v15, %v2468_v23  ;;  %v3887_v6 = vld [vmem:[%s5233_s2 + $0x20] sm:$0xff]   ;;  %v1538_v15 = vsel %vm921_vm4, %v4193_v9, %v1400_v36 }
  0xab   : > { %5275 = vst [vmem:[#allocation18_spill] sm:$0xff] %v4586_v3  ;;  %2852 = vmatprep.subr.bf16.mxu0 %v5273_v26  ;;  %3540 = vmatprep.mubr.msk.bf16.mxu1 %vm921_vm4, %v1491_v51  ;;  %v745_v30 = vshrl.u32 %v4586_v3, 16  ;;  %v747_v19 = vshll.u32 %v4586_v3, 16  ;;  %v3945_v51 = vld [vmem:[#allocation2 + $0xa0] sm:$0xf]  ;;  %v4610_v3 = vcombine.low %v2167_v32, %v4601_v55 }
  0xac   : > { %1987 = vmatprep.subr.bf16.mxu1 %v5273_v26  ;;  %v1467_v53 = vsel %vm872_vm3, %v1465_v57, %v5276_v24  ;;  %v1468_v57 = vrot.slane %v3481_v42, 1  ;;  %v3490_v45 = vcombine.low %v1055_v62, %v3945_v51  ;;  %v754_v24 = vrot.slane %v752_v2, 1  ;;  %v1384_v23 = vpop.permute.xlu1 %1383  ;;  %v1047_v42 = vld [vmem:[#allocation2 + $0x3c] sm:$0xe]  ;;  %v3890_v9 = vld [vmem:[%s5233_s2 + $0xe0] sm:$0xff]   ;;  %v1402_v51 = vpop.permute.xlu0 %1401 }
  0xad   : > { %1741 = vmatmul.mubr.bf16.gmra.mrb[4].mxu0 %v1511_v41  ;;  %v2478_v11 = vsel %vm599_vm2, %v2473_v43, %v2477_v33  ;;  %v749_v52 = vrot.slane %v747_v19, 1  ;;  %5277 = vst [vmem:[#allocation19_spill] sm:$0xff] %v4610_v3  ;;  %v4612_v41 = vld [vmem:[#allocation2 + $0xb0] ss:$0 sps:$4 sm:$0x11]   ;;  %v5278_v62 = vrot.slane %v4550_v13, 1  ;;  %v1514_v13 = vsel %vm921_vm4, %v4201_v22, %v1384_v23 }
  0xae   : > { %2853 = vmatpush1.bf16.msra.mxu0 %v3880_v21  ;;  %1988 = vmatpush1.bf16.msra.mxu1 %v3883_v12  ;;  %v2480_v12 = vshrl.u32 %v4610_v3, 16  ;;  %v2482_v36 = vshll.u32 %v4610_v3, 16  ;;  %v2487_v2 = vshll.u32 %v4612_v41, 16  ;;  %v3946_v43 = vld [vmem:[#allocation2 + $0xa4] ss:$0 sps:$4 sm:$0x11]  }
  0xaf   : > { %3532 = vmatprep.mubr.msk.bf16.mxu0 %vm921_vm4, %v1467_v53  ;;  %2854 = vmatprep.subr.bf16.mxu0 %v5273_v26  ;;  %v1494_v21 = vsel %vm872_vm3, %v1492_v0, %v5278_v62  ;;  %v750_v33 = vor.u32 %v749_v52, %v745_v30  ;;  %v433_v53 = vld [vmem:[#allocation2 + $0x9c] sm:$0xf]  ;;  %v1495_v0 = vrot.slane %v3490_v45, 1  ;;  %v1496_v19 = vrot.slane %v3946_v43, 1  ;;  %v4629_v32 = vld [vmem:[#allocation2 + $0xa0] sm:$0xf] }
  0xb0   : > { %1989 = vmatprep.subr.bf16.mxu1 %v5273_v26  ;;  %2549 = vrot.lane.b32.xlu1 %v2478_v11, %s4026_s11  ;;  %v3893_v52 = vld [vmem:[%s5233_s2 + $0x28] sm:$0xff]   ;;  %v2484_v11 = vrot.slane %v2482_v36, 1  ;;  %v2489_v62 = vrot.slane %v2487_v2, 1  ;;  %v4639_v22 = vcombine.low %v433_v53, %v4629_v32  ;;  %v4641_v45 = vld [vmem:[#allocation2 + $0xa4] ss:$0 sps:$4 sm:$0x11]  }
  0xb1   : > { %1813 = vmatmul.mubr.bf16.gmra.mrb[8].mxu1 %v1538_v15  ;;  %v4635_v30 = vld [vmem:[#allocation2 + $0xa8] sm:$0xe]  ;;  %v755_v15 = vsel %vm599_vm2, %v750_v33, %v754_v24  ;;  %v2169_v2 = vld [vmem:[#allocation2 + $0xb4] sm:$0xf] }
  0xb2   : > { %2855 = vmatpush1.bf16.msra.mxu0 %v3884_v38  ;;  %3541 = vmatprep.mubr.msk.bf16.mxu1 %vm921_vm4, %v1494_v21  ;;  %5279 = vst [vmem:[#allocation20_spill] sm:$0xff] %v4639_v22  ;;  %v5280_v38 = vrot.slane %v4577_v63, 1  ;;  %v3947_v21 = vld [vmem:[#allocation2 + $0x40] sm:$0xf]  ;;  %v1048_v3 = vld [vmem:[#allocation2 + $0x48] sm:$0xe]  ;;  %v2485_v24 = vor.u32 %v2484_v11, %v2480_v12  ;;  %v1541_v63 = vsel %vm921_vm4, %v4207_v28, %v1402_v51 }
  0xb3   : > { %1990 = vmatpush1.bf16.msra.mxu1 %v3887_v6  ;;  %2856 = vmatprep.subr.bf16.mxu0 %v5273_v26  ;;  %v3482_v43 = vcombine.low %v1047_v42, %v3947_v21  ;;  %v757_v33 = vshrl.u32 %v4639_v22, 16  ;;  %v759_v36 = vshll.u32 %v4639_v22, 16  ;;  %v764_v6 = vshll.u32 %v4641_v45, 16  ;;  %v4654_v42 = vld [vmem:[#allocation2 + $0xb0] ss:$0 sps:$4 sm:$0x11]  }
  0xb4   : > { %v1470_v23 = vsel %vm872_vm3, %v1468_v57, %v5280_v38  ;;  %1991 = vmatprep.subr.bf16.mxu1 %v5273_v26  ;;  %816 = vrot.lane.b32.xlu0 %v755_v15, %s4026_s11  ;;  %v3948_v57 = vld [vmem:[#allocation2 + $0x44] ss:$0 sps:$4 sm:$0x11]   ;;  %v4657_v21 = vld [vmem:[#allocation2 + $0xb8] sm:$0xf]  ;;  %v3894_v12 = vld [vmem:[%s5233_s2 + $0xe8] sm:$0xff]  }
  0xb5   : > { %1749 = vmatmul.mubr.bf16.gmra.mrb[8].mxu0 %v1514_v13  ;;  %v1472_v53 = vrot.slane %v3948_v57, 1  ;;  %v2490_v13 = vsel %vm599_vm2, %v2485_v24, %v2489_v62  ;;  %v761_v15 = vrot.slane %v759_v36, 1  ;;  %v766_v11 = vrot.slane %v764_v6, 1  ;;  %v4667_v51 = vld [vmem:[#allocation2 + $0xbc] ss:$0 sps:$4 sm:$0x11]   ;;  %v1386_v57 = vpop.permute.xlu1 %1385 }
  0xb6   : > { %2857 = vmatpush1.bf16.msra.mxu0 %v3890_v9  ;;  %3533 = vmatprep.mubr.msk.bf16.mxu0 %vm921_vm4, %v1470_v23  ;;  %v4665_v28 = vcombine.low %v2169_v2, %v4657_v21  ;;  %v1497_v9 = vsel %vm872_vm3, %v1495_v0, %v1496_v19  ;;  %v3897_v23 = vld [vmem:[%s5233_s2 + $0x30] sm:$0xff]   ;;  %v1471_v38 = vrot.slane %v3482_v43, 1  ;;  %v3950_v22 = vld [vmem:[#allocation2 + $0xac] sm:$0xf]  ;;  %v2499_v43 = vshll.u32 %v4667_v51, 16 }
  0xb7   : > { %1992 = vmatpush1.bf16.msra.mxu1 %v3893_v52  ;;  %2858 = vmatprep.subr.bf16.mxu0 %v5273_v26  ;;  %v3491_v62 = vcombine.low %v4635_v30, %v3950_v22  ;;  %v3951_v24 = vld [vmem:[#allocation2 + $0x4c] sm:$0xf]  ;;  %v3898_v52 = vld [vmem:[%s5233_s2 + $0xf0] sm:$0xff]   ;;  %v762_v6 = vor.u32 %v761_v15, %v757_v33  ;;  %v435_v2 = vld [vmem:[#allocation2 + $0xa8] sm:$0xf] }
  0xb8   : > { %5281 = vst [vmem:[#allocation21_spill] sm:$0xff] %v4665_v28  ;;  %v3483_v36 = vcombine.low %v1048_v3, %v3951_v24  ;;  %1993 = vmatprep.subr.bf16.mxu1 %v5273_v26  ;;  %2551 = vrot.lane.b32.xlu1 %v2490_v13, %s4026_s11  ;;  %v2492_v0 = vshrl.u32 %v4665_v28, 16  ;;  %v2494_v19 = vshll.u32 %v4665_v28, 16  ;;  %v4683_v30 = vld [vmem:[#allocation2 + $0xac] sm:$0xf]  ;;  %v1517_v3 = vsel %vm921_vm4, %v4218_v49, %v1386_v57  ;;  %v3901_v22 = vld [vmem:[%s5233_s2 + $0x38] sm:$0xff]  }
  0xb9   : > { %1821 = vmatmul.mubr.bf16.gmra.mrb[12].mxu1 %v1541_v63  ;;  %v767_v33 = vsel %vm599_vm2, %v762_v6, %v766_v11  ;;  %v2501_v15 = vrot.slane %v2499_v43, 1  ;;  %v4692_v24 = vld [vmem:[#allocation2 + $0xb0] ss:$0 sps:$4 sm:$0x11]   ;;  %v1473_v63 = vsel %vm872_vm3, %v1471_v38, %v1472_v53  ;;  %v1498_v49 = vrot.slane %v3491_v62, 1  ;;  %v3904_v11 = vld [vmem:[%s5233_s2 + $0xf8] sm:$0xff]  }
  0xba   : > { %3542 = vmatprep.mubr.msk.bf16.mxu1 %vm921_vm4, %v1497_v9  ;;  %2859 = vmatpush1.bf16.msra.mxu0 %v3894_v12  ;;  %v2496_v13 = vrot.slane %v2494_v19, 1  ;;  %v3952_v57 = vld [vmem:[#allocation2 + $0x50] ss:$0 sps:$4 sm:$0x11]   ;;  %v1057_v12 = vld [vmem:[#allocation2 + $0xb4] sm:$0xe]  ;;  %v4697_v59 = vcombine.low %v435_v2, %v4683_v30 }
  0xbb   : > { %1994 = vmatpush1.bf16.msra.mxu1 %v3897_v23  ;;  %2860 = vmatprep.subr.bf16.mxu0 %v5273_v26  ;;  %v1475_v9 = vrot.slane %v3952_v57, 1  ;;  %v1474_v6 = vrot.slane %v3483_v36, 1  ;;  %v776_v53 = vshll.u32 %v4692_v24, 16  ;;  %v2171_v19 = vld [vmem:[#allocation2 + $0xc0] sm:$0xf] }
  0xbc   : > { %v1404_v28 = vpop.permute.xlu0 %1403  ;;  %5282 = vst [vmem:[#allocation22_spill] sm:$0xff] %v4697_v59  ;;  %1995 = vmatprep.subr.bf16.mxu1 %v5273_v26  ;;  %818 = vrot.lane.b32.xlu0 %v767_v33, %s4026_s11  ;;  %v2497_v23 = vor.u32 %v2496_v13, %v2492_v0  ;;  %v769_v38 = vshrl.u32 %v4697_v59, 16  ;;  %v771_v62 = vshll.u32 %v4697_v59, 16  ;;  %v4707_v43 = vld [vmem:[#allocation2 + $0xc4] sm:$0xf]  ;;  %v5284_v59 = vrot.slane %v4654_v42, 1 }
  0xbd   : > { %1757 = vmatmul.mubr.bf16.gmra.mrb[12].mxu0 %v1517_v3  ;;  %v1544_v2 = vsel %vm921_vm4, %v4287_v29, %v1404_v28  ;;  %v3907_v36 = vld [vmem:[%s5233_s2 + $0x40] sm:$0xff]   ;;  %v4715_v0 = vld [vmem:[#allocation2 + $0x54] sm:$0xe]  ;;  %v778_v33 = vrot.slane %v776_v53, 1  ;;  %v4719_v13 = vcombine.low %v2171_v19, %v4707_v43  ;;  %v3953_v28 = vld [vmem:[#allocation2 + $0xb8] sm:$0xf] }
  0xbe   : > { %3534 = vmatprep.mubr.msk.bf16.mxu0 %vm921_vm4, %v1473_v63  ;;  %2861 = vmatpush1.bf16.msra.mxu0 %v3898_v52  ;;  %v2502_v3 = vsel %vm599_vm2, %v2497_v23, %v2501_v15  ;;  %v1388_v57 = vpop.permute.xlu1 %1387  ;;  %v1500_v29 = vsel %vm872_vm3, %v1498_v49, %v5284_v59  ;;  %v3492_v52 = vcombine.low %v1057_v12, %v3953_v28  ;;  %v773_v63 = vrot.slane %v771_v62, 1  ;;  %v4731_v42 = vld [vmem:[#allocation2 + $0xb8] sm:$0xf]  ;;  %v4737_v12 = vld [vmem:[#allocation2 + $0xbc] ss:$0 sps:$4 sm:$0x11]  }
  0xbf   : > { %5283 = vst [vmem:[#allocation23_spill] sm:$0xff] %v4719_v13  ;;  %1996 = vmatpush1.bf16.msra.mxu1 %v3901_v22  ;;  %2862 = vmatprep.subr.bf16.mxu0 %v5273_v26  ;;  %v2504_v15 = vshrl.u32 %v4719_v13, 16  ;;  %v2506_v23 = vshll.u32 %v4719_v13, 16  ;;  %v2511_v22 = vshll.u32 %v4725_v40, 16  ;;  %v4735_v49 = vcombine.low %v437_v20, %v4731_v42  ;;  %v3911_v20 = vld [vmem:[%s5233_s2 + $0x48] sm:$0xff]  }
  0xc0   : > { %1997 = vmatprep.subr.bf16.mxu1 %v5273_v26  ;;  %2553 = vrot.lane.b32.xlu1 %v2502_v3, %s4026_s11  ;;  %v774_v59 = vor.u32 %v773_v63, %v769_v38  ;;  %v1520_v53 = vsel %vm921_vm4, %v4297_v44, %v1388_v57  ;;  %v1476_v62 = vsel %vm872_vm3, %v1474_v6, %v1475_v9  ;;  %v3954_v19 = vld [vmem:[#allocation2 + $0xbc] ss:$0 sps:$4 sm:$0x11]   ;;  %v3908_v38 = vld [vmem:[%s5233_s2 + $0x100] sm:$0xff]   ;;  %v397_v28 = vld [vmem:[%s4278_s28 + $0xc] sm:$0xf] }
  0xc1   : > { %1829 = vmatmul.mubr.bf16.gmra.mrb[16].mxu1 %v1544_v2  ;;  %v1502_v2 = vrot.slane %v3954_v19, 1  ;;  %v2508_v3 = vrot.slane %v2506_v23, 1  ;;  %v3955_v57 = vld [vmem:[#allocation2 + $0x58] sm:$0xf]  ;;  %v398_v63 = vld [vmem:[%s4278_s28 + $0x10] sm:$0xf] }
  0xc2   : > { %3543 = vmatprep.mubr.msk.bf16.mxu1 %vm921_vm4, %v1500_v29  ;;  %2863 = vmatpush1.bf16.msra.mxu0 %v3904_v11  ;;  %v1406_v44 = vpop.permute.xlu0 %1405  ;;  %v1501_v11 = vrot.slane %v3492_v52, 1  ;;  %v3484_v9 = vcombine.low %v4715_v0, %v3955_v57  ;;  %v779_v6 = vsel %vm599_vm2, %v774_v59, %v778_v33  ;;  %v2513_v29 = vrot.slane %v2511_v22, 1  ;;  %v399_v19 = vld [vmem:[%s4278_s28 + $0x14] sm:$0x1]  ;;  %404 = vst.msk [vmem:[#allocation2 + $0xcc] sm:$0xf] %vm344_vm0, %v397_v28 }
  0xc3   : > { %1998 = vmatpush1.bf16.msra.mxu1 %v3907_v36  ;;  %2864 = vmatprep.subr.bf16.mxu0 %v5273_v26  ;;  %v1058_v13 = vld [vmem:[#allocation2 + $0xc0] sm:$0xe]  ;;  %v2509_v23 = vor.u32 %v2508_v3, %v2504_v15  ;;  %v781_v36 = vshrl.u32 %v4735_v49, 16  ;;  %v783_v52 = vshll.u32 %v4735_v49, 16  ;;  %v788_v60 = vshll.u32 %v4737_v12, 16  ;;  %v3912_v33 = vld [vmem:[%s5233_s2 + $0x108] sm:$0xff]   ;;  %v1390_v3 = vpop.permute.xlu1 %1389 }
  0xc4   : > { %1999 = vmatprep.subr.bf16.mxu1 %v5273_v26  ;;  %820 = vrot.lane.b32.xlu0 %v779_v6, %s4026_s11  ;;  %405 = vst.msk [vmem:[#allocation2 + $0xd0] sm:$0xf] %vm344_vm0, %v398_v63  ;;  %v1547_v0 = vsel %vm921_vm4, %v4304_v56, %v1406_v44  ;;  %v1503_v28 = vsel %vm872_vm3, %v1501_v11, %v1502_v2  ;;  %v1477_v57 = vrot.slane %v3484_v9, 1  ;;  %v3957_v56 = vld [vmem:[#allocation2 + $0xc4] sm:$0xf] }
  0xc5   : > { %406 = vst.msk [vmem:[#allocation2 + $0xd4] sm:$0x1] %vm347_vm1, %v399_v19  ;;  %1765 = vmatmul.mubr.bf16.gmra.mrb[16].mxu0 %v1520_v53  ;;  %v2514_v15 = vsel %vm599_vm2, %v2509_v23, %v2513_v29  ;;  %v785_v59 = vrot.slane %v783_v52, 1  ;;  %v790_v22 = vrot.slane %v788_v60, 1  ;;  %v1050_v44 = vld [vmem:[#allocation2 + $0x60] sm:$0xe]  ;;  %v1523_v2 = vsel %vm921_vm4, %v4311_v5, %v1390_v3 }
  0xc6   : > { %3535 = vmatprep.mubr.msk.bf16.mxu0 %vm921_vm4, %v1476_v62  ;;  %2865 = vmatpush1.bf16.msra.mxu0 %v3908_v38  ;;  %v3956_v53 = vld [vmem:[#allocation2 + $0x5c] ss:$0 sps:$4 sm:$0x11]   ;;  %v3493_v62 = vcombine.low %v1058_v13, %v3957_v56  ;;  %v3915_v38 = vld [vmem:[%s5233_s2 + $0x50] sm:$0xff]   ;;  %v1408_v63 = vpop.permute.xlu0 %1407  ;;  %v3959_v5 = vld [vmem:[#allocation2 + $0x64] sm:$0xf] }
  0xc7   : > { %2000 = vmatpush1.bf16.msra.mxu1 %v3911_v20  ;;  %v1478_v6 = vrot.slane %v3956_v53, 1  ;;  %2866 = vmatprep.subr.bf16.mxu0 %v5273_v26  ;;  %v786_v60 = vor.u32 %v785_v59, %v781_v36  ;;  %v3958_v20 = vld [vmem:[#allocation2 + $0xc8] ss:$0 sps:$4 sm:$0x11]   ;;  %v3918_v13 = vld [vmem:[%s5233_s2 + $0x110] sm:$0xff]   ;;  %v3485_v36 = vcombine.low %v1050_v44, %v3959_v5  ;;  %v3921_v52 = vld [vmem:[%s5233_s2 + $0x58] sm:$0xff]   ;;  %v1550_v3 = vsel %vm921_vm4, %v4318_v18, %v1408_v63  ;;  %v1392_v56 = vpop.permute.xlu1 %1391 }
  0xc8   : > { %2001 = vmatprep.subr.bf16.mxu1 %v5273_v26  ;;  %2555 = vrot.lane.b32.xlu1 %v2514_v15, %s4026_s11  ;;  %v1505_v11 = vrot.slane %v3958_v20, 1  ;;  %v1504_v23 = vrot.slane %v3493_v62, 1  ;;  %v3960_v44 = vld [vmem:[#allocation2 + $0x68] ss:$0 sps:$4 sm:$0x11]   ;;  %v1526_v63 = vsel %vm921_vm4, %v4320_v25, %v1392_v56 }
  0xc9   : > { %1837 = vmatmul.mubr.bf16.gmra.mrb[20].mxu1 %v1547_v0  ;;  %v791_v9 = vsel %vm599_vm2, %v786_v60, %v790_v22  ;;  %v2173_v29 = vld [vmem:[#allocation2 + $0xcc] sm:$0xf]  ;;  %v1479_v19 = vsel %vm872_vm3, %v1477_v57, %v1478_v6  ;;  %v2191_v22 = vld [vmem:[#allocation2 + $0x18] sm:$0xe]  ;;  %v1481_v60 = vrot.slane %v3960_v44, 1 }
  0xca   : > { %3544 = vmatprep.mubr.msk.bf16.mxu1 %vm921_vm4, %v1503_v28  ;;  %2867 = vmatpush1.bf16.msra.mxu0 %v3912_v33  ;;  %v455_v33 = vld [vmem:[#allocation2] sm:$0xe]  ;;  %v3923_v28 = vld [vmem:[%s5233_s2 + $0x118] sm:$0xff]   ;;  %v1506_v62 = vsel %vm872_vm3, %v1504_v23, %v1505_v11  ;;  %v3961_v18 = vld [vmem:[#allocation2 + $0x4] sm:$0xf] }
  0xcb   : > { %2002 = vmatpush1.bf16.msra.mxu1 %v3915_v38  ;;  %2868 = vmatprep.subr.bf16.mxu0 %v5273_v26  ;;  %v4789_v0 = vld [vmem:[#allocation2 + $0xd0] sm:$0xf]  ;;  %v1480_v38 = vrot.slane %v3485_v36, 1  ;;  %v3962_v20 = vld [vmem:[#allocation2 + $0x1c] sm:$0xf] }
  0xcc   : > { %2003 = vmatprep.subr.bf16.mxu1 %v5273_v26  ;;  %822 = vrot.lane.b32.xlu0 %v791_v9, %s4026_s11  ;;  %v4794_v15 = vcombine.low %v2173_v29, %v4789_v0  ;;  %v4796_v59 = vld [vmem:[#allocation2 + $0xd4] ss:$0 sps:$4 sm:$0x11]   ;;  %v456_v11 = vld [vmem:[#allocation2 + $0xc] sm:$0xe] }
  0xcd   : > { %1773 = vmatmul.mubr.bf16.gmra.mrb[20].mxu0 %v1523_v2  ;;  %v2523_v6 = vshll.u32 %v4796_v59, 16  ;;  %v3430_v2 = vcombine.low %v455_v33, %v3961_v18  ;;  %v2192_v23 = vld [vmem:[#allocation2 + $0x24] sm:$0xe]  ;;  %v1482_v36 = vsel %vm872_vm3, %v1480_v38, %v1481_v60  ;;  %v457_v44 = vld [vmem:[#allocation2 + $0x18] sm:$0xe] }
  0xce   : > { %3536 = vmatprep.mubr.msk.bf16.mxu0 %vm921_vm4, %v1479_v19  ;;  %2869 = vmatpush1.bf16.msra.mxu0 %v3918_v13  ;;  %v2516_v57 = vshrl.u32 %v4794_v15, 16  ;;  %v2518_v53 = vshll.u32 %v4794_v15, 16  ;;  %v3606_v13 = vcombine.low %v2191_v22, %v3962_v20  ;;  %v3965_v25 = vld [vmem:[#allocation2 + $0x10] sm:$0xf]  ;;  %v3967_v60 = vld [vmem:[#allocation2 + $0x1c] sm:$0xf] }
  0xcf   : > { %2004 = vmatpush1.bf16.msra.mxu1 %v3921_v52  ;;  %2870 = vmatprep.subr.bf16.mxu0 %v5273_v26  ;;  %v2525_v29 = vrot.slane %v2523_v6, 1  ;;  %v873_v26 = vrot.slane %v3430_v2, 1  ;;  %v3963_v52 = vld [vmem:[#allocation2 + $0x8] ss:$0 sps:$4 sm:$0x11]   ;;  %v3431_v56 = vcombine.low %v456_v11, %v3965_v25  ;;  %v3432_v18 = vcombine.low %v457_v44, %v3967_v60 }
  0xd0   : > { %v2520_v9 = vrot.slane %v2518_v53, 1  ;;  %v874_v33 = vrot.slane %v3963_v52, 1  ;;  %v2607_v22 = vrot.slane %v3606_v13, 1  ;;  %v3964_v53 = vld [vmem:[#allocation2 + $0x20] ss:$0 sps:$4 sm:$0x11]  }
  0xd1   : > { %1845 = vmatmul.mubr.bf16.gmra.mrb[24].mxu1 %v1550_v3  ;;  %v2608_v6 = vrot.slane %v3964_v53, 1  ;;  %v2201_v2 = vld [vmem:[#allocation2 + $0x90] sm:$0xe]  ;;  %v2202_v44 = vld [vmem:[#allocation2 + $0x9c] sm:$0xe]  ;;  %v2638_v25 = vrot.slane %v4508_v35, 1 }
  0xd2   : > { %3545 = vmatprep.mubr.msk.bf16.mxu1 %vm921_vm4, %v1506_v62  ;;  %2871 = vmatpush1.bf16.msra.mxu0 %v3923_v28  ;;  %v2521_v19 = vor.u32 %v2520_v9, %v2516_v57  ;;  %v3966_v28 = vld [vmem:[#allocation2 + $0x28] sm:$0xf]  ;;  %v465_v62 = vld [vmem:[#allocation2 + $0x78] sm:$0xe]  ;;  %v875_v13 = vsel %vm872_vm3, %v873_v26, %v874_v33  ;;  %v876_v26 = vrot.slane %v3431_v56, 1  ;;  %v907_v35 = vrot.slane %v4529_v1, 1 }
  0xd3   : > { %v1410_v5 = vpop.permute.xlu0 %1409  ;;  %v3607_v57 = vcombine.low %v2192_v23, %v3966_v28  ;;  %v3968_v9 = vld [vmem:[#allocation2 + $0x14] ss:$0 sps:$4 sm:$0x11]   ;;  %v2609_v52 = vsel %vm872_vm3, %v2607_v22, %v2608_v6  ;;  %v4820_v23 = vld [vmem:[#allocation2 + $0x20] ss:$0 sps:$4 sm:$0x11]  }
  0xd4   : > { %v2526_v3 = vsel %vm599_vm2, %v2521_v19, %v2525_v29  ;;  %v1553_v38 = vsel %vm921_vm4, %v4355_v14, %v1410_v5  ;;  %v1394_v20 = vpop.permute.xlu1 %1393  ;;  %v877_v29 = vrot.slane %v3968_v9, 1  ;;  %v466_v19 = vld [vmem:[#allocation2 + $0x84] sm:$0xe]  ;;  %v880_v53 = vrot.slane %v4820_v23, 1  ;;  %v4823_v14 = vld [vmem:[#allocation2 + $0x30] sm:$0xe] }
  0xd5   : > { %1781 = vmatmul.mubr.bf16.gmra.mrb[24].mxu0 %v1526_v63  ;;  %2557 = vrot.lane.b32.xlu1 %v2526_v3, %s4026_s11  ;;  %v3969_v63 = vld [vmem:[#allocation2 + $0x2c] ss:$0 sps:$4 sm:$0x11]   ;;  %v3440_v5 = vcombine.low %v465_v62, %v4486_v8  ;;  %v2610_v33 = vrot.slane %v3607_v57, 1  ;;  %v3616_v3 = vcombine.low %v2201_v2, %v4502_v58  ;;  %v467_v28 = vld [vmem:[#allocation2 + $0x90] sm:$0xe]  ;;  %v1529_v22 = vsel %vm921_vm4, %v4362_v34, %v1394_v20 }
  0xd6   : > { %3537 = vmatprep.mubr.msk.bf16.mxu0 %vm921_vm4, %v1482_v36  ;;  %v2611_v11 = vrot.slane %v3969_v63, 1  ;;  %v904_v36 = vrot.slane %v4492_v16, 1  ;;  %v4832_v6 = vrot.slane %v3432_v18, 1  ;;  %v3441_v8 = vcombine.low %v466_v19, %v4523_v37  ;;  %v4835_v62 = vld [vmem:[#allocation2 + $0x34] sm:$0xf] }
  0xd7   : > { %v903_v60 = vrot.slane %v3440_v5, 1  ;;  %v793_v16 = vpop.permute.xlu0 %792  ;;  %v3608_v56 = vcombine.low %v4823_v14, %v4835_v62  ;;  %v2637_v58 = vrot.slane %v3616_v3, 1  ;;  %v3617_v57 = vcombine.low %v2202_v44, %v4548_v50  ;;  %v468_v20 = vld [vmem:[#allocation2 + $0x9c] sm:$0xe]  ;;  %v2204_v50 = vld [vmem:[#allocation2 + $0xb4] sm:$0xe] }
  0xd8   : > { %v906_v18 = vrot.slane %v3441_v8, 1  ;;  %v2641_v2 = vrot.slane %v4554_v31, 1  ;;  %v3442_v37 = vcombine.low %v467_v28, %v4575_v47  ;;  %v910_v1 = vrot.slane %v4581_v54, 1  ;;  %v3974_v62 = vld [vmem:[#allocation2 + $0x2c] ss:$0 sps:$4 sm:$0x11]  }
  0xd9   : > { %1853 = vmatmul.mubr.bf16.gmra.mrb[28].mxu1 %v1553_v38  ;;  %v2203_v38 = vld [vmem:[#allocation2 + $0xa8] sm:$0xe]  ;;  %v4842_v34 = vsel %vm872_vm3, %v903_v60, %v904_v36  ;;  %v4848_v9 = vsel %vm872_vm3, %v2637_v58, %v2638_v25  ;;  %v2640_v63 = vrot.slane %v3617_v57, 1  ;;  %v923_v19 = vsel %vm921_vm4, %v4366_v48, %v793_v16  ;;  %v2205_v48 = vld [vmem:[#allocation2 + $0xc0] sm:$0xe] }
  0xda   : > { %3558 = vmatprep.mubr.msk.bf16.mxu1 %vm921_vm4, %v875_v13  ;;  %v878_v13 = vsel %vm872_vm3, %v876_v26, %v877_v29  ;;  %v4855_v31 = vsel %vm872_vm3, %v906_v18, %v907_v35  ;;  %v909_v47 = vrot.slane %v3442_v37, 1  ;;  %v3618_v5 = vcombine.low %v2203_v38, %v4601_v55  ;;  %v469_v36 = vld [vmem:[#allocation2 + $0xa8] sm:$0xe]  ;;  %v2528_v29 = vpop.permute.xlu1 %2527  ;;  %v2206_v16 = vld [vmem:[#allocation2 + $0xcc] sm:$0xe] }
  0xdb   : > { %v4859_v44 = vsel %vm872_vm3, %v2640_v63, %v2641_v2  ;;  %v2644_v26 = vrot.slane %v4612_v41, 1  ;;  %v3443_v54 = vcombine.low %v468_v20, %v4629_v32  ;;  %v913_v3 = vrot.slane %v4641_v45, 1  ;;  %v795_v35 = vpop.permute.xlu0 %794  ;;  %v458_v57 = vld [vmem:[#allocation2 + $0x24] sm:$0xe] }
  0xdc   : > { %v2643_v25 = vrot.slane %v3618_v5, 1  ;;  %v3619_v28 = vcombine.low %v2204_v50, %v4657_v21  ;;  %v2647_v55 = vrot.slane %v4667_v51, 1  ;;  %v2612_v60 = vsel %vm872_vm3, %v2610_v33, %v2611_v11  ;;  %v3973_v50 = vld [vmem:[#allocation2 + $0x28] sm:$0xf] }
  0xdd   : > { %1789 = vmatmul.mubr.bf16.gmra.mrb[28].mxu0 %v1529_v22  ;;  %v470_v22 = vld [vmem:[#allocation2 + $0xb4] sm:$0xe]  ;;  %v912_v8 = vrot.slane %v3443_v54, 1  ;;  %v3444_v41 = vcombine.low %v469_v36, %v4683_v30  ;;  %v916_v32 = vrot.slane %v4692_v24, 1  ;;  %v2656_v45 = vsel %vm921_vm4, %v4347_v4, %v2528_v29  ;;  %v3975_v36 = vld [vmem:[#allocation2 + $0x40] sm:$0xf] }
  0xde   : > { %3658 = vmatprep.mubr.msk.bf16.mxu0 %vm921_vm4, %v2609_v52  ;;  %v4865_v52 = vsel %vm872_vm3, %v909_v47, %v910_v1  ;;  %v4876_v58 = vsel %vm872_vm3, %v2643_v25, %v2644_v26  ;;  %v2646_v21 = vrot.slane %v3619_v28, 1  ;;  %v3620_v51 = vcombine.low %v2205_v48, %v4707_v43  ;;  %v2530_v1 = vpop.permute.xlu1 %2529  ;;  %v2194_v47 = vld [vmem:[#allocation2 + $0x3c] sm:$0xe]  ;;  %v459_v26 = vld [vmem:[#allocation2 + $0x30] sm:$0xe] }
  0xdf   : > { %v4880_v11 = vsel %vm872_vm3, %v912_v8, %v913_v3  ;;  %v915_v33 = vrot.slane %v3444_v41, 1  ;;  %v2650_v30 = vrot.slane %v4725_v40, 1  ;;  %v3445_v24 = vcombine.low %v470_v22, %v4731_v42  ;;  %v3972_v42 = vld [vmem:[#allocation2 + $0x38] ss:$0 sps:$4 sm:$0x11]  }
  0xe0   : > { %v4885_v4 = vsel %vm872_vm3, %v2646_v21, %v2647_v55  ;;  %v2649_v38 = vrot.slane %v3620_v51, 1  ;;  %v919_v18 = vrot.slane %v4737_v12, 1  ;;  %v3621_v2 = vcombine.low %v2206_v16, %v4789_v0  ;;  %v3976_v25 = vld [vmem:[#allocation2 + $0x44] ss:$0 sps:$4 sm:$0x11]  }
  0xe1   : > { %2014 = vmatmul.mubr.bf16.vlgmr.msra.gmra.mrb[32].mxu1 %v923_v19  ;;  %v4890_v43 = vsel %vm872_vm3, %v915_v33, %v916_v32  ;;  %v918_v37 = vrot.slane %v3445_v24, 1  ;;  %v2653_v20 = vrot.slane %v4796_v59, 1  ;;  %v926_v40 = vsel %vm921_vm4, %v4351_v10, %v795_v35  ;;  %v3977_v55 = vld [vmem:[#allocation2 + $0x34] sm:$0xf]  ;;  %v3979_v21 = vld [vmem:[#allocation2 + $0x4c] sm:$0xf] }
  0xe2   : > { %3559 = vmatprep.mubr.msk.bf16.mxu1 %vm921_vm4, %v878_v13  ;;  %v2614_v13 = vrot.slane %v3972_v42, 1  ;;  %v4897_v63 = vsel %vm872_vm3, %v2649_v38, %v2650_v30  ;;  %v2652_v12 = vrot.slane %v3621_v2, 1  ;;  %v881_v0 = vsel %vm872_vm3, %v4832_v6, %v880_v53  ;;  %v797_v53 = vpop.permute.xlu0 %796  ;;  %v2532_v3 = vpop.permute.xlu1 %2531  ;;  %v3978_v16 = vld [vmem:[#allocation2 + $0x38] ss:$0 sps:$4 sm:$0x11]  }
  0xe3   : > { %v2613_v59 = vrot.slane %v3608_v56, 1  ;;  %v3433_v10 = vcombine.low %v458_v57, %v3973_v50  ;;  %v4907_v19 = vsel %vm872_vm3, %v918_v37, %v919_v18  ;;  %v2659_v23 = vsel %vm921_vm4, %v4371_v7, %v2530_v1  ;;  %v460_v35 = vld [vmem:[#allocation2 + $0x3c] sm:$0xe]  ;;  %v3980_v57 = vld [vmem:[#allocation2 + $0x50] ss:$0 sps:$4 sm:$0x11]  }
  0xe4   : > { %v4910_v5 = vsel %vm872_vm3, %v2652_v12, %v2653_v20  ;;  %v883_v56 = vrot.slane %v3974_v62, 1  ;;  %v3609_v29 = vcombine.low %v2194_v47, %v3975_v36  ;;  %v929_v54 = vsel %vm921_vm4, %v4378_v27, %v797_v53  ;;  %v3981_v18 = vld [vmem:[#allocation2 + $0x40] sm:$0xf]  ;;  %v2196_v37 = vld [vmem:[#allocation2 + $0x54] sm:$0xe] }
  0xe5   : > { %2881 = vmatmul.mubr.bf16.vlgmr.msra.gmra.mrb[32].mxu0 %v2656_v45  ;;  %v2615_v6 = vsel %vm872_vm3, %v2613_v59, %v2614_v13  ;;  %v882_v14 = vrot.slane %v3433_v10, 1  ;;  %v2617_v28 = vrot.slane %v3976_v25, 1  ;;  %v3434_v22 = vcombine.low %v459_v26, %v3977_v55  ;;  %v3982_v13 = vld [vmem:[#allocation2 + $0x44] ss:$0 sps:$4 sm:$0x11]  }
  0xe6   : > { %3659 = vmatprep.mubr.msk.bf16.mxu0 %vm921_vm4, %v2612_v60  ;;  %v2616_v48 = vrot.slane %v3609_v29, 1  ;;  %v2195_v60 = vld [vmem:[#allocation2 + $0x48] sm:$0xe]  ;;  %v2662_v8 = vsel %vm921_vm4, %v4381_v39, %v2532_v3  ;;  %v799_v41 = vpop.permute.xlu0 %798  ;;  %v886_v45 = vrot.slane %v3978_v16, 1  ;;  %v2534_v30 = vpop.permute.xlu1 %2533  ;;  %v2620_v38 = vrot.slane %v3980_v57, 1 }
  0xe7   : > { %v884_v7 = vsel %vm872_vm3, %v882_v14, %v883_v56  ;;  %v885_v32 = vrot.slane %v3434_v22, 1  ;;  %v3610_v51 = vcombine.low %v2195_v60, %v3979_v21  ;;  %v932_v33 = vsel %vm921_vm4, %v4391_v61, %v799_v41  ;;  %v3983_v1 = vld [vmem:[#allocation2 + $0x58] sm:$0xf]  ;;  %v461_v59 = vld [vmem:[#allocation2 + $0x48] sm:$0xe] }
  0xe8   : > { %v2618_v27 = vsel %vm872_vm3, %v2616_v48, %v2617_v28  ;;  %v3435_v2 = vcombine.low %v460_v35, %v3981_v18  ;;  %v2665_v20 = vsel %vm921_vm4, %v4397_v17, %v2534_v30  ;;  %v889_v12 = vrot.slane %v3982_v13, 1  ;;  %v2197_v62 = vld [vmem:[#allocation2 + $0x60] sm:$0xe]  ;;  %v5285_v56 = vld [vmem:[#allocation3_spill] sm:$0xff]  ;;  %v462_v25 = vld [vmem:[#allocation2 + $0x54] sm:$0xe] }
  0xe9   : > { %2022 = vmatmul.mubr.bf16.gmra.mrb[36].mxu1 %v926_v40  ;;  %v887_v39 = vsel %vm872_vm3, %v885_v32, %v886_v45  ;;  %v2619_v24 = vrot.slane %v3610_v51, 1  ;;  %v5286_v28 = vld [vmem:[#allocation4_spill] sm:$0xff]  ;;  %v3988_v41 = vld [vmem:[#allocation2 + $0x68] ss:$0 sps:$4 sm:$0x11]  }
  0xea   : > { %3560 = vmatprep.mubr.msk.bf16.mxu1 %vm921_vm4, %v881_v0  ;;  %v801_v40 = vpop.permute.xlu0 %800  ;;  %v888_v42 = vrot.slane %v3435_v2, 1  ;;  %v3611_v0 = vcombine.low %v2196_v37, %v3983_v1  ;;  %v2536_v10 = vpop.permute.xlu1 %2535  ;;  %v3989_v32 = vld [vmem:[#allocation2 + $0x58] sm:$0xf]  ;;  %v2198_v45 = vld [vmem:[#allocation2 + $0x6c] sm:$0xe]  ;;  %v5288_v2 = vld [vmem:[#allocation6_spill] sm:$0xff] }
  0xeb   : > { %v2621_v61 = vsel %vm872_vm3, %v2619_v24, %v2620_v38  ;;  %v935_v50 = vsel %vm921_vm4, %v4405_v46, %v801_v40  ;;  %v2668_v36 = vsel %vm921_vm4, %v5285_v56, %v2536_v10  ;;  %v3437_v16 = vcombine.low %v462_v25, %v3989_v32  ;;  %v5287_v21 = vld [vmem:[#allocation5_spill] sm:$0xff]  ;;  %v3991_v57 = vld [vmem:[#allocation2 + $0x70] sm:$0xf]  ;;  %v463_v18 = vld [vmem:[#allocation2 + $0x60] sm:$0xe] }
  0xec   : > { %v890_v17 = vsel %vm872_vm3, %v888_v42, %v889_v12  ;;  %v2622_v47 = vrot.slane %v3611_v0, 1  ;;  %v3613_v38 = vcombine.low %v2198_v45, %v3991_v57  ;;  %v3992_v42 = vld [vmem:[#allocation2 + $0x74] ss:$0 sps:$4 sm:$0x11]   ;;  %v3993_v12 = vld [vmem:[#allocation2 + $0x64] sm:$0xf] }
  0xed   : > { %2889 = vmatmul.mubr.bf16.gmra.mrb[36].mxu0 %v2659_v23  ;;  %v3984_v23 = vld [vmem:[#allocation2 + $0x5c] ss:$0 sps:$4 sm:$0x11]   ;;  %v894_v30 = vrot.slane %v3437_v16, 1  ;;  %v2629_v13 = vrot.slane %v3992_v42, 1  ;;  %v3438_v1 = vcombine.low %v463_v18, %v3993_v12  ;;  %v5290_v56 = vld [vmem:[#allocation8_spill] sm:$0xff] }
  0xee   : > { %3660 = vmatprep.mubr.msk.bf16.mxu0 %vm921_vm4, %v2615_v6  ;;  %v2623_v53 = vrot.slane %v3984_v23, 1  ;;  %v3985_v6 = vld [vmem:[#allocation2 + $0x4c] sm:$0xf]  ;;  %v803_v29 = vpop.permute.xlu0 %802  ;;  %v2538_v22 = vpop.permute.xlu1 %2537  ;;  %v2199_v0 = vld [vmem:[#allocation2 + $0x78] sm:$0xe]  ;;  %v5292_v45 = vld [vmem:[#allocation10_spill] sm:$0xff] }
  0xef   : > { %v3436_v14 = vcombine.low %v461_v59, %v3985_v6  ;;  %v938_v55 = vsel %vm921_vm4, %v5286_v28, %v803_v29  ;;  %v2671_v51 = vsel %vm921_vm4, %v5287_v21, %v2538_v22  ;;  %v5289_v59 = vld [vmem:[#allocation7_spill] sm:$0xff]  ;;  %v3994_v23 = vld [vmem:[#allocation2 + $0x68] ss:$0 sps:$4 sm:$0x11]   ;;  %v2200_v25 = vld [vmem:[#allocation2 + $0x84] sm:$0xe] }
  0xf0   : > { %v2624_v46 = vsel %vm872_vm3, %v2622_v47, %v2623_v53  ;;  %v897_v47 = vrot.slane %v3438_v1, 1  ;;  %v898_v53 = vrot.slane %v3994_v23, 1  ;;  %v3995_v6 = vld [vmem:[#allocation2 + $0x7c] sm:$0xf]  ;;  %v5291_v28 = vld [vmem:[#allocation9_spill] sm:$0xff] }
  0xf1   : > { %2030 = vmatmul.mubr.bf16.gmra.mrb[40].mxu1 %v929_v54  ;;  %v891_v26 = vrot.slane %v3436_v14, 1  ;;  %v3986_v54 = vld [vmem:[#allocation2 + $0x50] ss:$0 sps:$4 sm:$0x11]   ;;  %v3614_v14 = vcombine.low %v2199_v0, %v3995_v6  ;;  %v3999_v32 = vld [vmem:[#allocation2 + $0x88] sm:$0xf] }
  0xf2   : > { %3561 = vmatprep.mubr.msk.bf16.mxu1 %vm921_vm4, %v884_v7  ;;  %v892_v3 = vrot.slane %v3986_v54, 1  ;;  %v3987_v7 = vld [vmem:[#allocation2 + $0x64] sm:$0xf]  ;;  %v805_v35 = vpop.permute.xlu0 %804  ;;  %v3996_v54 = vld [vmem:[#allocation2 + $0x80] ss:$0 sps:$4 sm:$0x11]   ;;  %v3615_v16 = vcombine.low %v2200_v25, %v3999_v32 }
  0xf3   : > { %v3612_v48 = vcombine.low %v2197_v62, %v3987_v7  ;;  %v941_v37 = vsel %vm921_vm4, %v5288_v2, %v805_v35  ;;  %v464_v62 = vld [vmem:[#allocation2 + $0x6c] sm:$0xe]  ;;  %v3997_v7 = vld [vmem:[#allocation2 + $0x70] sm:$0xf]  ;;  %v5294_v2 = vld [vmem:[#allocation12_spill] sm:$0xff] }
  0xf4   : > { %v893_v60 = vsel %vm872_vm3, %v891_v26, %v892_v3  ;;  %v2631_v26 = vrot.slane %v3614_v14, 1  ;;  %v2632_v3 = vrot.slane %v3996_v54, 1  ;;  %v5297_v0 = vld [vmem:[#allocation15_spill] sm:$0xff] }
  0xf5   : > { %2897 = vmatmul.mubr.bf16.gmra.mrb[40].mxu0 %v2662_v8  ;;  %v2625_v8 = vrot.slane %v3612_v48, 1  ;;  %v3439_v48 = vcombine.low %v464_v62, %v3997_v7  ;;  %v5301_v14 = vld [vmem:[#allocation19_spill] sm:$0xff] }
  0xf6   : > { %3661 = vmatprep.mubr.msk.bf16.mxu0 %vm921_vm4, %v2618_v27  ;;  %v2626_v27 = vrot.slane %v3988_v41, 1  ;;  %v807_v10 = vpop.permute.xlu0 %806  ;;  %v3998_v41 = vld [vmem:[#allocation2 + $0x74] ss:$0 sps:$4 sm:$0x11]  }
  0xf9   : > { %2038 = vmatmul.mubr.bf16.gmra.mrb[44].mxu1 %v932_v33  ;;  %v2627_v33 = vsel %vm872_vm3, %v2625_v8, %v2626_v27  ;;  %v900_v8 = vrot.slane %v3439_v48, 1  ;;  %v901_v27 = vrot.slane %v3998_v41, 1 }
  0xfa   : > { %3562 = vmatprep.mubr.msk.bf16.mxu1 %vm921_vm4, %v887_v39  ;;  %v3990_v39 = vld [vmem:[#allocation2 + $0x5c] ss:$0 sps:$4 sm:$0x11]   ;;  %v809_v22 = vpop.permute.xlu0 %808 }
  0xfb   : > { %v895_v24 = vrot.slane %v3990_v39, 1  ;;  %v947_v21 = vsel %vm921_vm4, %v5292_v45, %v809_v22  ;;  %v902_v35 = vsel %vm872_vm3, %v900_v8, %v901_v27 }
  0xfd   : > { %2905 = vmatmul.mubr.bf16.gmra.mrb[44].mxu0 %v2665_v20  ;;  %v2540_v20 = vpop.permute.xlu1 %2539  ;;  %v896_v40 = vsel %vm872_vm3, %v894_v30, %v895_v24  ;;  %v4000_v30 = vld [vmem:[#allocation2 + $0x8c] ss:$0 sps:$4 sm:$0x11]   ;;  %v5293_v24 = vld [vmem:[#allocation11_spill] sm:$0xff] }
  0xfe   : > { %3662 = vmatprep.mubr.msk.bf16.mxu0 %vm921_vm4, %v2621_v61  ;;  %v2628_v61 = vrot.slane %v3613_v38, 1  ;;  %v2635_v39 = vrot.slane %v4000_v30, 1  ;;  %v811_v38 = vpop.permute.xlu0 %810 }
 0x101   : > { %2046 = vmatmul.mubr.bf16.gmra.mrb[48].mxu1 %v935_v50  ;;  %v2674_v50 = vsel %vm921_vm4, %v5289_v59, %v2540_v20  ;;  %v2542_v29 = vpop.permute.xlu1 %2541 }
 0x102   : > { %3563 = vmatprep.mubr.msk.bf16.mxu1 %vm921_vm4, %v890_v17  ;;  %v2630_v17 = vsel %vm872_vm3, %v2628_v61, %v2629_v13  ;;  %v813_v42 = vpop.permute.xlu0 %812  ;;  %v5296_v13 = vld [vmem:[#allocation14_spill] sm:$0xff] }
 0x103   : > { %v953_v12 = vsel %vm921_vm4, %v5296_v13, %v813_v42 }
 0x105   : > { %2913 = vmatmul.mubr.bf16.gmra.mrb[48].mxu0 %v2668_v36  ;;  %v944_v36 = vsel %vm921_vm4, %v5290_v56, %v807_v10  ;;  %v5298_v10 = vld [vmem:[#allocation16_spill] sm:$0xff] }
 0x106   : > { %3663 = vmatprep.mubr.msk.bf16.mxu0 %vm921_vm4, %v2624_v46  ;;  %v899_v46 = vsel %vm872_vm3, %v897_v47, %v898_v53  ;;  %v5299_v47 = vld [vmem:[#allocation17_spill] sm:$0xff]  ;;  %v5300_v53 = vld [vmem:[#allocation18_spill] sm:$0xff]  ;;  %v5302_v56 = vld [vmem:[#allocation20_spill] sm:$0xff] }
 0x109   : > { %2054 = vmatmul.mubr.bf16.gmra.mrb[52].mxu1 %v938_v55  ;;  %v2677_v55 = vsel %vm921_vm4, %v5291_v28, %v2542_v29  ;;  %v5303_v29 = vld [vmem:[#allocation21_spill] sm:$0xff] }
 0x10a   : > { %3564 = vmatprep.mubr.msk.bf16.mxu1 %vm921_vm4, %v893_v60  ;;  %v2633_v60 = vsel %vm872_vm3, %v2631_v26, %v2632_v3  ;;  %v5304_v26 = vld [vmem:[#allocation22_spill] sm:$0xff]  ;;  %v5305_v3 = vld [vmem:[#allocation23_spill] sm:$0xff] }
 0x10d   : > { %2921 = vmatmul.mubr.bf16.gmra.mrb[52].mxu0 %v2671_v51  ;;  %v2544_v51 = vpop.permute.xlu1 %2543 }
 0x10e   : > { %3664 = vmatprep.mubr.msk.bf16.mxu0 %vm921_vm4, %v2627_v33  ;;  %v2634_v33 = vrot.slane %v3615_v16, 1  ;;  %v2680_v57 = vsel %vm921_vm4, %v5293_v24, %v2544_v51 }
 0x110   : > { %v2636_v18 = vsel %vm872_vm3, %v2634_v33, %v2635_v39 }
 0x111   : > { %2062 = vmatmul.mubr.bf16.gmra.mrb[56].mxu1 %v941_v37  ;;  %v950_v37 = vsel %vm921_vm4, %v5294_v2, %v811_v38  ;;  %v2546_v20 = vpop.permute.xlu1 %2545 }
 0x112   : > { %3565 = vmatprep.mubr.msk.bf16.mxu1 %vm921_vm4, %v896_v40  ;;  %v5295_v40 = vld [vmem:[#allocation13_spill] sm:$0xff] }
 0x113   : > { %v2683_v61 = vsel %vm921_vm4, %v5295_v40, %v2546_v20 }
 0x115   : > { %2929 = vmatmul.mubr.bf16.gmra.mrb[56].mxu0 %v2674_v50 }
 0x116   : > { %3665 = vmatprep.mubr.msk.bf16.mxu0 %vm921_vm4, %v2630_v17 }
 0x117   : > { %v2548_v1 = vpop.permute.xlu1 %2547 }
 0x118   : > { %v2686_v59 = vsel %vm921_vm4, %v5297_v0, %v2548_v1 }
 0x119   : > { %2070 = vmatmul.mubr.bf16.gmra.mrb[60].mxu1 %v944_v36 }
 0x11a   : > { %3566 = vmatprep.mubr.msk.bf16.mxu1 %vm921_vm4, %v899_v46 }
 0x11b   : > { %v815_v50 = vpop.permute.xlu0 %814 }
 0x11d   : > { %2937 = vmatmul.mubr.bf16.gmra.mrb[60].mxu0 %v2677_v55 }
 0x11e   : > { %3666 = vmatprep.mubr.msk.bf16.mxu0 %vm921_vm4, %v2633_v60 }
 0x121   : > { %2078 = vmatmul.mubr.bf16.gmra.mrb[64].mxu1 %v947_v21 }
 0x122   : > { %3567 = vmatprep.mubr.msk.bf16.mxu1 %vm921_vm4, %v902_v35  ;;  %v2550_v17 = vpop.permute.xlu1 %2549 }
 0x125   : > { %2945 = vmatmul.mubr.bf16.gmra.mrb[64].mxu0 %v2680_v57 }
 0x126   : > { %3667 = vmatprep.mubr.msk.bf16.mxu0 %vm921_vm4, %v2636_v18  ;;  %v817_v23 = vpop.permute.xlu0 %816 }
 0x129   : > { %2086 = vmatmul.mubr.bf16.gmra.mrb[68].mxu1 %v950_v37 }
 0x12a   : > { %3568 = vmatprep.mubr.msk.bf16.mxu1 %vm921_vm4, %v4842_v34  ;;  %v956_v34 = vsel %vm921_vm4, %v5298_v10, %v815_v50  ;;  %v2552_v6 = vpop.permute.xlu1 %2551 }
 0x12d   : > { %2953 = vmatmul.mubr.bf16.gmra.mrb[68].mxu0 %v2683_v61 }
 0x12e   : > { %3668 = vmatprep.mubr.msk.bf16.mxu0 %vm921_vm4, %v4848_v9  ;;  %v2689_v9 = vsel %vm921_vm4, %v5299_v47, %v2550_v17  ;;  %v819_v62 = vpop.permute.xlu0 %818 }
 0x131   : > { %2094 = vmatmul.mubr.bf16.gmra.mrb[72].mxu1 %v953_v12 }
 0x132   : > { %3569 = vmatprep.mubr.msk.bf16.mxu1 %vm921_vm4, %v4855_v31  ;;  %v959_v31 = vsel %vm921_vm4, %v5300_v53, %v817_v23  ;;  %v2554_v36 = vpop.permute.xlu1 %2553 }
 0x135   : > { %2961 = vmatmul.mubr.bf16.gmra.mrb[72].mxu0 %v2686_v59 }
 0x136   : > { %3669 = vmatprep.mubr.msk.bf16.mxu0 %vm921_vm4, %v4859_v44  ;;  %v2692_v44 = vsel %vm921_vm4, %v5301_v14, %v2552_v6  ;;  %v821_v46 = vpop.permute.xlu0 %820 }
 0x139   : > { %2102 = vmatmul.mubr.bf16.gmra.mrb[76].mxu1 %v956_v34 }
 0x13a   : > { %3570 = vmatprep.mubr.msk.bf16.mxu1 %vm921_vm4, %v4865_v52  ;;  %v962_v52 = vsel %vm921_vm4, %v5302_v56, %v819_v62  ;;  %v2556_v54 = vpop.permute.xlu1 %2555 }
 0x13d   : > { %2969 = vmatmul.mubr.bf16.gmra.mrb[76].mxu0 %v2689_v9 }
 0x13e   : > { %3670 = vmatprep.mubr.msk.bf16.mxu0 %vm921_vm4, %v4876_v58  ;;  %v2695_v58 = vsel %vm921_vm4, %v5303_v29, %v2554_v36  ;;  %v823_v7 = vpop.permute.xlu0 %822 }
 0x141   : > { %2110 = vmatmul.mubr.bf16.gmra.mrb[80].mxu1 %v959_v31 }
 0x142   : > { %3571 = vmatprep.mubr.msk.bf16.mxu1 %vm921_vm4, %v4880_v11  ;;  %v965_v11 = vsel %vm921_vm4, %v5304_v26, %v821_v46 }
 0x145   : > { %2977 = vmatmul.mubr.bf16.gmra.mrb[80].mxu0 %v2692_v44 }
 0x146   : > { %3671 = vmatprep.mubr.msk.bf16.mxu0 %vm921_vm4, %v4885_v4  ;;  %v2698_v4 = vsel %vm921_vm4, %v5305_v3, %v2556_v54 }
 0x147   : > { %v2558_v48 = vpop.permute.xlu1 %2557 }
 0x149   : > { %2118 = vmatmul.mubr.bf16.gmra.mrb[84].mxu1 %v962_v52 }
 0x14a   : > { %3572 = vmatprep.mubr.msk.bf16.mxu1 %vm921_vm4, %v4890_v43  ;;  %v968_v43 = vsel %vm921_vm4, %v4735_v49, %v823_v7 }
 0x14d   : > { %2985 = vmatmul.mubr.bf16.gmra.mrb[84].mxu0 %v2695_v58 }
 0x14e   : > { %3672 = vmatprep.mubr.msk.bf16.mxu0 %vm921_vm4, %v4897_v63  ;;  %v2701_v63 = vsel %vm921_vm4, %v4794_v15, %v2558_v48 }
 0x151   : > { %2126 = vmatmul.mubr.bf16.gmra.mrb[88].mxu1 %v965_v11 }
 0x152   : > { %3573 = vmatprep.mubr.msk.bf16.mxu1 %vm921_vm4, %v4907_v19 }
 0x155   : > { %2993 = vmatmul.mubr.bf16.gmra.mrb[88].mxu0 %v2698_v4 }
 0x156   : > { %3673 = vmatprep.mubr.msk.bf16.mxu0 %vm921_vm4, %v4910_v5 }
 0x159   : > { %2134 = vmatmul.mubr.bf16.gmra.mrb[92].mxu1 %v968_v43 }
 0x15d   : > { %3001 = vmatmul.mubr.bf16.gmra.mrb[92].mxu0 %v2701_v63 }
 0x174   : > { %v5025_v25 = vpop.f32.mrb[0].mxu1 }
 0x175   : > { %v1800_v28 = vpop.f32.mrb[1].mxu1 }
 0x176   : > { %v5027_v55 = vpop.f32.mrb[2].mxu1 }
 0x177   : > { %v1803_v19 = vpop.f32.mrb[3].mxu1 }
 0x178   : > { %v1734_v22 = vpop.f32.mrb[0].mxu0 }
 0x179   : > { %v1736_v60 = vpop.f32.mrb[1].mxu0 }
 0x17a   : > { %v1737_v8 = vpop.f32.mrb[2].mxu0 }
 0x17b   : > { %v1739_v41 = vpop.f32.mrb[3].mxu0 }
 0x17c   : > { %v5029_v49 = vpop.f32.mrb[4].mxu1 }
 0x17d   : > { %v1808_v27 = vpop.f32.mrb[5].mxu1 }
 0x17e   : > { %v5031_v5 = vpop.f32.mrb[6].mxu1 }
 0x17f   : > { %v1811_v32 = vpop.f32.mrb[7].mxu1 }
 0x180   : > { %v5033_v16 = vpop.f32.mrb[4].mxu0 }
 0x181   : > { %v1744_v15 = vpop.f32.mrb[5].mxu0 }
 0x182   : > { %v5035_v45 = vpop.f32.mrb[6].mxu0 }
 0x183   : > { %v1747_v21 = vpop.f32.mrb[7].mxu0 }
 0x184   : > { %v5037_v51 = vpop.f32.mrb[8].mxu1  ;;  %v5088_v21 = vld [vmem:[%s5234_s3] ss:$0 sm:$0xff] }
 0x185   : > { %v1816_v35 = vpop.f32.mrb[9].mxu1 }
 0x186   : > { %v5039_v33 = vpop.f32.mrb[10].mxu1 }
 0x187   : > { %v1819_v30 = vpop.f32.mrb[11].mxu1 }
 0x188   : > { %v5041_v39 = vpop.f32.mrb[8].mxu0 }
 0x189   : > { %v1752_v24 = vpop.f32.mrb[9].mxu0 }
 0x18a   : > { %v5043_v57 = vpop.f32.mrb[10].mxu0 }
 0x18b   : > { %v1755_v38 = vpop.f32.mrb[11].mxu0 }
 0x18c   : > { %v5045_v18 = vpop.f32.mrb[12].mxu1 }
 0x18d   : > { %v1824_v2 = vpop.f32.mrb[13].mxu1 }
 0x18e   : > { %v5047_v37 = vpop.f32.mrb[14].mxu1 }
 0x18f   : > { %v1827_v20 = vpop.f32.mrb[15].mxu1 }
 0x190   : > { %v5049_v40 = vpop.f32.mrb[12].mxu0 }
 0x191   : > { %v1760_v61 = vpop.f32.mrb[13].mxu0 }
 0x192   : > { %v5051_v42 = vpop.f32.mrb[14].mxu0 }
 0x193   : > { %v1763_v13 = vpop.f32.mrb[15].mxu0 }
 0x194   : > { %v5053_v12 = vpop.f32.mrb[16].mxu1 }
 0x195   : > { %v1832_v1 = vpop.f32.mrb[17].mxu1 }
 0x196   : > { %v5055_v0 = vpop.f32.mrb[18].mxu1 }
 0x197   : > { %v1835_v59 = vpop.f32.mrb[19].mxu1 }
 0x198   : > { %v5057_v50 = vpop.f32.mrb[16].mxu0 }
 0x199   : > { %v1768_v10 = vpop.f32.mrb[17].mxu0 }
 0x19a   : > { %v5059_v34 = vpop.f32.mrb[18].mxu0 }
 0x19b   : > { %v1771_v17 = vpop.f32.mrb[19].mxu0 }
 0x19c   : > { %v5061_v47 = vpop.f32.mrb[20].mxu1 }
 0x19d   : > { %v1840_v9 = vpop.f32.mrb[21].mxu1 }
 0x19e   : > { %v5063_v23 = vpop.f32.mrb[22].mxu1 }
 0x19f   : > { %v1843_v53 = vpop.f32.mrb[23].mxu1 }
 0x1a0   : > { %v5065_v31 = vpop.f32.mrb[20].mxu0 }
 0x1a1   : > { %v1776_v6 = vpop.f32.mrb[21].mxu0 }
 0x1a2   : > { %v5067_v14 = vpop.f32.mrb[22].mxu0 }
 0x1a3   : > { %v1779_v44 = vpop.f32.mrb[23].mxu0 }
 0x1a4   : > { %v5069_v62 = vpop.f32.mrb[24].mxu1 }
 0x1a5   : > { %v1848_v56 = vpop.f32.mrb[25].mxu1 }
 0x1a6   : > { %v5071_v52 = vpop.f32.mrb[26].mxu1 }
 0x1a7   : > { %v1851_v36 = vpop.f32.mrb[27].mxu1 }
 0x1a8   : > { %v5073_v29 = vpop.f32.mrb[24].mxu0 }
 0x1a9   : > { %v1784_v58 = vpop.f32.mrb[25].mxu0 }
 0x1aa   : > { %v5075_v46 = vpop.f32.mrb[26].mxu0 }
 0x1ab   : > { %v1787_v26 = vpop.f32.mrb[27].mxu0 }
 0x1ac   : > { %v5077_v11 = vpop.f32.mrb[28].mxu1 }
 0x1ad   : > { %v1856_v54 = vpop.f32.mrb[29].mxu1 }
 0x1ae   : > { %v5079_v3 = vpop.f32.mrb[30].mxu1 }
 0x1af   : > { %v1859_v4 = vpop.f32.mrb[31].mxu1 }
 0x1b0   : > { %v5081_v7 = vpop.f32.mrb[28].mxu0 }
 0x1b1   : > { %v1792_v43 = vpop.f32.mrb[29].mxu0 }
 0x1b2   : > { %v5083_v48 = vpop.f32.mrb[30].mxu0 }
 0x1b3   : > { %v1795_v63 = vpop.f32.mrb[31].mxu0 }
 0x1b4   : > { %v2015_v28 = vpop.f32.mrb[32].mxu1 }
 0x1b5   : > { %v2016_v19 = vadd.f32 %v2015_v28, %v1734_v22  ;;  %v2017_v60 = vpop.f32.mrb[33].mxu1 }
 0x1b6   : > { %v2018_v41 = vpop.f32.mrb[34].mxu1 }
 0x1b7   : > { %v2019_v27 = vadd.f32 %v2018_v41, %v1737_v8  ;;  %v2020_v32 = vpop.f32.mrb[35].mxu1 }
 0x1b8   : > { %v2882_v15 = vpop.f32.mrb[32].mxu0 }
 0x1b9   : > { %v3009_v35 = vadd.f32 %v2882_v15, %v2016_v19  ;;  %v2884_v30 = vpop.f32.mrb[33].mxu0 }
 0x1ba   : > { %v2885_v24 = vpop.f32.mrb[34].mxu0 }
 0x1bb   : > { %v3048_v38 = vadd.f32 %v5088_v21, %v3009_v35  ;;  %v3010_v2 = vadd.f32 %v2885_v24, %v2019_v27  ;;  %v2887_v20 = vpop.f32.mrb[35].mxu0 }
 0x1bc   : > { %v2023_v61 = vpop.f32.mrb[36].mxu1 }
 0x1bd   : > { %v3080_v22 = vmax.f32 %v3048_v38, 0.0  ;;  %v3049_v13 = vadd.f32 %v5088_v21, %v3010_v2  ;;  %v2024_v8 = vadd.f32 %v2023_v61, %v5033_v16  ;;  %v2025_v1 = vpop.f32.mrb[37].mxu1 }
 0x1be   : > { %v2026_v59 = vpop.f32.mrb[38].mxu1 }
 0x1bf   : > { %v3712_v10 = vpack.c.bf16 %v3080_v22, %v3080_v22  ;;  %v3081_v17 = vmax.f32 %v3049_v13, 0.0  ;;  %v2027_v9 = vadd.f32 %v2026_v59, %v5035_v45  ;;  %v2028_v53 = vpop.f32.mrb[39].mxu1 }
 0x1c0   : > { %v2890_v6 = vpop.f32.mrb[36].mxu0 }
 0x1c1   : > { %3240 = vst.msk [vmem:[%s5097_s20] sm:$0xf] %vm344_vm0, %v3712_v10  ;;  %v3713_v44 = vpack.c.bf16 %v3081_v17, %v3081_v17  ;;  %v3011_v56 = vadd.f32 %v2890_v6, %v2024_v8  ;;  %v2892_v16 = vpop.f32.mrb[37].mxu0 }
 0x1c2   : > { %v2893_v36 = vpop.f32.mrb[38].mxu0 }
 0x1c3   : > { %3241 = vst.msk [vmem:[%s5097_s20 + $0x4] sm:$0xf] %vm344_vm0, %v3713_v44  ;;  %v3050_v58 = vadd.f32 %v5088_v21, %v3011_v56  ;;  %v3012_v26 = vadd.f32 %v2893_v36, %v2027_v9  ;;  %v2895_v54 = vpop.f32.mrb[39].mxu0 }
 0x1c4   : > { %v2031_v4 = vpop.f32.mrb[40].mxu1 }
 0x1c5   : > { %v3082_v43 = vmax.f32 %v3050_v58, 0.0  ;;  %v3051_v45 = vadd.f32 %v5088_v21, %v3012_v26  ;;  %v2032_v63 = vadd.f32 %v2031_v4, %v5041_v39  ;;  %v2033_v28 = vpop.f32.mrb[41].mxu1 }
 0x1c6   : > { %v2034_v19 = vpop.f32.mrb[42].mxu1 }
 0x1c7   : > { %v3714_v60 = vpack.c.bf16 %v3082_v43, %v3082_v43  ;;  %v3083_v41 = vmax.f32 %v3051_v45, 0.0  ;;  %v2035_v27 = vadd.f32 %v2034_v19, %v5043_v57  ;;  %v2036_v32 = vpop.f32.mrb[43].mxu1 }
 0x1c8   : > { %v2898_v15 = vpop.f32.mrb[40].mxu0 }
 0x1c9   : > { %3242 = vst.msk [vmem:[%s5097_s20 + $0x8] sm:$0xf] %vm344_vm0, %v3714_v60  ;;  %v3715_v35 = vpack.c.bf16 %v3083_v41, %v3083_v41  ;;  %v3013_v30 = vadd.f32 %v2898_v15, %v2032_v63  ;;  %v2900_v24 = vpop.f32.mrb[41].mxu0 }
 0x1ca   : > { %v2901_v38 = vpop.f32.mrb[42].mxu0 }
 0x1cb   : > { %3243 = vst.msk [vmem:[%s5097_s20 + $0xc] sm:$0xf] %vm344_vm0, %v3715_v35  ;;  %v3052_v2 = vadd.f32 %v5088_v21, %v3013_v30  ;;  %v3014_v39 = vadd.f32 %v2901_v38, %v2035_v27  ;;  %v2903_v20 = vpop.f32.mrb[43].mxu0 }
 0x1cc   : > { %v2039_v61 = vpop.f32.mrb[44].mxu1 }
 0x1cd   : > { %v3084_v22 = vmax.f32 %v3052_v2, 0.0  ;;  %v3053_v57 = vadd.f32 %v5088_v21, %v3014_v39  ;;  %v2040_v13 = vadd.f32 %v2039_v61, %v5049_v40  ;;  %v2041_v8 = vpop.f32.mrb[45].mxu1 }
 0x1ce   : > { %v2042_v1 = vpop.f32.mrb[46].mxu1 }
 0x1cf   : > { %v3716_v59 = vpack.c.bf16 %v3084_v22, %v3084_v22  ;;  %v3085_v10 = vmax.f32 %v3053_v57, 0.0  ;;  %v2043_v17 = vadd.f32 %v2042_v1, %v5051_v42  ;;  %v2044_v9 = vpop.f32.mrb[47].mxu1 }
 0x1d0   : > { %v2906_v53 = vpop.f32.mrb[44].mxu0 }
 0x1d1   : > { %3244 = vst.msk [vmem:[%s5097_s20 + $0x10] sm:$0xf] %vm344_vm0, %v3716_v59  ;;  %v3717_v6 = vpack.c.bf16 %v3085_v10, %v3085_v10  ;;  %v3015_v44 = vadd.f32 %v2906_v53, %v2040_v13  ;;  %v2908_v56 = vpop.f32.mrb[45].mxu0 }
 0x1d2   : > { %v2909_v16 = vpop.f32.mrb[46].mxu0 }
 0x1d3   : > { %3245 = vst.msk [vmem:[%s5097_s20 + $0x14] sm:$0xf] %vm344_vm0, %v3717_v6  ;;  %v3054_v36 = vadd.f32 %v5088_v21, %v3015_v44  ;;  %v3016_v40 = vadd.f32 %v2909_v16, %v2043_v17  ;;  %v2911_v58 = vpop.f32.mrb[47].mxu0 }
 0x1d4   : > { %v2047_v26 = vpop.f32.mrb[48].mxu1 }
 0x1d5   : > { %v3086_v54 = vmax.f32 %v3054_v36, 0.0  ;;  %v3055_v42 = vadd.f32 %v5088_v21, %v3016_v40  ;;  %v2048_v4 = vadd.f32 %v2047_v26, %v5057_v50  ;;  %v2049_v43 = vpop.f32.mrb[49].mxu1 }
 0x1d6   : > { %v2050_v45 = vpop.f32.mrb[50].mxu1 }
 0x1d7   : > { %v3718_v63 = vpack.c.bf16 %v3086_v54, %v3086_v54  ;;  %v3087_v28 = vmax.f32 %v3055_v42, 0.0  ;;  %v2051_v19 = vadd.f32 %v2050_v45, %v5059_v34  ;;  %v2052_v60 = vpop.f32.mrb[51].mxu1 }
 0x1d8   : > { %v2914_v41 = vpop.f32.mrb[48].mxu0 }
 0x1d9   : > { %3246 = vst.msk [vmem:[%s5097_s20 + $0x18] sm:$0xf] %vm344_vm0, %v3718_v63  ;;  %v3719_v27 = vpack.c.bf16 %v3087_v28, %v3087_v28  ;;  %v3017_v32 = vadd.f32 %v2914_v41, %v2048_v4  ;;  %v2916_v15 = vpop.f32.mrb[49].mxu0 }
 0x1da   : > { %v2917_v35 = vpop.f32.mrb[50].mxu0 }
 0x1db   : > { %3247 = vst.msk [vmem:[%s5097_s20 + $0x1c] sm:$0xf] %vm344_vm0, %v3719_v27  ;;  %v3056_v30 = vadd.f32 %v5088_v21, %v3017_v32  ;;  %v3018_v50 = vadd.f32 %v2917_v35, %v2051_v19  ;;  %v2919_v24 = vpop.f32.mrb[51].mxu0 }
 0x1dc   : > { %v2055_v38 = vpop.f32.mrb[52].mxu1 }
 0x1dd   : > { %v3088_v2 = vmax.f32 %v3056_v30, 0.0  ;;  %v3057_v34 = vadd.f32 %v5088_v21, %v3018_v50  ;;  %v2056_v39 = vadd.f32 %v2055_v38, %v5065_v31  ;;  %v2057_v20 = vpop.f32.mrb[53].mxu1 }
 0x1de   : > { %v2058_v61 = vpop.f32.mrb[54].mxu1 }
 0x1df   : > { %v3720_v22 = vpack.c.bf16 %v3088_v2, %v3088_v2  ;;  %v3089_v57 = vmax.f32 %v3057_v34, 0.0  ;;  %v2059_v13 = vadd.f32 %v2058_v61, %v5067_v14  ;;  %v2060_v8 = vpop.f32.mrb[55].mxu1 }
 0x1e0   : > { %v2922_v1 = vpop.f32.mrb[52].mxu0 }
 0x1e1   : > { %3248 = vst.msk [vmem:[%s5097_s20 + $0x20] sm:$0xf] %vm344_vm0, %v3720_v22  ;;  %v3721_v59 = vpack.c.bf16 %v3089_v57, %v3089_v57  ;;  %v3019_v10 = vadd.f32 %v2922_v1, %v2056_v39  ;;  %v2924_v17 = vpop.f32.mrb[53].mxu0 }
 0x1e2   : > { %v2925_v9 = vpop.f32.mrb[54].mxu0 }
 0x1e3   : > { %3249 = vst.msk [vmem:[%s5097_s20 + $0x24] sm:$0xf] %vm344_vm0, %v3721_v59  ;;  %v3058_v53 = vadd.f32 %v5088_v21, %v3019_v10  ;;  %v3020_v31 = vadd.f32 %v2925_v9, %v2059_v13  ;;  %v2927_v6 = vpop.f32.mrb[55].mxu0 }
 0x1e4   : > { %v2063_v44 = vpop.f32.mrb[56].mxu1 }
 0x1e5   : > { %v3090_v56 = vmax.f32 %v3058_v53, 0.0  ;;  %v3059_v14 = vadd.f32 %v5088_v21, %v3020_v31  ;;  %v2064_v16 = vadd.f32 %v2063_v44, %v5073_v29  ;;  %v2065_v36 = vpop.f32.mrb[57].mxu1 }
 0x1e6   : > { %v2066_v40 = vpop.f32.mrb[58].mxu1 }
 0x1e7   : > { %v3722_v58 = vpack.c.bf16 %v3090_v56, %v3090_v56  ;;  %v3091_v26 = vmax.f32 %v3059_v14, 0.0  ;;  %v2067_v54 = vadd.f32 %v2066_v40, %v5075_v46  ;;  %v2068_v42 = vpop.f32.mrb[59].mxu1 }
 0x1e8   : > { %v2930_v4 = vpop.f32.mrb[56].mxu0 }
 0x1e9   : > { %3250 = vst.msk [vmem:[%s5097_s20 + $0x28] sm:$0xf] %vm344_vm0, %v3722_v58  ;;  %v3723_v43 = vpack.c.bf16 %v3091_v26, %v3091_v26  ;;  %v3021_v45 = vadd.f32 %v2930_v4, %v2064_v16  ;;  %v2932_v63 = vpop.f32.mrb[57].mxu0 }
 0x1ea   : > { %v2933_v28 = vpop.f32.mrb[58].mxu0 }
 0x1eb   : > { %3251 = vst.msk [vmem:[%s5097_s20 + $0x2c] sm:$0xf] %vm344_vm0, %v3723_v43  ;;  %v3060_v19 = vadd.f32 %v5088_v21, %v3021_v45  ;;  %v3022_v29 = vadd.f32 %v2933_v28, %v2067_v54  ;;  %v2935_v60 = vpop.f32.mrb[59].mxu0 }
 0x1ec   : > { %v2071_v41 = vpop.f32.mrb[60].mxu1 }
 0x1ed   : > { %v3092_v27 = vmax.f32 %v3060_v19, 0.0  ;;  %v3061_v46 = vadd.f32 %v5088_v21, %v3022_v29  ;;  %v2072_v32 = vadd.f32 %v2071_v41, %v5081_v7  ;;  %v2073_v15 = vpop.f32.mrb[61].mxu1 }
 0x1ee   : > { %v2074_v35 = vpop.f32.mrb[62].mxu1 }
 0x1ef   : > { %v3724_v30 = vpack.c.bf16 %v3092_v27, %v3092_v27  ;;  %v3093_v50 = vmax.f32 %v3061_v46, 0.0  ;;  %v2075_v24 = vadd.f32 %v2074_v35, %v5083_v48  ;;  %v2076_v38 = vpop.f32.mrb[63].mxu1 }
 0x1f0   : > { %v2938_v2 = vpop.f32.mrb[60].mxu0 }
 0x1f1   : > { %3252 = vst.msk [vmem:[%s5097_s20 + $0x30] sm:$0xf] %vm344_vm0, %v3724_v30  ;;  %v3725_v34 = vpack.c.bf16 %v3093_v50, %v3093_v50  ;;  %v3023_v39 = vadd.f32 %v2938_v2, %v2072_v32  ;;  %v2940_v20 = vpop.f32.mrb[61].mxu0 }
 0x1f2   : > { %v2941_v61 = vpop.f32.mrb[62].mxu0 }
 0x1f3   : > { %3253 = vst.msk [vmem:[%s5097_s20 + $0x34] sm:$0xf] %vm344_vm0, %v3725_v34  ;;  %v3062_v22 = vadd.f32 %v5088_v21, %v3023_v39  ;;  %v3024_v7 = vadd.f32 %v2941_v61, %v2075_v24  ;;  %v2943_v57 = vpop.f32.mrb[63].mxu0 }
 0x1f4   : > { %v2079_v13 = vpop.f32.mrb[64].mxu1 }
 0x1f5   : > { %v3094_v8 = vmax.f32 %v3062_v22, 0.0  ;;  %v3063_v48 = vadd.f32 %v5088_v21, %v3024_v7  ;;  %v2080_v1 = vadd.f32 %v2079_v13, %v5025_v25  ;;  %v2081_v59 = vpop.f32.mrb[65].mxu1 }
 0x1f6   : > { %v2082_v10 = vpop.f32.mrb[66].mxu1 }
 0x1f7   : > { %v3726_v17 = vpack.c.bf16 %v3094_v8, %v3094_v8  ;;  %v3095_v9 = vmax.f32 %v3063_v48, 0.0  ;;  %v2083_v53 = vadd.f32 %v2082_v10, %v5027_v55  ;;  %v2084_v31 = vpop.f32.mrb[67].mxu1 }
 0x1f8   : > { %v2946_v6 = vpop.f32.mrb[64].mxu0 }
 0x1f9   : > { %3254 = vst.msk [vmem:[%s5097_s20 + $0x38] sm:$0xf] %vm344_vm0, %v3726_v17  ;;  %v3727_v44 = vpack.c.bf16 %v3095_v9, %v3095_v9  ;;  %v3025_v56 = vadd.f32 %v2946_v6, %v2080_v1  ;;  %v2948_v14 = vpop.f32.mrb[65].mxu0 }
 0x1fa   : > { %v2949_v16 = vpop.f32.mrb[66].mxu0 }
 0x1fb   : > { %3255 = vst.msk [vmem:[%s5097_s20 + $0x3c] sm:$0xf] %vm344_vm0, %v3727_v44  ;;  %v3064_v36 = vadd.f32 %v5088_v21, %v3025_v56  ;;  %v3026_v25 = vadd.f32 %v2949_v16, %v2083_v53  ;;  %v2951_v40 = vpop.f32.mrb[67].mxu0 }
 0x1fc   : > { %v2087_v58 = vpop.f32.mrb[68].mxu1 }
 0x1fd   : > { %v3096_v26 = vmax.f32 %v3064_v36, 0.0  ;;  %v3065_v55 = vadd.f32 %v5088_v21, %v3026_v25  ;;  %v2088_v54 = vadd.f32 %v2087_v58, %v5029_v49  ;;  %v2089_v42 = vpop.f32.mrb[69].mxu1 }
 0x1fe   : > { %v2090_v4 = vpop.f32.mrb[70].mxu1 }
 0x1ff   : > { %v3728_v43 = vpack.c.bf16 %v3096_v26, %v3096_v26  ;;  %v3097_v45 = vmax.f32 %v3065_v55, 0.0  ;;  %v2091_v63 = vadd.f32 %v2090_v4, %v5031_v5  ;;  %v2092_v28 = vpop.f32.mrb[71].mxu1 }
 0x200   : > { %v2954_v19 = vpop.f32.mrb[68].mxu0 }
 0x201   : > { %3256 = vst.msk [vmem:[%s5097_s20 + $0x40] sm:$0xf] %vm344_vm0, %v3728_v43  ;;  %v3729_v29 = vpack.c.bf16 %v3097_v45, %v3097_v45  ;;  %v3027_v60 = vadd.f32 %v2954_v19, %v2088_v54  ;;  %v2956_v41 = vpop.f32.mrb[69].mxu0 }
 0x202   : > { %v2957_v27 = vpop.f32.mrb[70].mxu0 }
 0x203   : > { %3257 = vst.msk [vmem:[%s5097_s20 + $0x44] sm:$0xf] %vm344_vm0, %v3729_v29  ;;  %v3066_v46 = vadd.f32 %v5088_v21, %v3027_v60  ;;  %v3028_v49 = vadd.f32 %v2957_v27, %v2091_v63  ;;  %v2959_v32 = vpop.f32.mrb[71].mxu0 }
 0x204   : > { %v2095_v15 = vpop.f32.mrb[72].mxu1 }
 0x205   : > { %v3098_v35 = vmax.f32 %v3066_v46, 0.0  ;;  %v3067_v5 = vadd.f32 %v5088_v21, %v3028_v49  ;;  %v2096_v30 = vadd.f32 %v2095_v15, %v5037_v51  ;;  %v2097_v50 = vpop.f32.mrb[73].mxu1 }
 0x206   : > { %v2098_v24 = vpop.f32.mrb[74].mxu1 }
 0x207   : > { %v3730_v38 = vpack.c.bf16 %v3098_v35, %v3098_v35  ;;  %v3099_v2 = vmax.f32 %v3067_v5, 0.0  ;;  %v2099_v34 = vadd.f32 %v2098_v24, %v5039_v33  ;;  %v2100_v39 = vpop.f32.mrb[75].mxu1 }
 0x208   : > { %v2962_v20 = vpop.f32.mrb[72].mxu0 }
 0x209   : > { %3258 = vst.msk [vmem:[%s5097_s20 + $0x48] sm:$0xf] %vm344_vm0, %v3730_v38  ;;  %v3731_v61 = vpack.c.bf16 %v3099_v2, %v3099_v2  ;;  %v3029_v22 = vadd.f32 %v2962_v20, %v2096_v30  ;;  %v2964_v7 = vpop.f32.mrb[73].mxu0 }
 0x20a   : > { %v2965_v57 = vpop.f32.mrb[74].mxu0 }
 0x20b   : > { %3259 = vst.msk [vmem:[%s5097_s20 + $0x4c] sm:$0xf] %vm344_vm0, %v3731_v61  ;;  %v3068_v13 = vadd.f32 %v5088_v21, %v3029_v22  ;;  %v3030_v51 = vadd.f32 %v2965_v57, %v2099_v34  ;;  %v2967_v8 = vpop.f32.mrb[75].mxu0 }
 0x20c   : > { %v2103_v48 = vpop.f32.mrb[76].mxu1 }
 0x20d   : > { %v3100_v1 = vmax.f32 %v3068_v13, 0.0  ;;  %v3069_v33 = vadd.f32 %v5088_v21, %v3030_v51  ;;  %v2104_v59 = vadd.f32 %v2103_v48, %v5045_v18  ;;  %v2105_v10 = vpop.f32.mrb[77].mxu1 }
 0x20e   : > { %v2106_v17 = vpop.f32.mrb[78].mxu1 }
 0x20f   : > { %v3732_v9 = vpack.c.bf16 %v3100_v1, %v3100_v1  ;;  %v3101_v53 = vmax.f32 %v3069_v33, 0.0  ;;  %v2107_v31 = vadd.f32 %v2106_v17, %v5047_v37  ;;  %v2108_v6 = vpop.f32.mrb[79].mxu1 }
 0x210   : > { %v2970_v44 = vpop.f32.mrb[76].mxu0 }
 0x211   : > { %3260 = vst.msk [vmem:[%s5097_s20 + $0x50] sm:$0xf] %vm344_vm0, %v3732_v9  ;;  %v3733_v56 = vpack.c.bf16 %v3101_v53, %v3101_v53  ;;  %v3031_v14 = vadd.f32 %v2970_v44, %v2104_v59  ;;  %v2972_v16 = vpop.f32.mrb[77].mxu0 }
 0x212   : > { %v2973_v36 = vpop.f32.mrb[78].mxu0 }
 0x213   : > { %3261 = vst.msk [vmem:[%s5097_s20 + $0x54] sm:$0xf] %vm344_vm0, %v3733_v56  ;;  %v3070_v25 = vadd.f32 %v5088_v21, %v3031_v14  ;;  %v3032_v18 = vadd.f32 %v2973_v36, %v2107_v31  ;;  %v2975_v40 = vpop.f32.mrb[79].mxu0 }
 0x214   : > { %v2111_v58 = vpop.f32.mrb[80].mxu1 }
 0x215   : > { %v3102_v26 = vmax.f32 %v3070_v25, 0.0  ;;  %v3071_v37 = vadd.f32 %v5088_v21, %v3032_v18  ;;  %v2112_v55 = vadd.f32 %v2111_v58, %v5053_v12  ;;  %v2113_v54 = vpop.f32.mrb[81].mxu1 }
 0x216   : > { %v2114_v42 = vpop.f32.mrb[82].mxu1 }
 0x217   : > { %v3734_v4 = vpack.c.bf16 %v3102_v26, %v3102_v26  ;;  %v3103_v43 = vmax.f32 %v3071_v37, 0.0  ;;  %v2115_v45 = vadd.f32 %v2114_v42, %v5055_v0  ;;  %v2116_v63 = vpop.f32.mrb[83].mxu1 }
 0x218   : > { %v2978_v28 = vpop.f32.mrb[80].mxu0 }
 0x219   : > { %3262 = vst.msk [vmem:[%s5097_s20 + $0x58] sm:$0xf] %vm344_vm0, %v3734_v4  ;;  %v3735_v19 = vpack.c.bf16 %v3103_v43, %v3103_v43  ;;  %v3033_v29 = vadd.f32 %v2978_v28, %v2112_v55  ;;  %v2980_v60 = vpop.f32.mrb[81].mxu0 }
 0x21a   : > { %v2981_v41 = vpop.f32.mrb[82].mxu0 }
 0x21b   : > { %3263 = vst.msk [vmem:[%s5097_s20 + $0x5c] sm:$0xf] %vm344_vm0, %v3735_v19  ;;  %v3072_v27 = vadd.f32 %v5088_v21, %v3033_v29  ;;  %v3034_v12 = vadd.f32 %v2981_v41, %v2115_v45  ;;  %v2983_v46 = vpop.f32.mrb[83].mxu0 }
 0x21c   : > { %v2119_v49 = vpop.f32.mrb[84].mxu1 }
 0x21d   : > { %v3104_v32 = vmax.f32 %v3072_v27, 0.0  ;;  %v3073_v0 = vadd.f32 %v5088_v21, %v3034_v12  ;;  %v2120_v15 = vadd.f32 %v2119_v49, %v5061_v47  ;;  %v2121_v35 = vpop.f32.mrb[85].mxu1 }
 0x21e   : > { %v2122_v5 = vpop.f32.mrb[86].mxu1 }
 0x21f   : > { %v3736_v30 = vpack.c.bf16 %v3104_v32, %v3104_v32  ;;  %v3105_v50 = vmax.f32 %v3073_v0, 0.0  ;;  %v2123_v24 = vadd.f32 %v2122_v5, %v5063_v23  ;;  %v2124_v38 = vpop.f32.mrb[87].mxu1 }
 0x220   : > { %v2986_v2 = vpop.f32.mrb[84].mxu0 }
 0x221   : > { %3264 = vst.msk [vmem:[%s5097_s20 + $0x60] sm:$0xf] %vm344_vm0, %v3736_v30  ;;  %v3737_v34 = vpack.c.bf16 %v3105_v50, %v3105_v50  ;;  %v3035_v39 = vadd.f32 %v2986_v2, %v2120_v15  ;;  %v2988_v20 = vpop.f32.mrb[85].mxu0 }
 0x222   : > { %v2989_v61 = vpop.f32.mrb[86].mxu0 }
 0x223   : > { %3265 = vst.msk [vmem:[%s5097_s20 + $0x64] sm:$0xf] %vm344_vm0, %v3737_v34  ;;  %v3074_v22 = vadd.f32 %v5088_v21, %v3035_v39  ;;  %v3036_v47 = vadd.f32 %v2989_v61, %v2123_v24  ;;  %v2991_v7 = vpop.f32.mrb[87].mxu0 }
 0x224   : > { %v2127_v57 = vpop.f32.mrb[88].mxu1 }
 0x225   : > { %v3106_v13 = vmax.f32 %v3074_v22, 0.0  ;;  %v3075_v23 = vadd.f32 %v5088_v21, %v3036_v47  ;;  %v2128_v51 = vadd.f32 %v2127_v57, %v5069_v62  ;;  %v2129_v8 = vpop.f32.mrb[89].mxu1 }
 0x226   : > { %v2130_v48 = vpop.f32.mrb[90].mxu1 }
 0x227   : > { %v3738_v1 = vpack.c.bf16 %v3106_v13, %v3106_v13  ;;  %v3107_v33 = vmax.f32 %v3075_v23, 0.0  ;;  %v2131_v59 = vadd.f32 %v2130_v48, %v5071_v52  ;;  %v2132_v10 = vpop.f32.mrb[91].mxu1 }
 0x228   : > { %v2994_v17 = vpop.f32.mrb[88].mxu0 }
 0x229   : > { %3266 = vst.msk [vmem:[%s5097_s20 + $0x68] sm:$0xf] %vm344_vm0, %v3738_v1  ;;  %v3739_v9 = vpack.c.bf16 %v3107_v33, %v3107_v33  ;;  %v3037_v53 = vadd.f32 %v2994_v17, %v2128_v51  ;;  %v2996_v31 = vpop.f32.mrb[89].mxu0 }
 0x22a   : > { %v2997_v6 = vpop.f32.mrb[90].mxu0 }
 0x22b   : > { %3267 = vst.msk [vmem:[%s5097_s20 + $0x6c] sm:$0xf] %vm344_vm0, %v3739_v9  ;;  %v3076_v44 = vadd.f32 %v5088_v21, %v3037_v53  ;;  %v3038_v62 = vadd.f32 %v2997_v6, %v2131_v59  ;;  %v2999_v56 = vpop.f32.mrb[91].mxu0 }
 0x22c   : > { %v2135_v14 = vpop.f32.mrb[92].mxu1 }
 0x22d   : > { %v3108_v16 = vmax.f32 %v3076_v44, 0.0  ;;  %v3077_v52 = vadd.f32 %v5088_v21, %v3038_v62  ;;  %v2136_v36 = vadd.f32 %v2135_v14, %v5077_v11  ;;  %v2137_v25 = vpop.f32.mrb[93].mxu1 }
 0x22e   : > { %v2138_v18 = vpop.f32.mrb[94].mxu1 }
 0x22f   : > { %v3740_v40 = vpack.c.bf16 %v3108_v16, %v3108_v16  ;;  %v3109_v58 = vmax.f32 %v3077_v52, 0.0  ;;  %v2139_v26 = vadd.f32 %v2138_v18, %v5079_v3  ;;  %v2140_v37 = vpop.f32.mrb[95].mxu1 }
 0x230   : > { %v3002_v55 = vpop.f32.mrb[92].mxu0 }
 0x231   : > { %3268 = vst.msk [vmem:[%s5097_s20 + $0x70] sm:$0xf] %vm344_vm0, %v3740_v40  ;;  %v3741_v54 = vpack.c.bf16 %v3109_v58, %v3109_v58  ;;  %v3039_v42 = vadd.f32 %v3002_v55, %v2136_v36  ;;  %v3004_v4 = vpop.f32.mrb[93].mxu0 }
 0x232   : > { %v3005_v43 = vpop.f32.mrb[94].mxu0 }
 0x233   : > { %3269 = vst.msk [vmem:[%s5097_s20 + $0x74] sm:$0xf] %vm344_vm0, %v3741_v54  ;;  %v3078_v11 = vadd.f32 %v5088_v21, %v3039_v42  ;;  %v3040_v45 = vadd.f32 %v3005_v43, %v2139_v26  ;;  %v3007_v63 = vpop.f32.mrb[95].mxu0 }
 0x235   : > { %v3110_v28 = vmax.f32 %v3078_v11, 0.0  ;;  %v3079_v19 = vadd.f32 %v5088_v21, %v3040_v45 }
 0x237   : > { %v3742_v3 = vpack.c.bf16 %v3110_v28, %v3110_v28  ;;  %v3111_v29 = vmax.f32 %v3079_v19, 0.0 }
 0x239   : > { %3270 = vst.msk [vmem:[%s5097_s20 + $0x78] sm:$0xf] %vm344_vm0, %v3742_v3  ;;  %v3743_v60 = vpack.c.bf16 %v3111_v29, %v3111_v29 }
 0x23b   : > { %3271 = vst.msk [vmem:[%s5097_s20 + $0x7c] sm:$0xf] %vm344_vm0, %v3743_v60 }
 0x23c PF: > { %s14_s17 = sadd.s32 1, %s4023_s17   ;;  %s5306_s15 = smov %s4019_s16 }
 0x23d   : > { %p11_p5 = scmp.ge.s32.totalorder %s14_s17, 4   ;;  %s5307_s16 = smov %s5309_s18 }
 0x23f   :  { %13 = sbr.rel (!%p11_p5) target bundleno = 2 (0x2), region = 74 }

// kernel: vgg_l1_loss.22
= control target key start
LH: loop header
LB: loop body
LE: loop exit
PB: predicated region body
PF: predicated region fallthrough
CT: control target
= control target key end

     0   :  { %s2806_s15 = smov 0   ;;  %s2808_s16 = smov 0   ;;  %s3189_s0 = inlined_call_operand.vmem [shape: bf16[2,16,10,128], index: 0, kind: input, shape index: {}, may-alias: {0,1}]   ;;  %s3190_s1 = inlined_call_operand.vmem [shape: bf16[2,16,10,128], index: 1, kind: input, shape index: {}, may-alias: {0,1}]   ;;  %s3191_s2 = inlined_call_operand.vmem [shape: bf16[3,384,128], index: 2, kind: input, shape index: {}]   ;;  %s3192_s3 = inlined_call_operand.vmem [shape: f32[1,128], index: 3, kind: input, shape index: {}]   ;;  %s3193_s4 = inlined_call_operand.vmem [shape: bf16[2,8,8,128], index: 4, kind: output, shape index: {}]  }
   0x1   :  { %s2810_s17 = smov 0  }
   0x2 LB: > { %s26_s18 = sadd.s32 1, %s2775_s16  ;;  %p2043_p0 = scmp.ge.s32.totalorder %s2779_s17, 1  ;;  %s2779_s17 = sphi %s2810_s17, %s14_s17   ;;  %s2775_s16 = sphi %s2808_s16, %s3195_s16   ;;  %s2771_s15 = sphi %s2806_s15, %s3194_s15  }
   0x3   : > { %p28_p1 = scmp.ge.s32.totalorder %s26_s18, 2  ;;  %p210_p2 = scmp.lt.s32.totalorder %s2779_s17, 3 }
   0x5   : > { %s3197_s18 = smov (%p28_p1, %s26_s18), 0  ;;  %p211_p3 = pnand %p2043_p0, %p210_p2 }
   0x6   : > { %v2625_v0 = vld [vmem:[%s3191_s2 + $0x100] sm:$0xff] (!%p211_p3)   ;;  %v2628_v3 = vld [vmem:[%s3191_s2 + $0x108] sm:$0xff] (!%p211_p3)   ;;  %v2631_v6 = vld [vmem:[%s3191_s2 + $0x110] sm:$0xff] (!%p211_p3)   ;;  %p258_p4 = scmp.lt.s32.totalorder (!%p211_p3), %s2771_s15, 1 }
   0x7   : > { %214 = sbr.rel (%p211_p3) target bundleno = 356 (0x164), region = 36  ;;  %v2626_v1 = vld [vmem:[%s3191_s2 + $0x140] sm:$0xff] (!%p211_p3)   ;;  %2333 = vmatprep.subr.bf16.mxu0 (!%p211_p3), %v2625_v0  ;;  %v2629_v4 = vld [vmem:[%s3191_s2 + $0x148] sm:$0xff] (!%p211_p3)   ;;  %v2632_v7 = vld [vmem:[%s3191_s2 + $0x150] sm:$0xff] (!%p211_p3)  }
   0x8   : > { %v2627_v2 = vld [vmem:[%s3191_s2 + $0xc0] sm:$0xff] (!%p211_p3)   ;;  %2489 = vmatprep.subr.bf16.mxu1 (!%p211_p3), %v2626_v1  ;;  %v2630_v5 = vld [vmem:[%s3191_s2 + $0xc8] sm:$0xff] (!%p211_p3)   ;;  %v2633_v8 = vld [vmem:[%s3191_s2 + $0xd0] sm:$0xff] (!%p211_p3)  }
   0x9   : > { %2334 = vmatpush3.bf16.msra.mxu0 (!%p211_p3), %v2627_v2  ;;  %2490 = vmatpush3.bf16.msra.mxu1 (!%p211_p3), %v2626_v1  ;;  %v2634_v9 = vld [vmem:[%s3191_s2 + $0x118] sm:$0xff] (!%p211_p3)   ;;  %v2637_v12 = vld [vmem:[%s3191_s2 + $0x120] sm:$0xff] (!%p211_p3)   ;;  %v2640_v15 = vld [vmem:[%s3191_s2 + $0x128] sm:$0xff] (!%p211_p3)  }
   0xa   : > { %2335 = vmatprep.subr.bf16.mxu0 (!%p211_p3), %v2628_v3  ;;  %2491 = vmatprep.subr.bf16.mxu1 (!%p211_p3), %v2629_v4  ;;  %v2635_v10 = vld [vmem:[%s3191_s2 + $0x158] sm:$0xff] (!%p211_p3)   ;;  %v2638_v13 = vld [vmem:[%s3191_s2 + $0x160] sm:$0xff] (!%p211_p3)   ;;  %v2641_v16 = vld [vmem:[%s3191_s2 + $0x168] sm:$0xff] (!%p211_p3)  }
   0xb   : > { %v2636_v11 = vld [vmem:[%s3191_s2 + $0xd8] sm:$0xff] (!%p211_p3)   ;;  %v2639_v14 = vld [vmem:[%s3191_s2 + $0xe0] sm:$0xff] (!%p211_p3)   ;;  %v2642_v17 = vld [vmem:[%s3191_s2 + $0xe8] sm:$0xff] (!%p211_p3)  }
   0xc   : > { %v2643_v18 = vld [vmem:[%s3191_s2 + $0x130] sm:$0xff] (!%p211_p3)   ;;  %v2646_v21 = vld [vmem:[%s3191_s2 + $0x138] sm:$0xff] (!%p211_p3)   ;;  %v2654_v28 = vld [vmem:[%s3191_s2 + $0x40] sm:$0xff] (!%p211_p3)  }
   0xd   : > { %2336 = vmatpush3.bf16.msra.mxu0 (!%p211_p3), %v2630_v5  ;;  %2492 = vmatpush3.bf16.msra.mxu1 (!%p211_p3), %v2629_v4  ;;  %v2644_v19 = vld [vmem:[%s3191_s2 + $0x170] sm:$0xff] (!%p211_p3)   ;;  %v2647_v22 = vld [vmem:[%s3191_s2 + $0x178] sm:$0xff] (!%p211_p3)   ;;  %v2924_v33 = vld [vmem:[%s3191_s2 + $0x80] sm:$0xff] (!%p211_p3)  }
   0xe   : > { %2337 = vmatprep.subr.bf16.mxu0 %v2631_v6  ;;  %2493 = vmatprep.subr.bf16.mxu1 %v2632_v7  ;;  %s3199_s15 = smov (!%p258_p4, %s2771_s15), 1  ;;  %v2645_v20 = vld [vmem:[%s3191_s2 + $0xf0] sm:$0xff]   ;;  %v2648_v27 = vld [vmem:[%s3191_s2 + $0xf8] sm:$0xff]   ;;  %v2660_v4 = vld [vmem:[%s3191_s2] sm:$0xff]  }
   0xf   : > { %s2305_s5 = sshll.u32 %s3199_s15, 7  ;;  %s2308_s24 = sshll.u32 %s3199_s15, 5 }
  0x10   : > { %s2896_s14 = scalar_lea.vmem %s3189_s0, %s2305_s5  ;;  %s2307_s23 = sadd.s32 64, %s2305_s5 }
  0x11   : > { %2338 = vmatpush3.bf16.msra.mxu0 %v2633_v8  ;;  %2494 = vmatpush3.bf16.msra.mxu1 %v2632_v7  ;;  %v296_v23 = vld [vmem:[%s2896_s14 + $0x8] sm:$0xf]  ;;  %v297_v24 = vld [vmem:[%s2896_s14 + $0xc] sm:$0x1]  ;;  %v298_v25 = vld [vmem:[%s2896_s14 + $0x10] sm:$0xf]  ;;  %s2972_s6 = scalar_lea.vmem %s3190_s1, %s2307_s23  ;;  %s3172_s27 = scalar_lea.vmem %s3193_s4, %s2308_s24 }
  0x12   : > { %2339 = vmatprep.subr.bf16.mxu0 %v2634_v9  ;;  %2495 = vmatprep.subr.bf16.mxu1 %v2635_v10  ;;  %v299_v26 = vld [vmem:[%s2896_s14 + $0x14] sm:$0x1]  ;;  %312 = vst [vmem:[#allocation2 + $0x8] sm:$0xf] %v296_v23  ;;  %313 = vst [vmem:[#allocation2 + $0xc] sm:$0x1] %v297_v24 }
  0x13   : > { %314 = vst [vmem:[#allocation2 + $0x10] sm:$0xf] %v298_v25  ;;  %315 = vst [vmem:[#allocation2 + $0x14] sm:$0x1] %v299_v26  ;;  %v300_v29 = vld [vmem:[%s2896_s14 + $0x18] sm:$0xf] }
  0x14   : > { %v301_v30 = vld [vmem:[%s2896_s14 + $0x1c] sm:$0x1]  ;;  %v302_v31 = vld [vmem:[%s2896_s14 + $0x20] sm:$0xf]  ;;  %v303_v32 = vld [vmem:[%s2896_s14 + $0x24] sm:$0x1] }
  0x15   : > { %2340 = vmatpush3.bf16.msra.mxu0 %v2636_v11  ;;  %2496 = vmatpush3.bf16.msra.mxu1 %v2635_v10  ;;  %316 = vst [vmem:[#allocation2 + $0x18] sm:$0xf] %v300_v29  ;;  %317 = vst [vmem:[#allocation2 + $0x1c] sm:$0x1] %v301_v30  ;;  %v2661_v11 = vld [vmem:[%s3191_s2 + $0x48] sm:$0xff]   ;;  %v2665_v23 = vld [vmem:[%s3191_s2 + $0x50] sm:$0xff]  }
  0x16   : > { %2341 = vmatprep.subr.bf16.mxu0 %v2637_v12  ;;  %2497 = vmatprep.subr.bf16.mxu1 %v2638_v13  ;;  %318 = vst [vmem:[#allocation2 + $0x20] sm:$0xf] %v302_v31  ;;  %319 = vst [vmem:[#allocation2 + $0x24] sm:$0x1] %v303_v32  ;;  %v2666_v24 = vld [vmem:[%s3191_s2 + $0x90] sm:$0xff]   ;;  %v2670_v29 = vld [vmem:[%s3191_s2 + $0x18] sm:$0xff]  }
  0x17   : > { %v2667_v26 = vld [vmem:[%s3191_s2 + $0x10] sm:$0xff]   ;;  %v308_v31 = vld [vmem:[%s2896_s14 + $0x38] sm:$0xf]  ;;  %v309_v32 = vld [vmem:[%s2896_s14 + $0x3c] sm:$0x1] }
  0x18   : > { %324 = vst [vmem:[#allocation2 + $0x38] sm:$0xf] %v308_v31  ;;  %325 = vst [vmem:[#allocation2 + $0x3c] sm:$0x1] %v309_v32 }
  0x19   : > { %2342 = vmatpush3.bf16.msra.mxu0 %v2639_v14  ;;  %2498 = vmatpush3.bf16.msra.mxu1 %v2638_v13  ;;  %v552_v34 = vld [vmem:[#allocation2 + $0x8] sm:$0xf]  ;;  %v560_v36 = vld [vmem:[#allocation2 + $0xc] sm:$0x1] }
  0x1a   : > { %2343 = vmatprep.subr.bf16.mxu0 %v2640_v15  ;;  %2499 = vmatprep.subr.bf16.mxu1 %v2641_v16  ;;  %v553_v35 = vld [vmem:[#allocation2 + $0x10] sm:$0xf]  ;;  %v561_v37 = vld [vmem:[#allocation2 + $0x14] sm:$0x1]  ;;  %v2066_v38 = vcombine.low %v552_v34, %v560_v36  ;;  %v568_v39 = vld [vmem:[#allocation2 + $0x8] sm:$0xe] }
  0x1b   : > { %v569_v40 = vld [vmem:[#allocation2 + $0x10] sm:$0xe]  ;;  %v2067_v41 = vcombine.low %v553_v35, %v561_v37  ;;  %v2074_v42 = vcombine.low %v568_v39, %v560_v36  ;;  %v2130_v7 = vcombine.low %v552_v34, %v553_v35  ;;  %v2662_v14 = vld [vmem:[%s3191_s2 + $0x88] sm:$0xff]   ;;  %v2674_v36 = vld [vmem:[%s3191_s2 + $0x60] sm:$0xff]  }
  0x1c   : > { %v2075_v43 = vcombine.low %v569_v40, %v561_v37  ;;  %v617_v44 = vshrl.u32 %v2066_v38, 16  ;;  %v619_v45 = vshll.u32 %v2066_v38, 16  ;;  %v2927_v46 = vld [vmem:[#allocation2 + $0x18] sm:$0xf]  ;;  %v562_v47 = vld [vmem:[#allocation2 + $0x1c] sm:$0x1] }
  0x1d   : > { %2344 = vmatpush3.bf16.msra.mxu0 %v2642_v17  ;;  %2500 = vmatpush3.bf16.msra.mxu1 %v2641_v16  ;;  %v624_v48 = vshrl.u32 %v2067_v41, 16  ;;  %v626_v49 = vshll.u32 %v2067_v41, 16  ;;  %v696_v50 = vrot.slane %v2074_v42, 1  ;;  %v2929_v52 = vld [vmem:[#allocation2 + $0x20] sm:$0xf]  ;;  %v2068_v56 = vcombine.low %v2927_v46, %v562_v47  ;;  %v2663_v16 = vld [vmem:[%s3191_s2 + $0x8] sm:$0xff]  }
  0x1e   : > { %2345 = vmatprep.subr.bf16.mxu0 %v2643_v18  ;;  %2501 = vmatprep.subr.bf16.mxu1 %v2644_v19  ;;  %v697_v51 = vrot.slane %v2075_v43, 1  ;;  %v621_v53 = vrot.slane %v619_v45, 1  ;;  %v563_v54 = vld [vmem:[#allocation2 + $0x24] sm:$0x1]  ;;  %v570_v55 = vld [vmem:[#allocation2 + $0x18] sm:$0xe]  ;;  %v2133_v25 = vcombine.low %v2927_v46, %v2929_v52 }
  0x1f   : > { %v628_v57 = vrot.slane %v626_v49, 1  ;;  %v571_v59 = vld [vmem:[#allocation2 + $0x20] sm:$0xe]  ;;  %v2069_v60 = vcombine.low %v2929_v52, %v563_v54  ;;  %v2076_v61 = vcombine.low %v570_v55, %v562_v47  ;;  %v631_v0 = vshrl.u32 %v2068_v56, 16  ;;  %v304_v18 = vld [vmem:[%s2896_s14 + $0x28] sm:$0xf] }
  0x20   : > { %v2132_v58 = vcombine.low %v696_v50, %v697_v51  ;;  %v622_v62 = vor.u32 %v621_v53, %v617_v44  ;;  %v2077_v63 = vcombine.low %v571_v59, %v563_v54  ;;  %v633_v1 = vshll.u32 %v2068_v56, 16  ;;  %320 = vst [vmem:[#allocation2 + $0x28] sm:$0xf] %v304_v18  ;;  %v2675_v37 = vld [vmem:[%s3191_s2 + $0xa0] sm:$0xff]   ;;  %v2677_v50 = vld [vmem:[%s3191_s2 + $0x68] sm:$0xff]  }
  0x21   : > { %2346 = vmatpush3.bf16.msra.mxu0 %v2645_v20  ;;  %2502 = vmatpush3.bf16.msra.mxu1 %v2644_v19  ;;  %v629_v2 = vor.u32 %v628_v57, %v624_v48  ;;  %v698_v3 = vrot.slane %v2076_v61, 1  ;;  %v638_v5 = vshrl.u32 %v2069_v60, 16  ;;  %v640_v6 = vshll.u32 %v2069_v60, 16  ;;  %v305_v19 = vld [vmem:[%s2896_s14 + $0x2c] sm:$0x1]  ;;  %v2676_v49 = vld [vmem:[%s3191_s2 + $0x20] sm:$0xff]  }
  0x22   : > { %2347 = vmatprep.subr.bf16.mxu0 %v2646_v21  ;;  %2503 = vmatprep.subr.bf16.mxu1 %v2647_v22  ;;  %v699_v8 = vrot.slane %v2077_v63, 1  ;;  %v635_v9 = vrot.slane %v633_v1, 1  ;;  %v306_v20 = vld [vmem:[%s2896_s14 + $0x30] sm:$0xf]  ;;  %v307_v21 = vld [vmem:[%s2896_s14 + $0x34] sm:$0x1] }
  0x23   : > { %2505 = vmatprep.mubr.bf16.mxu1 %v2132_v58  ;;  %v2131_v10 = vcombine.low %v622_v62, %v629_v2  ;;  %v642_v12 = vrot.slane %v640_v6, 1  ;;  %321 = vst [vmem:[#allocation2 + $0x2c] sm:$0x1] %v305_v19  ;;  %322 = vst [vmem:[#allocation2 + $0x30] sm:$0xf] %v306_v20  ;;  %v2678_v55 = vld [vmem:[%s3191_s2 + $0xa8] sm:$0xff]  }
  0x24   : > { %v2135_v13 = vcombine.low %v698_v3, %v699_v8  ;;  %v636_v15 = vor.u32 %v635_v9, %v631_v0  ;;  %323 = vst [vmem:[#allocation2 + $0x34] sm:$0x1] %v307_v21  ;;  %v326_v40 = vld [vmem:[%s2972_s6] sm:$0xf]  ;;  %v327_v41 = vld [vmem:[%s2972_s6 + $0x4] sm:$0x1] }
  0x25   : > { %2348 = vmatpush3.bf16.msra.mxu0 %v2648_v27  ;;  %2504 = vmatpush3.bf16.msra.mxu1 %v2647_v22  ;;  %v643_v17 = vor.u32 %v642_v12, %v638_v5  ;;  %v2668_v27 = vld [vmem:[%s3191_s2 + $0x58] sm:$0xff]   ;;  %331 = vst [vmem:[#allocation2 + $0x40] sm:$0xf] %v326_v40  ;;  %332 = vst [vmem:[#allocation2 + $0x44] sm:$0x1] %v327_v41  ;;  %v2679_v59 = vld [vmem:[%s3191_s2 + $0x28] sm:$0xff]  }
  0x26   : > { %2385 = vmatprep.subr.bf16.mxu0 %v2654_v28  ;;  %2513 = vmatprep.subr.bf16.mxu1 %v2924_v33  ;;  %v2669_v28 = vld [vmem:[%s3191_s2 + $0x98] sm:$0xff]   ;;  %v2685_v2 = vld [vmem:[%s3191_s2 + $0x70] sm:$0xff]   ;;  %v3024_v20 = vld [vmem:[#allocation2 + $0x8] sm:$0xf] }
  0x27   : > { %969 = vmatprep.mubr.bf16.mxu0 %v2131_v10  ;;  %v2134_v22 = vcombine.low %v636_v15, %v643_v17  ;;  %v2977_v30 = vld [vmem:[#allocation2 + $0x28] sm:$0xf]  ;;  %v3005_v60 = vld [vmem:[#allocation2 + $0x38] sm:$0xf]  ;;  %v566_v61 = vld [vmem:[#allocation2 + $0x3c] sm:$0x1] }
  0x28   : > { %970 = vmatmul.mubr.bf16.vlgmr.msra.gmra.mrb[0].mxu0 %v2130_v7  ;;  %2506 = vmatmul.mubr.bf16.vlgmr.msra.gmra.mrb[0].mxu1 %v2135_v13  ;;  %v572_v42 = vld [vmem:[#allocation2 + $0x28] sm:$0xe]  ;;  %v574_v62 = vld [vmem:[#allocation2 + $0x38] sm:$0xe]  ;;  %v2072_v0 = vcombine.low %v3005_v60, %v566_v61  ;;  %v2686_v3 = vld [vmem:[%s3191_s2 + $0xb0] sm:$0xff]  }
  0x29   : > { %2386 = vmatpush3.bf16.msra.mxu0 %v2660_v4  ;;  %2514 = vmatpush3.bf16.msra.mxu1 %v2924_v33  ;;  %v2080_v4 = vcombine.low %v574_v62, %v566_v61  ;;  %v295_v15 = vld [vmem:[%s2896_s14 + $0x4] sm:$0x1]  ;;  %v2689_v19 = vld [vmem:[%s3191_s2 + $0x30] sm:$0xff]   ;;  %v354_v41 = vld [vmem:[#allocation2 + $0x18] sm:$0xe] }
  0x2a   : > { %2387 = vmatprep.subr.bf16.mxu0 %v2661_v11  ;;  %2515 = vmatprep.subr.bf16.mxu1 %v2662_v14  ;;  %v2981_v33 = vld [vmem:[#allocation2 + $0x30] sm:$0xf]  ;;  %v564_v34 = vld [vmem:[#allocation2 + $0x2c] sm:$0x1]  ;;  %v659_v10 = vshrl.u32 %v2072_v0, 16  ;;  %v661_v11 = vshll.u32 %v2072_v0, 16 }
  0x2b   : > { %977 = vmatprep.mubr.bf16.mxu0 %v2134_v22  ;;  %v565_v35 = vld [vmem:[#allocation2 + $0x34] sm:$0x1]  ;;  %v2070_v38 = vcombine.low %v2977_v30, %v564_v34  ;;  %v573_v43 = vld [vmem:[#allocation2 + $0x30] sm:$0xe]  ;;  %v2078_v44 = vcombine.low %v572_v42, %v564_v34  ;;  %v2136_v63 = vcombine.low %v2977_v30, %v2981_v33  ;;  %v702_v13 = vrot.slane %v2080_v4, 1  ;;  %v2690_v22 = vld [vmem:[%s3191_s2 + $0x78] sm:$0xff]  }
  0x2c   : > { %v2071_v39 = vcombine.low %v2981_v33, %v565_v35  ;;  %v2079_v51 = vcombine.low %v573_v43, %v565_v35  ;;  %v3016_v6 = vld [vmem:[#allocation2 + $0x40] sm:$0xf]  ;;  %v567_v7 = vld [vmem:[#allocation2 + $0x44] sm:$0x1]  ;;  %311 = vst [vmem:[#allocation2 + $0x4] sm:$0x1] %v295_v15 }
  0x2d   : > { %2388 = vmatpush3.bf16.msra.mxu0 %v2663_v16  ;;  %2516 = vmatpush3.bf16.msra.mxu1 %v2662_v14  ;;  %v645_v45 = vshrl.u32 %v2070_v38, 16  ;;  %v647_v46 = vshll.u32 %v2070_v38, 16  ;;  %v700_v52 = vrot.slane %v2078_v44, 1  ;;  %v575_v8 = vld [vmem:[#allocation2 + $0x40] sm:$0xe]  ;;  %v2073_v9 = vcombine.low %v3016_v6, %v567_v7  ;;  %v2692_v33 = vld [vmem:[%s3191_s2 + $0x38] sm:$0xff]  }
  0x2e   : > { %2389 = vmatprep.subr.bf16.mxu0 %v2665_v23  ;;  %2517 = vmatprep.subr.bf16.mxu1 %v2666_v24  ;;  %v652_v47 = vshrl.u32 %v2071_v39, 16  ;;  %v654_v48 = vshll.u32 %v2071_v39, 16  ;;  %v701_v56 = vrot.slane %v2079_v51, 1  ;;  %v2081_v12 = vcombine.low %v575_v8, %v567_v7  ;;  %v294_v14 = vld [vmem:[%s2896_s14] sm:$0xf] }
  0x2f   : > { %v649_v53 = vrot.slane %v647_v46, 1  ;;  %v663_v16 = vrot.slane %v661_v11, 1  ;;  %v666_v17 = vshrl.u32 %v2073_v9, 16  ;;  %v668_v18 = vshll.u32 %v2073_v9, 16  ;;  %310 = vst [vmem:[#allocation2] sm:$0xf] %v294_v14 }
  0x30   : > { %978 = vmatmul.mubr.bf16.gmra.mrb[4].mxu0 %v2133_v25  ;;  %v656_v54 = vrot.slane %v654_v48, 1  ;;  %v2138_v1 = vcombine.low %v700_v52, %v701_v56  ;;  %v703_v21 = vrot.slane %v2081_v12, 1  ;;  %v344_v23 = vld [vmem:[#allocation2 + $0xc] sm:$0x1]  ;;  %v345_v31 = vld [vmem:[#allocation2 + $0x14] sm:$0x1]  ;;  %v2139_v38 = vcombine.low %v3005_v60, %v3016_v6 }
  0x31   : > { %2390 = vmatpush3.bf16.msra.mxu0 %v2667_v26  ;;  %2518 = vmatpush3.bf16.msra.mxu1 %v2666_v24  ;;  %v650_v57 = vor.u32 %v649_v53, %v645_v45  ;;  %v352_v24 = vld [vmem:[#allocation2 + $0x8] sm:$0xe]  ;;  %v664_v25 = vor.u32 %v663_v16, %v659_v10  ;;  %v670_v26 = vrot.slane %v668_v18, 1  ;;  %v2698_v39 = vld [vmem:[%s3191_s2 + $0x1c0] sm:$0xff]   ;;  %v353_v40 = vld [vmem:[#allocation2 + $0x10] sm:$0xe] }
  0x32   : > { %2391 = vmatprep.subr.bf16.mxu0 %v2668_v27  ;;  %2519 = vmatprep.subr.bf16.mxu1 %v2669_v28  ;;  %v657_v58 = vor.u32 %v656_v54, %v652_v47  ;;  %v2691_v27 = vld [vmem:[%s3191_s2 + $0xb8] sm:$0xff]   ;;  %v2141_v30 = vcombine.low %v702_v13, %v703_v21  ;;  %v2699_v44 = vld [vmem:[%s3191_s2 + $0x200] sm:$0xff]   ;;  %v2060_v45 = vcombine.low %v353_v40, %v345_v31  ;;  %v2703_v11 = vld [vmem:[%s3191_s2 + $0x1c8] sm:$0xff]  }
  0x33   : > { %2509 = vmatprep.mubr.bf16.mxu1 %v2138_v1  ;;  %v671_v32 = vor.u32 %v670_v26, %v666_v17  ;;  %v343_v48 = vld [vmem:[#allocation2 + $0x4] sm:$0x1]  ;;  %v2704_v1 = vld [vmem:[%s3191_s2 + $0x208] sm:$0xff]   ;;  %v2710_v14 = vld [vmem:[%s3191_s2 + $0x210] sm:$0xff]  }
  0x34   : > { %v2137_v5 = vcombine.low %v650_v57, %v657_v58  ;;  %2510 = vmatmul.mubr.bf16.gmra.mrb[4].mxu1 %v2141_v30  ;;  %v481_v52 = vrot.slane %v2060_v45, 1  ;;  %v3044_v57 = vld [vmem:[#allocation2 + $0x10] sm:$0xf]  ;;  %v2702_v8 = vld [vmem:[%s3191_s2 + $0x180] sm:$0xff]   ;;  %v2705_v16 = vld [vmem:[%s3191_s2 + $0x188] sm:$0xff]  }
  0x35   : > { %2392 = vmatpush3.bf16.msra.mxu0 %v2670_v29  ;;  %2520 = vmatpush3.bf16.msra.mxu1 %v2669_v28  ;;  %v2051_v28 = vcombine.low %v3024_v20, %v344_v23  ;;  %v2059_v29 = vcombine.low %v352_v24, %v344_v23  ;;  %v2140_v42 = vcombine.low %v664_v25, %v671_v32  ;;  %v3063_v15 = vld [vmem:[#allocation2 + $0x20] sm:$0xf]  ;;  %v3068_v18 = vld [vmem:[#allocation2 + $0x28] sm:$0xf]  ;;  %v2709_v21 = vld [vmem:[%s3191_s2 + $0x1d0] sm:$0xff]  }
  0x36   : > { %2393 = vmatprep.subr.bf16.mxu0 %v2674_v36  ;;  %2521 = vmatprep.subr.bf16.mxu1 %v2675_v37  ;;  %v335_v47 = vld [vmem:[#allocation2] sm:$0xf]  ;;  %v2052_v60 = vcombine.low %v3044_v57, %v345_v31  ;;  %v2713_v25 = vld [vmem:[%s3191_s2 + $0x218] sm:$0xff]   ;;  %v2711_v31 = vld [vmem:[%s3191_s2 + $0x190] sm:$0xff]  }
  0x37   : > { %985 = vmatprep.mubr.bf16.mxu0 %v2137_v5  ;;  %v407_v34 = vshrl.u32 %v2051_v28, 16  ;;  %v409_v35 = vshll.u32 %v2051_v28, 16  ;;  %v480_v36 = vrot.slane %v2059_v29, 1  ;;  %v2166_v7 = vcombine.low %v335_v47, %v3024_v20  ;;  %v348_v20 = vld [vmem:[#allocation2 + $0x2c] sm:$0x1]  ;;  %v2712_v32 = vld [vmem:[%s3191_s2 + $0x1d8] sm:$0xff]  }
  0x38   : > { %986 = vmatmul.mubr.bf16.gmra.mrb[8].mxu0 %v2136_v63  ;;  %v2055_v23 = vcombine.low %v3068_v18, %v348_v20  ;;  %v3094_v40 = vld [vmem:[#allocation2 + $0x38] sm:$0xf] }
  0x39   : > { %2394 = vmatpush3.bf16.msra.mxu0 %v2676_v49  ;;  %2522 = vmatpush3.bf16.msra.mxu1 %v2675_v37  ;;  %v346_v37 = vld [vmem:[#allocation2 + $0x1c] sm:$0x1]  ;;  %v411_v43 = vrot.slane %v409_v35, 1  ;;  %v351_v49 = vld [vmem:[#allocation2] sm:$0xe] }
  0x3a   : > { %2395 = vmatprep.subr.bf16.mxu0 %v2677_v50  ;;  %2523 = vmatprep.subr.bf16.mxu1 %v2678_v55  ;;  %v2061_v46 = vcombine.low %v354_v41, %v346_v37  ;;  %v2050_v50 = vcombine.low %v335_v47, %v343_v48  ;;  %v2058_v51 = vcombine.low %v351_v49, %v343_v48  ;;  %v435_v28 = vshrl.u32 %v2055_v23, 16  ;;  %v349_v41 = vld [vmem:[#allocation2 + $0x34] sm:$0x1]  ;;  %v356_v47 = vld [vmem:[#allocation2 + $0x28] sm:$0xe] }
  0x3b   : > { %993 = vmatprep.mubr.bf16.mxu0 %v2140_v42  ;;  %v412_v62 = vor.u32 %v411_v43, %v407_v34  ;;  %v437_v29 = vshll.u32 %v2055_v23, 16  ;;  %v350_v42 = vld [vmem:[#allocation2 + $0x3c] sm:$0x1]  ;;  %v357_v48 = vld [vmem:[#allocation2 + $0x30] sm:$0xe] }
  0x3c   : > { %v482_v53 = vrot.slane %v2061_v46, 1  ;;  %v400_v54 = vshrl.u32 %v2050_v50, 16  ;;  %v479_v56 = vrot.slane %v2058_v51, 1  ;;  %v2057_v45 = vcombine.low %v3094_v40, %v350_v42  ;;  %v355_v46 = vld [vmem:[#allocation2 + $0x20] sm:$0xe] }
  0x3d   : > { %2396 = vmatpush3.bf16.msra.mxu0 %v2679_v59  ;;  %2524 = vmatpush3.bf16.msra.mxu1 %v2678_v55  ;;  %v402_v55 = vshll.u32 %v2050_v50, 16  ;;  %v3046_v59 = vld [vmem:[#allocation2 + $0x18] sm:$0xf]  ;;  %v439_v34 = vrot.slane %v437_v29, 1  ;;  %v2063_v50 = vcombine.low %v356_v47, %v348_v20  ;;  %v1376_v23 = vld [vmem:[#allocation2 + $0x24] sm:$0x1] }
  0x3e   : > { %2397 = vmatprep.subr.bf16.mxu0 %v2685_v2  ;;  %2525 = vmatprep.subr.bf16.mxu1 %v2686_v3  ;;  %v2171_v58 = vcombine.low %v481_v52, %v482_v53  ;;  %v2168_v63 = vcombine.low %v479_v56, %v480_v36  ;;  %v2053_v0 = vcombine.low %v3046_v59, %v346_v37  ;;  %v414_v2 = vshrl.u32 %v2052_v60, 16  ;;  %v2719_v37 = vld [vmem:[%s3191_s2 + $0x220] sm:$0xff]   ;;  %v358_v51 = vld [vmem:[#allocation2 + $0x38] sm:$0xe]  ;;  %v1385_v29 = vld [vmem:[#allocation2 + $0x28] sm:$0xe] }
  0x3f   : > { %v404_v61 = vrot.slane %v402_v55, 1  ;;  %v2169_v30 = vcombine.low %v3044_v57, %v3046_v59  ;;  %v440_v36 = vor.u32 %v439_v34, %v435_v28  ;;  %v2064_v52 = vcombine.low %v357_v48, %v349_v41  ;;  %v2718_v53 = vld [vmem:[%s3191_s2 + $0x1e0] sm:$0xff]   ;;  %v1378_v47 = vld [vmem:[#allocation2 + $0x34] sm:$0x1]  ;;  %v1379_v48 = vld [vmem:[#allocation2 + $0x3c] sm:$0x1] }
  0x40   : > { %994 = vmatmul.mubr.bf16.gmra.mrb[12].mxu0 %v2139_v38  ;;  %2529 = vmatprep.mubr.bf16.mxu1 %v2168_v63  ;;  %v421_v5 = vshrl.u32 %v2053_v0, 16  ;;  %v423_v6 = vshll.u32 %v2053_v0, 16  ;;  %v3089_v38 = vld [vmem:[#allocation2 + $0x30] sm:$0xf]  ;;  %v449_v57 = vshrl.u32 %v2057_v45, 16  ;;  %v2720_v59 = vld [vmem:[%s3191_s2 + $0x1a0] sm:$0xff]   ;;  %v2172_v0 = vcombine.low %v3063_v15, %v3068_v18 }
  0x41   : > { %2398 = vmatpush3.bf16.msra.mxu0 %v2689_v19  ;;  %2526 = vmatpush3.bf16.msra.mxu1 %v2686_v3  ;;  %v416_v3 = vshll.u32 %v2052_v60, 16  ;;  %v405_v4 = vor.u32 %v404_v61, %v400_v54  ;;  %v347_v19 = vld [vmem:[#allocation2 + $0x24] sm:$0x1]  ;;  %v2722_v54 = vld [vmem:[%s3191_s2 + $0x228] sm:$0xff]   ;;  %v484_v61 = vrot.slane %v2063_v50, 1  ;;  %v485_v63 = vrot.slane %v2064_v52, 1 }
  0x42   : > { %2399 = vmatprep.subr.bf16.mxu0 %v2690_v22  ;;  %2527 = vmatprep.subr.bf16.mxu1 %v2691_v27  ;;  %v425_v12 = vrot.slane %v423_v6, 1  ;;  %v2054_v22 = vcombine.low %v3063_v15, %v347_v19  ;;  %v2062_v49 = vcombine.low %v355_v46, %v347_v19  ;;  %v3126_v15 = vld [vmem:[#allocation2 + $0x18] sm:$0xf]  ;;  %v1382_v18 = vld [vmem:[#allocation2 + $0x10] sm:$0xe] }
  0x43   : > { %v418_v9 = vrot.slane %v416_v3, 1  ;;  %v2167_v10 = vcombine.low %v405_v4, %v412_v62  ;;  %v2065_v62 = vcombine.low %v358_v51, %v350_v42  ;;  %v2721_v3 = vld [vmem:[%s3191_s2 + $0x1e8] sm:$0xff]   ;;  %v1384_v28 = vld [vmem:[#allocation2 + $0x20] sm:$0xe]  ;;  %v3144_v42 = vld [vmem:[#allocation2 + $0x38] sm:$0xf] }
  0x44   : > { %v426_v17 = vor.u32 %v425_v12, %v421_v5  ;;  %v428_v26 = vshrl.u32 %v2054_v22, 16  ;;  %v483_v60 = vrot.slane %v2062_v49, 1  ;;  %v2731_v12 = vld [vmem:[%s3191_s2 + $0x1f0] sm:$0xff]   ;;  %v2736_v49 = vld [vmem:[%s3191_s2 + $0x1b8] sm:$0xff]  }
  0x45   : > { %2400 = vmatpush3.bf16.msra.mxu0 %v2692_v33  ;;  %2528 = vmatpush3.bf16.msra.mxu1 %v2691_v27  ;;  %v419_v13 = vor.u32 %v418_v9, %v414_v2  ;;  %v430_v27 = vshll.u32 %v2054_v22, 16  ;;  %v486_v5 = vrot.slane %v2065_v62, 1 }
  0x46   : > { %2437 = vmatprep.subr.bf16.mxu0 %v2698_v39  ;;  %2537 = vmatprep.subr.bf16.mxu1 %v2699_v44  ;;  %v2714_v39 = vld [vmem:[%s3191_s2 + $0x198] sm:$0xff]   ;;  %v2174_v4 = vcombine.low %v483_v60, %v484_v61  ;;  %v328_v60 = vld [vmem:[%s2972_s6 + $0x8] sm:$0xf]  ;;  %v329_v61 = vld [vmem:[%s2972_s6 + $0xc] sm:$0x1] }
  0x47   : > { %1267 = vmatprep.mubr.bf16.mxu0 %v2167_v10  ;;  %v2170_v24 = vcombine.low %v419_v13, %v426_v17  ;;  %v432_v33 = vrot.slane %v430_v27, 1  ;;  %v2177_v9 = vcombine.low %v485_v63, %v486_v5  ;;  %v2732_v10 = vld [vmem:[%s3191_s2 + $0x230] sm:$0xff]   ;;  %v2735_v13 = vld [vmem:[%s3191_s2 + $0x238] sm:$0xff]   ;;  %333 = vst [vmem:[#allocation2 + $0x48] sm:$0xf] %v328_v60 }
  0x48   : > { %2530 = vmatmul.mubr.bf16.vlgmr.msra.gmra.mrb[0].mxu1 %v2171_v58  ;;  %1268 = vmatmul.mubr.bf16.vlgmr.msra.gmra.mrb[16].mxu0 %v2166_v7  ;;  %v451_v58 = vshll.u32 %v2057_v45, 16  ;;  %v1375_v17 = vld [vmem:[#allocation2 + $0x1c] sm:$0x1]  ;;  %334 = vst [vmem:[#allocation2 + $0x4c] sm:$0x1] %v329_v61 }
  0x49   : > { %2538 = vmatpush3.bf16.msra.mxu1 %v2699_v44  ;;  %2438 = vmatpush3.bf16.msra.mxu0 %v2702_v8  ;;  %v433_v35 = vor.u32 %v432_v33, %v428_v26  ;;  %v2056_v44 = vcombine.low %v3089_v38, %v349_v41  ;;  %v2723_v8 = vld [vmem:[%s3191_s2 + $0x1a8] sm:$0xff]   ;;  %v2203_v20 = vcombine.low %v3126_v15, %v1375_v17  ;;  %v2733_v26 = vld [vmem:[%s3191_s2 + $0x1b0] sm:$0xff]  }
  0x4a   : > { %2539 = vmatprep.subr.bf16.mxu1 %v2704_v1  ;;  %2439 = vmatprep.subr.bf16.mxu0 %v2703_v11  ;;  %v453_v2 = vrot.slane %v451_v58, 1  ;;  %v3142_v41 = vld [vmem:[#allocation2 + $0x30] sm:$0xf] }
  0x4b   : > { %1275 = vmatprep.mubr.bf16.mxu0 %v2170_v24  ;;  %v2173_v43 = vcombine.low %v433_v35, %v440_v36  ;;  %v442_v55 = vshrl.u32 %v2056_v44, 16  ;;  %v444_v56 = vshll.u32 %v2056_v44, 16  ;;  %2533 = vmatprep.mubr.bf16.mxu1 %v2174_v4  ;;  %v1377_v24 = vld [vmem:[#allocation2 + $0x2c] sm:$0x1]  ;;  %v1438_v34 = vshrl.u32 %v2203_v20, 16 }
  0x4c   : > { %v454_v7 = vor.u32 %v453_v2, %v449_v57  ;;  %v1440_v35 = vshll.u32 %v2203_v20, 16  ;;  %v3140_v36 = vld [vmem:[#allocation2 + $0x28] sm:$0xf]  ;;  %v1372_v2 = vld [vmem:[#allocation2 + $0x40] sm:$0xf] }
  0x4d   : > { %2540 = vmatpush3.bf16.msra.mxu1 %v2704_v1  ;;  %2440 = vmatpush3.bf16.msra.mxu0 %v2705_v16  ;;  %v446_v1 = vrot.slane %v444_v56, 1  ;;  %v1374_v16 = vld [vmem:[#allocation2 + $0x14] sm:$0x1]  ;;  %v2205_v46 = vcombine.low %v3140_v36, %v1377_v24 }
  0x4e   : > { %2541 = vmatprep.subr.bf16.mxu1 %v2710_v14  ;;  %2441 = vmatprep.subr.bf16.mxu0 %v2709_v21  ;;  %v1383_v21 = vld [vmem:[#allocation2 + $0x18] sm:$0xe]  ;;  %v2210_v22 = vcombine.low %v1382_v18, %v1374_v16  ;;  %v1442_v44 = vrot.slane %v1440_v35, 1 }
  0x4f   : > { %v447_v6 = vor.u32 %v446_v1, %v442_v55  ;;  %v2211_v27 = vcombine.low %v1383_v21, %v1375_v17  ;;  %v2206_v55 = vcombine.low %v3142_v41, %v1378_v47  ;;  %v1452_v63 = vshrl.u32 %v2205_v46, 16 }
  0x50   : > { %1276 = vmatmul.mubr.bf16.gmra.mrb[20].mxu0 %v2169_v30  ;;  %2534 = vmatmul.mubr.bf16.gmra.mrb[4].mxu1 %v2177_v9  ;;  %v3135_v30 = vld [vmem:[#allocation2 + $0x20] sm:$0xf]  ;;  %v1443_v57 = vor.u32 %v1442_v44, %v1438_v34  ;;  %v2207_v1 = vcombine.low %v3144_v42, %v1379_v48 }
  0x51   : > { %2542 = vmatpush3.bf16.msra.mxu1 %v2710_v14  ;;  %2442 = vmatpush3.bf16.msra.mxu0 %v2711_v31  ;;  %v2176_v11 = vcombine.low %v447_v6, %v454_v7  ;;  %v3124_v14 = vld [vmem:[#allocation2 + $0x10] sm:$0xf]  ;;  %v2734_v31 = vld [vmem:[%s3191_s2 + $0x1f8] sm:$0xff]   ;;  %v2204_v45 = vcombine.low %v3135_v30, %v1376_v23  ;;  %v1461_v20 = vshll.u32 %v2206_v55, 16 }
  0x52   : > { %2543 = vmatprep.subr.bf16.mxu1 %v2713_v25  ;;  %2443 = vmatprep.subr.bf16.mxu0 %v2712_v32  ;;  %v2202_v19 = vcombine.low %v3124_v14, %v1374_v16 }
  0x53   : > { %1283 = vmatprep.mubr.bf16.mxu0 %v2173_v43  ;;  %v1445_v58 = vshrl.u32 %v2204_v45, 16 }
  0x54   : > { %v1431_v32 = vshrl.u32 %v2202_v19, 16  ;;  %v1433_v33 = vshll.u32 %v2202_v19, 16  ;;  %v1459_v19 = vshrl.u32 %v2206_v55, 16 }
  0x55   : > { %2544 = vmatpush3.bf16.msra.mxu1 %v2713_v25  ;;  %2444 = vmatpush3.bf16.msra.mxu0 %v2714_v39  ;;  %v2175_v25 = vcombine.low %v3089_v38, %v3094_v40  ;;  %v1511_v38 = vrot.slane %v2211_v27, 1  ;;  %v2212_v39 = vcombine.low %v1384_v28, %v1376_v23  ;;  %v2213_v40 = vcombine.low %v1385_v29, %v1377_v24  ;;  %v1373_v28 = vld [vmem:[#allocation2 + $0x48] sm:$0xf]  ;;  %v1381_v29 = vld [vmem:[#allocation2 + $0x4c] sm:$0x1] }
  0x56   : > { %2545 = vmatprep.subr.bf16.mxu1 %v2719_v37  ;;  %2445 = vmatprep.subr.bf16.mxu0 %v2718_v53  ;;  %v1435_v43 = vrot.slane %v1433_v33, 1  ;;  %v1386_v53 = vld [vmem:[#allocation2 + $0x30] sm:$0xe]  ;;  %v1468_v23 = vshll.u32 %v2207_v1, 16 }
  0x57   : > { %v1512_v51 = vrot.slane %v2212_v39, 1  ;;  %v1513_v52 = vrot.slane %v2213_v40, 1  ;;  %v2214_v6 = vcombine.low %v1386_v53, %v1378_v47 }
  0x58   : > { %1284 = vmatmul.mubr.bf16.gmra.mrb[24].mxu0 %v2172_v0  ;;  %v1436_v56 = vor.u32 %v1435_v43, %v1431_v32  ;;  %v1454_v0 = vshll.u32 %v2205_v46, 16  ;;  %v1470_v33 = vrot.slane %v1468_v23, 1 }
  0x59   : > { %2546 = vmatpush3.bf16.msra.mxu1 %v2719_v37  ;;  %2446 = vmatpush3.bf16.msra.mxu0 %v2720_v59  ;;  %v1510_v37 = vrot.slane %v2210_v22, 1  ;;  %v1447_v59 = vshll.u32 %v2204_v45, 16  ;;  %v2271_v62 = vcombine.low %v1512_v51, %v1513_v52  ;;  %v1514_v16 = vrot.slane %v2214_v6, 1 }
  0x5a   : > { %2547 = vmatprep.subr.bf16.mxu1 %v2722_v54  ;;  %2447 = vmatprep.subr.bf16.mxu0 %v2721_v3  ;;  %v1380_v3 = vld [vmem:[#allocation2 + $0x44] sm:$0x1]  ;;  %v2267_v4 = vcombine.low %v1436_v56, %v1443_v57  ;;  %v1456_v9 = vrot.slane %v1454_v0, 1  ;;  %v2275_v51 = vcombine.low %v1372_v2, %v1373_v28 }
  0x5b   : > { %1291 = vmatprep.mubr.bf16.mxu0 %v2176_v11  ;;  %v2268_v50 = vcombine.low %v1510_v37, %v1511_v38  ;;  %v1449_v5 = vrot.slane %v1447_v59, 1  ;;  %v2269_v38 = vcombine.low %v3135_v30, %v3140_v36 }
  0x5c   : > { %v1457_v18 = vor.u32 %v1456_v9, %v1452_v63 }
  0x5d   : > { %2548 = vmatpush3.bf16.msra.mxu1 %v2722_v54  ;;  %2448 = vmatpush3.bf16.msra.mxu0 %v2723_v8  ;;  %v1387_v54 = vld [vmem:[#allocation2 + $0x38] sm:$0xe]  ;;  %v1388_v8 = vld [vmem:[#allocation2 + $0x40] sm:$0xe] }
  0x5e   : > { %2549 = vmatprep.subr.bf16.mxu1 %v2732_v10  ;;  %2449 = vmatprep.subr.bf16.mxu0 %v2731_v12  ;;  %v2215_v7 = vcombine.low %v1387_v54, %v1379_v48  ;;  %v2216_v11 = vcombine.low %v1388_v8, %v1380_v3  ;;  %v2266_v12 = vcombine.low %v3124_v14, %v3126_v15  ;;  %v1389_v14 = vld [vmem:[#allocation2 + $0x48] sm:$0xe] }
  0x5f   : > { %2553 = vmatprep.mubr.bf16.mxu1 %v2268_v50  ;;  %v2209_v15 = vcombine.low %v1373_v28, %v1381_v29 }
  0x60   : > { %1292 = vmatmul.mubr.bf16.gmra.mrb[28].mxu0 %v2175_v25  ;;  %v1515_v17 = vrot.slane %v2215_v7, 1  ;;  %v1516_v22 = vrot.slane %v2216_v11, 1  ;;  %v1463_v25 = vrot.slane %v1461_v20, 1 }
  0x61   : > { %2550 = vmatpush3.bf16.msra.mxu1 %v2732_v10  ;;  %2450 = vmatpush3.bf16.msra.mxu0 %v2733_v26  ;;  %v2208_v10 = vcombine.low %v1372_v2, %v1380_v3  ;;  %v1466_v26 = vshrl.u32 %v2207_v1, 16  ;;  %v1482_v37 = vshll.u32 %v2209_v15, 16  ;;  %v1480_v45 = vshrl.u32 %v2209_v15, 16 }
  0x62   : > { %2551 = vmatprep.subr.bf16.mxu1 %v2735_v13  ;;  %2451 = vmatprep.subr.bf16.mxu0 %v2734_v31  ;;  %v2274_v21 = vcombine.low %v1514_v16, %v1515_v17  ;;  %v2217_v31 = vcombine.low %v1389_v14, %v1381_v29  ;;  %v1464_v32 = vor.u32 %v1463_v25, %v1459_v19 }
  0x63   : > { %1783 = vmatprep.mubr.bf16.mxu0 %v2267_v4  ;;  %v1475_v27 = vshll.u32 %v2208_v10, 16  ;;  %v1471_v35 = vor.u32 %v1470_v33, %v1466_v26  ;;  %v1473_v39 = vshrl.u32 %v2208_v10, 16  ;;  %v1484_v46 = vrot.slane %v1482_v37, 1 }
  0x64   : > { %v1517_v34 = vrot.slane %v2217_v31, 1 }
  0x65   : > { %2552 = vmatpush3.bf16.msra.mxu1 %v2735_v13  ;;  %v1450_v13 = vor.u32 %v1449_v5, %v1445_v58  ;;  %2452 = vmatpush3.bf16.msra.mxu0 %v2736_v49  ;;  %v1477_v40 = vrot.slane %v1475_v27, 1  ;;  %v2273_v44 = vcombine.low %v1464_v32, %v1471_v35  ;;  %v1485_v48 = vor.u32 %v1484_v46, %v1480_v45 }
  0x66   : > { %v2277_v43 = vcombine.low %v1516_v22, %v1517_v34  ;;  %v2272_v49 = vcombine.low %v3142_v41, %v3144_v42 }
  0x67   : > { %v2270_v24 = vcombine.low %v1450_v13, %v1457_v18  ;;  %v1478_v47 = vor.u32 %v1477_v40, %v1473_v39 }
  0x68   : > { %2554 = vmatmul.mubr.bf16.vlgmr.msra.gmra.mrb[0].mxu1 %v2271_v62  ;;  %1784 = vmatmul.mubr.bf16.vlgmr.msra.gmra.mrb[32].mxu0 %v2266_v12 }
  0x69   : > { %2557 = vmatprep.mubr.bf16.mxu1 %v2274_v21  ;;  %1791 = vmatprep.mubr.bf16.mxu0 %v2270_v24  ;;  %v2276_v50 = vcombine.low %v1478_v47, %v1485_v48 }
  0x70   : > { %2558 = vmatmul.mubr.bf16.gmra.mrb[4].mxu1 %v2277_v43  ;;  %1792 = vmatmul.mubr.bf16.gmra.mrb[36].mxu0 %v2269_v38 }
  0x71   : > { %1799 = vmatprep.mubr.bf16.mxu0 %v2273_v44 }
  0x78   : > { %1800 = vmatmul.mubr.bf16.gmra.mrb[40].mxu0 %v2272_v49 }
  0x79   : > { %1807 = vmatprep.mubr.bf16.mxu0 %v2276_v50 }
  0x80   : > { %1808 = vmatmul.mubr.bf16.gmra.mrb[44].mxu0 %v2275_v51 }
  0xfb   : > { %v2349_v30 = vpop.f32.mrb[0].mxu0 }
  0xfc   : > { %v2350_v36 = vpop.f32.mrb[1].mxu0 }
  0xfd   : > { %v2351_v52 = vadd.f32 %v2350_v36, %v2349_v30  ;;  %v2352_v53 = vpop.f32.mrb[2].mxu0 }
  0xfe   : > { %v2353_v54 = vpop.f32.mrb[3].mxu0 }
  0xff   : > { %v2354_v55 = vadd.f32 %v2353_v54, %v2352_v53  ;;  %v2302_v53 = vld [vmem:[%s3192_s3] ss:$0 sm:$0xff] }
 0x103   : > { %v2355_v56 = vpop.f32.mrb[4].mxu0 }
 0x104   : > { %v2356_v57 = vpop.f32.mrb[5].mxu0 }
 0x105   : > { %v2357_v58 = vadd.f32 %v2356_v57, %v2355_v56  ;;  %v2358_v59 = vpop.f32.mrb[6].mxu0 }
 0x106   : > { %v2359_v60 = vpop.f32.mrb[7].mxu0 }
 0x107   : > { %v2360_v61 = vadd.f32 %v2359_v60, %v2358_v59 }
 0x10b   : > { %v2361_v62 = vpop.f32.mrb[8].mxu0 }
 0x10c   : > { %v2362_v63 = vpop.f32.mrb[9].mxu0 }
 0x10d   : > { %v2363_v41 = vadd.f32 %v2362_v63, %v2361_v62  ;;  %v2364_v42 = vpop.f32.mrb[10].mxu0 }
 0x10e   : > { %v2365_v0 = vpop.f32.mrb[11].mxu0 }
 0x10f   : > { %v2366_v1 = vadd.f32 %v2365_v0, %v2364_v42 }
 0x113   : > { %v2367_v2 = vpop.f32.mrb[12].mxu0 }
 0x114   : > { %v2368_v3 = vpop.f32.mrb[13].mxu0 }
 0x115   : > { %v2369_v4 = vadd.f32 %v2368_v3, %v2367_v2  ;;  %v2370_v5 = vpop.f32.mrb[14].mxu0 }
 0x116   : > { %v2371_v6 = vpop.f32.mrb[15].mxu0 }
 0x117   : > { %v2372_v7 = vadd.f32 %v2371_v6, %v2370_v5 }
 0x11b   : > { %v2401_v8 = vpop.f32.mrb[16].mxu0 }
 0x11c   : > { %v2402_v9 = vpop.f32.mrb[17].mxu0 }
 0x11d   : > { %v2403_v10 = vadd.f32 %v2402_v9, %v2401_v8  ;;  %v2404_v11 = vpop.f32.mrb[18].mxu0 }
 0x11e   : > { %v2405_v12 = vpop.f32.mrb[19].mxu0 }
 0x11f   : > { %v2564_v13 = vadd.f32 %v2403_v10, %v2351_v52  ;;  %v2406_v16 = vadd.f32 %v2405_v12, %v2404_v11 }
 0x121   : > { %v2570_v17 = vadd.f32 %v2406_v16, %v2354_v55 }
 0x123   : > { %v2407_v18 = vpop.f32.mrb[20].mxu0 }
 0x124   : > { %v2408_v19 = vpop.f32.mrb[21].mxu0 }
 0x125   : > { %v2409_v20 = vadd.f32 %v2408_v19, %v2407_v18  ;;  %v2410_v21 = vpop.f32.mrb[22].mxu0 }
 0x126   : > { %v2411_v22 = vpop.f32.mrb[23].mxu0 }
 0x127   : > { %v2561_v23 = vadd.f32 %v2409_v20, %v2357_v58  ;;  %v2412_v24 = vadd.f32 %v2411_v22, %v2410_v21 }
 0x129   : > { %v2567_v25 = vadd.f32 %v2412_v24, %v2360_v61 }
 0x12b   : > { %v2413_v26 = vpop.f32.mrb[24].mxu0 }
 0x12c   : > { %v2414_v27 = vpop.f32.mrb[25].mxu0 }
 0x12d   : > { %v2415_v28 = vadd.f32 %v2414_v27, %v2413_v26  ;;  %v2416_v29 = vpop.f32.mrb[26].mxu0 }
 0x12e   : > { %v2417_v14 = vpop.f32.mrb[27].mxu0 }
 0x12f   : > { %v2576_v15 = vadd.f32 %v2415_v28, %v2363_v41  ;;  %v2418_v31 = vadd.f32 %v2417_v14, %v2416_v29 }
 0x131   : > { %v2582_v32 = vadd.f32 %v2418_v31, %v2366_v1 }
 0x133   : > { %v2419_v33 = vpop.f32.mrb[28].mxu0 }
 0x134   : > { %v2420_v34 = vpop.f32.mrb[29].mxu0 }
 0x135   : > { %v2421_v35 = vadd.f32 %v2420_v34, %v2419_v33  ;;  %v2422_v37 = vpop.f32.mrb[30].mxu0 }
 0x136   : > { %v2423_v38 = vpop.f32.mrb[31].mxu0 }
 0x137   : > { %v3161_v39 = vadd.f32 %v2421_v35, %v2369_v4  ;;  %v2424_v40 = vadd.f32 %v2423_v38, %v2422_v37 }
 0x139   : > { %v3163_v45 = vadd.f32 %v2424_v40, %v2372_v7 }
 0x13b   : > { %v2555_v43 = vpop.f32.mrb[0].mxu1  ;;  %v2453_v48 = vpop.f32.mrb[32].mxu0 }
 0x13c   : > { %v1850_v44 = vpop.f32.mrb[1].mxu1  ;;  %v2454_v49 = vpop.f32.mrb[33].mxu0 }
 0x13d   : > { %v2556_v46 = vpop.f32.mrb[2].mxu1  ;;  %v2455_v50 = vadd.f32 %v2454_v49, %v2453_v48  ;;  %v2456_v51 = vpop.f32.mrb[34].mxu0 }
 0x13e   : > { %v1853_v47 = vpop.f32.mrb[3].mxu1  ;;  %v2457_v30 = vpop.f32.mrb[35].mxu0 }
 0x13f   : > { %v2565_v36 = vadd.f32 %v2564_v13, %v2455_v50  ;;  %v2458_v52 = vadd.f32 %v2457_v30, %v2456_v51 }
 0x141   : > { %v2566_v54 = vadd.f32 %v2565_v36, %v1850_v44  ;;  %v2571_v55 = vadd.f32 %v2570_v17, %v2458_v52 }
 0x143   : > { %v2559_v56 = vpop.f32.mrb[4].mxu1  ;;  %v1896_v57 = vadd.f32 %v2566_v54, %v2302_v53  ;;  %v2572_v58 = vadd.f32 %v2571_v55, %v1853_v47  ;;  %v2459_v59 = vpop.f32.mrb[36].mxu0 }
 0x144   : > { %v1866_v60 = vpop.f32.mrb[5].mxu1  ;;  %v2460_v61 = vpop.f32.mrb[37].mxu0 }
 0x145   : > { %v2560_v62 = vpop.f32.mrb[6].mxu1  ;;  %v1897_v63 = vadd.f32 %v2572_v58, %v2302_v53  ;;  %v2461_v41 = vadd.f32 %v2460_v61, %v2459_v59  ;;  %v2462_v42 = vpop.f32.mrb[38].mxu0  ;;  %v1904_v2 = vmax.f32 %v1896_v57, 0.0 }
 0x146   : > { %v1869_v0 = vpop.f32.mrb[7].mxu1  ;;  %v2463_v1 = vpop.f32.mrb[39].mxu0 }
 0x147   : > { %v1905_v3 = vmax.f32 %v1897_v63, 0.0  ;;  %v2562_v4 = vadd.f32 %v2561_v23, %v2461_v41  ;;  %v2464_v5 = vadd.f32 %v2463_v1, %v2462_v42 }
 0x149   : > { %v2312_v6 = vpack.c.bf16 %v1905_v3, %v1904_v2  ;;  %v2563_v7 = vadd.f32 %v2562_v4, %v2555_v43  ;;  %v2568_v8 = vadd.f32 %v2567_v25, %v2464_v5 }
 0x14b   : > { %2313 = vst [vmem:[%s3172_s27] sm:$0xff] %v2312_v6   ;;  %v1898_v9 = vadd.f32 %v2563_v7, %v2302_v53  ;;  %v2569_v10 = vadd.f32 %v2568_v8, %v2556_v46  ;;  %v2465_v11 = vpop.f32.mrb[40].mxu0 }
 0x14c   : > { %v2466_v12 = vpop.f32.mrb[41].mxu0 }
 0x14d   : > { %v1899_v13 = vadd.f32 %v2569_v10, %v2302_v53  ;;  %v2467_v16 = vadd.f32 %v2466_v12, %v2465_v11  ;;  %v2468_v17 = vpop.f32.mrb[42].mxu0  ;;  %v1906_v19 = vmax.f32 %v1898_v9, 0.0 }
 0x14e   : > { %v2469_v18 = vpop.f32.mrb[43].mxu0 }
 0x14f   : > { %v1907_v20 = vmax.f32 %v1899_v13, 0.0  ;;  %v2577_v21 = vadd.f32 %v2576_v15, %v2467_v16  ;;  %v2470_v22 = vadd.f32 %v2469_v18, %v2468_v17 }
 0x151   : > { %v2317_v23 = vpack.c.bf16 %v1907_v20, %v1906_v19  ;;  %v2578_v24 = vadd.f32 %v2577_v21, %v1866_v60  ;;  %v2583_v26 = vadd.f32 %v2582_v32, %v2470_v22 }
 0x153   : > { %2330 = vst [vmem:[%s3172_s27 + $0x8] sm:$0xff] %v2317_v23   ;;  %v1900_v25 = vadd.f32 %v2578_v24, %v2302_v53  ;;  %v2584_v27 = vadd.f32 %v2583_v26, %v1869_v0  ;;  %v2471_v28 = vpop.f32.mrb[44].mxu0 }
 0x154   : > { %v2472_v29 = vpop.f32.mrb[45].mxu0 }
 0x155   : > { %v1901_v14 = vadd.f32 %v2584_v27, %v2302_v53  ;;  %v2473_v31 = vadd.f32 %v2472_v29, %v2471_v28  ;;  %v2474_v33 = vpop.f32.mrb[46].mxu0  ;;  %v1908_v35 = vmax.f32 %v1900_v25, 0.0 }
 0x156   : > { %v2475_v34 = vpop.f32.mrb[47].mxu0 }
 0x157   : > { %v1909_v37 = vmax.f32 %v1901_v14, 0.0  ;;  %v2574_v38 = vadd.f32 %v3161_v39, %v2473_v31  ;;  %v2476_v15 = vadd.f32 %v2475_v34, %v2474_v33 }
 0x159   : > { %v2322_v40 = vpack.c.bf16 %v1909_v37, %v1908_v35  ;;  %v2575_v43 = vadd.f32 %v2574_v38, %v2559_v56  ;;  %v2580_v32 = vadd.f32 %v3163_v45, %v2476_v15 }
 0x15b   : > { %2331 = vst [vmem:[%s3172_s27 + $0x10] sm:$0xff] %v2322_v40   ;;  %v1902_v44 = vadd.f32 %v2575_v43, %v2302_v53  ;;  %v2581_v46 = vadd.f32 %v2580_v32, %v2560_v62 }
 0x15d   : > { %v1903_v47 = vadd.f32 %v2581_v46, %v2302_v53  ;;  %v1910_v48 = vmax.f32 %v1902_v44, 0.0 }
 0x15f   : > { %v1911_v49 = vmax.f32 %v1903_v47, 0.0 }
 0x161   : > { %v2327_v50 = vpack.c.bf16 %v1911_v49, %v1910_v48 }
 0x163   : > { %2332 = vst [vmem:[%s3172_s27 + $0x18] sm:$0xff] %v2327_v50  }
 0x164 PF: > { %s14_s17 = sadd.s32 1, %s2779_s17   ;;  %s3194_s15 = smov %s2775_s16 }
 0x165   : > { %p11_p5 = scmp.ge.s32.totalorder %s14_s17, 4   ;;  %s3195_s16 = smov %s3197_s18 }
 0x167   :  { %13 = sbr.rel (!%p11_p5) target bundleno = 2 (0x2), region = 74 }

// kernel: vgg_l1_loss.25
= control target key start
LH: loop header
LB: loop body
LE: loop exit
PB: predicated region body
PF: predicated region fallthrough
CT: control target
= control target key end

     0   :  { %v15_v0 = vlaneseq  ;;  %v109_v11 = vmov 0.0   ;;  %v110_v53 = vmov 1966171168   ;;  %s167_s0 = inlined_call_operand.vmem [shape: bf16[32,256], index: 0, kind: input, shape index: {}]   ;;  %s168_s1 = inlined_call_operand.vmem [shape: bf16[32,256], index: 1, kind: input, shape index: {}]   ;;  %s169_s2 = inlined_call_operand.vmem [shape: f32[1,256], index: 2, kind: output, shape index: {}]  }
   0x1   :  { %v20_v1 = vld [vmem:[%s167_s0] sm:$0xff]  ;;  %v21_v2 = vld [vmem:[%s167_s0 + $0x8] sm:$0xff]  ;;  %v22_v3 = vld [vmem:[%s167_s0 + $0x10] sm:$0xff]  ;;  %v83_v54 = vunpack.c.l.s4 %v110_v53 }
   0x2   :  { %vm135_vm0 = vcmp.lt.s32.totalorder %v15_v0, 256  ;;  %v23_v5 = vld [vmem:[%s167_s0 + $0x18] sm:$0xff]  ;;  %v24_v6 = vunpack.c.l.bf16 %v20_v1  ;;  %v25_v7 = vunpack.c.h.bf16 %v20_v1  ;;  %v26_v8 = vunpack.c.l.bf16 %v21_v2  ;;  %v32_v9 = vld [vmem:[%s168_s1] sm:$0xff]  ;;  %v33_v10 = vld [vmem:[%s168_s1 + $0x8] sm:$0xff] }
   0x3   :  { %19 = vst.msk [vmem:[%s169_s2] sm:$0x3] %vm135_vm0, %v109_v11  ;;  %v27_v12 = vunpack.c.h.bf16 %v21_v2  ;;  %v28_v13 = vunpack.c.l.bf16 %v22_v3  ;;  %v29_v14 = vunpack.c.h.bf16 %v22_v3  ;;  %v30_v15 = vunpack.c.l.bf16 %v23_v5  ;;  %v34_v16 = vld [vmem:[%s168_s1 + $0x10] sm:$0xff]  ;;  %v35_v17 = vld [vmem:[%s168_s1 + $0x18] sm:$0xff] }
   0x4   :  { %v31_v18 = vunpack.c.h.bf16 %v23_v5  ;;  %v36_v19 = vunpack.c.l.bf16 %v32_v9  ;;  %v37_v20 = vunpack.c.h.bf16 %v32_v9  ;;  %v38_v21 = vunpack.c.l.bf16 %v33_v10 }
   0x5   :  { %v39_v22 = vunpack.c.h.bf16 %v33_v10  ;;  %v40_v23 = vunpack.c.l.bf16 %v34_v16  ;;  %v41_v24 = vunpack.c.h.bf16 %v34_v16  ;;  %v42_v25 = vunpack.c.l.bf16 %v35_v17 }
   0x6   :  { %v43_v26 = vunpack.c.h.bf16 %v35_v17  ;;  %v44_v27 = vsub.f32 %v24_v6, %v36_v19  ;;  %v45_v28 = vsub.f32 %v25_v7, %v37_v20  ;;  %v46_v29 = vsub.f32 %v26_v8, %v38_v21 }
   0x7   :  { %v47_v30 = vsub.f32 %v27_v12, %v39_v22  ;;  %v48_v31 = vsub.f32 %v28_v13, %v40_v23  ;;  %v49_v32 = vsub.f32 %v29_v14, %v41_v24  ;;  %v50_v33 = vsub.f32 %v30_v15, %v42_v25 }
   0x8   :  { %v51_v34 = vsub.f32 %v31_v18, %v43_v26  ;;  %v52_v35 = vand.u32 2147483647, %v44_v27  ;;  %v53_v36 = vand.u32 2147483647, %v45_v28  ;;  %v54_v37 = vand.u32 2147483647, %v46_v29 }
   0x9   :  { %v55_v38 = vand.u32 2147483647, %v47_v30  ;;  %v56_v39 = vand.u32 2147483647, %v48_v31  ;;  %v57_v40 = vand.u32 2147483647, %v49_v32  ;;  %v84_v59 = vunpack.c.0.s8 %v83_v54 }
   0xa   :  { %v58_v41 = vand.u32 2147483647, %v50_v33  ;;  %v61_v42 = vadd.f32 %v54_v37, %v52_v35  ;;  %v59_v43 = vand.u32 2147483647, %v51_v34  ;;  %v86_v60 = vshrl.u32 %v15_v0, 7 }
   0xb   :  { %v70_v44 = vadd.f32 %v55_v38, %v53_v36  ;;  %v60_v6 = vld [vmem:[%s169_s2] sm:$0x3] }
   0xc   :  { %v62_v45 = vadd.f32 %v61_v42, %v56_v39  ;;  %v87_v2 = vsub.s32 %v84_v59, %v86_v60 }
   0xd   :  { %v71_v46 = vadd.f32 %v70_v44, %v57_v40 }
   0xe   :  { %v63_v47 = vadd.f32 %v62_v45, %v58_v41 }
   0xf   :  { %v72_v48 = vadd.f32 %v71_v46, %v59_v43 }
  0x10   :  { %v64_v49 = vrot.slane %v63_v47, 4 }
  0x11   :  { %v73_v50 = vrot.slane %v72_v48, 4 }
  0x12   :  { %v65_v51 = vadd.f32 %v64_v49, %v63_v47 }
  0x13   :  { %v74_v52 = vadd.f32 %v73_v50, %v72_v48 }
  0x14   :  { %v66_v55 = vrot.slane %v65_v51, 2 }
  0x15   :  { %v75_v56 = vrot.slane %v74_v52, 2 }
  0x16   :  { %v67_v57 = vadd.f32 %v66_v55, %v65_v51 }
  0x17   :  { %v76_v58 = vadd.f32 %v75_v56, %v74_v52 }
  0x18   :  { %v68_v61 = vrot.slane %v67_v57, 1 }
  0x19   :  { %v77_v62 = vrot.slane %v76_v58, 1 }
  0x1a   :  { %v69_v63 = vadd.f32 %v68_v61, %v67_v57 }
  0x1b   :  { %v78_v1 = vadd.f32 %v77_v62, %v76_v58 }
  0x1d   :  { %v81_v3 = vcombine.low %v69_v63, %v78_v1 }
  0x1f   :  { %v88_v5 = vrot.slane %v81_v3, %v87_v2 }
  0x21   :  { %v95_v7 = vrot.slane %v88_v5, %v87_v2 }
  0x23   :  { %v97_v8 = vadd.f32 %v95_v7, %v60_v6 }
  0x25   :  { %102 = vst.msk [vmem:[%s169_s2] sm:$0x3] %vm135_vm0, %v97_v8 }

// kernel: vgg_l1_loss.23
= control target key start
LH: loop header
LB: loop body
LE: loop exit
PB: predicated region body
PF: predicated region fallthrough
CT: control target
= control target key end

     0   :  { %s3273_s15 = smov 0   ;;  %s3275_s16 = smov 0   ;;  %s4062_s0 = inlined_call_operand.vmem [shape: bf16[2,16,10,128], index: 0, kind: input, shape index: {}, may-alias: {0,1}]   ;;  %s4063_s1 = inlined_call_operand.vmem [shape: bf16[2,16,10,128], index: 1, kind: input, shape index: {}, may-alias: {0,1}]   ;;  %s4064_s2 = inlined_call_operand.vmem [shape: bf16[3,384,256], index: 2, kind: input, shape index: {}]   ;;  %s4065_s3 = inlined_call_operand.vmem [shape: f32[1,256], index: 3, kind: input, shape index: {}]   ;;  %s4066_s4 = inlined_call_operand.vmem [shape: bf16[2,8,8,256], index: 4, kind: output, shape index: {}]  }
   0x1   :  { %s3277_s17 = smov 0  }
   0x2 LB: > { %s26_s18 = sadd.s32 1, %s3241_s16  ;;  %p2472_p0 = scmp.ge.s32.totalorder %s3245_s17, 1  ;;  %s3245_s17 = sphi %s3277_s17, %s14_s17   ;;  %s3241_s16 = sphi %s3275_s16, %s4068_s16   ;;  %s3237_s15 = sphi %s3273_s15, %s4067_s15  }
   0x3   : > { %p28_p1 = scmp.ge.s32.totalorder %s26_s18, 2  ;;  %p210_p2 = scmp.lt.s32.totalorder %s3245_s17, 3 }
   0x5   : > { %s4070_s18 = smov (%p28_p1, %s26_s18), 0  ;;  %p211_p3 = pnand %p2472_p0, %p210_p2 }
   0x6   : > { %v2947_v0 = vld [vmem:[%s4064_s2 + $0x184] ss:$8 sps:$4 sm:$0xff] (!%p211_p3)   ;;  %v3247_v2 = vmov (!%p211_p3), 0   ;;  %v2951_v3 = vld [vmem:[%s4064_s2 + $0x180] ss:$8 sps:$4 sm:$0xff] (!%p211_p3)   ;;  %p259_p4 = scmp.lt.s32.totalorder (!%p211_p3), %s3237_s15, 1 }
   0x7   : > { %214 = sbr.rel (%p211_p3) target bundleno = 401 (0x191), region = 36  ;;  %v2949_v1 = vld [vmem:[%s4064_s2 + $0x284] ss:$8 sps:$4 sm:$0xff] (!%p211_p3)   ;;  %1140 = vmatprep.mubr.bf16.mxu0 (!%p211_p3), %v3247_v2  ;;  %1035 = vmatprep.subr.bf16.mxu1 (!%p211_p3), %v2947_v0  ;;  %v2952_v4 = vld [vmem:[%s4064_s2 + $0x280] ss:$8 sps:$4 sm:$0xff] (!%p211_p3)  }
   0x8   : > { %1108 = vmatprep.subr.bf16.mxu0 (!%p211_p3), %v2949_v1  ;;  %v2953_v5 = vld [vmem:[%s4064_s2 + $0x194] ss:$8 sps:$4 sm:$0xff] (!%p211_p3)   ;;  %1036 = vmatpush1.bf16.msra.mxu1 (!%p211_p3), %v2951_v3  ;;  %v2957_v7 = vld [vmem:[%s4064_s2 + $0x190] ss:$8 sps:$4 sm:$0xff] (!%p211_p3)   ;;  %v2959_v9 = vld [vmem:[%s4064_s2 + $0x1a4] ss:$8 sps:$4 sm:$0xff] (!%p211_p3)  }
   0x9   : > { %1109 = vmatpush1.bf16.msra.mxu0 (!%p211_p3), %v2952_v4  ;;  %v2955_v6 = vld [vmem:[%s4064_s2 + $0x294] ss:$8 sps:$4 sm:$0xff] (!%p211_p3)   ;;  %1037 = vmatprep.subr.bf16.mxu1 (!%p211_p3), %v2953_v5  ;;  %v2958_v8 = vld [vmem:[%s4064_s2 + $0x290] ss:$8 sps:$4 sm:$0xff] (!%p211_p3)   ;;  %v2961_v10 = vld [vmem:[%s4064_s2 + $0x2a4] ss:$8 sps:$4 sm:$0xff] (!%p211_p3)  }
   0xa   : > { %1110 = vmatprep.subr.bf16.mxu0 (!%p211_p3), %v2955_v6  ;;  %v2963_v11 = vld [vmem:[%s4064_s2 + $0x1a0] ss:$8 sps:$4 sm:$0xff] (!%p211_p3)   ;;  %v2965_v13 = vld [vmem:[%s4064_s2 + $0x1b4] ss:$8 sps:$4 sm:$0xff] (!%p211_p3)   ;;  %v2969_v15 = vld [vmem:[%s4064_s2 + $0x1b0] ss:$8 sps:$4 sm:$0xff] (!%p211_p3)  }
   0xb   : > { %v2964_v12 = vld [vmem:[%s4064_s2 + $0x2a0] ss:$8 sps:$4 sm:$0xff] (!%p211_p3)   ;;  %v2967_v14 = vld [vmem:[%s4064_s2 + $0x2b4] ss:$8 sps:$4 sm:$0xff] (!%p211_p3)   ;;  %v2970_v16 = vld [vmem:[%s4064_s2 + $0x2b0] ss:$8 sps:$4 sm:$0xff] (!%p211_p3)  }
   0xc   : > { %1038 = vmatpush1.bf16.msra.mxu1 (!%p211_p3), %v2957_v7  ;;  %v2971_v17 = vld [vmem:[%s4064_s2 + $0x1c4] ss:$8 sps:$4 sm:$0xff] (!%p211_p3)   ;;  %v2975_v19 = vld [vmem:[%s4064_s2 + $0x1c0] ss:$8 sps:$4 sm:$0xff] (!%p211_p3)   ;;  %v2977_v21 = vld [vmem:[%s4064_s2 + $0x1d4] ss:$8 sps:$4 sm:$0xff] (!%p211_p3)  }
   0xd   : > { %1111 = vmatpush1.bf16.msra.mxu0 (!%p211_p3), %v2958_v8  ;;  %1039 = vmatprep.subr.bf16.mxu1 (!%p211_p3), %v2959_v9  ;;  %v2973_v18 = vld [vmem:[%s4064_s2 + $0x2c4] ss:$8 sps:$4 sm:$0xff] (!%p211_p3)   ;;  %v2976_v20 = vld [vmem:[%s4064_s2 + $0x2c0] ss:$8 sps:$4 sm:$0xff] (!%p211_p3)   ;;  %v2979_v22 = vld [vmem:[%s4064_s2 + $0x2d4] ss:$8 sps:$4 sm:$0xff] (!%p211_p3)  }
   0xe   : > { %1112 = vmatprep.subr.bf16.mxu0 %v2961_v10  ;;  %s4072_s15 = smov (!%p259_p4, %s3237_s15), 1  ;;  %v2981_v23 = vld [vmem:[%s4064_s2 + $0x1d0] ss:$8 sps:$4 sm:$0xff]   ;;  %v2983_v25 = vld [vmem:[%s4064_s2 + $0x1e4] ss:$8 sps:$4 sm:$0xff]  }
   0xf   : > { %s2813_s13 = sshll.u32 %s4072_s15, 7  ;;  %v2982_v24 = vld [vmem:[%s4064_s2 + $0x2d0] ss:$8 sps:$4 sm:$0xff]   ;;  %v2985_v26 = vld [vmem:[%s4064_s2 + $0x2e4] ss:$8 sps:$4 sm:$0xff]   ;;  %s2816_s21 = sshll.u32 %s4072_s15, 6 }
  0x10   : > { %1040 = vmatpush1.bf16.msra.mxu1 %v2963_v11  ;;  %s3373_s24 = scalar_lea.vmem %s4062_s0, %s2813_s13  ;;  %v2987_v27 = vld [vmem:[%s4064_s2 + $0x1e0] ss:$8 sps:$4 sm:$0xff]   ;;  %v2989_v33 = vld [vmem:[%s4064_s2 + $0x1f4] ss:$8 sps:$4 sm:$0xff]   ;;  %v2993_v35 = vld [vmem:[%s4064_s2 + $0x1f0] ss:$8 sps:$4 sm:$0xff]  }
  0x11   : > { %1113 = vmatpush1.bf16.msra.mxu0 %v2964_v12  ;;  %1041 = vmatprep.subr.bf16.mxu1 %v2965_v13  ;;  %v298_v28 = vld [vmem:[%s3373_s24 + $0x8] sm:$0xf]  ;;  %v299_v29 = vld [vmem:[%s3373_s24 + $0xc] sm:$0x1]  ;;  %v300_v30 = vld [vmem:[%s3373_s24 + $0x10] sm:$0xf] }
  0x12   : > { %1114 = vmatprep.subr.bf16.mxu0 %v2967_v14  ;;  %v301_v31 = vld [vmem:[%s3373_s24 + $0x14] sm:$0x1]  ;;  %314 = vst [vmem:[#allocation2 + $0x8] sm:$0xf] %v298_v28  ;;  %315 = vst [vmem:[#allocation2 + $0xc] sm:$0x1] %v299_v29 }
  0x13   : > { %v2988_v32 = vld [vmem:[%s4064_s2 + $0x2e0] ss:$8 sps:$4 sm:$0xff]   ;;  %316 = vst [vmem:[#allocation2 + $0x10] sm:$0xf] %v300_v30  ;;  %317 = vst [vmem:[#allocation2 + $0x14] sm:$0x1] %v301_v31 }
  0x14   : > { %1042 = vmatpush1.bf16.msra.mxu1 %v2969_v15  ;;  %v2991_v34 = vld [vmem:[%s4064_s2 + $0x2f4] ss:$8 sps:$4 sm:$0xff]   ;;  %v2994_v36 = vld [vmem:[%s4064_s2 + $0x2f0] ss:$8 sps:$4 sm:$0xff]   ;;  %v2995_v37 = vld [vmem:[%s4064_s2 + $0x204] ss:$8 sps:$4 sm:$0xff]  }
  0x15   : > { %1115 = vmatpush1.bf16.msra.mxu0 %v2970_v16  ;;  %1043 = vmatprep.subr.bf16.mxu1 %v2971_v17  ;;  %v3001_v38 = vld [vmem:[%s4064_s2 + $0x104] ss:$8 sps:$4 sm:$0xff]   ;;  %v302_v39 = vld [vmem:[%s3373_s24 + $0x18] sm:$0xf]  ;;  %v303_v40 = vld [vmem:[%s3373_s24 + $0x1c] sm:$0x1] }
  0x16   : > { %1116 = vmatprep.subr.bf16.mxu0 %v2973_v18  ;;  %v304_v41 = vld [vmem:[%s3373_s24 + $0x20] sm:$0xf]  ;;  %v305_v44 = vld [vmem:[%s3373_s24 + $0x24] sm:$0x1]  ;;  %318 = vst [vmem:[#allocation2 + $0x18] sm:$0xf] %v302_v39 }
  0x17   : > { %319 = vst [vmem:[#allocation2 + $0x1c] sm:$0x1] %v303_v40  ;;  %320 = vst [vmem:[#allocation2 + $0x20] sm:$0xf] %v304_v41  ;;  %v3002_v49 = vld [vmem:[%s4064_s2 + $0x200] ss:$8 sps:$4 sm:$0xff]  }
  0x18   : > { %1044 = vmatpush1.bf16.msra.mxu1 %v2975_v19  ;;  %321 = vst [vmem:[#allocation2 + $0x24] sm:$0x1] %v305_v44  ;;  %v3003_v51 = vld [vmem:[%s4064_s2 + $0x214] ss:$8 sps:$4 sm:$0xff]   ;;  %v2999_v53 = vld [vmem:[%s4064_s2 + $0x100] ss:$8 sps:$4 sm:$0xff]  }
  0x19   : > { %1117 = vmatpush1.bf16.msra.mxu0 %v2976_v20  ;;  %1045 = vmatprep.subr.bf16.mxu1 %v2977_v21  ;;  %v3415_v42 = vld [vmem:[#allocation2 + $0xc] sm:$0x1]  ;;  %v570_v43 = vld [vmem:[#allocation2 + $0x8] sm:$0xe]  ;;  %v3007_v54 = vld [vmem:[%s4064_s2 + $0x114] ss:$8 sps:$4 sm:$0xff]  }
  0x1a   : > { %1118 = vmatprep.subr.bf16.mxu0 %v2979_v22  ;;  %v3418_v45 = vld [vmem:[#allocation2 + $0x14] sm:$0x1]  ;;  %v571_v46 = vld [vmem:[#allocation2 + $0x10] sm:$0xe]  ;;  %v2503_v47 = vcombine.low %v570_v43, %v3415_v42  ;;  %v3009_v58 = vld [vmem:[%s4064_s2 + $0x224] ss:$8 sps:$4 sm:$0xff]  }
  0x1b   : > { %v2504_v48 = vcombine.low %v571_v46, %v3418_v45  ;;  %v3008_v56 = vld [vmem:[%s4064_s2 + $0x210] ss:$8 sps:$4 sm:$0xff]   ;;  %v3017_v63 = vld [vmem:[%s4064_s2 + $0x124] ss:$8 sps:$4 sm:$0xff]   ;;  %v3018_v0 = vld [vmem:[%s4064_s2 + $0x220] ss:$8 sps:$4 sm:$0xff]  }
  0x1c   : > { %1046 = vmatpush1.bf16.msra.mxu1 %v2981_v23  ;;  %v698_v50 = vrot.slane %v2503_v47, 1  ;;  %v3005_v57 = vld [vmem:[%s4064_s2 + $0x110] ss:$8 sps:$4 sm:$0xff]   ;;  %v306_v4 = vld [vmem:[%s3373_s24 + $0x28] sm:$0xf]  ;;  %s2815_s25 = sadd.s32 64, %s2813_s13 }
  0x1d   : > { %1119 = vmatpush1.bf16.msra.mxu0 %v2982_v24  ;;  %1047 = vmatprep.subr.bf16.mxu1 %v2983_v25  ;;  %v699_v52 = vrot.slane %v2504_v48, 1  ;;  %v572_v61 = vld [vmem:[#allocation2 + $0x18] sm:$0xe]  ;;  %v307_v5 = vld [vmem:[%s3373_s24 + $0x2c] sm:$0x1]  ;;  %s3467_s5 = scalar_lea.vmem %s4063_s1, %s2815_s25  ;;  %s4024_s25 = scalar_lea.vmem %s4066_s4, %s2816_s21 }
  0x1e   : > { %1120 = vmatprep.subr.bf16.mxu0 %v2985_v26  ;;  %v564_v59 = vld [vmem:[#allocation2 + $0x1c] sm:$0x1]  ;;  %v573_v62 = vld [vmem:[#allocation2 + $0x20] sm:$0xe]  ;;  %v308_v6 = vld [vmem:[%s3373_s24 + $0x30] sm:$0xf] }
  0x1f   : > { %v2561_v55 = vcombine.low %v698_v50, %v699_v52  ;;  %v565_v60 = vld [vmem:[#allocation2 + $0x24] sm:$0x1]  ;;  %v2505_v1 = vcombine.low %v572_v61, %v564_v59  ;;  %v309_v7 = vld [vmem:[%s3373_s24 + $0x34] sm:$0x1]  ;;  %322 = vst [vmem:[#allocation2 + $0x28] sm:$0xf] %v306_v4 }
  0x20   : > { %1048 = vmatpush1.bf16.msra.mxu1 %v2987_v27  ;;  %v2506_v3 = vcombine.low %v573_v62, %v565_v60  ;;  %323 = vst [vmem:[#allocation2 + $0x2c] sm:$0x1] %v307_v5  ;;  %324 = vst [vmem:[#allocation2 + $0x30] sm:$0xf] %v308_v6  ;;  %v3019_v10 = vld [vmem:[%s4064_s2 + $0x234] ss:$8 sps:$4 sm:$0xff]  }
  0x21   : > { %1121 = vmatpush1.bf16.msra.mxu0 %v2988_v32  ;;  %1049 = vmatprep.subr.bf16.mxu1 %v2989_v33  ;;  %v700_v8 = vrot.slane %v2505_v1, 1  ;;  %325 = vst [vmem:[#allocation2 + $0x34] sm:$0x1] %v309_v7  ;;  %v3459_v11 = vld [vmem:[#allocation2 + $0x18] sm:$0xf] }
  0x22   : > { %1122 = vmatprep.subr.bf16.mxu0 %v2991_v34  ;;  %v701_v9 = vrot.slane %v2506_v3, 1  ;;  %v3015_v13 = vld [vmem:[%s4064_s2 + $0x120] ss:$8 sps:$4 sm:$0xff]   ;;  %v3023_v14 = vld [vmem:[%s4064_s2 + $0x134] ss:$8 sps:$4 sm:$0xff]   ;;  %v3481_v18 = vcombine.low %v3459_v11, %v564_v59 }
  0x23   : > { %v3024_v15 = vld [vmem:[%s4064_s2 + $0x230] ss:$8 sps:$4 sm:$0xff]   ;;  %v3025_v16 = vld [vmem:[%s4064_s2 + $0x244] ss:$8 sps:$4 sm:$0xff]   ;;  %v3478_v17 = vld [vmem:[#allocation2 + $0x20] sm:$0xf] }
  0x24   : > { %1050 = vmatpush1.bf16.msra.mxu1 %v2993_v35  ;;  %v2564_v12 = vcombine.low %v700_v8, %v701_v9  ;;  %v3021_v19 = vld [vmem:[%s4064_s2 + $0x130] ss:$8 sps:$4 sm:$0xff]   ;;  %v3033_v20 = vld [vmem:[%s4064_s2 + $0x144] ss:$8 sps:$4 sm:$0xff]   ;;  %v311_v22 = vld [vmem:[%s3373_s24 + $0x3c] sm:$0x1]  ;;  %v3500_v30 = vcombine.low %v3478_v17, %v565_v60 }
  0x25   : > { %1123 = vmatpush1.bf16.msra.mxu0 %v2994_v36  ;;  %1051 = vmatprep.subr.bf16.mxu1 %v2995_v37  ;;  %v310_v21 = vld [vmem:[%s3373_s24 + $0x38] sm:$0xf]  ;;  %v328_v23 = vld [vmem:[%s3467_s5] sm:$0xf]  ;;  %v3035_v26 = vld [vmem:[%s4064_s2 + $0x254] ss:$8 sps:$4 sm:$0xff]  }
  0x26   : > { %1518 = vmatprep.subr.bf16.mxu0 %v3001_v38  ;;  %v3034_v25 = vld [vmem:[%s4064_s2 + $0x240] ss:$8 sps:$4 sm:$0xff]   ;;  %326 = vst [vmem:[#allocation2 + $0x38] sm:$0xf] %v310_v21  ;;  %327 = vst [vmem:[#allocation2 + $0x3c] sm:$0x1] %v311_v22 }
  0x27   : > { %v566_v24 = vld [vmem:[#allocation2 + $0x2c] sm:$0x1]  ;;  %333 = vst [vmem:[#allocation2 + $0x40] sm:$0xf] %v328_v23  ;;  %v574_v28 = vld [vmem:[#allocation2 + $0x28] sm:$0xe] }
  0x28   : > { %1052 = vmatpush1.bf16.msra.mxu1 %v3002_v49  ;;  %1141 = vmatmul.mubr.bf16.vlgmr.msra.gmra.mrb[0].mxu0 %v2561_v55  ;;  %v567_v27 = vld [vmem:[#allocation2 + $0x34] sm:$0x1]  ;;  %v575_v29 = vld [vmem:[#allocation2 + $0x30] sm:$0xe]  ;;  %v2507_v31 = vcombine.low %v574_v28, %v566_v24  ;;  %v329_v33 = vld [vmem:[%s3467_s5 + $0x4] sm:$0x1] }
  0x29   : > { %1053 = vmatprep.subr.bf16.mxu1 %v3003_v51  ;;  %1519 = vmatpush1.bf16.msra.mxu0 %v2999_v53  ;;  %v2508_v32 = vcombine.low %v575_v29, %v567_v27  ;;  %v635_v34 = vshll.u32 %v3481_v18, 16  ;;  %v3031_v35 = vld [vmem:[%s4064_s2 + $0x140] ss:$8 sps:$4 sm:$0xff]   ;;  %334 = vst [vmem:[#allocation2 + $0x44] sm:$0x1] %v329_v33  ;;  %v633_v40 = vshrl.u32 %v3481_v18, 16 }
  0x2a   : > { %1150 = vmatprep.mubr.bf16.mxu0 %v3247_v2  ;;  %1520 = vmatprep.subr.bf16.mxu0 %v3007_v54  ;;  %v702_v36 = vrot.slane %v2507_v31, 1  ;;  %v3040_v38 = vld [vmem:[%s4064_s2 + $0x250] ss:$8 sps:$4 sm:$0xff]   ;;  %v3510_v39 = vld [vmem:[#allocation2 + $0x28] sm:$0xf]  ;;  %v642_v47 = vshll.u32 %v3500_v30, 16 }
  0x2b   : > { %v703_v37 = vrot.slane %v2508_v32, 1  ;;  %v3039_v43 = vld [vmem:[%s4064_s2 + $0x154] ss:$8 sps:$4 sm:$0xff]   ;;  %v3516_v44 = vld [vmem:[#allocation2 + $0x8] sm:$0xf]  ;;  %v637_v46 = vrot.slane %v635_v34, 1  ;;  %v3532_v53 = vcombine.low %v3510_v39, %v566_v24 }
  0x2c   : > { %1054 = vmatpush1.bf16.msra.mxu1 %v3008_v56  ;;  %v3519_v48 = vld [vmem:[#allocation2 + $0x30] sm:$0xf]  ;;  %v3041_v50 = vld [vmem:[%s4064_s2 + $0x264] ss:$8 sps:$4 sm:$0xff]   ;;  %v2495_v52 = vcombine.low %v3516_v44, %v3415_v42  ;;  %v3050_v42 = vld [vmem:[%s4064_s2 + $0x260] ss:$8 sps:$4 sm:$0xff]  }
  0x2d   : > { %1055 = vmatprep.subr.bf16.mxu1 %v3009_v58  ;;  %1521 = vmatpush1.bf16.msra.mxu0 %v3005_v57  ;;  %v2567_v41 = vcombine.low %v702_v36, %v703_v37  ;;  %v3037_v49 = vld [vmem:[%s4064_s2 + $0x150] ss:$8 sps:$4 sm:$0xff]   ;;  %v3527_v51 = vld [vmem:[#allocation2 + $0x3c] sm:$0x1]  ;;  %v3049_v56 = vld [vmem:[%s4064_s2 + $0x164] ss:$8 sps:$4 sm:$0xff]  }
  0x2e   : > { %1522 = vmatprep.subr.bf16.mxu0 %v3017_v63  ;;  %v576_v54 = vld [vmem:[#allocation2 + $0x38] sm:$0xe]  ;;  %v577_v55 = vld [vmem:[#allocation2 + $0x40] sm:$0xe]  ;;  %v3537_v57 = vld [vmem:[#allocation2 + $0x10] sm:$0xf] }
  0x2f   : > { %v2509_v58 = vcombine.low %v576_v54, %v3527_v51  ;;  %v2496_v59 = vcombine.low %v3537_v57, %v3418_v45  ;;  %v621_v60 = vshll.u32 %v2495_v52, 16  ;;  %v640_v61 = vshrl.u32 %v3500_v30, 16  ;;  %v3051_v63 = vld [vmem:[%s4064_s2 + $0x274] ss:$8 sps:$4 sm:$0xff]   ;;  %v3047_v6 = vld [vmem:[%s4064_s2 + $0x160] ss:$8 sps:$4 sm:$0xff]  }
  0x30   : > { %1056 = vmatpush1.bf16.msra.mxu1 %v3018_v0  ;;  %1151 = vmatmul.mubr.bf16.gmra.mrb[4].mxu0 %v2564_v12  ;;  %v569_v62 = vld [vmem:[#allocation2 + $0x44] sm:$0x1]  ;;  %v619_v0 = vshrl.u32 %v2495_v52, 16  ;;  %v644_v5 = vrot.slane %v642_v47, 1  ;;  %v2500_v45 = vcombine.low %v3519_v48, %v567_v27  ;;  %v296_v9 = vld [vmem:[%s3373_s24] sm:$0xf]  ;;  %v2559_v30 = vcombine.low %v3516_v44, %v3537_v57 }
  0x31   : > { %1057 = vmatprep.subr.bf16.mxu1 %v3019_v10  ;;  %1523 = vmatpush1.bf16.msra.mxu0 %v3015_v13  ;;  %v2510_v1 = vcombine.low %v577_v55, %v569_v62  ;;  %v704_v3 = vrot.slane %v2509_v58, 1  ;;  %v623_v4 = vrot.slane %v621_v60, 1  ;;  %v626_v7 = vshrl.u32 %v2496_v59, 16  ;;  %v3055_v13 = vld [vmem:[%s4064_s2 + $0x174] ss:$8 sps:$4 sm:$0xff]  }
  0x32   : > { %1160 = vmatprep.mubr.bf16.mxu0 %v3247_v2  ;;  %1524 = vmatprep.subr.bf16.mxu0 %v3023_v14  ;;  %v628_v8 = vshll.u32 %v2496_v59, 16  ;;  %v649_v10 = vshll.u32 %v3532_v53, 16  ;;  %v3056_v14 = vld [vmem:[%s4064_s2 + $0x270] ss:$8 sps:$4 sm:$0xff]   ;;  %312 = vst [vmem:[#allocation2] sm:$0xf] %v296_v9  ;;  %v645_v27 = vor.u32 %v644_v5, %v640_v61  ;;  %v2562_v59 = vcombine.low %v3459_v11, %v3478_v17 }
  0x33   : > { %v705_v12 = vrot.slane %v2510_v1, 1  ;;  %v624_v18 = vor.u32 %v623_v4, %v619_v0  ;;  %v3568_v22 = vld [vmem:[#allocation2 + $0xc] sm:$0x1]  ;;  %v354_v23 = vld [vmem:[#allocation2 + $0x8] sm:$0xe]  ;;  %v656_v28 = vshll.u32 %v2500_v45, 16 }
  0x34   : > { %1058 = vmatpush1.bf16.msra.mxu1 %v3024_v15  ;;  %v297_v15 = vld [vmem:[%s3373_s24 + $0x4] sm:$0x1]  ;;  %v3570_v24 = vld [vmem:[#allocation2 + $0x40] sm:$0xf]  ;;  %v3053_v29 = vld [vmem:[%s4064_s2 + $0x170] ss:$8 sps:$4 sm:$0xff]  }
  0x35   : > { %1059 = vmatprep.subr.bf16.mxu1 %v3025_v16  ;;  %1525 = vmatpush1.bf16.msra.mxu0 %v3021_v19  ;;  %v3563_v16 = vld [vmem:[#allocation2 + $0x38] sm:$0xf]  ;;  %v630_v19 = vrot.slane %v628_v8, 1  ;;  %313 = vst [vmem:[#allocation2 + $0x4] sm:$0x1] %v297_v15  ;;  %v2570_v21 = vcombine.low %v704_v3, %v705_v12  ;;  %v647_v31 = vshrl.u32 %v3532_v53, 16 }
  0x36   : > { %1526 = vmatprep.subr.bf16.mxu0 %v3033_v20  ;;  %v3062_v20 = vld [vmem:[%s4064_s2 + $0x4] ss:$8 sps:$4 sm:$0xff]   ;;  %v3060_v33 = vld [vmem:[%s4064_s2] ss:$8 sps:$4 sm:$0xff]   ;;  %v651_v36 = vrot.slane %v649_v10, 1  ;;  %v2501_v37 = vcombine.low %v3563_v16, %v3527_v51  ;;  %v2565_v10 = vcombine.low %v3510_v39, %v3519_v48 }
  0x37   : > { %v3065_v34 = vld [vmem:[%s4064_s2 + $0x304] ss:$8 sps:$4 sm:$0xff]   ;;  %v3068_v51 = vld [vmem:[%s4064_s2 + $0x10] ss:$8 sps:$4 sm:$0xff]   ;;  %v3063_v57 = vld [vmem:[%s4064_s2 + $0x300] ss:$8 sps:$4 sm:$0xff]  }
  0x38   : > { %1060 = vmatpush1.bf16.msra.mxu1 %v3034_v25  ;;  %1161 = vmatmul.mubr.bf16.gmra.mrb[8].mxu0 %v2567_v41  ;;  %v631_v25 = vor.u32 %v630_v19, %v626_v7  ;;  %v654_v41 = vshrl.u32 %v2500_v45, 16  ;;  %v3077_v52 = vld [vmem:[%s4064_s2 + $0x24] ss:$8 sps:$4 sm:$0xff]   ;;  %v652_v53 = vor.u32 %v651_v36, %v647_v31  ;;  %v663_v55 = vshll.u32 %v2501_v37, 16  ;;  %v3075_v61 = vld [vmem:[%s4064_s2 + $0x20] ss:$8 sps:$4 sm:$0xff]  }
  0x39   : > { %1061 = vmatprep.subr.bf16.mxu1 %v3035_v26  ;;  %1527 = vmatpush1.bf16.msra.mxu0 %v3031_v35  ;;  %v638_v26 = vor.u32 %v637_v46, %v633_v40  ;;  %v2488_v35 = vcombine.low %v354_v23, %v3568_v22  ;;  %v3070_v40 = vld [vmem:[%s4064_s2 + $0x14] ss:$8 sps:$4 sm:$0xff]   ;;  %v353_v44 = vld [vmem:[#allocation2] sm:$0xe]  ;;  %v3071_v11 = vld [vmem:[%s4064_s2 + $0x310] ss:$8 sps:$4 sm:$0xff]   ;;  %v2568_v23 = vcombine.low %v3563_v16, %v3570_v24 }
  0x3a   : > { %1528 = vmatprep.subr.bf16.mxu0 %v3039_v43  ;;  %1170 = vmatprep.mubr.bf16.mxu0 %v3247_v2  ;;  %v2560_v32 = vcombine.low %v624_v18, %v631_v25  ;;  %v658_v43 = vrot.slane %v656_v28, 1  ;;  %v665_v1 = vrot.slane %v663_v55, 1  ;;  %v3080_v17 = vld [vmem:[%s4064_s2 + $0x324] ss:$8 sps:$4 sm:$0xff]   ;;  %v3081_v5 = vld [vmem:[%s4064_s2 + $0x30] ss:$8 sps:$4 sm:$0xff]  }
  0x3b   : > { %v2563_v46 = vcombine.low %v638_v26, %v645_v27  ;;  %v3090_v45 = vld [vmem:[%s4064_s2 + $0x44] ss:$8 sps:$4 sm:$0xff]   ;;  %v3078_v8 = vld [vmem:[%s4064_s2 + $0x320] ss:$8 sps:$4 sm:$0xff]   ;;  %v3086_v9 = vld [vmem:[%s4064_s2 + $0x334] ss:$8 sps:$4 sm:$0xff]  }
  0x3c   : > { %1062 = vmatpush1.bf16.msra.mxu1 %v3040_v38  ;;  %v2502_v38 = vcombine.low %v3570_v24, %v569_v62  ;;  %1067 = vmatprep.mubr.bf16.mxu1 %v2560_v32  ;;  %v3592_v47 = vld [vmem:[#allocation2 + $0x4] sm:$0x1]  ;;  %v659_v54 = vor.u32 %v658_v43, %v654_v41  ;;  %v661_v62 = vshrl.u32 %v2501_v37, 16  ;;  %v3088_v12 = vld [vmem:[%s4064_s2 + $0x40] ss:$8 sps:$4 sm:$0xff]  }
  0x3d   : > { %1063 = vmatprep.subr.bf16.mxu1 %v3041_v50  ;;  %1529 = vmatpush1.bf16.msra.mxu0 %v3037_v49  ;;  %v2487_v49 = vcombine.low %v353_v44, %v3592_v47  ;;  %v482_v50 = vrot.slane %v2488_v35, 1  ;;  %v3084_v15 = vld [vmem:[%s4064_s2 + $0x330] ss:$8 sps:$4 sm:$0xff]   ;;  %v3093_v39 = vld [vmem:[%s4064_s2 + $0x344] ss:$8 sps:$4 sm:$0xff]  }
  0x3e   : > { %1530 = vmatprep.subr.bf16.mxu0 %v3049_v56  ;;  %v670_v56 = vshll.u32 %v2502_v38, 16  ;;  %v2566_v0 = vcombine.low %v652_v53, %v659_v54  ;;  %v668_v3 = vshrl.u32 %v2502_v38, 16  ;;  %v3094_v48 = vld [vmem:[%s4064_s2 + $0x50] ss:$8 sps:$4 sm:$0xff]   ;;  %v3103_v18 = vld [vmem:[%s4064_s2 + $0x64] ss:$8 sps:$4 sm:$0xff]  }
  0x3f   : > { %v481_v58 = vrot.slane %v2487_v49, 1  ;;  %v3091_v19 = vld [vmem:[%s4064_s2 + $0x340] ss:$8 sps:$4 sm:$0xff]   ;;  %v355_v25 = vld [vmem:[#allocation2 + $0x10] sm:$0xe] }
  0x40   : > { %1064 = vmatpush1.bf16.msra.mxu1 %v3050_v42  ;;  %1171 = vmatmul.mubr.bf16.gmra.mrb[12].mxu0 %v2570_v21  ;;  %v3073_v42 = vld [vmem:[%s4064_s2 + $0x314] ss:$8 sps:$4 sm:$0xff]   ;;  %v672_v4 = vrot.slane %v670_v56, 1  ;;  %v356_v26 = vld [vmem:[#allocation2 + $0x18] sm:$0xe] }
  0x41   : > { %1065 = vmatprep.subr.bf16.mxu1 %v3051_v63  ;;  %1531 = vmatpush1.bf16.msra.mxu0 %v3047_v6  ;;  %v2621_v60 = vcombine.low %v481_v58, %v482_v50  ;;  %v3083_v63 = vld [vmem:[%s4064_s2 + $0x34] ss:$8 sps:$4 sm:$0xff]   ;;  %v666_v6 = vor.u32 %v665_v1, %v661_v62  ;;  %v3101_v28 = vld [vmem:[%s4064_s2 + $0x60] ss:$8 sps:$4 sm:$0xff]   ;;  %v3097_v32 = vld [vmem:[%s4064_s2 + $0x350] ss:$8 sps:$4 sm:$0xff]  }
  0x42   : > { %1532 = vmatprep.subr.bf16.mxu0 %v3055_v13  ;;  %1550 = vmatprep.mubr.bf16.mxu0 %v3247_v2  ;;  %v673_v7 = vor.u32 %v672_v4, %v668_v3  ;;  %v3096_v13 = vld [vmem:[%s4064_s2 + $0x54] ss:$8 sps:$4 sm:$0xff]   ;;  %v3104_v36 = vld [vmem:[%s4064_s2 + $0x360] ss:$8 sps:$4 sm:$0xff]   ;;  %v3115_v37 = vld [vmem:[%s4064_s2 + $0x84] ss:$8 sps:$4 sm:$0xff]  }
  0x43   : > { %v3659_v21 = vld [vmem:[#allocation2 + $0x1c] sm:$0x1]  ;;  %v3689_v38 = vld [vmem:[#allocation2 + $0x24] sm:$0x1]  ;;  %v357_v41 = vld [vmem:[#allocation2 + $0x20] sm:$0xe] }
  0x44   : > { %1066 = vmatpush1.bf16.msra.mxu1 %v3056_v14  ;;  %v2569_v14 = vcombine.low %v666_v6, %v673_v7  ;;  %v3099_v27 = vld [vmem:[%s4064_s2 + $0x354] ss:$8 sps:$4 sm:$0xff]   ;;  %v358_v43 = vld [vmem:[#allocation2 + $0x28] sm:$0xe]  ;;  %v3110_v54 = vld [vmem:[%s4064_s2 + $0x370] ss:$8 sps:$4 sm:$0xff]  }
  0x45   : > { %1445 = vmatprep.subr.bf16.mxu1 %v3062_v20  ;;  %1533 = vmatpush1.bf16.msra.mxu0 %v3053_v29  ;;  %v3657_v20 = vld [vmem:[#allocation2 + $0x14] sm:$0x1]  ;;  %v3113_v50 = vld [vmem:[%s4064_s2 + $0x80] ss:$8 sps:$4 sm:$0xff]   ;;  %v3118_v56 = vld [vmem:[%s4064_s2 + $0x384] ss:$8 sps:$4 sm:$0xff]  }
  0x46   : > { %2073 = vmatprep.subr.bf16.mxu0 %v3065_v34  ;;  %v2489_v29 = vcombine.low %v355_v25, %v3657_v20  ;;  %v3109_v16 = vld [vmem:[%s4064_s2 + $0x74] ss:$8 sps:$4 sm:$0xff]   ;;  %v3107_v34 = vld [vmem:[%s4064_s2 + $0x70] ss:$8 sps:$4 sm:$0xff]   ;;  %v3127_v58 = vld [vmem:[%s4064_s2 + $0xa4] ss:$8 sps:$4 sm:$0xff]  }
  0x47   : > { %1068 = vmatmul.mubr.bf16.vlgmr.msra.gmra.mrb[0].mxu1 %v2559_v30  ;;  %v2490_v30 = vcombine.low %v356_v26, %v3659_v21  ;;  %v3112_v44 = vld [vmem:[%s4064_s2 + $0x374] ss:$8 sps:$4 sm:$0xff]   ;;  %v3116_v62 = vld [vmem:[%s4064_s2 + $0x380] ss:$8 sps:$4 sm:$0xff]   ;;  %v3744_v7 = vld [vmem:[#allocation2 + $0x10] sm:$0xf] }
  0x48   : > { %1446 = vmatpush1.bf16.msra.mxu1 %v3060_v33  ;;  %1077 = vmatprep.mubr.bf16.mxu1 %v2563_v46  ;;  %v483_v24 = vrot.slane %v2489_v29, 1  ;;  %v3106_v33 = vld [vmem:[%s4064_s2 + $0x364] ss:$8 sps:$4 sm:$0xff]   ;;  %v2491_v46 = vcombine.low %v357_v41, %v3689_v38  ;;  %v3125_v3 = vld [vmem:[%s4064_s2 + $0xa0] ss:$8 sps:$4 sm:$0xff]  }
  0x49   : > { %1447 = vmatprep.subr.bf16.mxu1 %v3070_v40  ;;  %1551 = vmatmul.mubr.bf16.vlgmr.msra.gmra.mrb[16].mxu0 %v2621_v60  ;;  %v484_v31 = vrot.slane %v2490_v30, 1  ;;  %v3691_v40 = vld [vmem:[#allocation2 + $0x2c] sm:$0x1]  ;;  %v359_v60 = vld [vmem:[#allocation2 + $0x30] sm:$0xe] }
  0x4a   : > { %2074 = vmatpush1.bf16.msra.mxu0 %v3063_v57  ;;  %1560 = vmatprep.mubr.bf16.mxu0 %v3247_v2  ;;  %v2492_v49 = vcombine.low %v358_v43, %v3691_v40  ;;  %v3119_v57 = vld [vmem:[%s4064_s2 + $0x90] ss:$8 sps:$4 sm:$0xff]   ;;  %v3137_v4 = vld [vmem:[%s4064_s2 + $0xb4] ss:$8 sps:$4 sm:$0xff]   ;;  %v3742_v6 = vld [vmem:[#allocation2] sm:$0xf] }
  0x4b   : > { %2075 = vmatprep.subr.bf16.mxu0 %v3073_v42  ;;  %v2624_v35 = vcombine.low %v483_v24, %v484_v31  ;;  %v3717_v42 = vld [vmem:[#allocation2 + $0x34] sm:$0x1]  ;;  %v3780_v31 = vcombine.low %v3744_v7, %v3657_v20 }
  0x4c   : > { %1448 = vmatpush1.bf16.msra.mxu1 %v3068_v51  ;;  %v3121_v51 = vld [vmem:[%s4064_s2 + $0x94] ss:$8 sps:$4 sm:$0xff]   ;;  %v486_v53 = vrot.slane %v2492_v49, 1 }
  0x4d   : > { %1449 = vmatprep.subr.bf16.mxu1 %v3077_v52  ;;  %v485_v52 = vrot.slane %v2491_v46, 1  ;;  %v3153_v20 = vld [vmem:[%s4064_s2 + $0xd4] ss:$8 sps:$4 sm:$0xff]  }
  0x4e   : > { %2076 = vmatpush1.bf16.msra.mxu0 %v3071_v11 }
  0x4f   : > { %1078 = vmatmul.mubr.bf16.gmra.mrb[4].mxu1 %v2562_v59  ;;  %2077 = vmatprep.subr.bf16.mxu0 %v3080_v17  ;;  %v2627_v55 = vcombine.low %v485_v52, %v486_v53  ;;  %v3719_v59 = vld [vmem:[#allocation2 + $0x3c] sm:$0x1]  ;;  %v3802_v52 = vld [vmem:[#allocation2 + $0x24] sm:$0x1]  ;;  %v3804_v53 = vld [vmem:[#allocation2 + $0x2c] sm:$0x1] }
  0x50   : > { %1450 = vmatpush1.bf16.msra.mxu1 %v3075_v61  ;;  %1087 = vmatprep.mubr.bf16.mxu1 %v2566_v0  ;;  %v360_v61 = vld [vmem:[#allocation2 + $0x38] sm:$0xe]  ;;  %v2493_v0 = vcombine.low %v359_v60, %v3717_v42  ;;  %v3159_v60 = vld [vmem:[%s4064_s2 + $0xe4] ss:$8 sps:$4 sm:$0xff]  }
  0x51   : > { %1451 = vmatprep.subr.bf16.mxu1 %v3083_v63  ;;  %1561 = vmatmul.mubr.bf16.gmra.mrb[20].mxu0 %v2624_v35  ;;  %v3124_v63 = vld [vmem:[%s4064_s2 + $0x394] ss:$8 sps:$4 sm:$0xff]   ;;  %v2494_v1 = vcombine.low %v360_v61, %v3719_v59 }
  0x52   : > { %2078 = vmatpush1.bf16.msra.mxu0 %v3078_v8  ;;  %1570 = vmatprep.mubr.bf16.mxu0 %v3247_v2  ;;  %v487_v11 = vrot.slane %v2493_v0, 1 }
  0x53   : > { %2079 = vmatprep.subr.bf16.mxu0 %v3086_v9  ;;  %v488_v17 = vrot.slane %v2494_v1, 1  ;;  %v3746_v9 = vld [vmem:[#allocation2 + $0x8] sm:$0xf] }
  0x54   : > { %1452 = vmatpush1.bf16.msra.mxu1 %v3081_v5  ;;  %v3122_v5 = vld [vmem:[%s4064_s2 + $0x390] ss:$8 sps:$4 sm:$0xff]  }
  0x55   : > { %1453 = vmatprep.subr.bf16.mxu1 %v3090_v45  ;;  %v3134_v45 = vld [vmem:[%s4064_s2 + $0x3a4] ss:$8 sps:$4 sm:$0xff]   ;;  %v2630_v8 = vcombine.low %v487_v11, %v488_v17  ;;  %v3156_v17 = vld [vmem:[%s4064_s2 + $0x3d4] ss:$8 sps:$4 sm:$0xff]  }
  0x56   : > { %2080 = vmatpush1.bf16.msra.mxu0 %v3084_v15  ;;  %v3135_v15 = vld [vmem:[%s4064_s2 + $0xb0] ss:$8 sps:$4 sm:$0xff]  }
  0x57   : > { %1088 = vmatmul.mubr.bf16.gmra.mrb[8].mxu1 %v2565_v10  ;;  %2081 = vmatprep.subr.bf16.mxu0 %v3093_v39  ;;  %v2479_v10 = vcombine.low %v3742_v6, %v3592_v47  ;;  %v2480_v39 = vcombine.low %v3746_v9, %v3568_v22  ;;  %v3143_v47 = vld [vmem:[%s4064_s2 + $0xc4] ss:$8 sps:$4 sm:$0xff]   ;;  %v3132_v22 = vld [vmem:[%s4064_s2 + $0x3a0] ss:$8 sps:$4 sm:$0xff]  }
  0x58   : > { %1454 = vmatpush1.bf16.msra.mxu1 %v3088_v12  ;;  %1097 = vmatprep.mubr.bf16.mxu1 %v2569_v14  ;;  %v3750_v12 = vld [vmem:[#allocation2 + $0x10] sm:$0xf]  ;;  %v3754_v14 = vld [vmem:[#allocation2 + $0x18] sm:$0xf] }
  0x59   : > { %1455 = vmatprep.subr.bf16.mxu1 %v3096_v13  ;;  %1571 = vmatmul.mubr.bf16.gmra.mrb[24].mxu0 %v2627_v55  ;;  %v3752_v13 = vld [vmem:[#allocation2 + $0x18] sm:$0xf]  ;;  %v411_v29 = vshll.u32 %v2480_v39, 16 }
  0x5a   : > { %2082 = vmatpush1.bf16.msra.mxu0 %v3091_v19  ;;  %1580 = vmatprep.mubr.bf16.mxu0 %v3247_v2  ;;  %v402_v19 = vshrl.u32 %v2479_v10, 16 }
  0x5b   : > { %2083 = vmatprep.subr.bf16.mxu0 %v3099_v27  ;;  %v3140_v27 = vld [vmem:[%s4064_s2 + $0x3b4] ss:$8 sps:$4 sm:$0xff]  }
  0x5c   : > { %1456 = vmatpush1.bf16.msra.mxu1 %v3094_v48  ;;  %v3761_v48 = vld [vmem:[#allocation2 + $0x14] sm:$0x1] }
  0x5d   : > { %1457 = vmatprep.subr.bf16.mxu1 %v3103_v18  ;;  %v3763_v18 = vld [vmem:[#allocation2 + $0x1c] sm:$0x1]  ;;  %v2679_v25 = vcombine.low %v3750_v12, %v3761_v48 }
  0x5e   : > { %2084 = vmatpush1.bf16.msra.mxu0 %v3097_v32  ;;  %v2680_v26 = vcombine.low %v3752_v13, %v3763_v18  ;;  %v3141_v32 = vld [vmem:[%s4064_s2 + $0xc0] ss:$8 sps:$4 sm:$0xff]  }
  0x5f   : > { %1098 = vmatmul.mubr.bf16.gmra.mrb[12].mxu1 %v2568_v23  ;;  %2085 = vmatprep.subr.bf16.mxu0 %v3106_v33  ;;  %v404_v23 = vshll.u32 %v2479_v10, 16  ;;  %v1659_v24 = vshll.u32 %v2679_v25, 16  ;;  %v413_v33 = vrot.slane %v411_v29, 1  ;;  %v3169_v10 = vld [vmem:[%s4064_s2 + $0xf4] ss:$8 sps:$4 sm:$0xff]  }
  0x60   : > { %1458 = vmatpush1.bf16.msra.mxu1 %v3101_v28  ;;  %v409_v28 = vshrl.u32 %v2480_v39, 16  ;;  %v1666_v35 = vshll.u32 %v2680_v26, 16  ;;  %v330_v29 = vld [vmem:[%s3467_s5 + $0x8] sm:$0xf] }
  0x61   : > { %1459 = vmatprep.subr.bf16.mxu1 %v3109_v16  ;;  %1581 = vmatmul.mubr.bf16.gmra.mrb[28].mxu0 %v2630_v8  ;;  %v406_v30 = vrot.slane %v404_v23, 1  ;;  %v1657_v16 = vshrl.u32 %v2679_v25, 16  ;;  %v1661_v43 = vrot.slane %v1659_v24, 1  ;;  %v3859_v25 = vld [vmem:[#allocation2 + $0x30] sm:$0xf] }
  0x62   : > { %2086 = vmatpush1.bf16.msra.mxu0 %v3104_v36  ;;  %v3787_v36 = vcombine.low %v3754_v14, %v3659_v21  ;;  %v414_v46 = vor.u32 %v413_v33, %v409_v28  ;;  %v1668_v49 = vrot.slane %v1666_v35, 1  ;;  %335 = vst [vmem:[#allocation2 + $0x48] sm:$0xf] %v330_v29  ;;  %v3874_v33 = vld [vmem:[#allocation2 + $0x30] sm:$0xf]  ;;  %v2619_v35 = vcombine.low %v3742_v6, %v3746_v9 }
  0x63   : > { %2087 = vmatprep.subr.bf16.mxu0 %v3112_v44  ;;  %v407_v41 = vor.u32 %v406_v30, %v402_v19  ;;  %v3150_v44 = vld [vmem:[%s4064_s2 + $0x3c4] ss:$8 sps:$4 sm:$0xff]   ;;  %v1662_v21 = vor.u32 %v1661_v43, %v1657_v16  ;;  %v2622_v29 = vcombine.low %v3744_v7, %v3754_v14 }
  0x64   : > { %1460 = vmatpush1.bf16.msra.mxu1 %v3107_v34  ;;  %v1664_v34 = vshrl.u32 %v2680_v26, 16  ;;  %v425_v61 = vshll.u32 %v3787_v36, 16  ;;  %v3861_v26 = vld [vmem:[#allocation2 + $0x38] sm:$0xf]  ;;  %v331_v30 = vld [vmem:[%s3467_s5 + $0xc] sm:$0x1] }
  0x65   : > { %1461 = vmatprep.subr.bf16.mxu1 %v3115_v37  ;;  %v3138_v37 = vld [vmem:[%s4064_s2 + $0x3b0] ss:$8 sps:$4 sm:$0xff]   ;;  %v2620_v55 = vcombine.low %v407_v41, %v414_v46  ;;  %v3183_v16 = vld [vmem:[%s4064_s2 + $0x404] ss:$8 sps:$4 sm:$0xff]   ;;  %336 = vst [vmem:[#allocation2 + $0x4c] sm:$0x1] %v331_v30 }
  0x66   : > { %2088 = vmatpush1.bf16.msra.mxu0 %v3110_v54  ;;  %v3151_v54 = vld [vmem:[%s4064_s2 + $0xd0] ss:$8 sps:$4 sm:$0xff]   ;;  %v427_v39 = vrot.slane %v425_v61, 1  ;;  %v3164_v41 = vld [vmem:[%s4064_s2 + $0x3e0] ss:$8 sps:$4 sm:$0xff]  }
  0x67   : > { %2089 = vmatprep.subr.bf16.mxu0 %v3118_v56  ;;  %v1669_v56 = vor.u32 %v1668_v49, %v1664_v34  ;;  %1477 = vmatprep.mubr.bf16.mxu1 %v2620_v55  ;;  %v3876_v34 = vld [vmem:[#allocation2 + $0x38] sm:$0xf]  ;;  %v3172_v46 = vld [vmem:[%s4064_s2 + $0x3f4] ss:$8 sps:$4 sm:$0xff]   ;;  %v3181_v49 = vld [vmem:[%s4064_s2 + $0x400] ss:$8 sps:$4 sm:$0xff]   ;;  %v2485_v55 = vcombine.low %v3874_v33, %v3717_v42 }
  0x68   : > { %1462 = vmatpush1.bf16.msra.mxu1 %v3113_v50  ;;  %v3798_v50 = vld [vmem:[#allocation2 + $0x20] sm:$0xf]  ;;  %v3184_v42 = vld [vmem:[%s4064_s2 + $0x410] ss:$8 sps:$4 sm:$0xff]  }
  0x69   : > { %1463 = vmatprep.subr.bf16.mxu1 %v3121_v51  ;;  %v3800_v51 = vld [vmem:[#allocation2 + $0x28] sm:$0xf]  ;;  %v3820_v0 = vcombine.low %v3798_v50, %v3802_v52  ;;  %v444_v30 = vshrl.u32 %v2485_v55, 16 }
  0x6a   : > { %2090 = vmatpush1.bf16.msra.mxu0 %v3116_v62  ;;  %v3816_v62 = vld [vmem:[#allocation2 + $0x28] sm:$0xf]  ;;  %v3824_v1 = vcombine.low %v3800_v51, %v3804_v53 }
  0x6b   : > { %2091 = vmatprep.subr.bf16.mxu0 %v3124_v63  ;;  %v2744_v63 = vcombine.low %v1662_v21, %v1669_v56  ;;  %v3842_v8 = vcombine.low %v3816_v62, %v3691_v40  ;;  %v3166_v40 = vld [vmem:[%s4064_s2 + $0x3e4] ss:$8 sps:$4 sm:$0xff]   ;;  %v1673_v19 = vshll.u32 %v3820_v0, 16  ;;  %v1671_v43 = vshrl.u32 %v3820_v0, 16 }
  0x6c   : > { %1464 = vmatpush1.bf16.msra.mxu1 %v3119_v57  ;;  %v418_v57 = vshll.u32 %v3780_v31, 16  ;;  %v1680_v23 = vshll.u32 %v3824_v1, 16  ;;  %v1678_v6 = vshrl.u32 %v3824_v1, 16  ;;  %v2486_v56 = vcombine.low %v3876_v34, %v3719_v59  ;;  %v3170_v1 = vld [vmem:[%s4064_s2 + $0x3f0] ss:$8 sps:$4 sm:$0xff]  }
  0x6d   : > { %1465 = vmatprep.subr.bf16.mxu1 %v3127_v58  ;;  %v3810_v58 = vld [vmem:[#allocation2 + $0x20] sm:$0xf]  ;;  %2105 = vmatprep.mubr.bf16.mxu0 %v2744_v63 }
  0x6e   : > { %2092 = vmatpush1.bf16.msra.mxu0 %v3122_v5  ;;  %v3832_v11 = vcombine.low %v3810_v58, %v3689_v38  ;;  %v3157_v5 = vld [vmem:[%s4064_s2 + $0xe0] ss:$8 sps:$4 sm:$0xff]   ;;  %v3154_v38 = vld [vmem:[%s4064_s2 + $0x3d0] ss:$8 sps:$4 sm:$0xff]   ;;  %v1682_v9 = vrot.slane %v1680_v23, 1 }
  0x6f   : > { %2093 = vmatprep.subr.bf16.mxu0 %v3134_v45  ;;  %v420_v45 = vrot.slane %v418_v57, 1  ;;  %v3186_v57 = vld [vmem:[%s4064_s2 + $0x414] ss:$8 sps:$4 sm:$0xff]  }
  0x70   : > { %1466 = vmatpush1.bf16.msra.mxu1 %v3125_v3  ;;  %v3148_v3 = vld [vmem:[%s4064_s2 + $0x3c0] ss:$8 sps:$4 sm:$0xff]   ;;  %v432_v28 = vshll.u32 %v3832_v11, 16 }
  0x71   : > { %1467 = vmatprep.subr.bf16.mxu1 %v3137_v4  ;;  %v416_v4 = vshrl.u32 %v3780_v31, 16 }
  0x72   : > { %2094 = vmatpush1.bf16.msra.mxu0 %v3132_v22  ;;  %v3863_v22 = vld [vmem:[#allocation2 + $0x34] sm:$0x1]  ;;  %v434_v21 = vrot.slane %v432_v28, 1 }
  0x73   : > { %2095 = vmatprep.subr.bf16.mxu0 %v3140_v27  ;;  %v3865_v27 = vld [vmem:[#allocation2 + $0x3c] sm:$0x1]  ;;  %v421_v24 = vor.u32 %v420_v45, %v416_v4  ;;  %v3916_v4 = vld [vmem:[#allocation2 + $0x40] sm:$0xf]  ;;  %v3922_v45 = vld [vmem:[#allocation2 + $0x4c] sm:$0x1] }
  0x74   : > { %1468 = vmatpush1.bf16.msra.mxu1 %v3135_v15  ;;  %v423_v15 = vshrl.u32 %v3787_v36, 16  ;;  %v430_v36 = vshrl.u32 %v3832_v11, 16 }
  0x75   : > { %1469 = vmatprep.subr.bf16.mxu1 %v3143_v47  ;;  %v3167_v47 = vld [vmem:[%s4064_s2 + $0xf0] ss:$8 sps:$4 sm:$0xff]  }
  0x76   : > { %2096 = vmatpush1.bf16.msra.mxu0 %v3138_v37  ;;  %v428_v31 = vor.u32 %v427_v39, %v423_v15  ;;  %v3883_v37 = vcombine.low %v3859_v25, %v3863_v22  ;;  %v435_v11 = vor.u32 %v434_v21, %v430_v36  ;;  %v446_v15 = vshll.u32 %v2485_v55, 16 }
  0x77   : > { %2097 = vmatprep.subr.bf16.mxu0 %v3150_v44  ;;  %v1675_v44 = vrot.slane %v1673_v19, 1  ;;  %v453_v39 = vshll.u32 %v2486_v56, 16 }
  0x78   : > { %1470 = vmatpush1.bf16.msra.mxu1 %v3141_v32  ;;  %v439_v32 = vshll.u32 %v3842_v8, 16  ;;  %v1687_v63 = vshll.u32 %v3883_v37, 16 }
  0x79   : > { %1471 = vmatprep.subr.bf16.mxu1 %v3153_v20  ;;  %v3887_v20 = vcombine.low %v3861_v26, %v3865_v27  ;;  %v1676_v59 = vor.u32 %v1675_v44, %v1671_v43  ;;  %v455_v36 = vrot.slane %v453_v39, 1 }
  0x7a   : > { %2098 = vmatpush1.bf16.msra.mxu0 %v3148_v3  ;;  %v441_v61 = vrot.slane %v439_v32, 1  ;;  %v1683_v3 = vor.u32 %v1682_v9, %v1678_v6  ;;  %v448_v32 = vrot.slane %v446_v15, 1  ;;  %v2746_v6 = vcombine.low %v3798_v50, %v3800_v51  ;;  %v3203_v50 = vld [vmem:[%s4064_s2 + $0x440] ss:$8 sps:$4 sm:$0xff]  }
  0x7b   : > { %2099 = vmatprep.subr.bf16.mxu0 %v3156_v17  ;;  %v1694_v0 = vshll.u32 %v3887_v20, 16  ;;  %v3918_v17 = vld [vmem:[#allocation2 + $0x48] sm:$0xf]  ;;  %v1692_v19 = vshrl.u32 %v3887_v20, 16 }
  0x7c   : > { %1472 = vmatpush1.bf16.msra.mxu1 %v3151_v54  ;;  %v437_v54 = vshrl.u32 %v3842_v8, 16  ;;  %v2743_v8 = vcombine.low %v3750_v12, %v3752_v13  ;;  %v2747_v28 = vcombine.low %v1676_v59, %v1683_v3  ;;  %v2686_v13 = vcombine.low %v3918_v17, %v3922_v45 }
  0x7d   : > { %1473 = vmatprep.subr.bf16.mxu1 %v3159_v60  ;;  %v2623_v60 = vcombine.low %v421_v24, %v428_v31  ;;  %v1696_v23 = vrot.slane %v1694_v0, 1  ;;  %v3191_v24 = vld [vmem:[%s4064_s2 + $0x420] ss:$8 sps:$4 sm:$0xff]   ;;  %v449_v43 = vor.u32 %v448_v32, %v444_v30  ;;  %v2749_v0 = vcombine.low %v3859_v25, %v3861_v26  ;;  %v3218_v26 = vld [vmem:[%s4064_s2 + $0x474] ss:$8 sps:$4 sm:$0xff]  }
  0x7e   : > { %2100 = vmatpush1.bf16.msra.mxu0 %v3154_v38  ;;  %v3193_v38 = vld [vmem:[%s4064_s2 + $0x424] ss:$8 sps:$4 sm:$0xff]   ;;  %v1708_v14 = vshll.u32 %v2686_v13, 16  ;;  %v3213_v25 = vld [vmem:[%s4064_s2 + $0x460] ss:$8 sps:$4 sm:$0xff]  }
  0x7f   : > { %2101 = vmatprep.subr.bf16.mxu0 %v3166_v40  ;;  %v1685_v40 = vshrl.u32 %v3883_v37, 16  ;;  %v3196_v37 = vld [vmem:[%s4064_s2 + $0x434] ss:$8 sps:$4 sm:$0xff]   ;;  %v1697_v20 = vor.u32 %v1696_v23, %v1692_v19 }
  0x80   : > { %1474 = vmatpush1.bf16.msra.mxu1 %v3157_v5  ;;  %v3920_v5 = vld [vmem:[#allocation2 + $0x44] sm:$0x1]  ;;  %v1710_v55 = vrot.slane %v1708_v14, 1 }
  0x81   : > { %1475 = vmatprep.subr.bf16.mxu1 %v3169_v10  ;;  %v442_v10 = vor.u32 %v441_v61, %v437_v54  ;;  %v2685_v12 = vcombine.low %v3916_v4, %v3920_v5  ;;  %v1706_v54 = vshrl.u32 %v2686_v13, 16 }
  0x82   : > { %2102 = vmatpush1.bf16.msra.mxu0 %v3164_v41  ;;  %v3194_v41 = vld [vmem:[%s4064_s2 + $0x430] ss:$8 sps:$4 sm:$0xff]  }
  0x83   : > { %2103 = vmatprep.subr.bf16.mxu0 %v3172_v46  ;;  %v2626_v31 = vcombine.low %v435_v11, %v442_v10  ;;  %v1701_v7 = vshll.u32 %v2685_v12, 16  ;;  %v3205_v46 = vld [vmem:[%s4064_s2 + $0x444] ss:$8 sps:$4 sm:$0xff]   ;;  %v1711_v61 = vor.u32 %v1710_v55, %v1706_v54  ;;  %v2628_v11 = vcombine.low %v3874_v33, %v3876_v34  ;;  %v3216_v33 = vld [vmem:[%s4064_s2 + $0x470] ss:$8 sps:$4 sm:$0xff]  }
  0x84   : > { %1476 = vmatpush1.bf16.msra.mxu1 %v3167_v47  ;;  %v1689_v47 = vrot.slane %v1687_v63, 1  ;;  %v1612_v63 = vld [vmem:[#allocation2 + $0x30] sm:$0xe]  ;;  %v1614_v34 = vld [vmem:[#allocation2 + $0x40] sm:$0xe] }
  0x85   : > { %2826 = vmatprep.subr.bf16.mxu1 %v3183_v16  ;;  %v1703_v21 = vrot.slane %v1701_v7, 1  ;;  %v2691_v59 = vcombine.low %v1612_v63, %v3863_v22  ;;  %v1615_v10 = vld [vmem:[#allocation2 + $0x48] sm:$0xe]  ;;  %v2693_v19 = vcombine.low %v1614_v34, %v3920_v5 }
  0x86   : > { %2104 = vmatpush1.bf16.msra.mxu0 %v3170_v1  ;;  %v3215_v1 = vld [vmem:[%s4064_s2 + $0x464] ss:$8 sps:$4 sm:$0xff]   ;;  %v2694_v23 = vcombine.low %v1615_v10, %v3922_v45 }
  0x87   : > { %1478 = vmatmul.mubr.bf16.vlgmr.msra.gmra.mrb[16].mxu1 %v2619_v35  ;;  %2146 = vmatprep.subr.bf16.mxu0 %v3183_v16  ;;  %v451_v35 = vshrl.u32 %v2486_v56, 16  ;;  %v1690_v16 = vor.u32 %v1689_v47, %v1685_v40  ;;  %v2625_v56 = vcombine.low %v3810_v58, %v3816_v62  ;;  %v1613_v58 = vld [vmem:[#allocation2 + $0x38] sm:$0xe]  ;;  %v1740_v22 = vrot.slane %v2691_v59, 1 }
  0x88   : > { %2834 = vmatpush1.bf16.msra.mxu1 %v3181_v49  ;;  %1487 = vmatprep.mubr.bf16.mxu1 %v2623_v60  ;;  %v3206_v62 = vld [vmem:[%s4064_s2 + $0x450] ss:$8 sps:$4 sm:$0xff]   ;;  %v2692_v3 = vcombine.low %v1613_v58, %v3865_v27  ;;  %v2752_v40 = vcombine.low %v3916_v4, %v3918_v17  ;;  %v1742_v4 = vrot.slane %v2693_v19, 1  ;;  %v1743_v17 = vrot.slane %v2694_v23, 1 }
  0x89   : > { %2827 = vmatprep.subr.bf16.mxu1 %v3186_v57  ;;  %2106 = vmatmul.mubr.bf16.vlgmr.msra.gmra.mrb[16].mxu0 %v2743_v8  ;;  %v456_v44 = vor.u32 %v455_v36, %v451_v35  ;;  %v2750_v9 = vcombine.low %v1690_v16, %v1697_v20  ;;  %v1608_v8 = vld [vmem:[#allocation2 + $0x10] sm:$0xe] }
  0x8a   : > { %2147 = vmatpush1.bf16.msra.mxu0 %v3181_v49  ;;  %2115 = vmatprep.mubr.bf16.mxu0 %v2747_v28  ;;  %v1699_v49 = vshrl.u32 %v2685_v12, 16  ;;  %v1741_v27 = vrot.slane %v2692_v3, 1  ;;  %v2687_v15 = vcombine.low %v1608_v8, %v3761_v48  ;;  %v1610_v48 = vld [vmem:[#allocation2 + $0x20] sm:$0xe] }
  0x8b   : > { %2148 = vmatprep.subr.bf16.mxu0 %v3186_v57  ;;  %v2629_v51 = vcombine.low %v449_v43, %v456_v44  ;;  %v3208_v57 = vld [vmem:[%s4064_s2 + $0x454] ss:$8 sps:$4 sm:$0xff]   ;;  %v2689_v5 = vcombine.low %v1610_v48, %v3802_v52 }
  0x8c   : > { %2835 = vmatpush1.bf16.msra.mxu1 %v3184_v42  ;;  %v1704_v60 = vor.u32 %v1703_v21, %v1699_v49  ;;  %v2751_v47 = vcombine.low %v1740_v22, %v1741_v27  ;;  %v1736_v28 = vrot.slane %v2687_v15, 1 }
  0x8d   : > { %2828 = vmatprep.subr.bf16.mxu1 %v3193_v38  ;;  %v1738_v30 = vrot.slane %v2689_v5, 1 }
  0x8e   : > { %2149 = vmatpush1.bf16.msra.mxu0 %v3184_v42  ;;  %v2753_v42 = vcombine.low %v1704_v60, %v1711_v61 }
  0x8f   : > { %1488 = vmatmul.mubr.bf16.gmra.mrb[20].mxu1 %v2622_v29  ;;  %2150 = vmatprep.subr.bf16.mxu0 %v3193_v38  ;;  %v1609_v38 = vld [vmem:[#allocation2 + $0x18] sm:$0xe]  ;;  %v2754_v29 = vcombine.low %v1742_v4, %v1743_v17 }
  0x90   : > { %2836 = vmatpush1.bf16.msra.mxu1 %v3191_v24  ;;  %1497 = vmatprep.mubr.bf16.mxu1 %v2626_v31  ;;  %v2688_v39 = vcombine.low %v1609_v38, %v3763_v18  ;;  %v1611_v18 = vld [vmem:[#allocation2 + $0x28] sm:$0xe] }
  0x91   : > { %2829 = vmatprep.subr.bf16.mxu1 %v3196_v37  ;;  %2116 = vmatmul.mubr.bf16.gmra.mrb[20].mxu0 %v2746_v6  ;;  %v2690_v45 = vcombine.low %v1611_v18, %v3804_v53 }
  0x92   : > { %2151 = vmatpush1.bf16.msra.mxu0 %v3191_v24  ;;  %2125 = vmatprep.mubr.bf16.mxu0 %v2750_v9  ;;  %v1737_v12 = vrot.slane %v2688_v39, 1 }
  0x93   : > { %2152 = vmatprep.subr.bf16.mxu0 %v3196_v37  ;;  %v1739_v24 = vrot.slane %v2690_v45, 1 }
  0x94   : > { %2837 = vmatpush1.bf16.msra.mxu1 %v3194_v41  ;;  %v2745_v13 = vcombine.low %v1736_v28, %v1737_v12 }
  0x95   : > { %2830 = vmatprep.subr.bf16.mxu1 %v3205_v46  ;;  %v2748_v31 = vcombine.low %v1738_v30, %v1739_v24 }
  0x96   : > { %2153 = vmatpush1.bf16.msra.mxu0 %v3194_v41 }
  0x97   : > { %1498 = vmatmul.mubr.bf16.gmra.mrb[24].mxu1 %v2625_v56  ;;  %2154 = vmatprep.subr.bf16.mxu0 %v3205_v46 }
  0x98   : > { %2838 = vmatpush1.bf16.msra.mxu1 %v3203_v50  ;;  %1507 = vmatprep.mubr.bf16.mxu1 %v2629_v51 }
  0x99   : > { %2831 = vmatprep.subr.bf16.mxu1 %v3208_v57  ;;  %2126 = vmatmul.mubr.bf16.gmra.mrb[24].mxu0 %v2749_v0 }
  0x9a   : > { %2155 = vmatpush1.bf16.msra.mxu0 %v3203_v50  ;;  %2135 = vmatprep.mubr.bf16.mxu0 %v2753_v42 }
  0x9b   : > { %2156 = vmatprep.subr.bf16.mxu0 %v3208_v57 }
  0x9c   : > { %2839 = vmatpush1.bf16.msra.mxu1 %v3206_v62 }
  0x9d   : > { %2832 = vmatprep.subr.bf16.mxu1 %v3215_v1 }
  0x9e   : > { %2157 = vmatpush1.bf16.msra.mxu0 %v3206_v62 }
  0x9f   : > { %1508 = vmatmul.mubr.bf16.gmra.mrb[28].mxu1 %v2628_v11  ;;  %2158 = vmatprep.subr.bf16.mxu0 %v3215_v1 }
  0xa0   : > { %2840 = vmatpush1.bf16.msra.mxu1 %v3213_v25  ;;  %2198 = vmatprep.mubr.bf16.mxu1 %v3247_v2 }
  0xa1   : > { %2833 = vmatprep.subr.bf16.mxu1 %v3218_v26  ;;  %2136 = vmatmul.mubr.bf16.gmra.mrb[28].mxu0 %v2752_v40 }
  0xa2   : > { %2159 = vmatpush1.bf16.msra.mxu0 %v3213_v25  ;;  %2178 = vmatprep.mubr.bf16.mxu0 %v3247_v2 }
  0xa3   : > { %2160 = vmatprep.subr.bf16.mxu0 %v3218_v26 }
  0xa4   : > { %2841 = vmatpush1.bf16.msra.mxu1 %v3216_v33 }
  0xa6   : > { %2161 = vmatpush1.bf16.msra.mxu0 %v3216_v33 }
  0xa7   : > { %2199 = vmatmul.mubr.bf16.vlgmr.msra.gmra.mrb[32].mxu1 %v2751_v47 }
  0xa8   : > { %2208 = vmatprep.mubr.bf16.mxu1 %v3247_v2 }
  0xa9   : > { %2179 = vmatmul.mubr.bf16.vlgmr.msra.gmra.mrb[16].mxu0 %v2745_v13 }
  0xaa   : > { %2188 = vmatprep.mubr.bf16.mxu0 %v3247_v2 }
  0xaf   : > { %2209 = vmatmul.mubr.bf16.gmra.mrb[36].mxu1 %v2754_v29 }
  0xb1   : > { %2189 = vmatmul.mubr.bf16.gmra.mrb[20].mxu0 %v2748_v31 }
  0xfb   : > { %v1142_v32 = vpop.f32.mrb[0].mxu0 }
  0xfc   : > { %v1144_v35 = vpop.f32.mrb[1].mxu0 }
  0xfd   : > { %v1146_v36 = vpop.f32.mrb[2].mxu0 }
  0xfe   : > { %v1148_v37 = vpop.f32.mrb[3].mxu0 }
 0x103   : > { %v1152_v16 = vpop.f32.mrb[4].mxu0 }
 0x104   : > { %v1154_v20 = vpop.f32.mrb[5].mxu0 }
 0x105   : > { %v1156_v7 = vpop.f32.mrb[6].mxu0 }
 0x106   : > { %v1158_v52 = vpop.f32.mrb[7].mxu0 }
 0x10b   : > { %v1162_v14 = vpop.f32.mrb[8].mxu0 }
 0x10c   : > { %v1164_v53 = vpop.f32.mrb[9].mxu0 }
 0x10d   : > { %v1166_v41 = vpop.f32.mrb[10].mxu0 }
 0x10e   : > { %v1168_v43 = vpop.f32.mrb[11].mxu0 }
 0x113   : > { %v1172_v44 = vpop.f32.mrb[12].mxu0 }
 0x114   : > { %v1174_v6 = vpop.f32.mrb[13].mxu0 }
 0x115   : > { %v1176_v9 = vpop.f32.mrb[14].mxu0 }
 0x116   : > { %v1178_v46 = vpop.f32.mrb[15].mxu0 }
 0x11a   : > { %v1069_v2 = vpop.f32.mrb[0].mxu1 }
 0x11b   : > { %v1143_v49 = vadd.f32 %v1142_v32, %v1069_v2  ;;  %v1071_v21 = vpop.f32.mrb[1].mxu1 }
 0x11c   : > { %v1145_v54 = vadd.f32 %v1144_v35, %v1071_v21  ;;  %v1073_v55 = vpop.f32.mrb[2].mxu1 }
 0x11d   : > { %v1147_v56 = vadd.f32 %v1146_v36, %v1073_v55  ;;  %v1075_v50 = vpop.f32.mrb[3].mxu1 }
 0x11e   : > { %v1149_v51 = vadd.f32 %v1148_v37, %v1075_v50 }
 0x122   : > { %v1079_v57 = vpop.f32.mrb[4].mxu1 }
 0x123   : > { %v1153_v60 = vadd.f32 %v1152_v16, %v1079_v57  ;;  %v1081_v61 = vpop.f32.mrb[5].mxu1 }
 0x124   : > { %v1155_v63 = vadd.f32 %v1154_v20, %v1081_v61  ;;  %v1083_v58 = vpop.f32.mrb[6].mxu1 }
 0x125   : > { %v1157_v62 = vadd.f32 %v1156_v7, %v1083_v58  ;;  %v1085_v0 = vpop.f32.mrb[7].mxu1 }
 0x126   : > { %v1159_v1 = vadd.f32 %v1158_v52, %v1085_v0  ;;  %v2237_v52 = vlaneseq }
 0x12a   : > { %v1089_v42 = vpop.f32.mrb[8].mxu1 }
 0x12b   : > { %v1163_v59 = vadd.f32 %v1162_v14, %v1089_v42  ;;  %v1091_v3 = vpop.f32.mrb[9].mxu1 }
 0x12c   : > { %v1165_v11 = vadd.f32 %v1164_v53, %v1091_v3  ;;  %v1093_v25 = vpop.f32.mrb[10].mxu1 }
 0x12d   : > { %v1167_v26 = vadd.f32 %v1166_v41, %v1093_v25  ;;  %v1095_v8 = vpop.f32.mrb[11].mxu1 }
 0x12e   : > { %v1169_v38 = vadd.f32 %v1168_v43, %v1095_v8 }
 0x132   : > { %v1099_v22 = vpop.f32.mrb[12].mxu1 }
 0x133   : > { %v1173_v27 = vadd.f32 %v1172_v44, %v1099_v22  ;;  %v1101_v33 = vpop.f32.mrb[13].mxu1  ;;  %v2238_v44 = vshrl.u32 %v2237_v52, 7 }
 0x134   : > { %v1175_v34 = vadd.f32 %v1174_v6, %v1101_v33  ;;  %v1103_v10 = vpop.f32.mrb[14].mxu1 }
 0x135   : > { %v1177_v15 = vadd.f32 %v1176_v9, %v1103_v10  ;;  %v1105_v39 = vpop.f32.mrb[15].mxu1  ;;  %v2243_v58 = vsub.s32 1, %v2238_v44 }
 0x136   : > { %v1179_v40 = vadd.f32 %v1178_v46, %v1105_v39 }
 0x15a   : > { %v1479_v47 = vpop.f32.mrb[16].mxu1 }
 0x15b   : > { %v3992_v19 = vadd.f32 %v1479_v47, %v1143_v49  ;;  %v1481_v23 = vpop.f32.mrb[17].mxu1 }
 0x15c   : > { %v3994_v28 = vadd.f32 %v1481_v23, %v1145_v54  ;;  %v1483_v12 = vpop.f32.mrb[18].mxu1 }
 0x15d   : > { %v3996_v48 = vadd.f32 %v1483_v12, %v1147_v56  ;;  %v1485_v18 = vpop.f32.mrb[19].mxu1 }
 0x15e   : > { %v3998_v4 = vadd.f32 %v1485_v18, %v1149_v51 }
 0x162   : > { %v1489_v17 = vpop.f32.mrb[20].mxu1 }
 0x163   : > { %v4000_v13 = vadd.f32 %v1489_v17, %v1153_v60  ;;  %v1491_v5 = vpop.f32.mrb[21].mxu1  ;;  %v2239_v60 = vsub.s32 0, %v2238_v44 }
 0x164   : > { %v4002_v45 = vadd.f32 %v1491_v5, %v1155_v63  ;;  %v1493_v29 = vpop.f32.mrb[22].mxu1  ;;  %v2235_v63 = vld [vmem:[%s4065_s3] sm:$0x3] }
 0x165   : > { %v4004_v30 = vadd.f32 %v1493_v29, %v1157_v62  ;;  %v1495_v24 = vpop.f32.mrb[23].mxu1  ;;  %v4011_v42 = vrot.slane %v2235_v63, %v2239_v60  ;;  %v4013_v25 = vrot.slane %v2235_v63, %v2243_v58 }
 0x166   : > { %v4006_v31 = vadd.f32 %v1495_v24, %v1159_v1 }
 0x16a   : > { %v1499_v32 = vpop.f32.mrb[24].mxu1 }
 0x16b   : > { %v1500_v35 = vadd.f32 %v1499_v32, %v1163_v59  ;;  %v1501_v36 = vpop.f32.mrb[25].mxu1 }
 0x16c   : > { %v1502_v37 = vadd.f32 %v1501_v36, %v1165_v11  ;;  %v1503_v16 = vpop.f32.mrb[26].mxu1  ;;  %v2127_v53 = vpop.f32.mrb[24].mxu0 }
 0x16d   : > { %v1504_v20 = vadd.f32 %v1503_v16, %v1167_v26  ;;  %v1505_v7 = vpop.f32.mrb[27].mxu1  ;;  %v2868_v41 = vadd.f32 %v2127_v53, %v1500_v35  ;;  %v2129_v43 = vpop.f32.mrb[25].mxu0 }
 0x16e   : > { %v1506_v14 = vadd.f32 %v1505_v7, %v1169_v38  ;;  %v2872_v6 = vadd.f32 %v2129_v43, %v1502_v37  ;;  %v2131_v9 = vpop.f32.mrb[26].mxu0 }
 0x16f   : > { %v2876_v2 = vadd.f32 %v2131_v9, %v1504_v20  ;;  %v2133_v49 = vpop.f32.mrb[27].mxu0 }
 0x170   : > { %v2880_v55 = vadd.f32 %v2133_v49, %v1506_v14 }
 0x172   : > { %v1509_v46 = vpop.f32.mrb[28].mxu1 }
 0x173   : > { %v1510_v21 = vadd.f32 %v1509_v46, %v1173_v27  ;;  %v1511_v54 = vpop.f32.mrb[29].mxu1 }
 0x174   : > { %v1512_v56 = vadd.f32 %v1511_v54, %v1175_v34  ;;  %v1513_v50 = vpop.f32.mrb[30].mxu1  ;;  %v2137_v62 = vpop.f32.mrb[28].mxu0 }
 0x175   : > { %v1514_v51 = vadd.f32 %v1513_v50, %v1177_v15  ;;  %v1515_v57 = vpop.f32.mrb[31].mxu1  ;;  %v2884_v0 = vadd.f32 %v2137_v62, %v1510_v21  ;;  %v2139_v1 = vpop.f32.mrb[29].mxu0 }
 0x176   : > { %v1516_v61 = vadd.f32 %v1515_v57, %v1179_v40  ;;  %v2888_v59 = vadd.f32 %v2139_v1, %v1512_v56  ;;  %v2141_v3 = vpop.f32.mrb[30].mxu0 }
 0x177   : > { %v2892_v26 = vadd.f32 %v2141_v3, %v1514_v51  ;;  %v2143_v8 = vpop.f32.mrb[31].mxu0 }
 0x178   : > { %v2896_v27 = vadd.f32 %v2143_v8, %v1516_v61 }
 0x17a   : > { %v2200_v11 = vpop.f32.mrb[32].mxu1 }
 0x17b   : > { %v2869_v38 = vadd.f32 %v2868_v41, %v2200_v11  ;;  %v2202_v22 = vpop.f32.mrb[33].mxu1 }
 0x17c   : > { %v2873_v33 = vadd.f32 %v2872_v6, %v2202_v22  ;;  %v2204_v34 = vpop.f32.mrb[34].mxu1  ;;  %v2180_v18 = vpop.f32.mrb[16].mxu0 }
 0x17d   : > { %v2255_v10 = vadd.f32 %v2869_v38, %v4011_v42  ;;  %v2877_v15 = vadd.f32 %v2876_v2, %v2204_v34  ;;  %v2206_v39 = vpop.f32.mrb[35].mxu1  ;;  %v2844_v29 = vadd.f32 %v2180_v18, %v3992_v19  ;;  %v2182_v24 = vpop.f32.mrb[17].mxu0 }
 0x17e   : > { %v2256_v40 = vadd.f32 %v2873_v33, %v4013_v25  ;;  %v2881_v47 = vadd.f32 %v2880_v55, %v2206_v39  ;;  %v2847_v35 = vadd.f32 %v2182_v24, %v3994_v28  ;;  %v2184_v37 = vpop.f32.mrb[18].mxu0 }
 0x17f   : > { %v2271_v23 = vmax.f32 %v2255_v10, 0.0  ;;  %v2257_v12 = vadd.f32 %v2877_v15, %v4011_v42  ;;  %v2247_v7 = vadd.f32 %v2844_v29, %v4011_v42  ;;  %v2850_v52 = vadd.f32 %v2184_v37, %v3996_v48  ;;  %v2186_v14 = vpop.f32.mrb[19].mxu0 }
 0x180   : > { %v2272_v17 = vmax.f32 %v2256_v40, 0.0  ;;  %v2258_v5 = vadd.f32 %v2881_v47, %v4013_v25  ;;  %v2248_v41 = vadd.f32 %v2847_v35, %v4013_v25  ;;  %v2853_v43 = vadd.f32 %v2186_v14, %v3998_v4 }
 0x181   : > { %v2273_v32 = vmax.f32 %v2257_v12, 0.0  ;;  %v2263_v9 = vmax.f32 %v2247_v7, 0.0  ;;  %v2249_v46 = vadd.f32 %v2850_v52, %v4011_v42 }
 0x182   : > { %v2821_v36 = vpack.c.bf16 %v2272_v17, %v2271_v23  ;;  %v2274_v16 = vmax.f32 %v2258_v5, 0.0  ;;  %v2210_v20 = vpop.f32.mrb[36].mxu1  ;;  %v2264_v48 = vmax.f32 %v2248_v41, 0.0  ;;  %v2250_v54 = vadd.f32 %v2853_v43, %v4013_v25 }
 0x183   : > { %v2885_v19 = vadd.f32 %v2884_v0, %v2210_v20  ;;  %v2212_v53 = vpop.f32.mrb[37].mxu1  ;;  %v2265_v50 = vmax.f32 %v2249_v46, 0.0 }
 0x184   : > { %2347 = vst [vmem:[%s4024_s25 + $0x20] sm:$0xff] %v2821_v36  ;;  %v2822_v44 = vpack.c.bf16 %v2274_v16, %v2273_v32  ;;  %v2889_v6 = vadd.f32 %v2888_v59, %v2212_v53  ;;  %v2214_v28 = vpop.f32.mrb[38].mxu1  ;;  %v2817_v57 = vpack.c.bf16 %v2264_v48, %v2263_v9  ;;  %v2266_v60 = vmax.f32 %v2250_v54, 0.0  ;;  %v2190_v61 = vpop.f32.mrb[20].mxu0 }
 0x185   : > { %v2259_v2 = vadd.f32 %v2885_v19, %v4011_v42  ;;  %v2893_v49 = vadd.f32 %v2892_v26, %v2214_v28  ;;  %v2216_v21 = vpop.f32.mrb[39].mxu1  ;;  %v2856_v62 = vadd.f32 %v2190_v61, %v4000_v13  ;;  %v2192_v0 = vpop.f32.mrb[21].mxu0 }
 0x186   : > { %2348 = vst [vmem:[%s4024_s25 + $0x28] sm:$0xff] %v2822_v44  ;;  %v2260_v55 = vadd.f32 %v2889_v6, %v4013_v25  ;;  %v2897_v56 = vadd.f32 %v2896_v27, %v2216_v21  ;;  %2343 = vst [vmem:[%s4024_s25] sm:$0xff] %v2817_v57  ;;  %v2818_v59 = vpack.c.bf16 %v2266_v60, %v2265_v50  ;;  %v2194_v26 = vpop.f32.mrb[22].mxu0 }
 0x187   : > { %v2275_v4 = vmax.f32 %v2259_v2, 0.0  ;;  %v2261_v51 = vadd.f32 %v2893_v49, %v4011_v42  ;;  %v2859_v3 = vadd.f32 %v2192_v0, %v4002_v45  ;;  %v2251_v38 = vadd.f32 %v2856_v62, %v4011_v42  ;;  %v2196_v27 = vpop.f32.mrb[23].mxu0 }
 0x188   : > { %v2276_v63 = vmax.f32 %v2260_v55, 0.0  ;;  %v2262_v58 = vadd.f32 %v2897_v56, %v4013_v25  ;;  %v2862_v22 = vadd.f32 %v2194_v26, %v4004_v30  ;;  %2344 = vst [vmem:[%s4024_s25 + $0x8] sm:$0xff] %v2818_v59  ;;  %v2865_v33 = vadd.f32 %v2196_v27, %v4006_v31 }
 0x189   : > { %v2277_v1 = vmax.f32 %v2261_v51, 0.0  ;;  %v2252_v13 = vadd.f32 %v2859_v3, %v4013_v25  ;;  %v2267_v10 = vmax.f32 %v2251_v38, 0.0 }
 0x18a   : > { %v2823_v11 = vpack.c.bf16 %v2276_v63, %v2275_v4  ;;  %v2278_v8 = vmax.f32 %v2262_v58, 0.0  ;;  %v2253_v45 = vadd.f32 %v2862_v22, %v4011_v42  ;;  %v2254_v39 = vadd.f32 %v2865_v33, %v4013_v25 }
 0x18b   : > { %v2268_v15 = vmax.f32 %v2252_v13, 0.0 }
 0x18c   : > { %2349 = vst [vmem:[%s4024_s25 + $0x30] sm:$0xff] %v2823_v11  ;;  %v2824_v34 = vpack.c.bf16 %v2278_v8, %v2277_v1  ;;  %v2269_v40 = vmax.f32 %v2253_v45, 0.0  ;;  %v2270_v23 = vmax.f32 %v2254_v39, 0.0 }
 0x18d   : > { %v2819_v47 = vpack.c.bf16 %v2268_v15, %v2267_v10 }
 0x18e   : > { %2350 = vst [vmem:[%s4024_s25 + $0x38] sm:$0xff] %v2824_v34  ;;  %v2820_v30 = vpack.c.bf16 %v2270_v23, %v2269_v40 }
 0x18f   : > { %2345 = vst [vmem:[%s4024_s25 + $0x10] sm:$0xff] %v2819_v47 }
 0x190   : > { %2346 = vst [vmem:[%s4024_s25 + $0x18] sm:$0xff] %v2820_v30 }
 0x191 PF: > { %s14_s17 = sadd.s32 1, %s3245_s17   ;;  %s4067_s15 = smov %s3241_s16 }
 0x192   : > { %p11_p5 = scmp.ge.s32.totalorder %s14_s17, 4   ;;  %s4068_s16 = smov %s4070_s18 }
 0x194   :  { %13 = sbr.rel (!%p11_p5) target bundleno = 2 (0x2), region = 74 }

// kernel: vgg_l1_loss.24
= control target key start
LH: loop header
LB: loop body
LE: loop exit
PB: predicated region body
PF: predicated region fallthrough
CT: control target
= control target key end

     0   :  { %s5407_s15 = smov 0   ;;  %s5409_s16 = smov 0   ;;  %s6753_s0 = inlined_call_operand.vmem [shape: bf16[2,16,10,256], index: 0, kind: input, shape index: {}, may-alias: {0,1}]   ;;  %s6754_s1 = inlined_call_operand.vmem [shape: bf16[2,16,10,256], index: 1, kind: input, shape index: {}, may-alias: {0,1}]   ;;  %s6755_s2 = inlined_call_operand.vmem [shape: bf16[3,768,256], index: 2, kind: input, shape index: {}]   ;;  %s6756_s3 = inlined_call_operand.vmem [shape: f32[1,256], index: 3, kind: input, shape index: {}]   ;;  %s6757_s4 = inlined_call_operand.vmem [shape: bf16[2,8,8,256], index: 4, kind: output, shape index: {}]  }
   0x1   :  { %s5411_s17 = smov 0  }
   0x2 LB: > { %s26_s18 = sadd.s32 1, %s5376_s16  ;;  %p3970_p0 = scmp.ge.s32.totalorder %s5380_s17, 1  ;;  %s5380_s17 = sphi %s5411_s17, %s14_s17   ;;  %s5376_s16 = sphi %s5409_s16, %s6759_s16   ;;  %s5372_s15 = sphi %s5407_s15, %s6758_s15  }
   0x3   : > { %p28_p1 = scmp.ge.s32.totalorder %s26_s18, 2  ;;  %p210_p2 = scmp.lt.s32.totalorder %s5380_s17, 3 }
   0x5   : > { %s6761_s18 = smov (%p28_p1, %s26_s18), 0  ;;  %p211_p3 = pnand %p3970_p0, %p210_p2 }
   0x6   : > { %v4832_v0 = vld [vmem:[%s6755_s2 + $0x304] ss:$8 sps:$4 sm:$0xff] (!%p211_p3)   ;;  %v4836_v2 = vld [vmem:[%s6755_s2 + $0x300] ss:$8 sps:$4 sm:$0xff] (!%p211_p3)   ;;  %v4838_v4 = vld [vmem:[%s6755_s2 + $0x314] ss:$8 sps:$4 sm:$0xff] (!%p211_p3)  }
   0x7   : > { %214 = sbr.rel (%p211_p3) target bundleno = 558 (0x22e), region = 36  ;;  %v4834_v1 = vld [vmem:[%s6755_s2 + $0x104] ss:$8 sps:$4 sm:$0xff] (!%p211_p3)   ;;  %1634 = vmatprep.subr.bf16.mxu1 (!%p211_p3), %v4832_v0  ;;  %v4837_v3 = vld [vmem:[%s6755_s2 + $0x100] ss:$8 sps:$4 sm:$0xff] (!%p211_p3)   ;;  %p259_p4 = scmp.lt.s32.totalorder (!%p211_p3), %s5372_s15, 1 }
   0x8   : > { %2454 = vmatprep.subr.bf16.mxu0 (!%p211_p3), %v4834_v1  ;;  %1635 = vmatpush1.bf16.msra.mxu1 (!%p211_p3), %v4836_v2  ;;  %v4840_v5 = vld [vmem:[%s6755_s2 + $0x114] ss:$8 sps:$4 sm:$0xff] (!%p211_p3)   ;;  %v4842_v6 = vld [vmem:[%s6755_s2 + $0x310] ss:$8 sps:$4 sm:$0xff] (!%p211_p3)   ;;  %v4844_v8 = vld [vmem:[%s6755_s2 + $0x324] ss:$8 sps:$4 sm:$0xff] (!%p211_p3)  }
   0x9   : > { %2455 = vmatpush1.bf16.msra.mxu0 (!%p211_p3), %v4837_v3  ;;  %1636 = vmatprep.subr.bf16.mxu1 (!%p211_p3), %v4838_v4  ;;  %v4843_v7 = vld [vmem:[%s6755_s2 + $0x110] ss:$8 sps:$4 sm:$0xff] (!%p211_p3)   ;;  %v4846_v9 = vld [vmem:[%s6755_s2 + $0x124] ss:$8 sps:$4 sm:$0xff] (!%p211_p3)   ;;  %v4848_v10 = vld [vmem:[%s6755_s2 + $0x320] ss:$8 sps:$4 sm:$0xff] (!%p211_p3)  }
   0xa   : > { %2456 = vmatprep.subr.bf16.mxu0 (!%p211_p3), %v4840_v5  ;;  %v4849_v11 = vld [vmem:[%s6755_s2 + $0x120] ss:$8 sps:$4 sm:$0xff] (!%p211_p3)   ;;  %v4850_v12 = vld [vmem:[%s6755_s2 + $0x334] ss:$8 sps:$4 sm:$0xff] (!%p211_p3)   ;;  %v4854_v14 = vld [vmem:[%s6755_s2 + $0x330] ss:$8 sps:$4 sm:$0xff] (!%p211_p3)  }
   0xb   : > { %v4852_v13 = vld [vmem:[%s6755_s2 + $0x134] ss:$8 sps:$4 sm:$0xff] (!%p211_p3)   ;;  %v4855_v15 = vld [vmem:[%s6755_s2 + $0x130] ss:$8 sps:$4 sm:$0xff] (!%p211_p3)   ;;  %v4856_v16 = vld [vmem:[%s6755_s2 + $0x344] ss:$8 sps:$4 sm:$0xff] (!%p211_p3)  }
   0xc   : > { %1637 = vmatpush1.bf16.msra.mxu1 (!%p211_p3), %v4842_v6  ;;  %v4858_v17 = vld [vmem:[%s6755_s2 + $0x144] ss:$8 sps:$4 sm:$0xff] (!%p211_p3)   ;;  %v4860_v18 = vld [vmem:[%s6755_s2 + $0x340] ss:$8 sps:$4 sm:$0xff] (!%p211_p3)   ;;  %v4862_v20 = vld [vmem:[%s6755_s2 + $0x354] ss:$8 sps:$4 sm:$0xff] (!%p211_p3)  }
   0xd   : > { %2457 = vmatpush1.bf16.msra.mxu0 (!%p211_p3), %v4843_v7  ;;  %1638 = vmatprep.subr.bf16.mxu1 (!%p211_p3), %v4844_v8  ;;  %v4861_v19 = vld [vmem:[%s6755_s2 + $0x140] ss:$8 sps:$4 sm:$0xff] (!%p211_p3)   ;;  %v4864_v21 = vld [vmem:[%s6755_s2 + $0x154] ss:$8 sps:$4 sm:$0xff] (!%p211_p3)   ;;  %v4866_v22 = vld [vmem:[%s6755_s2 + $0x350] ss:$8 sps:$4 sm:$0xff] (!%p211_p3)  }
   0xe   : > { %2458 = vmatprep.subr.bf16.mxu0 %v4846_v9  ;;  %v4867_v23 = vld [vmem:[%s6755_s2 + $0x150] ss:$8 sps:$4 sm:$0xff]   ;;  %v4868_v24 = vld [vmem:[%s6755_s2 + $0x364] ss:$8 sps:$4 sm:$0xff]   ;;  %v4872_v26 = vld [vmem:[%s6755_s2 + $0x360] ss:$8 sps:$4 sm:$0xff]  }
   0xf   : > { %v4870_v25 = vld [vmem:[%s6755_s2 + $0x164] ss:$8 sps:$4 sm:$0xff]   ;;  %v4873_v27 = vld [vmem:[%s6755_s2 + $0x160] ss:$8 sps:$4 sm:$0xff]   ;;  %v4874_v28 = vld [vmem:[%s6755_s2 + $0x374] ss:$8 sps:$4 sm:$0xff]  }
  0x10   : > { %1639 = vmatpush1.bf16.msra.mxu1 %v4848_v10  ;;  %v4876_v29 = vld [vmem:[%s6755_s2 + $0x174] ss:$8 sps:$4 sm:$0xff]   ;;  %v4878_v30 = vld [vmem:[%s6755_s2 + $0x370] ss:$8 sps:$4 sm:$0xff]   ;;  %v4880_v32 = vld [vmem:[%s6755_s2 + $0x384] ss:$8 sps:$4 sm:$0xff]  }
  0x11   : > { %2459 = vmatpush1.bf16.msra.mxu0 %v4849_v11  ;;  %1640 = vmatprep.subr.bf16.mxu1 %v4850_v12  ;;  %v4879_v31 = vld [vmem:[%s6755_s2 + $0x170] ss:$8 sps:$4 sm:$0xff]   ;;  %v4882_v33 = vld [vmem:[%s6755_s2 + $0x184] ss:$8 sps:$4 sm:$0xff]   ;;  %v4884_v34 = vld [vmem:[%s6755_s2 + $0x380] ss:$8 sps:$4 sm:$0xff]  }
  0x12   : > { %2460 = vmatprep.subr.bf16.mxu0 %v4852_v13  ;;  %v4885_v35 = vld [vmem:[%s6755_s2 + $0x180] ss:$8 sps:$4 sm:$0xff]   ;;  %v4886_v36 = vld [vmem:[%s6755_s2 + $0x394] ss:$8 sps:$4 sm:$0xff]   ;;  %s6763_s15 = smov (!%p259_p4, %s5372_s15), 1 }
  0x13   : > { %v4888_v37 = vld [vmem:[%s6755_s2 + $0x194] ss:$8 sps:$4 sm:$0xff]   ;;  %v4890_v38 = vld [vmem:[%s6755_s2 + $0x390] ss:$8 sps:$4 sm:$0xff]   ;;  %v4892_v40 = vld [vmem:[%s6755_s2 + $0x3a4] ss:$8 sps:$4 sm:$0xff]  }
  0x14   : > { %1641 = vmatpush1.bf16.msra.mxu1 %v4854_v14  ;;  %v4891_v39 = vld [vmem:[%s6755_s2 + $0x190] ss:$8 sps:$4 sm:$0xff]   ;;  %v4894_v41 = vld [vmem:[%s6755_s2 + $0x1a4] ss:$8 sps:$4 sm:$0xff]   ;;  %s4635_s11 = sshll.u32 %s6763_s15, 8  ;;  %s4638_s5 = sshll.u32 %s6763_s15, 6 }
  0x15   : > { %2461 = vmatpush1.bf16.msra.mxu0 %v4855_v15  ;;  %1642 = vmatprep.subr.bf16.mxu1 %v4856_v16  ;;  %v4896_v42 = vld [vmem:[%s6755_s2 + $0x3a0] ss:$8 sps:$4 sm:$0xff]   ;;  %v4898_v44 = vld [vmem:[%s6755_s2 + $0x3b4] ss:$8 sps:$4 sm:$0xff]   ;;  %s5572_s24 = scalar_lea.vmem %s6753_s0, %s4635_s11  ;;  %v4902_v46 = vld [vmem:[%s6755_s2 + $0x3b0] ss:$8 sps:$4 sm:$0xff]   ;;  %s6730_s8 = scalar_lea.vmem %s6757_s4, %s4638_s5 }
  0x16   : > { %2462 = vmatprep.subr.bf16.mxu0 %v4858_v17  ;;  %v4897_v43 = vld [vmem:[%s6755_s2 + $0x1a0] ss:$8 sps:$4 sm:$0xff]   ;;  %v4900_v45 = vld [vmem:[%s6755_s2 + $0x1b4] ss:$8 sps:$4 sm:$0xff]   ;;  %v4903_v47 = vld [vmem:[%s6755_s2 + $0x1b0] ss:$8 sps:$4 sm:$0xff]  }
  0x17   : > { %v5584_v48 = vld [vmem:[%s5572_s24 + $0x10] sm:$0xff]  ;;  %v298_v49 = vld [vmem:[%s5572_s24 + $0x18] sm:$0x11]  ;;  %v5588_v50 = vld [vmem:[%s5572_s24 + $0x20] sm:$0xff]  ;;  %s4637_s7 = sadd.s32 128, %s4635_s11 }
  0x18   : > { %1643 = vmatpush1.bf16.msra.mxu1 %v4860_v18  ;;  %v300_v51 = vld [vmem:[%s5572_s24 + $0x28] sm:$0x11]  ;;  %313 = vst [vmem:[#allocation2 + $0x10] sm:$0xff] %v5584_v48  ;;  %314 = vst [vmem:[#allocation2 + $0x18] sm:$0x11] %v298_v49  ;;  %v4138_v53 = vcombine.high %v5584_v48, %v5588_v50  ;;  %v295_v55 = vld [vmem:[%s5572_s24] sm:$0xff]  ;;  %s5806_s14 = scalar_lea.vmem %s6754_s1, %s4637_s7 }
  0x19   : > { %2463 = vmatpush1.bf16.msra.mxu0 %v4861_v19  ;;  %1644 = vmatprep.subr.bf16.mxu1 %v4862_v20  ;;  %v4904_v52 = vld [vmem:[%s6755_s2 + $0x3c4] ss:$8 sps:$4 sm:$0xff]   ;;  %315 = vst [vmem:[#allocation2 + $0x20] sm:$0xff] %v5588_v50  ;;  %316 = vst [vmem:[#allocation2 + $0x28] sm:$0x11] %v300_v51  ;;  %v5707_v51 = vld [vmem:[%s5572_s24 + $0x30] sm:$0xff] }
  0x1a   : > { %2464 = vmatprep.subr.bf16.mxu0 %v4864_v21  ;;  %v4906_v54 = vld [vmem:[%s6755_s2 + $0x1c4] ss:$8 sps:$4 sm:$0xff]   ;;  %1666 = vmatprep.mubr.bf16.mxu1 %v4138_v53  ;;  %311 = vst [vmem:[#allocation2] sm:$0xff] %v295_v55  ;;  %v4908_v57 = vld [vmem:[%s6755_s2 + $0x3c0] ss:$8 sps:$4 sm:$0xff]   ;;  %317 = vst [vmem:[#allocation2 + $0x30] sm:$0xff] %v5707_v51 }
  0x1b   : > { %v296_v56 = vld [vmem:[%s5572_s24 + $0x8] sm:$0x11]  ;;  %v4910_v59 = vld [vmem:[%s6755_s2 + $0x3d4] ss:$8 sps:$4 sm:$0xff]   ;;  %v4914_v61 = vld [vmem:[%s6755_s2 + $0x3d0] ss:$8 sps:$4 sm:$0xff]  }
  0x1c   : > { %1645 = vmatpush1.bf16.msra.mxu1 %v4866_v22  ;;  %312 = vst [vmem:[#allocation2 + $0x8] sm:$0x11] %v296_v56  ;;  %v4909_v58 = vld [vmem:[%s6755_s2 + $0x1c0] ss:$8 sps:$4 sm:$0xff]   ;;  %v4912_v60 = vld [vmem:[%s6755_s2 + $0x1d4] ss:$8 sps:$4 sm:$0xff]  }
  0x1d   : > { %2465 = vmatpush1.bf16.msra.mxu0 %v4867_v23  ;;  %1646 = vmatprep.subr.bf16.mxu1 %v4868_v24  ;;  %v4915_v63 = vld [vmem:[%s6755_s2 + $0x1d0] ss:$8 sps:$4 sm:$0xff]   ;;  %v4916_v0 = vld [vmem:[%s6755_s2 + $0x3e4] ss:$8 sps:$4 sm:$0xff]   ;;  %v4920_v5 = vld [vmem:[%s6755_s2 + $0x3e0] ss:$8 sps:$4 sm:$0xff]  }
  0x1e   : > { %2466 = vmatprep.subr.bf16.mxu0 %v4870_v25  ;;  %v4918_v1 = vld [vmem:[%s6755_s2 + $0x1e4] ss:$8 sps:$4 sm:$0xff]   ;;  %v4921_v6 = vld [vmem:[%s6755_s2 + $0x1e0] ss:$8 sps:$4 sm:$0xff]   ;;  %v4922_v11 = vld [vmem:[%s6755_s2 + $0x3f4] ss:$8 sps:$4 sm:$0xff]  }
  0x1f   : > { %v5618_v62 = vld [vmem:[#allocation2 + $0x18] sm:$0x11] }
  0x20   : > { %1647 = vmatpush1.bf16.msra.mxu1 %v4872_v26  ;;  %v3980_v3 = vcombine.high %v5584_v48, %v5618_v62  ;;  %v3979_v4 = vcombine.low %v5584_v48, %v5618_v62  ;;  %v4924_v14 = vld [vmem:[%s6755_s2 + $0x1f4] ss:$8 sps:$4 sm:$0xff]   ;;  %v4926_v23 = vld [vmem:[%s6755_s2 + $0x3f0] ss:$8 sps:$4 sm:$0xff]  }
  0x21   : > { %2467 = vmatpush1.bf16.msra.mxu0 %v4873_v27  ;;  %1648 = vmatprep.subr.bf16.mxu1 %v4874_v28  ;;  %v4927_v24 = vld [vmem:[%s6755_s2 + $0x1f0] ss:$8 sps:$4 sm:$0xff]   ;;  %v4931_v27 = vld [vmem:[%s6755_s2 + $0x404] ss:$8 sps:$4 sm:$0xff]  }
  0x22   : > { %2468 = vmatprep.subr.bf16.mxu0 %v4876_v29  ;;  %v446_v8 = vshrl.u32 %v3980_v3, 16  ;;  %v448_v9 = vshll.u32 %v3980_v3, 16  ;;  %v439_v12 = vshrl.u32 %v3979_v4, 16  ;;  %v441_v13 = vshll.u32 %v3979_v4, 16  ;;  %v4934_v29 = vld [vmem:[%s6755_s2 + $0x204] ss:$8 sps:$4 sm:$0xff]  }
  0x23   : > { %v5629_v2 = vld [vmem:[#allocation2 + $0x8] sm:$0x11]  ;;  %v4948_v49 = vld [vmem:[%s6755_s2 + $0x430] ss:$8 sps:$4 sm:$0xff]  }
  0x24   : > { %1649 = vmatpush1.bf16.msra.mxu1 %v4878_v30  ;;  %v3978_v7 = vcombine.high %v295_v55, %v5629_v2  ;;  %v3977_v10 = vcombine.low %v295_v55, %v5629_v2  ;;  %v450_v17 = vrot.slane %v448_v9, 1  ;;  %v443_v20 = vrot.slane %v441_v13, 1  ;;  %v4951_v55 = vld [vmem:[%s6755_s2 + $0x230] ss:$8 sps:$4 sm:$0xff]   ;;  %v5772_v13 = vld [vmem:[%s5572_s24 + $0x60] sm:$0xff] }
  0x25   : > { %2469 = vmatpush1.bf16.msra.mxu0 %v4879_v31  ;;  %1650 = vmatprep.subr.bf16.mxu1 %v4880_v32  ;;  %v4929_v31 = vld [vmem:[%s6755_s2 + $0x400] ss:$8 sps:$4 sm:$0xff]   ;;  %v4960_v9 = vld [vmem:[%s6755_s2 + $0x450] ss:$8 sps:$4 sm:$0xff]   ;;  %323 = vst [vmem:[#allocation2 + $0x60] sm:$0xff] %v5772_v13 }
  0x26   : > { %2470 = vmatprep.subr.bf16.mxu0 %v4882_v33  ;;  %v432_v15 = vshrl.u32 %v3978_v7, 16  ;;  %v434_v16 = vshll.u32 %v3978_v7, 16  ;;  %v425_v18 = vshrl.u32 %v3977_v10, 16  ;;  %v427_v19 = vshll.u32 %v3977_v10, 16  ;;  %v4965_v7 = vld [vmem:[%s6755_s2 + $0x254] ss:$8 sps:$4 sm:$0xff]  }
  0x27   : > { %v451_v22 = vor.u32 %v450_v17, %v446_v8  ;;  %v444_v26 = vor.u32 %v443_v20, %v439_v12  ;;  %v4137_v33 = vcombine.low %v5584_v48, %v5588_v50  ;;  %v4963_v10 = vld [vmem:[%s6755_s2 + $0x250] ss:$8 sps:$4 sm:$0xff]  }
  0x28   : > { %1651 = vmatpush1.bf16.msra.mxu1 %v4884_v34  ;;  %v436_v21 = vrot.slane %v434_v16, 1  ;;  %v429_v25 = vrot.slane %v427_v19, 1  ;;  %v4932_v34 = vld [vmem:[%s6755_s2 + $0x200] ss:$8 sps:$4 sm:$0xff]   ;;  %v5769_v12 = vld [vmem:[%s5572_s24 + $0x50] sm:$0xff] }
  0x29   : > { %2471 = vmatpush1.bf16.msra.mxu0 %v4885_v35  ;;  %1652 = vmatprep.subr.bf16.mxu1 %v4886_v36  ;;  %v4938_v36 = vld [vmem:[%s6755_s2 + $0x414] ss:$8 sps:$4 sm:$0xff]   ;;  %v4968_v16 = vld [vmem:[%s6755_s2 + $0x464] ss:$8 sps:$4 sm:$0xff]   ;;  %321 = vst [vmem:[#allocation2 + $0x50] sm:$0xff] %v5769_v12  ;;  %v4150_v17 = vcombine.high %v5769_v12, %v5772_v13 }
  0x2a   : > { %2472 = vmatprep.subr.bf16.mxu0 %v4888_v37  ;;  %v437_v28 = vor.u32 %v436_v21, %v432_v15  ;;  %v430_v30 = vor.u32 %v429_v25, %v425_v18  ;;  %v4941_v37 = vld [vmem:[%s6755_s2 + $0x214] ss:$8 sps:$4 sm:$0xff]   ;;  %v4149_v18 = vcombine.low %v5769_v12, %v5772_v13 }
  0x2c   : > { %1653 = vmatpush1.bf16.msra.mxu1 %v4890_v38  ;;  %v4260_v32 = vcombine.low %v437_v28, %v451_v22  ;;  %v4259_v35 = vcombine.low %v430_v30, %v444_v26  ;;  %v4936_v38 = vld [vmem:[%s6755_s2 + $0x410] ss:$8 sps:$4 sm:$0xff]   ;;  %v304_v22 = vld [vmem:[%s5572_s24 + $0x48] sm:$0x11] }
  0x2d   : > { %2473 = vmatpush1.bf16.msra.mxu0 %v4891_v39  ;;  %1654 = vmatprep.subr.bf16.mxu1 %v4892_v40  ;;  %v4939_v39 = vld [vmem:[%s6755_s2 + $0x210] ss:$8 sps:$4 sm:$0xff]   ;;  %v4944_v40 = vld [vmem:[%s6755_s2 + $0x424] ss:$8 sps:$4 sm:$0xff]   ;;  %320 = vst [vmem:[#allocation2 + $0x48] sm:$0x11] %v304_v22 }
  0x2e   : > { %2474 = vmatprep.subr.bf16.mxu0 %v4894_v41  ;;  %2486 = vmatprep.mubr.bf16.mxu0 %v4260_v32  ;;  %v4947_v41 = vld [vmem:[%s6755_s2 + $0x224] ss:$8 sps:$4 sm:$0xff]  }
  0x30   : > { %1655 = vmatpush1.bf16.msra.mxu1 %v4896_v42  ;;  %v4942_v42 = vld [vmem:[%s6755_s2 + $0x420] ss:$8 sps:$4 sm:$0xff]  }
  0x31   : > { %2475 = vmatpush1.bf16.msra.mxu0 %v4897_v43  ;;  %1656 = vmatprep.subr.bf16.mxu1 %v4898_v44  ;;  %v5690_v43 = vld [vmem:[#allocation2 + $0x18] sm:$0x11]  ;;  %v5692_v44 = vld [vmem:[#allocation2 + $0x28] sm:$0x11] }
  0x32   : > { %2476 = vmatprep.subr.bf16.mxu0 %v4900_v45  ;;  %v4945_v45 = vld [vmem:[%s6755_s2 + $0x220] ss:$8 sps:$4 sm:$0xff]   ;;  %v5714_v53 = vcombine.high %v5584_v48, %v5690_v43 }
  0x34   : > { %1657 = vmatpush1.bf16.msra.mxu1 %v4902_v46  ;;  %v4950_v46 = vld [vmem:[%s6755_s2 + $0x434] ss:$8 sps:$4 sm:$0xff]   ;;  %v819_v3 = vshll.u32 %v5714_v53, 16 }
  0x35   : > { %2477 = vmatpush1.bf16.msra.mxu0 %v4903_v47  ;;  %1658 = vmatprep.subr.bf16.mxu1 %v4904_v52  ;;  %v4953_v47 = vld [vmem:[%s6755_s2 + $0x234] ss:$8 sps:$4 sm:$0xff]   ;;  %v5710_v52 = vld [vmem:[%s5572_s24 + $0x40] sm:$0xff] }
  0x36   : > { %2478 = vmatprep.subr.bf16.mxu0 %v4906_v54  ;;  %v5718_v54 = vcombine.high %v5588_v50, %v5692_v44  ;;  %319 = vst [vmem:[#allocation2 + $0x40] sm:$0xff] %v5710_v52  ;;  %v4144_v56 = vcombine.high %v5707_v51, %v5710_v52  ;;  %v821_v19 = vrot.slane %v819_v3, 1 }
  0x38   : > { %1659 = vmatpush1.bf16.msra.mxu1 %v4908_v57  ;;  %v4143_v57 = vcombine.low %v5707_v51, %v5710_v52  ;;  %v833_v4 = vshll.u32 %v5718_v54, 16  ;;  %v831_v15 = vshrl.u32 %v5718_v54, 16  ;;  %v5827_v54 = vld [vmem:[%s5806_s14] sm:$0xff] }
  0x39   : > { %2479 = vmatpush1.bf16.msra.mxu0 %v4909_v58  ;;  %1660 = vmatprep.subr.bf16.mxu1 %v4910_v59  ;;  %v4956_v58 = vld [vmem:[%s6755_s2 + $0x444] ss:$8 sps:$4 sm:$0xff]   ;;  %v302_v59 = vld [vmem:[%s5572_s24 + $0x38] sm:$0x11]  ;;  %332 = vst [vmem:[#allocation2 + $0x80] sm:$0xff] %v5827_v54 }
  0x3a   : > { %2480 = vmatprep.subr.bf16.mxu0 %v4912_v60  ;;  %v5733_v60 = vld [vmem:[#allocation2 + $0x28] sm:$0x11]  ;;  %318 = vst [vmem:[#allocation2 + $0x38] sm:$0x11] %v302_v59  ;;  %v835_v20 = vrot.slane %v833_v4, 1 }
  0x3c   : > { %1661 = vmatpush1.bf16.msra.mxu1 %v4914_v61  ;;  %v4959_v61 = vld [vmem:[%s6755_s2 + $0x244] ss:$8 sps:$4 sm:$0xff]  }
  0x3d   : > { %2481 = vmatpush1.bf16.msra.mxu0 %v4915_v63  ;;  %1662 = vmatprep.subr.bf16.mxu1 %v4916_v0  ;;  %v5740_v63 = vcombine.high %v5588_v50, %v5733_v60  ;;  %v5744_v0 = vcombine.low %v5588_v50, %v5733_v60 }
  0x3e   : > { %2482 = vmatprep.subr.bf16.mxu0 %v4918_v1  ;;  %v4954_v1 = vld [vmem:[%s6755_s2 + $0x440] ss:$8 sps:$4 sm:$0xff]  }
  0x3f   : > { %v462_v8 = vshll.u32 %v5740_v63, 16  ;;  %v460_v26 = vshrl.u32 %v5740_v63, 16  ;;  %v5841_v63 = vld [vmem:[#allocation2 + $0x48] sm:$0x11] }
  0x40   : > { %1663 = vmatpush1.bf16.msra.mxu1 %v4920_v5  ;;  %v4957_v5 = vld [vmem:[%s6755_s2 + $0x240] ss:$8 sps:$4 sm:$0xff]   ;;  %v3986_v4 = vcombine.high %v5710_v52, %v5841_v63 }
  0x41   : > { %2483 = vmatpush1.bf16.msra.mxu0 %v4921_v6  ;;  %1664 = vmatprep.subr.bf16.mxu1 %v4922_v11  ;;  %v4962_v6 = vld [vmem:[%s6755_s2 + $0x454] ss:$8 sps:$4 sm:$0xff]   ;;  %v455_v11 = vshll.u32 %v5744_v0, 16 }
  0x42   : > { %2484 = vmatprep.subr.bf16.mxu0 %v4924_v14  ;;  %v817_v14 = vshrl.u32 %v5714_v53, 16  ;;  %v5787_v21 = vld [vmem:[#allocation2 + $0x38] sm:$0x11]  ;;  %v5824_v53 = vld [vmem:[%s5572_s24 + $0x70] sm:$0xff] }
  0x43   : > { %v3984_v25 = vcombine.high %v5707_v51, %v5787_v21  ;;  %v3983_v28 = vcombine.low %v5707_v51, %v5787_v21  ;;  %v457_v30 = vrot.slane %v455_v11, 1  ;;  %325 = vst [vmem:[#allocation2 + $0x70] sm:$0xff] %v5824_v53  ;;  %v4156_v59 = vcombine.high %v5824_v53, %v5827_v54 }
  0x44   : > { %1665 = vmatpush1.bf16.msra.mxu1 %v4926_v23  ;;  %v306_v23 = vld [vmem:[%s5572_s24 + $0x58] sm:$0x11] }
  0x45   : > { %2485 = vmatpush1.bf16.msra.mxu0 %v4927_v24  ;;  %1707 = vmatprep.subr.bf16.mxu1 %v4931_v27  ;;  %v4971_v24 = vld [vmem:[%s6755_s2 + $0x264] ss:$8 sps:$4 sm:$0xff]   ;;  %v464_v27 = vrot.slane %v462_v8, 1  ;;  %322 = vst [vmem:[#allocation2 + $0x58] sm:$0x11] %v306_v23  ;;  %v474_v32 = vshrl.u32 %v3984_v25, 16 }
  0x46   : > { %2527 = vmatprep.subr.bf16.mxu0 %v4934_v29  ;;  %v453_v29 = vshrl.u32 %v5744_v0, 16  ;;  %v4989_v23 = vld [vmem:[%s6755_s2 + $0x294] ss:$8 sps:$4 sm:$0xff]  }
  0x47   : > { %1667 = vmatmul.mubr.bf16.vlgmr.msra.gmra.mrb[0].mxu1 %v4137_v33  ;;  %v476_v33 = vshll.u32 %v3984_v25, 16 }
  0x48   : > { %2487 = vmatmul.mubr.bf16.vlgmr.msra.gmra.mrb[0].mxu0 %v4259_v35  ;;  %1708 = vmatpush1.bf16.msra.mxu1 %v4929_v31  ;;  %v4966_v31 = vld [vmem:[%s6755_s2 + $0x460] ss:$8 sps:$4 sm:$0xff]   ;;  %v469_v35 = vshll.u32 %v3983_v28, 16 }
  0x49   : > { %2528 = vmatpush1.bf16.msra.mxu0 %v4932_v34  ;;  %1709 = vmatprep.subr.bf16.mxu1 %v4938_v36  ;;  %v467_v34 = vshrl.u32 %v3983_v28, 16  ;;  %v4969_v36 = vld [vmem:[%s6755_s2 + $0x260] ss:$8 sps:$4 sm:$0xff]  }
  0x4a   : > { %2529 = vmatprep.subr.bf16.mxu0 %v4941_v37  ;;  %1676 = vmatprep.mubr.bf16.mxu1 %v4144_v56  ;;  %v822_v37 = vor.u32 %v821_v19, %v817_v14  ;;  %v4983_v56 = vld [vmem:[%s6755_s2 + $0x284] ss:$8 sps:$4 sm:$0xff]   ;;  %v4981_v14 = vld [vmem:[%s6755_s2 + $0x280] ss:$8 sps:$4 sm:$0xff]  }
  0x4c   : > { %1710 = vmatpush1.bf16.msra.mxu1 %v4936_v38  ;;  %v4974_v38 = vld [vmem:[%s6755_s2 + $0x474] ss:$8 sps:$4 sm:$0xff]  }
  0x4d   : > { %2530 = vmatpush1.bf16.msra.mxu0 %v4939_v39  ;;  %1711 = vmatprep.subr.bf16.mxu1 %v4944_v40  ;;  %v4977_v39 = vld [vmem:[%s6755_s2 + $0x274] ss:$8 sps:$4 sm:$0xff]   ;;  %v465_v40 = vor.u32 %v464_v27, %v460_v26 }
  0x4e   : > { %2531 = vmatprep.subr.bf16.mxu0 %v4947_v41  ;;  %v478_v41 = vrot.slane %v476_v33, 1  ;;  %v5843_v0 = vld [vmem:[#allocation2 + $0x58] sm:$0x11]  ;;  %v4993_v33 = vld [vmem:[%s6755_s2 + $0x4a4] ss:$8 sps:$4 sm:$0xff]  }
  0x4f   : > { %1677 = vmatmul.mubr.bf16.gmra.mrb[4].mxu1 %v4143_v57  ;;  %v3987_v11 = vcombine.low %v5769_v12, %v5843_v0 }
  0x50   : > { %1712 = vmatpush1.bf16.msra.mxu1 %v4942_v42  ;;  %1686 = vmatprep.mubr.bf16.mxu1 %v4150_v17  ;;  %v471_v42 = vrot.slane %v469_v35, 1  ;;  %v479_v57 = vor.u32 %v478_v41, %v474_v32  ;;  %v4986_v17 = vld [vmem:[%s6755_s2 + $0x494] ss:$8 sps:$4 sm:$0xff]  }
  0x51   : > { %2532 = vmatpush1.bf16.msra.mxu0 %v4945_v45  ;;  %1713 = vmatprep.subr.bf16.mxu1 %v4950_v46  ;;  %v836_v45 = vor.u32 %v835_v20, %v831_v15  ;;  %v4972_v46 = vld [vmem:[%s6755_s2 + $0x470] ss:$8 sps:$4 sm:$0xff]   ;;  %v488_v15 = vshrl.u32 %v3986_v4, 16  ;;  %v495_v25 = vshrl.u32 %v3987_v11, 16  ;;  %v497_v26 = vshll.u32 %v3987_v11, 16 }
  0x52   : > { %2533 = vmatprep.subr.bf16.mxu0 %v4953_v47  ;;  %v4975_v47 = vld [vmem:[%s6755_s2 + $0x270] ss:$8 sps:$4 sm:$0xff]   ;;  %v4266_v3 = vcombine.low %v465_v40, %v479_v57  ;;  %v4994_v57 = vld [vmem:[%s6755_s2 + $0x2a0] ss:$8 sps:$4 sm:$0xff]  }
  0x53   : > { %v499_v32 = vrot.slane %v497_v26, 1  ;;  %v5010_v26 = vld [vmem:[%s6755_s2 + $0x2c4] ss:$8 sps:$4 sm:$0xff]  }
  0x54   : > { %1714 = vmatpush1.bf16.msra.mxu1 %v4948_v49  ;;  %v458_v49 = vor.u32 %v457_v30, %v453_v29  ;;  %2496 = vmatprep.mubr.bf16.mxu0 %v4266_v3  ;;  %v4984_v29 = vld [vmem:[%s6755_s2 + $0x490] ss:$8 sps:$4 sm:$0xff]   ;;  %v5000_v3 = vld [vmem:[%s6755_s2 + $0x4b4] ss:$8 sps:$4 sm:$0xff]  }
  0x55   : > { %2534 = vmatpush1.bf16.msra.mxu0 %v4951_v55  ;;  %1715 = vmatprep.subr.bf16.mxu1 %v4956_v58  ;;  %v4980_v55 = vld [vmem:[%s6755_s2 + $0x484] ss:$8 sps:$4 sm:$0xff]   ;;  %v472_v58 = vor.u32 %v471_v42, %v467_v34  ;;  %v4987_v30 = vld [vmem:[%s6755_s2 + $0x290] ss:$8 sps:$4 sm:$0xff]  }
  0x56   : > { %2535 = vmatprep.subr.bf16.mxu0 %v4959_v61  ;;  %v4155_v61 = vcombine.low %v5824_v53, %v5827_v54 }
  0x57   : > { %1687 = vmatmul.mubr.bf16.gmra.mrb[8].mxu1 %v4149_v18  ;;  %v4265_v8 = vcombine.low %v458_v49, %v472_v58 }
  0x58   : > { %1716 = vmatpush1.bf16.msra.mxu1 %v4954_v1  ;;  %v308_v1 = vld [vmem:[%s5572_s24 + $0x68] sm:$0x11]  ;;  %1696 = vmatprep.mubr.bf16.mxu1 %v4156_v59 }
  0x59   : > { %2536 = vmatpush1.bf16.msra.mxu0 %v4957_v5  ;;  %1717 = vmatprep.subr.bf16.mxu1 %v4962_v6  ;;  %v310_v5 = vld [vmem:[%s5572_s24 + $0x78] sm:$0x11]  ;;  %324 = vst [vmem:[#allocation2 + $0x68] sm:$0x11] %v308_v1  ;;  %v4140_v6 = vcombine.low %v822_v37, %v836_v45  ;;  %v352_v37 = vld [vmem:[#allocation2] sm:$0xee] }
  0x5a   : > { %2537 = vmatprep.subr.bf16.mxu0 %v4965_v7  ;;  %v4978_v7 = vld [vmem:[%s6755_s2 + $0x480] ss:$8 sps:$4 sm:$0xff]   ;;  %326 = vst [vmem:[#allocation2 + $0x78] sm:$0x11] %v310_v5  ;;  %2497 = vmatmul.mubr.bf16.gmra.mrb[4].mxu0 %v4265_v8  ;;  %v5003_v8 = vld [vmem:[%s6755_s2 + $0x2b4] ss:$8 sps:$4 sm:$0xff]   ;;  %v3994_v11 = vcombine.high %v352_v37, %v5629_v2 }
  0x5b   : > { %v4991_v45 = vld [vmem:[%s6755_s2 + $0x4a0] ss:$8 sps:$4 sm:$0xff]  }
  0x5c   : > { %1718 = vmatpush1.bf16.msra.mxu1 %v4960_v9  ;;  %v3988_v9 = vcombine.high %v5769_v12, %v5843_v0 }
  0x5d   : > { %2538 = vmatpush1.bf16.msra.mxu0 %v4963_v10  ;;  %1719 = vmatprep.subr.bf16.mxu1 %v4968_v16  ;;  %v3985_v10 = vcombine.low %v5710_v52, %v5841_v63  ;;  %v490_v16 = vshll.u32 %v3986_v4, 16 }
  0x5e   : > { %2539 = vmatprep.subr.bf16.mxu0 %v4971_v24  ;;  %v502_v18 = vshrl.u32 %v3988_v9, 16  ;;  %v504_v19 = vshll.u32 %v3988_v9, 16 }
  0x5f   : > { %1697 = vmatmul.mubr.bf16.gmra.mrb[12].mxu1 %v4155_v61  ;;  %v481_v20 = vshrl.u32 %v3985_v10, 16  ;;  %v483_v22 = vshll.u32 %v3985_v10, 16  ;;  %v492_v24 = vrot.slane %v490_v16, 1 }
  0x60   : > { %1720 = vmatpush1.bf16.msra.mxu1 %v4966_v31  ;;  %v506_v27 = vrot.slane %v504_v19, 1  ;;  %1739 = vmatprep.mubr.bf16.mxu1 %v4140_v6  ;;  %v4998_v19 = vld [vmem:[%s6755_s2 + $0x4b0] ss:$8 sps:$4 sm:$0xff]  }
  0x61   : > { %2540 = vmatpush1.bf16.msra.mxu0 %v4969_v36  ;;  %1721 = vmatprep.subr.bf16.mxu1 %v4974_v38  ;;  %v485_v28 = vrot.slane %v483_v22, 1  ;;  %v493_v31 = vor.u32 %v492_v24, %v488_v15  ;;  %v5876_v36 = vld [vmem:[#allocation2 + $0x68] sm:$0x11]  ;;  %v5881_v40 = vld [vmem:[#allocation2 + $0x78] sm:$0x11] }
  0x62   : > { %2541 = vmatprep.subr.bf16.mxu0 %v4977_v39  ;;  %v507_v34 = vor.u32 %v506_v27, %v502_v18  ;;  %v4996_v38 = vld [vmem:[%s6755_s2 + $0x2a4] ss:$8 sps:$4 sm:$0xff]   ;;  %v500_v39 = vor.u32 %v499_v32, %v495_v25  ;;  %v3990_v41 = vcombine.high %v5772_v13, %v5876_v36  ;;  %v3989_v42 = vcombine.low %v5772_v13, %v5876_v36 }
  0x63   : > { %v486_v35 = vor.u32 %v485_v28, %v481_v20  ;;  %v3991_v49 = vcombine.low %v5824_v53, %v5881_v40 }
  0x64   : > { %1722 = vmatpush1.bf16.msra.mxu1 %v4972_v46  ;;  %v4272_v46 = vcombine.low %v493_v31, %v507_v34  ;;  %v516_v59 = vshrl.u32 %v3990_v41, 16  ;;  %v518_v61 = vshll.u32 %v3990_v41, 16  ;;  %v509_v1 = vshrl.u32 %v3989_v42, 16  ;;  %v5005_v34 = vld [vmem:[%s6755_s2 + $0x4c0] ss:$8 sps:$4 sm:$0xff]  }
  0x65   : > { %2542 = vmatpush1.bf16.msra.mxu0 %v4975_v47  ;;  %1723 = vmatprep.subr.bf16.mxu1 %v4980_v55  ;;  %v3992_v47 = vcombine.high %v5824_v53, %v5881_v40  ;;  %v353_v55 = vld [vmem:[#allocation2 + $0x10] sm:$0xee]  ;;  %v4271_v58 = vcombine.low %v486_v35, %v500_v39  ;;  %v511_v6 = vshll.u32 %v3989_v42, 16  ;;  %v525_v10 = vshll.u32 %v3991_v49, 16  ;;  %v5008_v35 = vld [vmem:[%s6755_s2 + $0x2c0] ss:$8 sps:$4 sm:$0xff]  }
  0x66   : > { %2543 = vmatprep.subr.bf16.mxu0 %v4983_v56  ;;  %v3993_v56 = vcombine.low %v352_v37, %v5629_v2  ;;  %v520_v9 = vrot.slane %v518_v61, 1  ;;  %2506 = vmatprep.mubr.bf16.mxu0 %v4272_v46  ;;  %v5001_v2 = vld [vmem:[%s6755_s2 + $0x2b0] ss:$8 sps:$4 sm:$0xff]   ;;  %v577_v31 = vrot.slane %v3994_v11, 1  ;;  %v5020_v42 = vld [vmem:[%s6755_s2 + $0x4e4] ss:$8 sps:$4 sm:$0xff]  }
  0x67   : > { %v530_v4 = vshrl.u32 %v3992_v47, 16  ;;  %v532_v5 = vshll.u32 %v3992_v47, 16  ;;  %v513_v16 = vrot.slane %v511_v6, 1  ;;  %2507 = vmatmul.mubr.bf16.gmra.mrb[8].mxu0 %v4271_v58  ;;  %v527_v22 = vrot.slane %v525_v10, 1  ;;  %v5012_v39 = vld [vmem:[%s6755_s2 + $0x4d0] ss:$8 sps:$4 sm:$0xff]  }
  0x68   : > { %1724 = vmatpush1.bf16.msra.mxu1 %v4978_v7  ;;  %v523_v7 = vshrl.u32 %v3991_v49, 16  ;;  %v5907_v18 = vrot.slane %v3993_v56, 1  ;;  %v521_v20 = vor.u32 %v520_v9, %v516_v59  ;;  %v5015_v41 = vld [vmem:[%s6755_s2 + $0x2d0] ss:$8 sps:$4 sm:$0xff]   ;;  %v5018_v56 = vld [vmem:[%s6755_s2 + $0x4e0] ss:$8 sps:$4 sm:$0xff]  }
  0x69   : > { %2544 = vmatpush1.bf16.msra.mxu0 %v4981_v14  ;;  %1725 = vmatprep.subr.bf16.mxu1 %v4986_v17  ;;  %v3995_v14 = vcombine.low %v353_v55, %v5618_v62  ;;  %v534_v15 = vrot.slane %v532_v5, 1  ;;  %v3996_v17 = vcombine.high %v353_v55, %v5618_v62  ;;  %v5007_v62 = vld [vmem:[%s6755_s2 + $0x4c4] ss:$8 sps:$4 sm:$0xff]   ;;  %v514_v25 = vor.u32 %v513_v16, %v509_v1  ;;  %v5026_v58 = vld [vmem:[%s6755_s2 + $0x4f4] ss:$8 sps:$4 sm:$0xff]  }
  0x6a   : > { %2545 = vmatprep.subr.bf16.mxu0 %v4989_v23  ;;  %v528_v27 = vor.u32 %v527_v22, %v523_v7  ;;  %v5029_v59 = vld [vmem:[%s6755_s2 + $0x2f4] ss:$8 sps:$4 sm:$0xff]   ;;  %v5032_v5 = vld [vmem:[%s6755_s2 + $0x504] ss:$8 sps:$4 sm:$0xff]   ;;  %v5030_v7 = vld [vmem:[%s6755_s2 + $0x500] ss:$8 sps:$4 sm:$0xff]  }
  0x6b   : > { %v5912_v23 = vrot.slane %v3995_v14, 1  ;;  %v535_v24 = vor.u32 %v534_v15, %v530_v4  ;;  %v579_v32 = vrot.slane %v3996_v17, 1  ;;  %v5027_v4 = vld [vmem:[%s6755_s2 + $0x2f0] ss:$8 sps:$4 sm:$0xff]   ;;  %v5039_v6 = vld [vmem:[%s6755_s2 + $0x604] ss:$8 sps:$4 sm:$0xff]  }
  0x6c   : > { %1726 = vmatpush1.bf16.msra.mxu1 %v4984_v29  ;;  %v4009_v29 = vcombine.low %v5584_v48, %v5690_v43  ;;  %v4277_v37 = vcombine.low %v514_v25, %v528_v27  ;;  %v5014_v48 = vld [vmem:[%s6755_s2 + $0x4d4] ss:$8 sps:$4 sm:$0xff]   ;;  %v5985_v11 = vld [vmem:[#allocation2 + $0x48] sm:$0x11]  ;;  %v5043_v22 = vld [vmem:[%s6755_s2 + $0x610] ss:$8 sps:$4 sm:$0xff]  }
  0x6d   : > { %2546 = vmatpush1.bf16.msra.mxu0 %v4987_v30  ;;  %1727 = vmatprep.subr.bf16.mxu1 %v4993_v33  ;;  %v4261_v28 = vcombine.low %v5907_v18, %v5912_v23  ;;  %v4278_v30 = vcombine.low %v521_v20, %v535_v24  ;;  %v4011_v33 = vcombine.low %v5588_v50, %v5692_v44  ;;  %v5017_v50 = vld [vmem:[%s6755_s2 + $0x2d4] ss:$8 sps:$4 sm:$0xff]   ;;  %v5040_v20 = vld [vmem:[%s6755_s2 + $0x510] ss:$8 sps:$4 sm:$0xff]  }
  0x6e   : > { %2547 = vmatprep.subr.bf16.mxu0 %v4996_v38  ;;  %v812_v43 = vshll.u32 %v4009_v29, 16  ;;  %v4262_v44 = vcombine.low %v577_v31, %v579_v32  ;;  %v810_v46 = vshrl.u32 %v4009_v29, 16  ;;  %v5983_v10 = vld [vmem:[#allocation2 + $0x38] sm:$0x11]  ;;  %v4016_v17 = vcombine.high %v5710_v52, %v5985_v11  ;;  %v5048_v29 = vld [vmem:[%s6755_s2 + $0x524] ss:$8 sps:$4 sm:$0xff]  }
  0x6f   : > { %2516 = vmatprep.mubr.bf16.mxu0 %v4278_v30  ;;  %v826_v38 = vshll.u32 %v4011_v33, 16  ;;  %v824_v49 = vshrl.u32 %v4011_v33, 16  ;;  %v5042_v14 = vld [vmem:[%s6755_s2 + $0x514] ss:$8 sps:$4 sm:$0xff]   ;;  %v4014_v16 = vcombine.high %v5707_v51, %v5983_v10  ;;  %v4015_v24 = vcombine.low %v5710_v52, %v5985_v11  ;;  %v5051_v30 = vld [vmem:[%s6755_s2 + $0x624] ss:$8 sps:$4 sm:$0xff]  }
  0x70   : > { %1728 = vmatpush1.bf16.msra.mxu1 %v4991_v45  ;;  %2517 = vmatmul.mubr.bf16.gmra.mrb[12].mxu0 %v4277_v37  ;;  %v5023_v45 = vld [vmem:[%s6755_s2 + $0x2e4] ss:$8 sps:$4 sm:$0xff]   ;;  %v814_v47 = vrot.slane %v812_v43, 1  ;;  %v5045_v15 = vld [vmem:[%s6755_s2 + $0x614] ss:$8 sps:$4 sm:$0xff]   ;;  %v861_v27 = vshll.u32 %v4016_v17, 16 }
  0x71   : > { %2548 = vmatpush1.bf16.msra.mxu0 %v4994_v57  ;;  %1729 = vmatprep.subr.bf16.mxu1 %v5000_v3  ;;  %v828_v55 = vrot.slane %v826_v38, 1  ;;  %v5021_v57 = vld [vmem:[%s6755_s2 + $0x2e0] ss:$8 sps:$4 sm:$0xff]   ;;  %v5024_v3 = vld [vmem:[%s6755_s2 + $0x4f0] ss:$8 sps:$4 sm:$0xff]   ;;  %v845_v25 = vshrl.u32 %v4014_v16, 16 }
  0x72   : > { %2549 = vmatprep.subr.bf16.mxu0 %v5003_v8  ;;  %2559 = vmatprep.mubr.bf16.mxu0 %v4262_v44  ;;  %v815_v61 = vor.u32 %v814_v47, %v810_v46  ;;  %v5037_v8 = vld [vmem:[%s6755_s2 + $0x600] ss:$8 sps:$4 sm:$0xff]   ;;  %v863_v32 = vrot.slane %v861_v27, 1  ;;  %v852_v33 = vshrl.u32 %v4015_v24, 16 }
  0x73   : > { %v829_v1 = vor.u32 %v828_v55, %v824_v49  ;;  %v5046_v43 = vld [vmem:[%s6755_s2 + $0x520] ss:$8 sps:$4 sm:$0xff]   ;;  %v6029_v49 = vld [vmem:[#allocation2 + $0x58] sm:$0x11] }
  0x74   : > { %1730 = vmatpush1.bf16.msra.mxu1 %v4998_v19  ;;  %v4013_v19 = vcombine.low %v5707_v51, %v5983_v10  ;;  %v847_v51 = vshll.u32 %v4014_v16, 16  ;;  %v5049_v44 = vld [vmem:[%s6755_s2 + $0x620] ss:$8 sps:$4 sm:$0xff]   ;;  %v5057_v55 = vld [vmem:[%s6755_s2 + $0x634] ss:$8 sps:$4 sm:$0xff]  }
  0x75   : > { %2550 = vmatpush1.bf16.msra.mxu0 %v5001_v2  ;;  %1731 = vmatprep.subr.bf16.mxu1 %v5007_v62  ;;  %v4139_v9 = vcombine.low %v815_v61, %v829_v1  ;;  %v354_v2 = vld [vmem:[#allocation2 + $0x20] sm:$0xee]  ;;  %v355_v62 = vld [vmem:[#allocation2 + $0x30] sm:$0xee] }
  0x76   : > { %2551 = vmatprep.subr.bf16.mxu0 %v5010_v26  ;;  %v859_v26 = vshrl.u32 %v4016_v17, 16  ;;  %v3998_v52 = vcombine.high %v354_v2, %v5733_v60  ;;  %v4000_v31 = vcombine.high %v355_v62, %v5787_v21  ;;  %v838_v18 = vshrl.u32 %v4013_v19, 16  ;;  %v5052_v61 = vld [vmem:[%s6755_s2 + $0x530] ss:$8 sps:$4 sm:$0xff]   ;;  %v5060_v16 = vld [vmem:[%s6755_s2 + $0x544] ss:$8 sps:$4 sm:$0xff]  }
  0x77   : > { %v840_v23 = vshll.u32 %v4013_v19, 16 }
  0x78   : > { %1732 = vmatpush1.bf16.msra.mxu1 %v5005_v34  ;;  %v854_v34 = vshll.u32 %v4015_v24, 16  ;;  %v583_v37 = vrot.slane %v4000_v31, 1 }
  0x79   : > { %2552 = vmatpush1.bf16.msra.mxu0 %v5008_v35  ;;  %1733 = vmatprep.subr.bf16.mxu1 %v5014_v48  ;;  %v581_v35 = vrot.slane %v3998_v52, 1  ;;  %v842_v48 = vrot.slane %v840_v23, 1  ;;  %v5066_v52 = vld [vmem:[%s6755_s2 + $0x554] ss:$8 sps:$4 sm:$0xff]  }
  0x7a   : > { %2553 = vmatprep.subr.bf16.mxu0 %v5017_v50  ;;  %v3997_v50 = vcombine.low %v354_v2, %v5733_v60 }
  0x7b   : > { %v4268_v60 = vcombine.low %v581_v35, %v583_v37  ;;  %v843_v46 = vor.u32 %v842_v48, %v838_v18  ;;  %v328_v35 = vld [vmem:[%s5806_s14 + $0x8] sm:$0x11]  ;;  %v6070_v37 = vld [vmem:[#allocation2 + $0x78] sm:$0x11] }
  0x7c   : > { %1734 = vmatpush1.bf16.msra.mxu1 %v5012_v39  ;;  %v864_v39 = vor.u32 %v863_v32, %v859_v26  ;;  %v580_v47 = vrot.slane %v3997_v50, 1  ;;  %v5069_v48 = vld [vmem:[%s6755_s2 + $0x654] ss:$8 sps:$4 sm:$0xff]   ;;  %333 = vst [vmem:[#allocation2 + $0x88] sm:$0x11] %v328_v35 }
  0x7d   : > { %2554 = vmatpush1.bf16.msra.mxu0 %v5015_v41  ;;  %1735 = vmatprep.subr.bf16.mxu1 %v5020_v42  ;;  %v856_v41 = vrot.slane %v854_v34, 1  ;;  %v3999_v42 = vcombine.low %v355_v62, %v5787_v21 }
  0x7e   : > { %2555 = vmatprep.subr.bf16.mxu0 %v5023_v45  ;;  %v5054_v45 = vld [vmem:[%s6755_s2 + $0x534] ss:$8 sps:$4 sm:$0xff]  }
  0x7f   : > { %v582_v21 = vrot.slane %v3999_v42, 1  ;;  %v6081_v42 = vcombine.low %v5824_v53, %v6070_v37 }
  0x80   : > { %1736 = vmatpush1.bf16.msra.mxu1 %v5018_v56 }
  0x81   : > { %2556 = vmatpush1.bf16.msra.mxu0 %v5021_v57  ;;  %1737 = vmatprep.subr.bf16.mxu1 %v5026_v58  ;;  %v857_v57 = vor.u32 %v856_v41, %v852_v33  ;;  %v6034_v58 = vld [vmem:[#allocation2 + $0x68] sm:$0x11]  ;;  %v359_v41 = vld [vmem:[#allocation2 + $0x70] sm:$0xee] }
  0x82   : > { %2557 = vmatprep.subr.bf16.mxu0 %v5029_v59  ;;  %v4018_v59 = vcombine.high %v5769_v12, %v6029_v49  ;;  %v4020_v1 = vcombine.high %v5772_v13, %v6034_v58 }
  0x84   : > { %1738 = vmatpush1.bf16.msra.mxu1 %v5024_v3  ;;  %v356_v3 = vld [vmem:[#allocation2 + $0x40] sm:$0xee]  ;;  %v887_v17 = vshrl.u32 %v4020_v1, 16 }
  0x85   : > { %2558 = vmatpush1.bf16.msra.mxu0 %v5027_v4  ;;  %1780 = vmatprep.subr.bf16.mxu1 %v5032_v5  ;;  %v357_v4 = vld [vmem:[#allocation2 + $0x50] sm:$0xee]  ;;  %v4017_v5 = vcombine.low %v5769_v12, %v6029_v49  ;;  %v889_v12 = vshll.u32 %v4020_v1, 16  ;;  %v4002_v19 = vcombine.high %v356_v3, %v5841_v63  ;;  %v4001_v23 = vcombine.low %v356_v3, %v5841_v63 }
  0x86   : > { %3514 = vmatprep.subr.bf16.mxu0 %v5039_v6  ;;  %v4019_v6 = vcombine.low %v5772_v13, %v6034_v58  ;;  %v4004_v13 = vcombine.high %v357_v4, %v5843_v0  ;;  %v6077_v63 = vcombine.high %v5824_v53, %v6070_v37  ;;  %v896_v53 = vshll.u32 %v6081_v42, 16 }
  0x87   : > { %1740 = vmatmul.mubr.bf16.vlgmr.msra.gmra.mrb[0].mxu1 %v4139_v9  ;;  %v4267_v9 = vcombine.low %v580_v47, %v582_v21  ;;  %v866_v2 = vshrl.u32 %v4017_v5, 16  ;;  %v868_v62 = vshll.u32 %v4017_v5, 16  ;;  %v585_v26 = vrot.slane %v4002_v19, 1  ;;  %v5072_v21 = vld [vmem:[%s6755_s2 + $0x564] ss:$8 sps:$4 sm:$0xff]  }
  0x88   : > { %2560 = vmatmul.mubr.bf16.vlgmr.msra.gmra.mrb[0].mxu0 %v4261_v28  ;;  %1781 = vmatpush1.bf16.msra.mxu1 %v5030_v7  ;;  %v849_v28 = vrot.slane %v847_v51, 1  ;;  %v5055_v7 = vld [vmem:[%s6755_s2 + $0x630] ss:$8 sps:$4 sm:$0xff]   ;;  %v880_v24 = vshrl.u32 %v4019_v6, 16  ;;  %v891_v51 = vrot.slane %v889_v12, 1  ;;  %v587_v27 = vrot.slane %v4004_v13, 1 }
  0x89   : > { %3515 = vmatpush1.bf16.msra.mxu0 %v5037_v8  ;;  %1782 = vmatprep.subr.bf16.mxu1 %v5042_v14  ;;  %v4145_v8 = vcombine.low %v843_v46, %v857_v57  ;;  %v873_v14 = vshrl.u32 %v4018_v59, 16  ;;  %v870_v18 = vrot.slane %v868_v62, 1  ;;  %v903_v46 = vshll.u32 %v6077_v63, 16  ;;  %v5073_v5 = vld [vmem:[%s6755_s2 + $0x660] ss:$8 sps:$4 sm:$0xff]  }
  0x8a   : > { %3516 = vmatprep.subr.bf16.mxu0 %v5045_v15  ;;  %v850_v38 = vor.u32 %v849_v28, %v845_v25  ;;  %2569 = vmatprep.mubr.bf16.mxu0 %v4268_v60  ;;  %v875_v15 = vshll.u32 %v4018_v59, 16  ;;  %v5058_v25 = vld [vmem:[%s6755_s2 + $0x540] ss:$8 sps:$4 sm:$0xff]   ;;  %v4003_v28 = vcombine.low %v357_v4, %v5843_v0  ;;  %v892_v32 = vor.u32 %v891_v51, %v887_v17  ;;  %v5075_v59 = vld [vmem:[%s6755_s2 + $0x664] ss:$8 sps:$4 sm:$0xff]  }
  0x8b   : > { %v4274_v33 = vcombine.low %v585_v26, %v587_v27  ;;  %v871_v50 = vor.u32 %v870_v18, %v866_v2  ;;  %v4008_v57 = vcombine.high %v359_v41, %v5881_v40  ;;  %v4007_v3 = vcombine.low %v359_v41, %v5881_v40  ;;  %v5070_v4 = vld [vmem:[%s6755_s2 + $0x560] ss:$8 sps:$4 sm:$0xff]   ;;  %v6109_v40 = vld [vmem:[#allocation2 + $0x10] sm:$0xee] }
  0x8c   : > { %1783 = vmatpush1.bf16.msra.mxu1 %v5040_v20  ;;  %v4146_v56 = vcombine.low %v850_v38, %v864_v39  ;;  %v5063_v20 = vld [vmem:[%s6755_s2 + $0x644] ss:$8 sps:$4 sm:$0xff]   ;;  %v898_v17 = vrot.slane %v896_v53, 1  ;;  %v5078_v19 = vld [vmem:[%s6755_s2 + $0x574] ss:$8 sps:$4 sm:$0xff]  }
  0x8d   : > { %3517 = vmatpush1.bf16.msra.mxu0 %v5043_v22  ;;  %1784 = vmatprep.subr.bf16.mxu1 %v5048_v29  ;;  %v877_v22 = vrot.slane %v875_v15, 1  ;;  %v882_v29 = vshll.u32 %v4019_v6, 16  ;;  %v358_v39 = vld [vmem:[#allocation2 + $0x60] sm:$0xee]  ;;  %v901_v6 = vshrl.u32 %v6077_v63, 16 }
  0x8e   : > { %3518 = vmatprep.subr.bf16.mxu0 %v5051_v30  ;;  %1749 = vmatprep.mubr.bf16.mxu1 %v4146_v56  ;;  %v5061_v30 = vld [vmem:[%s6755_s2 + $0x640] ss:$8 sps:$4 sm:$0xff]   ;;  %v4006_v47 = vcombine.high %v358_v39, %v5876_v36  ;;  %v4005_v1 = vcombine.low %v358_v39, %v5876_v36  ;;  %v5081_v13 = vld [vmem:[%s6755_s2 + $0x674] ss:$8 sps:$4 sm:$0xff]   ;;  %v5076_v62 = vld [vmem:[%s6755_s2 + $0x570] ss:$8 sps:$4 sm:$0xff]  }
  0x8f   : > { %1750 = vmatmul.mubr.bf16.gmra.mrb[4].mxu1 %v4145_v8  ;;  %v878_v31 = vor.u32 %v877_v22, %v873_v14  ;;  %v884_v34 = vrot.slane %v882_v29, 1  ;;  %v905_v8 = vrot.slane %v903_v46, 1  ;;  %v590_v14 = vrot.slane %v4007_v3, 1  ;;  %v6111_v15 = vld [vmem:[#allocation2 + $0x88] sm:$0x11]  ;;  %v6125_v2 = vld [vmem:[#allocation2 + $0x20] sm:$0xff] }
  0x90   : > { %1785 = vmatpush1.bf16.msra.mxu1 %v5046_v43  ;;  %2570 = vmatmul.mubr.bf16.gmra.mrb[4].mxu0 %v4267_v9  ;;  %v584_v43 = vrot.slane %v4001_v23, 1  ;;  %v894_v9 = vshrl.u32 %v6081_v42, 16  ;;  %v588_v36 = vrot.slane %v4005_v1, 1  ;;  %v6113_v12 = vld [vmem:[#allocation2 + $0x20] sm:$0xee]  ;;  %v4023_v22 = vcombine.low %v5827_v54, %v6111_v15  ;;  %v6138_v29 = vld [vmem:[#allocation2 + $0x30] sm:$0xff] }
  0x91   : > { %3519 = vmatpush1.bf16.msra.mxu0 %v5049_v44  ;;  %1786 = vmatprep.subr.bf16.mxu1 %v5054_v45  ;;  %v586_v44 = vrot.slane %v4003_v28, 1  ;;  %v4152_v0 = vcombine.low %v878_v31, %v892_v32  ;;  %v885_v38 = vor.u32 %v884_v34, %v880_v24  ;;  %v5064_v45 = vld [vmem:[%s6755_s2 + $0x550] ss:$8 sps:$4 sm:$0xff]   ;;  %v6134_v26 = vld [vmem:[#allocation2 + $0x28] sm:$0x11]  ;;  %v4506_v63 = vcombine.high %v6125_v2, %v6138_v29 }
  0x92   : > { %3520 = vmatprep.subr.bf16.mxu0 %v5057_v55  ;;  %2579 = vmatprep.mubr.bf16.mxu0 %v4274_v33  ;;  %v5067_v55 = vld [vmem:[%s6755_s2 + $0x650] ss:$8 sps:$4 sm:$0xff]   ;;  %v4279_v24 = vcombine.low %v588_v36, %v590_v14  ;;  %v4028_v27 = vcombine.high %v6113_v12, %v6134_v26  ;;  %v908_v18 = vshrl.u32 %v4023_v22, 16  ;;  %v910_v23 = vshll.u32 %v4023_v22, 16  ;;  %v5084_v32 = vld [vmem:[%s6755_s2 + $0x584] ss:$8 sps:$4 sm:$0xff]  }
  0x93   : > { %v4273_v60 = vcombine.low %v584_v43, %v586_v44  ;;  %v4151_v56 = vcombine.low %v871_v50, %v885_v38  ;;  %1759 = vmatprep.mubr.bf16.mxu1 %v4152_v0  ;;  %v5079_v28 = vld [vmem:[%s6755_s2 + $0x670] ss:$8 sps:$4 sm:$0xff]   ;;  %v906_v33 = vor.u32 %v905_v8, %v901_v6  ;;  %v899_v34 = vor.u32 %v898_v17, %v894_v9  ;;  %v5082_v42 = vld [vmem:[%s6755_s2 + $0x580] ss:$8 sps:$4 sm:$0xff]   ;;  %v5093_v53 = vld [vmem:[%s6755_s2 + $0x694] ss:$8 sps:$4 sm:$0xff]  }
  0x94   : > { %1787 = vmatpush1.bf16.msra.mxu1 %v5052_v61  ;;  %v589_v61 = vrot.slane %v4006_v47, 1  ;;  %v912_v43 = vrot.slane %v910_v23, 1  ;;  %v964_v38 = vrot.slane %v4028_v27, 1  ;;  %v5088_v3 = vld [vmem:[%s6755_s2 + $0x590] ss:$8 sps:$4 sm:$0xff]  }
  0x95   : > { %3521 = vmatpush1.bf16.msra.mxu0 %v5055_v7  ;;  %1788 = vmatprep.subr.bf16.mxu1 %v5060_v16  ;;  %v591_v7 = vrot.slane %v4008_v57, 1  ;;  %v5101_v8 = vld [vmem:[%s6755_s2 + $0x6a4] ss:$8 sps:$4 sm:$0xff]   ;;  %v5094_v36 = vld [vmem:[%s6755_s2 + $0x5a0] ss:$8 sps:$4 sm:$0xff]  }
  0x96   : > { %3522 = vmatprep.subr.bf16.mxu0 %v5063_v20  ;;  %v4024_v20 = vcombine.high %v5827_v54, %v6111_v15  ;;  %v6140_v54 = vld [vmem:[#allocation2 + $0x28] sm:$0x11]  ;;  %v5109_v17 = vld [vmem:[%s6755_s2 + $0x6b4] ss:$8 sps:$4 sm:$0xff]  }
  0x97   : > { %1760 = vmatmul.mubr.bf16.gmra.mrb[8].mxu1 %v4151_v56  ;;  %v4280_v16 = vcombine.low %v589_v61, %v591_v7  ;;  %v4377_v35 = vcombine.low %v6125_v2, %v6140_v54  ;;  %v5090_v56 = vld [vmem:[%s6755_s2 + $0x594] ss:$8 sps:$4 sm:$0xff]   ;;  %v5096_v7 = vld [vmem:[%s6755_s2 + $0x5a4] ss:$8 sps:$4 sm:$0xff]   ;;  %v5099_v14 = vld [vmem:[%s6755_s2 + $0x6a0] ss:$8 sps:$4 sm:$0xff]  }
  0x98   : > { %1789 = vmatpush1.bf16.msra.mxu1 %v5058_v25  ;;  %2580 = vmatmul.mubr.bf16.gmra.mrb[8].mxu0 %v4273_v60  ;;  %v6130_v25 = vld [vmem:[#allocation2 + $0x18] sm:$0x11]  ;;  %v917_v31 = vshll.u32 %v4024_v20, 16  ;;  %v913_v60 = vor.u32 %v912_v43, %v908_v18  ;;  %v5117_v22 = vld [vmem:[%s6755_s2 + $0x6c4] ss:$8 sps:$4 sm:$0xff]  }
  0x99   : > { %3523 = vmatpush1.bf16.msra.mxu0 %v5061_v30  ;;  %1790 = vmatprep.subr.bf16.mxu1 %v5066_v52  ;;  %v4026_v51 = vcombine.high %v6109_v40, %v6130_v25  ;;  %v6142_v30 = vld [vmem:[#allocation2 + $0x38] sm:$0x11]  ;;  %v915_v52 = vshrl.u32 %v4024_v20, 16  ;;  %v2690_v39 = vshrl.u32 %v4377_v35, 16  ;;  %v2692_v41 = vshll.u32 %v4377_v35, 16 }
  0x9a   : > { %3524 = vmatprep.subr.bf16.mxu0 %v5069_v48  ;;  %2589 = vmatprep.mubr.bf16.mxu0 %v4280_v16  ;;  %v5087_v48 = vld [vmem:[%s6755_s2 + $0x684] ss:$8 sps:$4 sm:$0xff]   ;;  %v919_v50 = vrot.slane %v917_v31, 1  ;;  %v4379_v44 = vcombine.low %v6138_v29, %v6142_v30  ;;  %v4157_v61 = vcombine.low %v899_v34, %v913_v60  ;;  %v5106_v16 = vld [vmem:[%s6755_s2 + $0x5b4] ss:$8 sps:$4 sm:$0xff]  }
  0x9b   : > { %v962_v0 = vrot.slane %v4026_v51, 1  ;;  %v2694_v57 = vrot.slane %v2692_v41, 1  ;;  %v5112_v20 = vld [vmem:[%s6755_s2 + $0x5c4] ss:$8 sps:$4 sm:$0xff]   ;;  %v5122_v51 = vld [vmem:[%s6755_s2 + $0x5d4] ss:$8 sps:$4 sm:$0xff]  }
  0x9c   : > { %1791 = vmatpush1.bf16.msra.mxu1 %v5064_v45  ;;  %v920_v45 = vor.u32 %v919_v50, %v915_v52  ;;  %v2704_v46 = vshrl.u32 %v4379_v44, 16  ;;  %v2706_v47 = vshll.u32 %v4379_v44, 16  ;;  %v5125_v27 = vld [vmem:[%s6755_s2 + $0x6d4] ss:$8 sps:$4 sm:$0xff]   ;;  %v5120_v52 = vld [vmem:[%s6755_s2 + $0x5d0] ss:$8 sps:$4 sm:$0xff]   ;;  %v4027_v50 = vcombine.low %v6113_v12, %v6134_v26 }
  0x9d   : > { %3525 = vmatpush1.bf16.msra.mxu0 %v5067_v55  ;;  %1792 = vmatprep.subr.bf16.mxu1 %v5072_v21  ;;  %v5085_v55 = vld [vmem:[%s6755_s2 + $0x680] ss:$8 sps:$4 sm:$0xff]   ;;  %v6171_v1 = vor.u32 %v2694_v57, %v2690_v39  ;;  %v5123_v31 = vld [vmem:[%s6755_s2 + $0x6d0] ss:$8 sps:$4 sm:$0xff]   ;;  %v5128_v18 = vld [vmem:[%s6755_s2 + $0x5e4] ss:$8 sps:$4 sm:$0xff]  }
  0x9e   : > { %3526 = vmatprep.subr.bf16.mxu0 %v5075_v59  ;;  %v4158_v21 = vcombine.low %v906_v33, %v920_v45  ;;  %v2708_v59 = vrot.slane %v2706_v47, 1  ;;  %v5133_v23 = vld [vmem:[%s6755_s2 + $0x6e4] ss:$8 sps:$4 sm:$0xff]   ;;  %v5126_v35 = vld [vmem:[%s6755_s2 + $0x5e0] ss:$8 sps:$4 sm:$0xff]   ;;  %v963_v41 = vrot.slane %v4027_v50, 1 }
  0x9f   : > { %v5131_v43 = vld [vmem:[%s6755_s2 + $0x6e0] ss:$8 sps:$4 sm:$0xff]   ;;  %v741_v45 = vld [vmem:[#allocation2 + $0x50] sm:$0xee] }
  0xa0   : > { %1793 = vmatpush1.bf16.msra.mxu1 %v5070_v4  ;;  %2590 = vmatmul.mubr.bf16.gmra.mrb[12].mxu0 %v4279_v24  ;;  %v5091_v4 = vld [vmem:[%s6755_s2 + $0x690] ss:$8 sps:$4 sm:$0xff]   ;;  %v6179_v6 = vor.u32 %v2708_v59, %v2704_v46  ;;  %v5115_v24 = vld [vmem:[%s6755_s2 + $0x6c0] ss:$8 sps:$4 sm:$0xff]   ;;  %v4033_v46 = vcombine.low %v741_v45, %v6029_v49  ;;  %v4505_v59 = vcombine.low %v6125_v2, %v6138_v29 }
  0xa1   : > { %3527 = vmatpush1.bf16.msra.mxu0 %v5073_v5  ;;  %1794 = vmatprep.subr.bf16.mxu1 %v5078_v19  ;;  %v4142_v5 = vcombine.low %v962_v0, %v964_v38  ;;  %v5104_v19 = vld [vmem:[%s6755_s2 + $0x5b0] ss:$8 sps:$4 sm:$0xff]   ;;  %v5138_v0 = vld [vmem:[%s6755_s2 + $0x5f4] ss:$8 sps:$4 sm:$0xff]   ;;  %v742_v60 = vld [vmem:[#allocation2 + $0x60] sm:$0xee] }
  0xa2   : > { %3528 = vmatprep.subr.bf16.mxu0 %v5081_v13  ;;  %3546 = vmatprep.mubr.bf16.mxu0 %v4506_v63  ;;  %v4507_v9 = vcombine.low %v6171_v1, %v6179_v6  ;;  %v5107_v13 = vld [vmem:[%s6755_s2 + $0x6b0] ss:$8 sps:$4 sm:$0xff]   ;;  %v5280_v1 = vld [vmem:[%s6755_s2 + $0x824] ss:$8 sps:$4 sm:$0xff]  }
  0xa3   : > { %1769 = vmatprep.mubr.bf16.mxu1 %v4158_v21  ;;  %v5136_v38 = vld [vmem:[%s6755_s2 + $0x5f0] ss:$8 sps:$4 sm:$0xff]  }
  0xa4   : > { %1795 = vmatpush1.bf16.msra.mxu1 %v5076_v62  ;;  %v5110_v62 = vld [vmem:[%s6755_s2 + $0x5c0] ss:$8 sps:$4 sm:$0xff]   ;;  %v6278_v57 = vld [vmem:[#allocation2 + $0x50] sm:$0xff] }
  0xa5   : > { %3529 = vmatpush1.bf16.msra.mxu0 %v5079_v28  ;;  %1796 = vmatprep.subr.bf16.mxu1 %v5084_v32  ;;  %v739_v28 = vld [vmem:[#allocation2 + $0x30] sm:$0xee]  ;;  %v740_v32 = vld [vmem:[#allocation2 + $0x40] sm:$0xee] }
  0xa6   : > { %3530 = vmatprep.subr.bf16.mxu0 %v5087_v48  ;;  %1770 = vmatmul.mubr.bf16.gmra.mrb[12].mxu1 %v4157_v61  ;;  %v4029_v33 = vcombine.low %v739_v28, %v5983_v10  ;;  %v4031_v34 = vcombine.low %v740_v32, %v5985_v11  ;;  %v4025_v48 = vcombine.low %v6109_v40, %v6130_v25  ;;  %v5141_v40 = vld [vmem:[%s6755_s2 + $0x6f4] ss:$8 sps:$4 sm:$0xff]   ;;  %v6283_v61 = vrot.slane %v4033_v46, 1 }
  0xa7   : > { %1812 = vmatprep.mubr.bf16.mxu1 %v4142_v5  ;;  %v4030_v12 = vcombine.high %v739_v28, %v5983_v10  ;;  %v4032_v25 = vcombine.high %v740_v32, %v5985_v11  ;;  %v5148_v10 = vld [vmem:[%s6755_s2 + $0x4] ss:$8 sps:$4 sm:$0xff]   ;;  %v5165_v28 = vld [vmem:[%s6755_s2 + $0x720] ss:$8 sps:$4 sm:$0xff]   ;;  %v5170_v32 = vld [vmem:[%s6755_s2 + $0x34] ss:$8 sps:$4 sm:$0xff]  }
  0xa8   : > { %1797 = vmatpush1.bf16.msra.mxu1 %v5082_v42  ;;  %v6249_v44 = vrot.slane %v4029_v33, 1  ;;  %v6251_v63 = vrot.slane %v4031_v34, 1  ;;  %v961_v39 = vrot.slane %v4025_v48, 1  ;;  %v5139_v42 = vld [vmem:[%s6755_s2 + $0x6f0] ss:$8 sps:$4 sm:$0xff]   ;;  %v4378_v34 = vcombine.high %v6125_v2, %v6140_v54 }
  0xa9   : > { %3531 = vmatpush1.bf16.msra.mxu0 %v5085_v55  ;;  %1798 = vmatprep.subr.bf16.mxu1 %v5090_v56  ;;  %v5154_v11 = vld [vmem:[%s6755_s2 + $0x704] ss:$8 sps:$4 sm:$0xff]   ;;  %v966_v47 = vrot.slane %v4030_v12, 1  ;;  %v968_v55 = vrot.slane %v4032_v25, 1  ;;  %v5173_v33 = vld [vmem:[%s6755_s2 + $0x734] ss:$8 sps:$4 sm:$0xff]  }
  0xaa   : > { %3532 = vmatprep.subr.bf16.mxu0 %v5093_v53  ;;  %v4147_v26 = vcombine.low %v6249_v44, %v6251_v63  ;;  %v6276_v56 = vld [vmem:[#allocation2 + $0x40] sm:$0xff]  ;;  %v4035_v53 = vcombine.low %v742_v60, %v6034_v58  ;;  %v4141_v21 = vcombine.low %v961_v39, %v963_v41  ;;  %v5168_v2 = vld [vmem:[%s6755_s2 + $0x30] ss:$8 sps:$4 sm:$0xff]  }
  0xab   : > { %v5176_v54 = vld [vmem:[%s6755_s2 + $0x44] ss:$8 sps:$4 sm:$0xff]   ;;  %v5174_v41 = vld [vmem:[%s6755_s2 + $0x40] ss:$8 sps:$4 sm:$0xff]  }
  0xac   : > { %1799 = vmatpush1.bf16.msra.mxu1 %v5088_v3  ;;  %v5146_v3 = vld [vmem:[%s6755_s2] ss:$8 sps:$4 sm:$0xff]   ;;  %v6291_v5 = vrot.slane %v4035_v53, 1 }
  0xad   : > { %3533 = vmatpush1.bf16.msra.mxu0 %v5091_v4  ;;  %1800 = vmatprep.subr.bf16.mxu1 %v5096_v7  ;;  %v5152_v4 = vld [vmem:[%s6755_s2 + $0x700] ss:$8 sps:$4 sm:$0xff]   ;;  %v5158_v7 = vld [vmem:[%s6755_s2 + $0x14] ss:$8 sps:$4 sm:$0xff]  }
  0xae   : > { %3534 = vmatprep.subr.bf16.mxu0 %v5101_v8  ;;  %v5161_v8 = vld [vmem:[%s6755_s2 + $0x714] ss:$8 sps:$4 sm:$0xff]  }
  0xb0   : > { %1801 = vmatpush1.bf16.msra.mxu1 %v5094_v36  ;;  %v4512_v36 = vcombine.high %v6276_v56, %v6278_v57 }
  0xb1   : > { %3535 = vmatpush1.bf16.msra.mxu0 %v5099_v14  ;;  %1802 = vmatprep.subr.bf16.mxu1 %v5106_v16  ;;  %v4148_v14 = vcombine.low %v966_v47, %v968_v55  ;;  %v4034_v16 = vcombine.high %v741_v45, %v6029_v49  ;;  %v5164_v49 = vld [vmem:[%s6755_s2 + $0x24] ss:$8 sps:$4 sm:$0xff]   ;;  %v5182_v45 = vld [vmem:[%s6755_s2 + $0x54] ss:$8 sps:$4 sm:$0xff]  }
  0xb2   : > { %3536 = vmatprep.subr.bf16.mxu0 %v5109_v17  ;;  %v4036_v17 = vcombine.high %v742_v60, %v6034_v58  ;;  %v5167_v58 = vld [vmem:[%s6755_s2 + $0x724] ss:$8 sps:$4 sm:$0xff]  }
  0xb4   : > { %1803 = vmatpush1.bf16.msra.mxu1 %v5104_v19  ;;  %v4153_v19 = vcombine.low %v6283_v61, %v6291_v5  ;;  %v5191_v61 = vld [vmem:[%s6755_s2 + $0x764] ss:$8 sps:$4 sm:$0xff]  }
  0xb5   : > { %3537 = vmatpush1.bf16.msra.mxu0 %v5107_v13  ;;  %1804 = vmatprep.subr.bf16.mxu1 %v5112_v20  ;;  %v5156_v13 = vld [vmem:[%s6755_s2 + $0x10] ss:$8 sps:$4 sm:$0xff]  }
  0xb6   : > { %3538 = vmatprep.subr.bf16.mxu0 %v5117_v22  ;;  %v5159_v20 = vld [vmem:[%s6755_s2 + $0x710] ss:$8 sps:$4 sm:$0xff]  }
  0xb7   : > { %v6312_v22 = vld [vmem:[%s5806_s14 + $0x10] sm:$0xff] }
  0xb8   : > { %1805 = vmatpush1.bf16.msra.mxu1 %v5110_v62  ;;  %334 = vst [vmem:[#allocation2 + $0x90] sm:$0xff] %v6312_v22  ;;  %v6321_v62 = vld [vmem:[#allocation2 + $0x60] sm:$0xff] }
  0xb9   : > { %3539 = vmatpush1.bf16.msra.mxu0 %v5115_v24  ;;  %1806 = vmatprep.subr.bf16.mxu1 %v5122_v51  ;;  %v970_v24 = vrot.slane %v4034_v16, 1  ;;  %v972_v51 = vrot.slane %v4036_v17, 1  ;;  %v5189_v16 = vld [vmem:[%s6755_s2 + $0x760] ss:$8 sps:$4 sm:$0xff]   ;;  %v5194_v17 = vld [vmem:[%s6755_s2 + $0x74] ss:$8 sps:$4 sm:$0xff]  }
  0xba   : > { %3540 = vmatprep.subr.bf16.mxu0 %v5125_v27  ;;  %v6323_v27 = vld [vmem:[#allocation2 + $0x70] sm:$0xff] }
  0xbb   : > { %v4154_v48 = vcombine.low %v970_v24, %v972_v51  ;;  %v4518_v50 = vcombine.high %v6321_v62, %v6323_v27  ;;  %v4517_v25 = vcombine.low %v6321_v62, %v6323_v27  ;;  %v5192_v24 = vld [vmem:[%s6755_s2 + $0x70] ss:$8 sps:$4 sm:$0xff]  }
  0xbc   : > { %1807 = vmatpush1.bf16.msra.mxu1 %v5120_v52  ;;  %v743_v52 = vld [vmem:[#allocation2 + $0x70] sm:$0xee] }
  0xbd   : > { %3541 = vmatpush1.bf16.msra.mxu0 %v5123_v31  ;;  %1808 = vmatprep.subr.bf16.mxu1 %v5128_v18  ;;  %v4511_v31 = vcombine.low %v6276_v56, %v6278_v57  ;;  %v744_v18 = vld [vmem:[#allocation2 + $0x80] sm:$0xee]  ;;  %v5195_v51 = vld [vmem:[%s6755_s2 + $0x770] ss:$8 sps:$4 sm:$0xff]  }
  0xbe   : > { %3542 = vmatprep.subr.bf16.mxu0 %v5133_v23  ;;  %v5162_v23 = vld [vmem:[%s6755_s2 + $0x20] ss:$8 sps:$4 sm:$0xff]   ;;  %v4039_v39 = vcombine.low %v744_v18, %v6111_v15 }
  0xc0   : > { %1809 = vmatpush1.bf16.msra.mxu1 %v5126_v35  ;;  %v4380_v35 = vcombine.high %v6138_v29, %v6142_v30  ;;  %v5171_v29 = vld [vmem:[%s6755_s2 + $0x730] ss:$8 sps:$4 sm:$0xff]   ;;  %v5179_v30 = vld [vmem:[%s6755_s2 + $0x744] ss:$8 sps:$4 sm:$0xff]   ;;  %v975_v53 = vrot.slane %v4039_v39, 1 }
  0xc1   : > { %3543 = vmatpush1.bf16.msra.mxu0 %v5131_v43  ;;  %1810 = vmatprep.subr.bf16.mxu1 %v5138_v0  ;;  %v4038_v43 = vcombine.high %v743_v52, %v6070_v37  ;;  %v4040_v0 = vcombine.high %v744_v18, %v6111_v15  ;;  %v2697_v15 = vshrl.u32 %v4378_v34, 16  ;;  %v5198_v18 = vld [vmem:[%s6755_s2 + $0x80] ss:$8 sps:$4 sm:$0xff]  }
  0xc2   : > { %3544 = vmatprep.subr.bf16.mxu0 %v5141_v40  ;;  %v2699_v40 = vshll.u32 %v4378_v34, 16  ;;  %v2713_v12 = vshll.u32 %v4380_v35, 16  ;;  %v2711_v60 = vshrl.u32 %v4380_v35, 16  ;;  %v5207_v34 = vld [vmem:[%s6755_s2 + $0x790] ss:$8 sps:$4 sm:$0xff]  }
  0xc3   : > { %v974_v44 = vrot.slane %v4038_v43, 1  ;;  %v976_v63 = vrot.slane %v4040_v0, 1  ;;  %v5217_v35 = vld [vmem:[%s6755_s2 + $0xa4] ss:$8 sps:$4 sm:$0xff]   ;;  %v2620_v43 = vld [vmem:[#allocation2 + $0x50] sm:$0xee] }
  0xc4   : > { %1811 = vmatpush1.bf16.msra.mxu1 %v5136_v38  ;;  %v4037_v38 = vcombine.low %v743_v52, %v6070_v37  ;;  %v5185_v37 = vld [vmem:[%s6755_s2 + $0x754] ss:$8 sps:$4 sm:$0xff]   ;;  %v2701_v46 = vrot.slane %v2699_v40, 1  ;;  %v2715_v47 = vrot.slane %v2713_v12, 1  ;;  %v5200_v52 = vld [vmem:[%s6755_s2 + $0x84] ss:$8 sps:$4 sm:$0xff]  }
  0xc5   : > { %3545 = vmatpush1.bf16.msra.mxu0 %v5139_v42  ;;  %2381 = vmatprep.subr.bf16.mxu1 %v5148_v10  ;;  %v5177_v42 = vld [vmem:[%s6755_s2 + $0x740] ss:$8 sps:$4 sm:$0xff]   ;;  %v4160_v10 = vcombine.low %v974_v44, %v976_v63  ;;  %v2612_v44 = vld [vmem:[#allocation2 + $0x58] sm:$0x11] }
  0xc6   : > { %3587 = vmatprep.subr.bf16.mxu0 %v5154_v11  ;;  %v973_v55 = vrot.slane %v4037_v38, 1  ;;  %v2702_v5 = vor.u32 %v2701_v46, %v2697_v15  ;;  %v5215_v0 = vld [vmem:[%s6755_s2 + $0xa0] ss:$8 sps:$4 sm:$0xff]   ;;  %v4400_v40 = vcombine.high %v2620_v43, %v2612_v44  ;;  %v5222_v12 = vld [vmem:[%s6755_s2 + $0xb0] ss:$8 sps:$4 sm:$0xff]  }
  0xc7   : > { %1813 = vmatmul.mubr.bf16.vlgmr.msra.gmra.mrb[0].mxu1 %v4141_v21  ;;  %v5180_v21 = vld [vmem:[%s6755_s2 + $0x50] ss:$8 sps:$4 sm:$0xff]   ;;  %v5237_v46 = vld [vmem:[%s6755_s2 + $0x7c0] ss:$8 sps:$4 sm:$0xff]  }
  0xc8   : > { %3547 = vmatmul.mubr.bf16.vlgmr.msra.gmra.mrb[0].mxu0 %v4505_v59  ;;  %2382 = vmatpush1.bf16.msra.mxu1 %v5146_v3  ;;  %v5183_v59 = vld [vmem:[%s6755_s2 + $0x750] ss:$8 sps:$4 sm:$0xff]   ;;  %v5188_v3 = vld [vmem:[%s6755_s2 + $0x64] ss:$8 sps:$4 sm:$0xff]   ;;  %v6474_v39 = vrot.slane %v4400_v40, 1 }
  0xc9   : > { %3588 = vmatpush1.bf16.msra.mxu0 %v5152_v4  ;;  %2383 = vmatprep.subr.bf16.mxu1 %v5158_v7  ;;  %v330_v4 = vld [vmem:[%s5806_s14 + $0x18] sm:$0x11]  ;;  %v2716_v7 = vor.u32 %v2715_v47, %v2711_v60 }
  0xca   : > { %3589 = vmatprep.subr.bf16.mxu0 %v5161_v8  ;;  %1822 = vmatprep.mubr.bf16.mxu1 %v4148_v14  ;;  %335 = vst [vmem:[#allocation2 + $0x98] sm:$0x11] %v330_v4  ;;  %v4159_v8 = vcombine.low %v973_v55, %v975_v53  ;;  %v5186_v14 = vld [vmem:[%s6755_s2 + $0x60] ss:$8 sps:$4 sm:$0xff]   ;;  %v5242_v47 = vld [vmem:[%s6755_s2 + $0xd4] ss:$8 sps:$4 sm:$0xff]  }
  0xcb   : > { %3556 = vmatprep.mubr.bf16.mxu0 %v4512_v36  ;;  %v5245_v55 = vld [vmem:[%s6755_s2 + $0x7d4] ss:$8 sps:$4 sm:$0xff]   ;;  %v5252_v4 = vld [vmem:[%s6755_s2 + $0xe4] ss:$8 sps:$4 sm:$0xff]  }
  0xcc   : > { %2384 = vmatpush1.bf16.msra.mxu1 %v5156_v13  ;;  %v6412_v13 = vld [vmem:[#allocation2 + $0x10] sm:$0xff] }
  0xcd   : > { %3590 = vmatpush1.bf16.msra.mxu0 %v5159_v20  ;;  %2385 = vmatprep.subr.bf16.mxu1 %v5164_v49  ;;  %v6414_v20 = vld [vmem:[#allocation2] sm:$0xff] }
  0xce   : > { %3591 = vmatprep.subr.bf16.mxu0 %v5167_v58  ;;  %v4258_v49 = vcombine.high %v6414_v20, %v6412_v13  ;;  %v4508_v58 = vcombine.low %v2702_v5, %v2716_v7  ;;  %v5255_v5 = vld [vmem:[%s6755_s2 + $0x7e4] ss:$8 sps:$4 sm:$0xff]  }
  0xcf   : > { %1823 = vmatmul.mubr.bf16.gmra.mrb[4].mxu1 %v4147_v26  ;;  %v6364_v26 = vld [vmem:[#allocation2 + $0x80] sm:$0xff] }
  0xd0   : > { %3557 = vmatmul.mubr.bf16.gmra.mrb[4].mxu0 %v4511_v31  ;;  %2386 = vmatpush1.bf16.msra.mxu1 %v5162_v23  ;;  %v4524_v11 = vcombine.high %v6364_v26, %v6312_v22  ;;  %v4523_v36 = vcombine.low %v6364_v26, %v6312_v22  ;;  %v5203_v31 = vld [vmem:[%s6755_s2 + $0x784] ss:$8 sps:$4 sm:$0xff]   ;;  %v5201_v23 = vld [vmem:[%s6755_s2 + $0x780] ss:$8 sps:$4 sm:$0xff]  }
  0xd1   : > { %3592 = vmatpush1.bf16.msra.mxu0 %v5165_v28  ;;  %2387 = vmatprep.subr.bf16.mxu1 %v5170_v32  ;;  %v5206_v28 = vld [vmem:[%s6755_s2 + $0x94] ss:$8 sps:$4 sm:$0xff]  }
  0xd2   : > { %3593 = vmatprep.subr.bf16.mxu0 %v5173_v33  ;;  %1832 = vmatprep.mubr.bf16.mxu1 %v4154_v48  ;;  %v5209_v32 = vld [vmem:[%s6755_s2 + $0x794] ss:$8 sps:$4 sm:$0xff]   ;;  %v5204_v33 = vld [vmem:[%s6755_s2 + $0x90] ss:$8 sps:$4 sm:$0xff]   ;;  %v5221_v48 = vld [vmem:[%s6755_s2 + $0x7a4] ss:$8 sps:$4 sm:$0xff]  }
  0xd3   : > { %3566 = vmatprep.mubr.bf16.mxu0 %v4518_v50  ;;  %v2619_v50 = vld [vmem:[#allocation2 + $0x40] sm:$0xee] }
  0xd4   : > { %2388 = vmatpush1.bf16.msra.mxu1 %v5168_v2  ;;  %v5219_v2 = vld [vmem:[%s6755_s2 + $0x7a0] ss:$8 sps:$4 sm:$0xff]  }
  0xd5   : > { %3594 = vmatpush1.bf16.msra.mxu0 %v5171_v29  ;;  %2389 = vmatprep.subr.bf16.mxu1 %v5176_v54  ;;  %v5224_v29 = vld [vmem:[%s6755_s2 + $0xb4] ss:$8 sps:$4 sm:$0xff]  }
  0xd6   : > { %3595 = vmatprep.subr.bf16.mxu0 %v5179_v30  ;;  %v5227_v54 = vld [vmem:[%s6755_s2 + $0x7b4] ss:$8 sps:$4 sm:$0xff]   ;;  %v2611_v30 = vld [vmem:[#allocation2 + $0x48] sm:$0x11] }
  0xd7   : > { %1833 = vmatmul.mubr.bf16.gmra.mrb[8].mxu1 %v4153_v19  ;;  %v5197_v19 = vld [vmem:[%s6755_s2 + $0x774] ss:$8 sps:$4 sm:$0xff]   ;;  %v4398_v63 = vcombine.high %v2619_v50, %v2611_v30 }
  0xd8   : > { %3567 = vmatmul.mubr.bf16.gmra.mrb[8].mxu0 %v4517_v25  ;;  %2390 = vmatpush1.bf16.msra.mxu1 %v5174_v41  ;;  %v5225_v25 = vld [vmem:[%s6755_s2 + $0x7b0] ss:$8 sps:$4 sm:$0xff]   ;;  %v5235_v41 = vld [vmem:[%s6755_s2 + $0xc4] ss:$8 sps:$4 sm:$0xff]  }
  0xd9   : > { %3596 = vmatpush1.bf16.msra.mxu0 %v5177_v42  ;;  %2391 = vmatprep.subr.bf16.mxu1 %v5182_v45  ;;  %v6472_v38 = vrot.slane %v4398_v63, 1  ;;  %v5239_v42 = vld [vmem:[%s6755_s2 + $0x7c4] ss:$8 sps:$4 sm:$0xff]   ;;  %v4397_v45 = vcombine.low %v2619_v50, %v2611_v30 }
  0xda   : > { %3597 = vmatprep.subr.bf16.mxu0 %v5185_v37  ;;  %1842 = vmatprep.mubr.bf16.mxu1 %v4160_v10  ;;  %v4399_v37 = vcombine.low %v2620_v43, %v2612_v44 }
  0xdb   : > { %3576 = vmatprep.mubr.bf16.mxu0 %v4524_v11  ;;  %v4516_v15 = vcombine.low %v6472_v38, %v6474_v39  ;;  %v6484_v60 = vrot.slane %v4397_v45, 1  ;;  %v5233_v11 = vld [vmem:[%s6755_s2 + $0xc0] ss:$8 sps:$4 sm:$0xff]   ;;  %v5351_v45 = vld [vmem:[#allocation2 + $0x30] sm:$0xff] }
  0xdc   : > { %2392 = vmatpush1.bf16.msra.mxu1 %v5180_v21  ;;  %v6486_v10 = vrot.slane %v4399_v37, 1  ;;  %v4382_v21 = vcombine.high %v6276_v56, %v2611_v30 }
  0xdd   : > { %3598 = vmatpush1.bf16.msra.mxu0 %v5183_v59  ;;  %2393 = vmatprep.subr.bf16.mxu1 %v5188_v3  ;;  %v4384_v59 = vcombine.high %v6278_v57, %v2612_v44  ;;  %v5240_v3 = vld [vmem:[%s6755_s2 + $0xd0] ss:$8 sps:$4 sm:$0xff]  }
  0xde   : > { %3599 = vmatprep.subr.bf16.mxu0 %v5191_v61  ;;  %v4515_v53 = vcombine.low %v6484_v60, %v6486_v10  ;;  %v5243_v61 = vld [vmem:[%s6755_s2 + $0x7d0] ss:$8 sps:$4 sm:$0xff]   ;;  %v2727_v7 = vshll.u32 %v4382_v21, 16 }
  0xdf   : > { %1843 = vmatmul.mubr.bf16.gmra.mrb[12].mxu1 %v4159_v8  ;;  %v2741_v8 = vshll.u32 %v4384_v59, 16 }
  0xe0   : > { %3577 = vmatmul.mubr.bf16.gmra.mrb[12].mxu0 %v4523_v36  ;;  %2394 = vmatpush1.bf16.msra.mxu1 %v5186_v14  ;;  %v6516_v36 = vld [vmem:[#allocation2 + $0x68] sm:$0x11]  ;;  %v4381_v14 = vcombine.low %v6276_v56, %v2611_v30  ;;  %v5258_v56 = vld [vmem:[%s6755_s2 + $0xf4] ss:$8 sps:$4 sm:$0xff]  }
  0xe1   : > { %3600 = vmatpush1.bf16.msra.mxu0 %v5189_v16  ;;  %2395 = vmatprep.subr.bf16.mxu1 %v5194_v17  ;;  %v4383_v16 = vcombine.low %v6278_v57, %v2612_v44  ;;  %v6520_v17 = vld [vmem:[#allocation2 + $0x78] sm:$0x11]  ;;  %v6555_v40 = vcombine.low %v6321_v62, %v6516_v36 }
  0xe2   : > { %3601 = vmatprep.subr.bf16.mxu0 %v5197_v19  ;;  %2413 = vmatprep.mubr.bf16.mxu1 %v4258_v49  ;;  %v5250_v19 = vld [vmem:[%s6755_s2 + $0xe0] ss:$8 sps:$4 sm:$0xff]   ;;  %v5261_v57 = vld [vmem:[%s6755_s2 + $0x7f4] ss:$8 sps:$4 sm:$0xff]  }
  0xe3   : > { %3619 = vmatprep.mubr.bf16.mxu0 %v4508_v58  ;;  %v5253_v49 = vld [vmem:[%s6755_s2 + $0x7e0] ss:$8 sps:$4 sm:$0xff]   ;;  %v2725_v58 = vshrl.u32 %v4382_v21, 16  ;;  %v6551_v30 = vld [vmem:[#allocation2 + $0x98] sm:$0x11] }
  0xe4   : > { %2396 = vmatpush1.bf16.msra.mxu1 %v5192_v24  ;;  %v4386_v24 = vcombine.high %v6321_v62, %v6516_v36 }
  0xe5   : > { %3602 = vmatpush1.bf16.msra.mxu0 %v5195_v51  ;;  %2397 = vmatprep.subr.bf16.mxu1 %v5200_v52  ;;  %v2729_v51 = vrot.slane %v2727_v7, 1  ;;  %v2739_v52 = vshrl.u32 %v4384_v59, 16  ;;  %v2748_v59 = vshll.u32 %v6555_v40, 16 }
  0xe6   : > { %3603 = vmatprep.subr.bf16.mxu0 %v5203_v31  ;;  %v2743_v31 = vrot.slane %v2741_v8, 1  ;;  %v2755_v50 = vshll.u32 %v4386_v24, 16  ;;  %v2746_v8 = vshrl.u32 %v6555_v40, 16  ;;  %v6608_v40 = vld [vmem:[#allocation2 + $0x20] sm:$0xee] }
  0xe7   : > { %v2730_v43 = vor.u32 %v2729_v51, %v2725_v58  ;;  %v5278_v58 = vld [vmem:[%s6755_s2 + $0x820] ss:$8 sps:$4 sm:$0xff]  }
  0xe8   : > { %2398 = vmatpush1.bf16.msra.mxu1 %v5198_v18  ;;  %v4388_v18 = vcombine.high %v6323_v27, %v6520_v17 }
  0xe9   : > { %3604 = vmatpush1.bf16.msra.mxu0 %v5201_v23  ;;  %2399 = vmatprep.subr.bf16.mxu1 %v5206_v28  ;;  %v2720_v23 = vshll.u32 %v4381_v14, 16  ;;  %v2734_v28 = vshll.u32 %v4383_v16, 16 }
  0xea   : > { %3605 = vmatprep.subr.bf16.mxu0 %v5209_v32  ;;  %v5256_v32 = vld [vmem:[%s6755_s2 + $0xf0] ss:$8 sps:$4 sm:$0xff]  }
  0xeb   : > { %v2722_v44 = vrot.slane %v2720_v23, 1  ;;  %v2736_v63 = vrot.slane %v2734_v28, 1 }
  0xec   : > { %2400 = vmatpush1.bf16.msra.mxu1 %v5204_v33  ;;  %v5259_v33 = vld [vmem:[%s6755_s2 + $0x7f0] ss:$8 sps:$4 sm:$0xff]  }
  0xed   : > { %3606 = vmatpush1.bf16.msra.mxu0 %v5207_v34  ;;  %2401 = vmatprep.subr.bf16.mxu1 %v5217_v35  ;;  %v4257_v34 = vcombine.low %v6414_v20, %v6412_v13  ;;  %v5268_v35 = vld [vmem:[%s6755_s2 + $0x804] ss:$8 sps:$4 sm:$0xff]   ;;  %v6559_v13 = vcombine.low %v6323_v27, %v6520_v17  ;;  %v5266_v20 = vld [vmem:[%s6755_s2 + $0x800] ss:$8 sps:$4 sm:$0xff]   ;;  %v4392_v27 = vcombine.high %v6312_v22, %v6551_v30 }
  0xee   : > { %3607 = vmatprep.subr.bf16.mxu0 %v5221_v48  ;;  %v2718_v48 = vshrl.u32 %v4381_v14, 16 }
  0xef   : > { %v2795_v51 = vshrl.u32 %v4392_v27, 16 }
  0xf0   : > { %2402 = vmatpush1.bf16.msra.mxu1 %v5215_v0  ;;  %v2744_v0 = vor.u32 %v2743_v31, %v2739_v52  ;;  %v5352_v31 = vld [vmem:[#allocation2 + $0x40] sm:$0xff] }
  0xf1   : > { %3608 = vmatpush1.bf16.msra.mxu0 %v5219_v2  ;;  %2403 = vmatprep.subr.bf16.mxu1 %v5224_v29  ;;  %v2732_v2 = vshrl.u32 %v4383_v16, 16  ;;  %v2769_v29 = vshll.u32 %v4388_v18, 16  ;;  %v6589_v16 = vcombine.low %v6312_v22, %v6551_v30 }
  0xf2   : > { %3609 = vmatprep.subr.bf16.mxu0 %v5227_v54  ;;  %v6549_v54 = vld [vmem:[#allocation2 + $0x88] sm:$0x11] }
  0xf3   : > { %v4390_v62 = vcombine.high %v6364_v26, %v6549_v54  ;;  %v2737_v21 = vor.u32 %v2736_v63, %v2732_v2  ;;  %v6585_v14 = vcombine.low %v6364_v26, %v6549_v54  ;;  %v5283_v26 = vld [vmem:[%s6755_s2 + $0x834] ss:$8 sps:$4 sm:$0xff]  }
  0xf4   : > { %2404 = vmatpush1.bf16.msra.mxu1 %v5222_v12  ;;  %v5271_v12 = vld [vmem:[%s6755_s2 + $0x814] ss:$8 sps:$4 sm:$0xff]  }
  0xf5   : > { %3610 = vmatpush1.bf16.msra.mxu0 %v5225_v25  ;;  %2405 = vmatprep.subr.bf16.mxu1 %v5235_v41  ;;  %v2753_v25 = vshrl.u32 %v4386_v24, 16  ;;  %v2757_v41 = vrot.slane %v2755_v50, 1  ;;  %v2781_v24 = vshrl.u32 %v4390_v62, 16  ;;  %v5292_v50 = vld [vmem:[%s6755_s2 + $0x844] ss:$8 sps:$4 sm:$0xff]   ;;  %v2774_v2 = vshrl.u32 %v6585_v14, 16 }
  0xf6   : > { %3611 = vmatprep.subr.bf16.mxu0 %v5239_v42  ;;  %v5350_v42 = vld [vmem:[#allocation2 + $0x20] sm:$0xff] }
  0xf7   : > { %v4264_v37 = vcombine.high %v5350_v42, %v5351_v45  ;;  %v2758_v6 = vor.u32 %v2757_v41, %v2753_v25  ;;  %v6612_v25 = vld [vmem:[#allocation2 + $0x60] sm:$0xee]  ;;  %v6614_v41 = vld [vmem:[#allocation2 + $0x70] sm:$0xee] }
  0xf8   : > { %2406 = vmatpush1.bf16.msra.mxu1 %v5233_v11  ;;  %v4514_v11 = vcombine.low %v2730_v43, %v2744_v0 }
  0xf9   : > { %3612 = vmatpush1.bf16.msra.mxu0 %v5237_v46  ;;  %2407 = vmatprep.subr.bf16.mxu1 %v5242_v47  ;;  %v2767_v46 = vshrl.u32 %v4388_v18, 16  ;;  %v2771_v47 = vrot.slane %v2769_v29, 1  ;;  %v5353_v18 = vld [vmem:[#allocation2 + $0x50] sm:$0xff] }
  0xfa   : > { %3613 = vmatprep.subr.bf16.mxu0 %v5245_v55  ;;  %v2723_v55 = vor.u32 %v2722_v44, %v2718_v48  ;;  %v4270_v23 = vcombine.high %v5352_v31, %v5353_v18  ;;  %v5281_v48 = vld [vmem:[%s6755_s2 + $0x830] ss:$8 sps:$4 sm:$0xff]   ;;  %v2788_v44 = vshrl.u32 %v6589_v16, 16 }
  0xfb   : > { %v2772_v7 = vor.u32 %v2771_v47, %v2767_v46  ;;  %v6622_v46 = vld [vmem:[#allocation2 + $0x28] sm:$0x11] }
  0xfc   : > { %2408 = vmatpush1.bf16.msra.mxu1 %v5240_v3  ;;  %v2762_v3 = vshll.u32 %v6559_v13, 16  ;;  %v4394_v47 = vcombine.high %v6608_v40, %v6622_v46 }
  0xfd   : > { %3614 = vmatpush1.bf16.msra.mxu0 %v5243_v61  ;;  %2409 = vmatprep.subr.bf16.mxu1 %v5252_v4  ;;  %v5269_v61 = vld [vmem:[%s6755_s2 + $0x810] ss:$8 sps:$4 sm:$0xff]   ;;  %v4263_v4 = vcombine.low %v5350_v42, %v5351_v45  ;;  %v4520_v28 = vcombine.low %v2758_v6, %v2772_v7  ;;  %v5354_v42 = vld [vmem:[#allocation2 + $0x60] sm:$0xff] }
  0xfe   : > { %3615 = vmatprep.subr.bf16.mxu0 %v5255_v5  ;;  %v2797_v5 = vshll.u32 %v4392_v27, 16  ;;  %v5295_v27 = vld [vmem:[%s6755_s2 + $0x854] ss:$8 sps:$4 sm:$0xff]   ;;  %v5302_v6 = vld [vmem:[%s6755_s2 + $0x864] ss:$8 sps:$4 sm:$0xff]  }
  0xff   : > { %v5355_v45 = vld [vmem:[#allocation2 + $0x70] sm:$0xff] }
 0x100   : > { %2410 = vmatpush1.bf16.msra.mxu1 %v5250_v19  ;;  %v4513_v19 = vcombine.low %v2723_v55, %v2737_v21  ;;  %v2799_v52 = vrot.slane %v2797_v5, 1  ;;  %v6626_v55 = vld [vmem:[#allocation2 + $0x38] sm:$0x11] }
 0x101   : > { %3616 = vmatpush1.bf16.msra.mxu0 %v5253_v49  ;;  %2411 = vmatprep.subr.bf16.mxu1 %v5258_v56  ;;  %v2750_v49 = vrot.slane %v2748_v59, 1  ;;  %v2760_v56 = vshrl.u32 %v6559_v13, 16  ;;  %v4269_v13 = vcombine.low %v5352_v31, %v5353_v18  ;;  %v4402_v59 = vcombine.high %v6612_v25, %v6516_v36  ;;  %v5312_v31 = vld [vmem:[%s6755_s2 + $0x8a0] ss:$8 sps:$4 sm:$0xff]   ;;  %v5317_v18 = vld [vmem:[%s6755_s2 + $0x8b4] ss:$8 sps:$4 sm:$0xff]  }
 0x102   : > { %3617 = vmatprep.subr.bf16.mxu0 %v5261_v57  ;;  %v2764_v57 = vrot.slane %v2762_v3, 1  ;;  %v2800_v0 = vor.u32 %v2799_v52, %v2795_v51  ;;  %v4404_v3 = vcombine.high %v6614_v41, %v6520_v17  ;;  %v5309_v51 = vld [vmem:[%s6755_s2 + $0x890] ss:$8 sps:$4 sm:$0xff]   ;;  %v5314_v52 = vld [vmem:[%s6755_s2 + $0x8a4] ss:$8 sps:$4 sm:$0xff]  }
 0x103   : > { %v2850_v7 = vrot.slane %v4402_v59, 1 }
 0x104   : > { %2412 = vmatpush1.bf16.msra.mxu1 %v5256_v32  ;;  %v2776_v32 = vshll.u32 %v6585_v14, 16  ;;  %v4275_v14 = vcombine.low %v5354_v42, %v5355_v45 }
 0x105   : > { %3618 = vmatpush1.bf16.msra.mxu0 %v5259_v33  ;;  %4648 = vmatprep.subr.bf16.mxu1 %v5268_v35  ;;  %v2790_v33 = vshll.u32 %v6589_v16, 16 }
 0x106   : > { %3660 = vmatprep.subr.bf16.mxu0 %v5268_v35  ;;  %v2765_v35 = vor.u32 %v2764_v57, %v2760_v56  ;;  %v2778_v29 = vrot.slane %v2776_v32, 1  ;;  %v5318_v32 = vld [vmem:[%s6755_s2 + $0x8c0] ss:$8 sps:$4 sm:$0xff]  }
 0x107   : > { %2414 = vmatmul.mubr.bf16.vlgmr.msra.gmra.mrb[0].mxu1 %v4257_v34  ;;  %v2751_v34 = vor.u32 %v2750_v49, %v2746_v8  ;;  %v2792_v63 = vrot.slane %v2790_v33, 1  ;;  %v2852_v8 = vrot.slane %v4404_v3, 1  ;;  %v5305_v49 = vld [vmem:[%s6755_s2 + $0x874] ss:$8 sps:$4 sm:$0xff]  }
 0x108   : > { %3620 = vmatmul.mubr.bf16.vlgmr.msra.gmra.mrb[0].mxu0 %v4507_v9  ;;  %4664 = vmatpush1.bf16.msra.mxu1 %v5266_v20  ;;  %v2783_v9 = vshll.u32 %v4390_v62, 16  ;;  %v5290_v62 = vld [vmem:[%s6755_s2 + $0x840] ss:$8 sps:$4 sm:$0xff]   ;;  %v5323_v33 = vld [vmem:[%s6755_s2 + $0x8d4] ss:$8 sps:$4 sm:$0xff]  }
 0x109   : > { %3661 = vmatpush1.bf16.msra.mxu0 %v5266_v20  ;;  %4649 = vmatprep.subr.bf16.mxu1 %v5271_v12  ;;  %v4519_v20 = vcombine.low %v2751_v34, %v2765_v35  ;;  %v4522_v57 = vcombine.low %v2850_v7, %v2852_v8  ;;  %v5321_v34 = vld [vmem:[%s6755_s2 + $0x8d0] ss:$8 sps:$4 sm:$0xff]   ;;  %v5326_v35 = vld [vmem:[%s6755_s2 + $0x8e4] ss:$8 sps:$4 sm:$0xff]  }
 0x10a   : > { %3662 = vmatprep.subr.bf16.mxu0 %v5271_v12  ;;  %2423 = vmatprep.mubr.bf16.mxu1 %v4264_v37  ;;  %v2785_v22 = vrot.slane %v2783_v9, 1  ;;  %v6610_v12 = vld [vmem:[#allocation2 + $0x30] sm:$0xee]  ;;  %v4276_v37 = vcombine.high %v5354_v42, %v5355_v45  ;;  %v2842_v9 = vrot.slane %v4394_v47, 1 }
 0x10b   : > { %3629 = vmatprep.mubr.bf16.mxu0 %v4514_v11  ;;  %v4396_v21 = vcombine.high %v6610_v12, %v6626_v55 }
 0x10c   : > { %4665 = vmatpush1.bf16.msra.mxu1 %v5269_v61  ;;  %v2786_v43 = vor.u32 %v2785_v22, %v2781_v24  ;;  %v5306_v24 = vld [vmem:[%s6755_s2 + $0x880] ss:$8 sps:$4 sm:$0xff]   ;;  %v5311_v22 = vld [vmem:[%s6755_s2 + $0x894] ss:$8 sps:$4 sm:$0xff]  }
 0x10d   : > { %3663 = vmatpush1.bf16.msra.mxu0 %v5269_v61  ;;  %4650 = vmatprep.subr.bf16.mxu1 %v5280_v1  ;;  %v2779_v61 = vor.u32 %v2778_v29, %v2774_v2  ;;  %v2844_v5 = vrot.slane %v4396_v21, 1  ;;  %v4401_v2 = vcombine.low %v6612_v25, %v6516_v36  ;;  %v4403_v29 = vcombine.low %v6614_v41, %v6520_v17  ;;  %v5327_v25 = vld [vmem:[%s6755_s2 + $0x8f0] ss:$8 sps:$4 sm:$0xff]  }
 0x10e   : > { %3664 = vmatprep.subr.bf16.mxu0 %v5280_v1  ;;  %v4526_v11 = vcombine.low %v2786_v43, %v2800_v0  ;;  %v5293_v1 = vld [vmem:[%s6755_s2 + $0x850] ss:$8 sps:$4 sm:$0xff]   ;;  %v4393_v43 = vcombine.low %v6608_v40, %v6622_v46  ;;  %v4395_v0 = vcombine.low %v6610_v12, %v6626_v55  ;;  %v5329_v40 = vld [vmem:[%s6755_s2 + $0x8f4] ss:$8 sps:$4 sm:$0xff]  }
 0x10f   : > { %2424 = vmatmul.mubr.bf16.gmra.mrb[4].mxu1 %v4263_v4  ;;  %v2793_v4 = vor.u32 %v2792_v63, %v2788_v44  ;;  %v4510_v56 = vcombine.low %v2842_v9, %v2844_v5  ;;  %v5324_v44 = vld [vmem:[%s6755_s2 + $0x8e0] ss:$8 sps:$4 sm:$0xff]   ;;  %v2849_v12 = vrot.slane %v4401_v2, 1  ;;  %v2851_v17 = vrot.slane %v4403_v29, 1 }
 0x110   : > { %3630 = vmatmul.mubr.bf16.gmra.mrb[4].mxu0 %v4513_v19  ;;  %4666 = vmatpush1.bf16.msra.mxu1 %v5278_v58  ;;  %v5300_v19 = vld [vmem:[%s6755_s2 + $0x860] ss:$8 sps:$4 sm:$0xff]   ;;  %v2841_v36 = vrot.slane %v4393_v43, 1 }
 0x111   : > { %3665 = vmatpush1.bf16.msra.mxu0 %v5278_v58  ;;  %4651 = vmatprep.subr.bf16.mxu1 %v5283_v26  ;;  %v4525_v16 = vcombine.low %v2779_v61, %v2793_v4  ;;  %v5303_v58 = vld [vmem:[%s6755_s2 + $0x870] ss:$8 sps:$4 sm:$0xff]   ;;  %v4521_v42 = vcombine.low %v2849_v12, %v2851_v17 }
 0x112   : > { %3666 = vmatprep.subr.bf16.mxu0 %v5283_v26  ;;  %2433 = vmatprep.mubr.bf16.mxu1 %v4270_v23  ;;  %v5308_v26 = vld [vmem:[%s6755_s2 + $0x884] ss:$8 sps:$4 sm:$0xff]   ;;  %v5315_v23 = vld [vmem:[%s6755_s2 + $0x8b0] ss:$8 sps:$4 sm:$0xff]  }
 0x113   : > { %3639 = vmatprep.mubr.bf16.mxu0 %v4520_v28  ;;  %v5320_v28 = vld [vmem:[%s6755_s2 + $0x8c4] ss:$8 sps:$4 sm:$0xff]  }
 0x114   : > { %4667 = vmatpush1.bf16.msra.mxu1 %v5281_v48 }
 0x115   : > { %3667 = vmatpush1.bf16.msra.mxu0 %v5281_v48  ;;  %4652 = vmatprep.subr.bf16.mxu1 %v5292_v50  ;;  %v2623_v48 = vld [vmem:[#allocation2 + $0x80] sm:$0xee] }
 0x116   : > { %3668 = vmatprep.subr.bf16.mxu0 %v5292_v50  ;;  %v2624_v50 = vld [vmem:[#allocation2 + $0x90] sm:$0xee]  ;;  %v4406_v63 = vcombine.high %v2623_v48, %v6549_v54  ;;  %v4405_v45 = vcombine.low %v2623_v48, %v6549_v54 }
 0x117   : > { %2434 = vmatmul.mubr.bf16.gmra.mrb[8].mxu1 %v4269_v13  ;;  %v4408_v13 = vcombine.high %v2624_v50, %v6551_v30 }
 0x118   : > { %3640 = vmatmul.mubr.bf16.gmra.mrb[8].mxu0 %v4519_v20  ;;  %4668 = vmatpush1.bf16.msra.mxu1 %v5290_v62  ;;  %v2843_v20 = vrot.slane %v4395_v0, 1  ;;  %v2854_v41 = vrot.slane %v4406_v63, 1  ;;  %v2853_v46 = vrot.slane %v4405_v45, 1 }
 0x119   : > { %3669 = vmatpush1.bf16.msra.mxu0 %v5290_v62  ;;  %4653 = vmatprep.subr.bf16.mxu1 %v5295_v27  ;;  %v2856_v62 = vrot.slane %v4408_v13, 1 }
 0x11a   : > { %3670 = vmatprep.subr.bf16.mxu0 %v5295_v27  ;;  %2443 = vmatprep.mubr.bf16.mxu1 %v4276_v37  ;;  %v4509_v27 = vcombine.low %v2841_v36, %v2843_v20  ;;  %v4407_v37 = vcombine.low %v2624_v50, %v6551_v30 }
 0x11b   : > { %3649 = vmatprep.mubr.bf16.mxu0 %v4526_v11  ;;  %v4528_v11 = vcombine.low %v2854_v41, %v2856_v62 }
 0x11c   : > { %4669 = vmatpush1.bf16.msra.mxu1 %v5293_v1  ;;  %v2855_v47 = vrot.slane %v4407_v37, 1 }
 0x11d   : > { %3671 = vmatpush1.bf16.msra.mxu0 %v5293_v1  ;;  %4654 = vmatprep.subr.bf16.mxu1 %v5302_v6 }
 0x11e   : > { %3672 = vmatprep.subr.bf16.mxu0 %v5302_v6  ;;  %v4527_v55 = vcombine.low %v2853_v46, %v2855_v47 }
 0x11f   : > { %2444 = vmatmul.mubr.bf16.gmra.mrb[12].mxu1 %v4275_v14 }
 0x120   : > { %3650 = vmatmul.mubr.bf16.gmra.mrb[12].mxu0 %v4525_v16  ;;  %4670 = vmatpush1.bf16.msra.mxu1 %v5300_v19 }
 0x121   : > { %3673 = vmatpush1.bf16.msra.mxu0 %v5300_v19  ;;  %4655 = vmatprep.subr.bf16.mxu1 %v5305_v49 }
 0x122   : > { %3674 = vmatprep.subr.bf16.mxu0 %v5305_v49  ;;  %3692 = vmatprep.mubr.bf16.mxu0 %v4510_v56 }
 0x123   : > { %3712 = vmatprep.mubr.bf16.mxu1 %v4522_v57 }
 0x124   : > { %4671 = vmatpush1.bf16.msra.mxu1 %v5303_v58 }
 0x125   : > { %3675 = vmatpush1.bf16.msra.mxu0 %v5303_v58  ;;  %4656 = vmatprep.subr.bf16.mxu1 %v5308_v26 }
 0x126   : > { %3676 = vmatprep.subr.bf16.mxu0 %v5308_v26 }
 0x128   : > { %4672 = vmatpush1.bf16.msra.mxu1 %v5306_v24 }
 0x129   : > { %3677 = vmatpush1.bf16.msra.mxu0 %v5306_v24  ;;  %4657 = vmatprep.subr.bf16.mxu1 %v5311_v22 }
 0x12a   : > { %3678 = vmatprep.subr.bf16.mxu0 %v5311_v22 }
 0x12c   : > { %4673 = vmatpush1.bf16.msra.mxu1 %v5309_v51 }
 0x12d   : > { %3679 = vmatpush1.bf16.msra.mxu0 %v5309_v51  ;;  %4658 = vmatprep.subr.bf16.mxu1 %v5314_v52 }
 0x12e   : > { %3680 = vmatprep.subr.bf16.mxu0 %v5314_v52 }
 0x130   : > { %4674 = vmatpush1.bf16.msra.mxu1 %v5312_v31 }
 0x131   : > { %3681 = vmatpush1.bf16.msra.mxu0 %v5312_v31  ;;  %4659 = vmatprep.subr.bf16.mxu1 %v5317_v18 }
 0x132   : > { %3682 = vmatprep.subr.bf16.mxu0 %v5317_v18  ;;  %v3751_v18 = vlaneseq }
 0x134   : > { %4675 = vmatpush1.bf16.msra.mxu1 %v5315_v23 }
 0x135   : > { %3683 = vmatpush1.bf16.msra.mxu0 %v5315_v23  ;;  %4660 = vmatprep.subr.bf16.mxu1 %v5320_v28  ;;  %v3752_v23 = vshrl.u32 %v3751_v18, 7 }
 0x136   : > { %3684 = vmatprep.subr.bf16.mxu0 %v5320_v28 }
 0x137   : > { %v3753_v28 = vsub.s32 0, %v3752_v23 }
 0x138   : > { %4676 = vmatpush1.bf16.msra.mxu1 %v5318_v32 }
 0x139   : > { %3685 = vmatpush1.bf16.msra.mxu0 %v5318_v32  ;;  %4661 = vmatprep.subr.bf16.mxu1 %v5323_v33  ;;  %v3749_v32 = vld [vmem:[%s6756_s3] sm:$0x3] }
 0x13a   : > { %3686 = vmatprep.subr.bf16.mxu0 %v5323_v33  ;;  %v3757_v33 = vsub.s32 1, %v3752_v23 }
 0x13c   : > { %4677 = vmatpush1.bf16.msra.mxu1 %v5321_v34  ;;  %v3758_v50 = vrot.slane %v3749_v32, %v3757_v33 }
 0x13d   : > { %3687 = vmatpush1.bf16.msra.mxu0 %v5321_v34  ;;  %4662 = vmatprep.subr.bf16.mxu1 %v5326_v35  ;;  %v3754_v34 = vrot.slane %v3749_v32, %v3753_v28 }
 0x13e   : > { %3688 = vmatprep.subr.bf16.mxu0 %v5326_v35 }
 0x140   : > { %4678 = vmatpush1.bf16.msra.mxu1 %v5324_v44 }
 0x141   : > { %3689 = vmatpush1.bf16.msra.mxu0 %v5324_v44  ;;  %4663 = vmatprep.subr.bf16.mxu1 %v5329_v40 }
 0x142   : > { %3690 = vmatprep.subr.bf16.mxu0 %v5329_v40 }
 0x144   : > { %4679 = vmatpush1.bf16.msra.mxu1 %v5327_v25 }
 0x145   : > { %3691 = vmatpush1.bf16.msra.mxu0 %v5327_v25 }
 0x147   : > { %3713 = vmatmul.mubr.bf16.vlgmr.msra.gmra.mrb[16].mxu1 %v4521_v42 }
 0x148   : > { %3693 = vmatmul.mubr.bf16.vlgmr.msra.gmra.mrb[0].mxu0 %v4509_v27  ;;  %3722 = vmatprep.mubr.bf16.mxu1 %v4528_v11 }
 0x149   : > { %3702 = vmatprep.mubr.bf16.mxu0 %v4516_v15 }
 0x14f   : > { %3723 = vmatmul.mubr.bf16.gmra.mrb[20].mxu1 %v4527_v55 }
 0x150   : > { %3703 = vmatmul.mubr.bf16.gmra.mrb[4].mxu0 %v4515_v53 }
 0x1da   : > { %v2415_v54 = vpop.f32.mrb[0].mxu1 }
 0x1db   : > { %v2417_v30 = vpop.f32.mrb[1].mxu1 }
 0x1dc   : > { %v2419_v21 = vpop.f32.mrb[2].mxu1 }
 0x1dd   : > { %v2421_v59 = vpop.f32.mrb[3].mxu1 }
 0x1e2   : > { %v6715_v3 = vpop.f32.mrb[4].mxu1 }
 0x1e3   : > { %v6717_v61 = vpop.f32.mrb[5].mxu1 }
 0x1e4   : > { %v6719_v4 = vpop.f32.mrb[6].mxu1 }
 0x1e5   : > { %v6721_v1 = vpop.f32.mrb[7].mxu1 }
 0x1ea   : > { %v2435_v38 = vpop.f32.mrb[8].mxu1 }
 0x1eb   : > { %v3641_v39 = vpop.f32.mrb[8].mxu0  ;;  %v2437_v6 = vpop.f32.mrb[9].mxu1 }
 0x1ec   : > { %v4688_v15 = vadd.f32 %v3641_v39, %v2435_v38  ;;  %v3643_v9 = vpop.f32.mrb[9].mxu0  ;;  %v2439_v10 = vpop.f32.mrb[10].mxu1 }
 0x1ed   : > { %v4690_v60 = vadd.f32 %v3643_v9, %v2437_v6  ;;  %v3645_v53 = vpop.f32.mrb[10].mxu0  ;;  %v2441_v7 = vpop.f32.mrb[11].mxu1 }
 0x1ee   : > { %v4692_v5 = vadd.f32 %v3645_v53, %v2439_v10  ;;  %v3647_v8 = vpop.f32.mrb[11].mxu0 }
 0x1ef   : > { %v4694_v14 = vadd.f32 %v3647_v8, %v2441_v7 }
 0x1f2   : > { %v2445_v16 = vpop.f32.mrb[12].mxu1 }
 0x1f3   : > { %v3651_v19 = vpop.f32.mrb[12].mxu0  ;;  %v2447_v56 = vpop.f32.mrb[13].mxu1 }
 0x1f4   : > { %v4696_v49 = vadd.f32 %v3651_v19, %v2445_v16  ;;  %v3653_v57 = vpop.f32.mrb[13].mxu0  ;;  %v2449_v26 = vpop.f32.mrb[14].mxu1 }
 0x1f5   : > { %v4698_v58 = vadd.f32 %v3653_v57, %v2447_v56  ;;  %v3655_v24 = vpop.f32.mrb[14].mxu0  ;;  %v2451_v51 = vpop.f32.mrb[15].mxu1 }
 0x1f6   : > { %v4700_v22 = vadd.f32 %v3655_v24, %v2449_v26  ;;  %v3657_v52 = vpop.f32.mrb[15].mxu0 }
 0x1f7   : > { %v4702_v31 = vadd.f32 %v3657_v52, %v2451_v51 }
 0x21a   : > { %v3714_v48 = vpop.f32.mrb[16].mxu1 }
 0x21b   : > { %v3694_v35 = vpop.f32.mrb[0].mxu0  ;;  %v4689_v0 = vadd.f32 %v4688_v15, %v3714_v48  ;;  %v3716_v29 = vpop.f32.mrb[17].mxu1 }
 0x21c   : > { %v4680_v43 = vadd.f32 %v3694_v35, %v2415_v54  ;;  %v3696_v2 = vpop.f32.mrb[1].mxu0  ;;  %v4691_v63 = vadd.f32 %v4690_v60, %v3716_v29  ;;  %v3718_v40 = vpop.f32.mrb[18].mxu1 }
 0x21d   : > { %v4681_v44 = vadd.f32 %v3696_v2, %v2417_v30  ;;  %v3698_v13 = vpop.f32.mrb[2].mxu0  ;;  %v3769_v20 = vadd.f32 %v4689_v0, %v3754_v34  ;;  %v4693_v17 = vadd.f32 %v4692_v5, %v3718_v40  ;;  %v3720_v41 = vpop.f32.mrb[19].mxu1 }
 0x21e   : > { %v3761_v36 = vadd.f32 %v4680_v43, %v3754_v34  ;;  %v4682_v12 = vadd.f32 %v3698_v13, %v2419_v21  ;;  %v3700_v25 = vpop.f32.mrb[3].mxu0  ;;  %v3770_v27 = vadd.f32 %v4691_v63, %v3758_v50  ;;  %v4695_v45 = vadd.f32 %v4694_v14, %v3720_v41 }
 0x21f   : > { %v3762_v62 = vadd.f32 %v4681_v44, %v3758_v50  ;;  %v4683_v42 = vadd.f32 %v3700_v25, %v2421_v59  ;;  %v3771_v11 = vadd.f32 %v4693_v17, %v3754_v34 }
 0x220   : > { %v3763_v37 = vadd.f32 %v4682_v12, %v3754_v34  ;;  %v4643_v47 = vpack.c.bf16 %v3770_v27, %v3769_v20  ;;  %v3772_v54 = vadd.f32 %v4695_v45, %v3758_v50 }
 0x221   : > { %v4639_v46 = vpack.c.bf16 %v3762_v62, %v3761_v36  ;;  %v3764_v55 = vadd.f32 %v4683_v42, %v3758_v50 }
 0x222   : > { %3845 = vst [vmem:[%s6730_s8 + $0x20] sm:$0xff] %v4643_v47  ;;  %v4644_v21 = vpack.c.bf16 %v3772_v54, %v3771_v11  ;;  %v3724_v38 = vpop.f32.mrb[20].mxu1 }
 0x223   : > { %3841 = vst [vmem:[%s6730_s8] sm:$0xff] %v4639_v46  ;;  %v4640_v30 = vpack.c.bf16 %v3764_v55, %v3763_v37  ;;  %v3704_v59 = vpop.f32.mrb[4].mxu0  ;;  %v4697_v15 = vadd.f32 %v4696_v49, %v3724_v38  ;;  %v3726_v9 = vpop.f32.mrb[21].mxu1 }
 0x224   : > { %v4684_v39 = vadd.f32 %v3704_v59, %v6715_v3  ;;  %v3706_v6 = vpop.f32.mrb[5].mxu0  ;;  %3846 = vst [vmem:[%s6730_s8 + $0x28] sm:$0xff] %v4644_v21  ;;  %v4699_v10 = vadd.f32 %v4698_v58, %v3726_v9  ;;  %v3728_v5 = vpop.f32.mrb[22].mxu1 }
 0x225   : > { %3842 = vst [vmem:[%s6730_s8 + $0x8] sm:$0xff] %v4640_v30  ;;  %v4685_v60 = vadd.f32 %v3706_v6, %v6717_v61  ;;  %v3708_v53 = vpop.f32.mrb[6].mxu0  ;;  %v3773_v8 = vadd.f32 %v4697_v15, %v3754_v34  ;;  %v4701_v16 = vadd.f32 %v4700_v22, %v3728_v5  ;;  %v3730_v3 = vpop.f32.mrb[23].mxu1 }
 0x226   : > { %v3765_v7 = vadd.f32 %v4684_v39, %v3754_v34  ;;  %v4686_v14 = vadd.f32 %v3708_v53, %v6719_v4  ;;  %v3710_v19 = vpop.f32.mrb[7].mxu0  ;;  %v3774_v56 = vadd.f32 %v4699_v10, %v3758_v50  ;;  %v4703_v26 = vadd.f32 %v4702_v31, %v3730_v3 }
 0x227   : > { %v3766_v49 = vadd.f32 %v4685_v60, %v3758_v50  ;;  %v4687_v57 = vadd.f32 %v3710_v19, %v6721_v1  ;;  %v3775_v58 = vadd.f32 %v4701_v16, %v3754_v34 }
 0x228   : > { %v3767_v61 = vadd.f32 %v4686_v14, %v3754_v34  ;;  %v4645_v51 = vpack.c.bf16 %v3774_v56, %v3773_v8  ;;  %v3776_v18 = vadd.f32 %v4703_v26, %v3758_v50 }
 0x229   : > { %v4641_v24 = vpack.c.bf16 %v3766_v49, %v3765_v7  ;;  %v3768_v52 = vadd.f32 %v4687_v57, %v3758_v50 }
 0x22a   : > { %3847 = vst [vmem:[%s6730_s8 + $0x30] sm:$0xff] %v4645_v51  ;;  %v4646_v4 = vpack.c.bf16 %v3776_v18, %v3775_v58 }
 0x22b   : > { %3843 = vst [vmem:[%s6730_s8 + $0x10] sm:$0xff] %v4641_v24  ;;  %v4642_v23 = vpack.c.bf16 %v3768_v52, %v3767_v61 }
 0x22c   : > { %3848 = vst [vmem:[%s6730_s8 + $0x38] sm:$0xff] %v4646_v4 }
 0x22d   : > { %3844 = vst [vmem:[%s6730_s8 + $0x18] sm:$0xff] %v4642_v23 }
 0x22e PF: > { %s14_s17 = sadd.s32 1, %s5380_s17   ;;  %s6758_s15 = smov %s5376_s16 }
 0x22f   : > { %p11_p5 = scmp.ge.s32.totalorder %s14_s17, 4   ;;  %s6759_s16 = smov %s6761_s18 }
 0x231   :  { %13 = sbr.rel (!%p11_p5) target bundleno = 2 (0x2), region = 74 }

</bundles_post_ra>
